<compile_context>
chip_gen: v5e
topology: v5e:2x2
jax: 0.10.0
libtpu: 0.0.40
codegen_flags: <defaults>
</compile_context>

<pallas_src>
import functools
import math

import jax
import jax.numpy as jnp
from jax.experimental import pallas as pl
from jax.experimental.pallas import tpu as pltpu

WEEKS_AHEAD = 4  # GradABM train_abm.py constant
MAX_VAL_PARAMS = {'abm-covid': [8.0, 0.02, 1.0]}
MIN_VAL_PARAMS = {'abm-covid': [1.0, 0.001, 0.01]}

H = 32        # per-direction GRU hidden size (CalibNN hard-codes hidden_dim = 64 = 2H)
D = 2 * H     # bidirectional feature width
G = 128       # lane-padded gate-group width (one vreg lane group)

VMEM_SPEC = pl.BlockSpec(memory_space=pltpu.MemorySpace.VMEM)


# ----------------------------------------------------------------------------
# In-kernel helper: one fused (fwd + bwd) bidirectional GRU recurrence
# ----------------------------------------------------------------------------
def _fused_bigru(gx_steps, whh6, bhn, h0):
    """Fused bidirectional GRU, statically unrolled over steps.

    gx_steps : list of T arrays (B, 3G); step s holds the fwd-direction input-gate
               projections for time s (lanes 0:H of each 128-lane gate group) and the
               bwd-direction projections for time T-1-s (lanes H:2H). r/z recurrent
               biases are already folded in; the n-gate recurrent bias is `bhn`.
    whh6     : (G, 3G) block-structured recurrent weights (rows 0:H fwd, H:2H bwd).
    bhn      : (1, G)  n-gate recurrent bias [fwd | bwd | 0].
    h0       : (B, G)  initial slab [h_fwd | h_bwd | 0-pad].

    Returns (S, S_rev, h_final): S is the (T*B, G) stack of per-step slabs in step
    order, S_rev the step-reversed stack, h_final the last slab (= [hn_fwd | hn_bwd]).
    """
    f32 = jnp.float32
    h = h0
    slabs = []
    for s in range(len(gx_steps)):
        gx = gx_steps[s]
        gh = jnp.dot(h, whh6, preferred_element_type=f32)            # (B, 3G) one MXU push
        rz = jax.nn.sigmoid(gx[:, :2 * G] + gh[:, :2 * G])           # r|z in one EUP pass
        r = rz[:, :G]
        z = rz[:, G:]
        n = jnp.tanh(gx[:, 2 * G:] + r * (gh[:, 2 * G:] + bhn))
        h = (1.0 - z) * n + z * h                                    # pad lanes stay 0
        slabs.append(h)
    S = jnp.concatenate(slabs, axis=0)
    S_rev = jnp.concatenate(slabs[::-1], axis=0)
    return S, S_rev, h


# ----------------------------------------------------------------------------
# The fused CalibNN forward kernel
# ----------------------------------------------------------------------------
def _calibnn_kernel(
    x_ref, xr_ref, meta_ref, hi_ref, hir_ref,
    w1f_ref, w1b_ref, b1_ref, whh1_ref, bhn1_ref,
    w2s_ref, w2r_ref, b2_ref, whh2_ref, bhn2_ref,
    wvqs_ref, wvqr_ref, bvq_ref,
    weoa_ref, weom_ref, beo_ref,
    wde_ref, bde_ref, wdct_ref, wdcb_ref, bdc_ref,
    wdef_ref, wdeb_ref, bd_ref, whhd_ref, bhnd_ref,
    wdos_ref, wdor_ref, bdo_ref,
    wh1_ref, bh1_ref, wh2_ref, bh2_ref,
    minv_ref, maxv_ref,
    out_ref,
    *, B, T_enc, T_dec):
    f32 = jnp.float32
    h0 = jnp.zeros((B, G), f32)

    # ---------------- Encoder layer 1 (bi-GRU, directions fused per step) ------------
    gx1 = (jnp.dot(x_ref[...], w1f_ref[...], preferred_element_type=f32)
           + jnp.dot(xr_ref[...], w1b_ref[...], preferred_element_type=f32)
           + b1_ref[...])                                            # (T_enc*B, 3G)
    gx1_steps = [gx1[s * B:(s + 1) * B, :] for s in range(T_enc)]
    S1, S1r, _ = _fused_bigru(gx1_steps, whh1_ref[...], bhn1_ref[...], h0)

    # ---------------- Encoder layer 2 -------------------------------------------------
    # Split/placed weights (built in the wrapper) turn the time-ordered bidirectional
    # output into fused-step gate projections with two matmuls — no lane concats.
    gx2 = (jnp.dot(S1, w2s_ref[...], preferred_element_type=f32)
           + jnp.dot(S1r, w2r_ref[...], preferred_element_type=f32)
           + b2_ref[...])
    gx2_steps = [gx2[s * B:(s + 1) * B, :] for s in range(T_enc)]
    S2, S2r, h_enc = _fused_bigru(gx2_steps, whh2_ref[...], bhn2_ref[...], h0)
    # h_enc = [hn_fwd(layer2) | hn_bwd(layer2)] == encoder_hidden[2:], decoder's h0.

    # ---------------- TransformerAttn + sum over time ---------------------------------
    proj = (jnp.dot(S2, wvqs_ref[...], preferred_element_type=f32)
            + jnp.dot(S2r, wvqr_ref[...], preferred_element_type=f32)
            + bvq_ref[...])                                          # (T_enc*B, 3G)
    v = proj[:, :G]              # lanes 0:D valid, rest zero-padded
    q = proj[:, G:2 * G]
    k = proj[:, 2 * G:]
    TB = T_enc * B
    scores = jax.lax.dot_general(v, q, (((1,), (1,)), ((), ())),
                                 preferred_element_type=f32) * (1.0 / math.sqrt(D))
    # batch-match mask generated in-kernel (rows are time-major: row % B = sample id)
    same = (jax.lax.broadcasted_iota(jnp.int32, (TB, TB), 0) % B ==
            jax.lax.broadcasted_iota(jnp.int32, (TB, TB), 1) % B)
    scores = jnp.where(same, scores, -1e30)
    e = jnp.exp(scores - jnp.max(scores, axis=-1, keepdims=True))
    w = e * pl.reciprocal(jnp.sum(e, axis=-1, keepdims=True), approx=True)
    attended = jnp.dot(w, k, preferred_element_type=f32)             # (T_enc*B, G)
    sel = (jax.lax.broadcasted_iota(jnp.int32, (B, TB), 0) ==
           jax.lax.broadcasted_iota(jnp.int32, (B, TB), 1) % B).astype(f32)
    attn_sum = jnp.dot(sel, attended, preferred_element_type=f32)    # (B, G): sum over time

    # ---------------- EmbedAttenSeq.out_layer: tanh(cat([attn, meta]) @ W + b) --------
    x_embeds = jnp.tanh(
        jnp.dot(attn_sum, weoa_ref[...], preferred_element_type=f32)
        + jnp.dot(meta_ref[...], weom_ref[...], preferred_element_type=f32)
        + beo_ref[...])                                              # (B, D)

    # ---------------- DecodeSeq --------------------------------------------------------
    # Linear(1->D) on the time ramp is a broadcast multiply; attn_combine is split into
    # a time part and a context part (the "combined" tensor is never materialized).
    emb_in = hi_ref[...] * wde_ref[...] + bde_ref[...]               # (T_dec, D)
    emb_in_rev = hir_ref[...] * wde_ref[...] + bde_ref[...]          # time-reversed ramp
    emb_part = jnp.dot(emb_in, wdct_ref[...], preferred_element_type=f32)      # (T_dec, D)
    emb_part_rev = jnp.dot(emb_in_rev, wdct_ref[...], preferred_element_type=f32)
    ctx_part = (jnp.dot(x_embeds, wdcb_ref[...], preferred_element_type=f32)
                + bdc_ref[...])                                      # (B, D)

    wdef = wdef_ref[...]                                             # fwd gates placed
    wdeb = wdeb_ref[...]                                             # bwd gates placed
    ep = (jnp.dot(emb_part, wdef, preferred_element_type=f32)
          + jnp.dot(emb_part_rev, wdeb, preferred_element_type=f32)) # (T_dec, 3G)
    cp = (jnp.dot(ctx_part, wdef + wdeb, preferred_element_type=f32)
          + bd_ref[...])                                             # (B, 3G)
    gxd_steps = [ep[s:s + 1, :] + cp for s in range(T_dec)]          # broadcast over batch
    Sd, Sdr, _ = _fused_bigru(gxd_steps, whhd_ref[...], bhnd_ref[...], h_enc)

    emb = jnp.tanh(jnp.dot(Sd, wdos_ref[...], preferred_element_type=f32)
                   + jnp.dot(Sdr, wdor_ref[...], preferred_element_type=f32)
                   + bdo_ref[...])                                   # (T_dec*B, 32)

    # ---------------- CalibNN head + parameter scaling ---------------------------------
    h1 = jnp.maximum(jnp.dot(emb, wh1_ref[...], preferred_element_type=f32)
                     + bh1_ref[...], 0.0)
    y = jnp.dot(h1, wh2_ref[...], preferred_element_type=f32) + bh2_ref[...]
    minv = minv_ref[...]
    maxv = maxv_ref[...]
    out_ref[...] = minv + (maxv - minv) * jax.nn.sigmoid(y)          # (T_dec*B, out_dim)


# ----------------------------------------------------------------------------
# Wrapper-side weight packing (all layout plumbing lives here, outside the kernel)
# ----------------------------------------------------------------------------
def _pad_groups(w, width, off=0):
    """(In, ngroups*width) -> (In, ngroups*G): each width-wide block placed at lane
    offset `off` of its own 128-lane group (zero elsewhere)."""
    n_in = w.shape[0]
    ng = w.shape[1] // width
    out = jnp.zeros((n_in, ng * G), jnp.float32)
    for g in range(ng):
        out = out.at[:, g * G + off:g * G + off + width].set(w[:, g * width:(g + 1) * width])
    return out


def _split_rows_f(w):
    """Keep only the rows that read the fwd half (lanes 0:H) of a (B, G) slab."""
    out = jnp.zeros((G,) + w.shape[1:], jnp.float32)
    return out.at[0:H].set(w[0:H])


def _split_rows_b(w):
    """Keep only the rows that read the bwd half (lanes H:2H) of a (B, G) slab."""
    out = jnp.zeros((G,) + w.shape[1:], jnp.float32)
    return out.at[H:2 * H].set(w[H:2 * H])


def _fused_whh(pf, pb):
    """Block-structured recurrent weights: (G, 3G); rows 0:H fwd, H:2H bwd, rest zero."""
    out = jnp.zeros((G, 3 * G), jnp.float32)
    out = out.at[0:H].set(_pad_groups(pf['whh'], H, 0))
    out = out.at[H:2 * H].set(_pad_groups(pb['whh'], H, H))
    return out


def _fused_bias(pf, pb):
    """Input biases + hoisted r/z recurrent biases, placed into the fused (1, 3G) layout."""
    zf = jnp.zeros((1, H), jnp.float32)
    bf = pf['bih'] + jnp.concatenate([pf['bhh'][:, :2 * H], zf], axis=1)
    bb = pb['bih'] + jnp.concatenate([pb['bhh'][:, :2 * H], zf], axis=1)
    return _pad_groups(bf, H, 0) + _pad_groups(bb, H, H)


def _fused_bhn(pf, pb):
    """n-gate recurrent bias kept inside r * (Wh h + b_hn): (1, G) = [fwd | bwd | 0]."""
    out = jnp.zeros((1, G), jnp.float32)
    out = out.at[:, 0:H].set(pf['bhh'][:, 2 * H:])
    out = out.at[:, H:2 * H].set(pb['bhh'][:, 2 * H:])
    return out


# ----------------------------------------------------------------------------
# Forward wrapper
# ----------------------------------------------------------------------------
def calibnn_forward(params, x, meta, *, training_weeks):
    """x: (B, T_enc, x_dim); meta: (B, meta_dim) -> (B, T_dec, out_dim)."""
    B, T_enc, x_dim = x.shape
    T_dec = training_weeks + WEEKS_AHEAD
    out_dim = params['wh2'].shape[1]
    assert params['enc1_f']['whh'].shape[0] == H

    # torch: x.transpose(1, 0) -> (T, B, F); flatten time-major (+ time-reversed copy).
    x_tm = jnp.transpose(x, (1, 0, 2))
    x_flat = x_tm.reshape(T_enc * B, x_dim)
    x_rev_flat = x_tm[::-1].reshape(T_enc * B, x_dim)

    # Hi_data: normalized time ramp (identical across the batch), plus its reversal.
    ts = jnp.arange(1, T_dec + 1, dtype=jnp.float32)
    hi = ((ts - ts.min()) / (ts.max() - ts.min())).reshape(T_dec, 1)
    hi_rev = hi[::-1]

    p = params
    # Layer-2 / attention / decoder-out weights consume the step-ordered slab stacks
    # (S) and step-reversed stacks (S_rev); combine fwd/bwd placement + row split here.
    w2s = (_split_rows_f(_pad_groups(p['enc2_f']['wih'], H, 0))
           + _split_rows_b(_pad_groups(p['enc2_b']['wih'], H, H)))
    w2r = (_split_rows_b(_pad_groups(p['enc2_f']['wih'], H, 0))
           + _split_rows_f(_pad_groups(p['enc2_b']['wih'], H, H)))
    wvqk6 = _pad_groups(p['wvqk'], D)
    weoa = jnp.zeros((G, D), jnp.float32).at[0:D].set(p['weo'][0:D])

    args = [
        x_flat, x_rev_flat, meta, hi, hi_rev,
        # encoder layer 1
        _pad_groups(p['enc1_f']['wih'], H, 0), _pad_groups(p['enc1_b']['wih'], H, H),
        _fused_bias(p['enc1_f'], p['enc1_b']),
        _fused_whh(p['enc1_f'], p['enc1_b']), _fused_bhn(p['enc1_f'], p['enc1_b']),
        # encoder layer 2
        w2s, w2r,
        _fused_bias(p['enc2_f'], p['enc2_b']),
        _fused_whh(p['enc2_f'], p['enc2_b']), _fused_bhn(p['enc2_f'], p['enc2_b']),
        # TransformerAttn stacked V|Q|K
        _split_rows_f(wvqk6), _split_rows_b(wvqk6), _pad_groups(p['bvqk'], D),
        # EmbedAttenSeq.out_layer
        weoa, p['weo'][D:], p['beo'],
        # DecodeSeq input prep (embed_input + attn_combine split)
        p['wde'], p['bde'], p['wdc'][0:D], p['wdc'][D:], p['bdc'],
        # DecodeSeq GRU
        _pad_groups(p['dec_f']['wih'], H, 0), _pad_groups(p['dec_b']['wih'], H, H),
        _fused_bias(p['dec_f'], p['dec_b']),
        _fused_whh(p['dec_f'], p['dec_b']), _fused_bhn(p['dec_f'], p['dec_b']),
        # DecodeSeq out layer + CalibNN head + bounds
        _split_rows_f(p['wdo']), _split_rows_b(p['wdo']), p['bdo'],
        p['wh1'], p['bh1'], p['wh2'], p['bh2'],
        p['minv'], p['maxv'],
    ]

    out_flat = pl.pallas_call(
        functools.partial(_calibnn_kernel, B=B, T_enc=T_enc, T_dec=T_dec),
        out_shape=jax.ShapeDtypeStruct((T_dec * B, out_dim), jnp.float32),
        in_specs=[VMEM_SPEC] * len(args),
        out_specs=VMEM_SPEC,
    )(*args)

    # (T_dec*B, out) time-major -> (B, T_dec, out), matching torch's output layout.
    return jnp.transpose(out_flat.reshape(T_dec, B, out_dim), (1, 0, 2))


# ----------------------------------------------------------------------------
# Parameter init (deterministic; shapes from CalibNN.__init__ and GradABM helpers)
# ----------------------------------------------------------------------------
def _xavier(key, fan_in, fan_out):
    lim = math.sqrt(6.0 / (fan_in + fan_out))
    return jax.random.uniform(key, (fan_in, fan_out), jnp.float32, -lim, lim)


def _init_gru_dir(key, in_dim, hid):
    ks = jax.random.split(key, 4)
    s = 1.0 / math.sqrt(hid)
    u = lambda kk, shape: jax.random.uniform(kk, shape, jnp.float32, -s, s)
    # Gate order [r | z | n]; weights stored (in, 3H), i.e. torch weight_ih/hh transposed.
    return dict(wih=u(ks[0], (in_dim, 3 * hid)),
                whh=u(ks[1], (hid, 3 * hid)),
                bih=u(ks[2], (1, 3 * hid)),
                bhh=u(ks[3], (1, 3 * hid)))


def init_params(key, x_dim, meta_dim, out_dim=3, scale_output='abm-covid'):
    hidden_dim = D            # CalibNN hard-codes hidden_dim = 64
    out_layer_dim = 32
    ks = iter(jax.random.split(key, 16))
    p = {}
    # EmbedAttenSeq: 2-layer bidirectional GRU
    p['enc1_f'] = _init_gru_dir(next(ks), x_dim, H)
    p['enc1_b'] = _init_gru_dir(next(ks), x_dim, H)
    p['enc2_f'] = _init_gru_dir(next(ks), hidden_dim, H)
    p['enc2_b'] = _init_gru_dir(next(ks), hidden_dim, H)
    # TransformerAttn value/query/key stacked along the output dim: (D, 3D)
    p['wvqk'] = _xavier(next(ks), hidden_dim, 3 * hidden_dim)
    p['bvqk'] = jnp.zeros((1, 3 * hidden_dim), jnp.float32)
    # EmbedAttenSeq.out_layer (Linear + Tanh), bias filled 0.01 (init_weights)
    p['weo'] = _xavier(next(ks), hidden_dim + meta_dim, hidden_dim)
    p['beo'] = jnp.full((1, hidden_dim), 0.01, jnp.float32)
    # DecodeSeq.embed_input (Linear 1->64) and attn_combine (Linear 128->64)
    p['wde'] = _xavier(next(ks), 1, hidden_dim)
    p['bde'] = jnp.full((1, hidden_dim), 0.01, jnp.float32)
    p['wdc'] = _xavier(next(ks), 2 * hidden_dim, hidden_dim)
    p['bdc'] = jnp.full((1, hidden_dim), 0.01, jnp.float32)
    # DecodeSeq GRU (1 layer, bidirectional) + out layer (Linear 64->32 + Tanh)
    p['dec_f'] = _init_gru_dir(next(ks), hidden_dim, H)
    p['dec_b'] = _init_gru_dir(next(ks), hidden_dim, H)
    p['wdo'] = _xavier(next(ks), hidden_dim, out_layer_dim)
    p['bdo'] = jnp.full((1, out_layer_dim), 0.01, jnp.float32)
    # CalibNN.out_layer: Linear(32->16) + ReLU + Linear(16->out_dim), bias 0.01
    p['wh1'] = _xavier(next(ks), out_layer_dim, out_layer_dim // 2)
    p['bh1'] = jnp.full((1, out_layer_dim // 2), 0.01, jnp.float32)
    p['wh2'] = _xavier(next(ks), out_layer_dim // 2, out_dim)
    p['bh2'] = jnp.full((1, out_dim), 0.01, jnp.float32)
    # calibration parameter bounds
    p['minv'] = jnp.array(MIN_VAL_PARAMS[scale_output], jnp.float32).reshape(1, -1)
    p['maxv'] = jnp.array(MAX_VAL_PARAMS[scale_output], jnp.float32).reshape(1, -1)
    return p


# ----------------------------------------------------------------------------
if __name__ == "__main__":
    B = 4                 # batch (regions / counties)
    T_enc = 8             # encoder sequence length
    x_dim = 5             # X_train_dim
    meta_dim = 3          # metas_train_dim
    training_weeks = 8    # decoder length = training_weeks + WEEKS_AHEAD
    out_dim = 3           # len(MIN_VAL_PARAMS['abm-covid'])

    key = jax.random.PRNGKey(0)
    kp, kx, km = jax.random.split(key, 3)
    params = init_params(kp, x_dim, meta_dim, out_dim=out_dim)
    x = jax.random.normal(kx, (B, T_enc, x_dim), jnp.float32)
    meta = jax.random.normal(km, (B, meta_dim), jnp.float32)

    fwd = jax.jit(functools.partial(calibnn_forward, training_weeks=training_weeks))
    out = jax.block_until_ready(fwd(params, x, meta))

    T_dec = training_weeks + WEEKS_AHEAD
    assert out.shape == (B, T_dec, out_dim), out.shape
    assert bool(jnp.all(jnp.isfinite(out)))
    minv = jnp.array(MIN_VAL_PARAMS['abm-covid'], jnp.float32)
    maxv = jnp.array(MAX_VAL_PARAMS['abm-covid'], jnp.float32)
    assert bool(jnp.all(out >= minv - 1e-5)) and bool(jnp.all(out <= maxv + 1e-5))
    print("KERNEL_OK")
</pallas_src>

<mosaic_0001>
module attributes {stable_mosaic.version = 11 : i64} {
  func.func @_calibnn_kernel(%arg0: memref<32x5xf32, #tpu.memory_space<vmem>>, %arg1: memref<32x5xf32, #tpu.memory_space<vmem>>, %arg2: memref<4x3xf32, #tpu.memory_space<vmem>>, %arg3: memref<12x1xf32, #tpu.memory_space<vmem>>, %arg4: memref<12x1xf32, #tpu.memory_space<vmem>>, %arg5: memref<5x384xf32, #tpu.memory_space<vmem>>, %arg6: memref<5x384xf32, #tpu.memory_space<vmem>>, %arg7: memref<1x384xf32, #tpu.memory_space<vmem>>, %arg8: memref<128x384xf32, #tpu.memory_space<vmem>>, %arg9: memref<1x128xf32, #tpu.memory_space<vmem>>, %arg10: memref<128x384xf32, #tpu.memory_space<vmem>>, %arg11: memref<128x384xf32, #tpu.memory_space<vmem>>, %arg12: memref<1x384xf32, #tpu.memory_space<vmem>>, %arg13: memref<128x384xf32, #tpu.memory_space<vmem>>, %arg14: memref<1x128xf32, #tpu.memory_space<vmem>>, %arg15: memref<128x384xf32, #tpu.memory_space<vmem>>, %arg16: memref<128x384xf32, #tpu.memory_space<vmem>>, %arg17: memref<1x384xf32, #tpu.memory_space<vmem>>, %arg18: memref<128x64xf32, #tpu.memory_space<vmem>>, %arg19: memref<3x64xf32, #tpu.memory_space<vmem>>, %arg20: memref<1x64xf32, #tpu.memory_space<vmem>>, %arg21: memref<1x64xf32, #tpu.memory_space<vmem>>, %arg22: memref<1x64xf32, #tpu.memory_space<vmem>>, %arg23: memref<64x64xf32, #tpu.memory_space<vmem>>, %arg24: memref<64x64xf32, #tpu.memory_space<vmem>>, %arg25: memref<1x64xf32, #tpu.memory_space<vmem>>, %arg26: memref<64x384xf32, #tpu.memory_space<vmem>>, %arg27: memref<64x384xf32, #tpu.memory_space<vmem>>, %arg28: memref<1x384xf32, #tpu.memory_space<vmem>>, %arg29: memref<128x384xf32, #tpu.memory_space<vmem>>, %arg30: memref<1x128xf32, #tpu.memory_space<vmem>>, %arg31: memref<128x32xf32, #tpu.memory_space<vmem>>, %arg32: memref<128x32xf32, #tpu.memory_space<vmem>>, %arg33: memref<1x32xf32, #tpu.memory_space<vmem>>, %arg34: memref<32x16xf32, #tpu.memory_space<vmem>>, %arg35: memref<1x16xf32, #tpu.memory_space<vmem>>, %arg36: memref<16x3xf32, #tpu.memory_space<vmem>>, %arg37: memref<1x3xf32, #tpu.memory_space<vmem>>, %arg38: memref<1x3xf32, #tpu.memory_space<vmem>>, %arg39: memref<1x3xf32, #tpu.memory_space<vmem>>, %arg40: memref<48x3xf32, #tpu.memory_space<vmem>>) attributes {dimension_semantics = [], scalar_prefetch = 0 : i64, scratch_operands = 0 : i64, tpu.core_type = #tpu.core_type<tc>} {
    %cst = arith.constant 0.000000e+00 : f32
    %0 = vector.broadcast %cst : f32 to vector<4x128xf32>
    %c0 = arith.constant 0 : index
    %c0_0 = arith.constant 0 : index
    %1 = vector.load %arg0[%c0, %c0_0] : memref<32x5xf32, #tpu.memory_space<vmem>>, vector<32x5xf32>
    %c0_1 = arith.constant 0 : index
    %c0_2 = arith.constant 0 : index
    %2 = vector.load %arg5[%c0_1, %c0_2] : memref<5x384xf32, #tpu.memory_space<vmem>>, vector<5x384xf32>
    %cst_3 = arith.constant dense<0.000000e+00> : vector<32x384xf32>
    %3 = tpu.matmul %1, %2, %cst_3 {dimension_numbers = #tpu.dot_dimension_numbers<[1], [0], [0], [1], [0, 0, 1, 1], [], []>} : vector<32x5xf32>, vector<5x384xf32>, vector<32x384xf32> -> vector<32x384xf32>
    %c0_4 = arith.constant 0 : index
    %c0_5 = arith.constant 0 : index
    %4 = vector.load %arg1[%c0_4, %c0_5] : memref<32x5xf32, #tpu.memory_space<vmem>>, vector<32x5xf32>
    %c0_6 = arith.constant 0 : index
    %c0_7 = arith.constant 0 : index
    %5 = vector.load %arg6[%c0_6, %c0_7] : memref<5x384xf32, #tpu.memory_space<vmem>>, vector<5x384xf32>
    %cst_8 = arith.constant dense<0.000000e+00> : vector<32x384xf32>
    %6 = tpu.matmul %4, %5, %cst_8 {dimension_numbers = #tpu.dot_dimension_numbers<[1], [0], [0], [1], [0, 0, 1, 1], [], []>} : vector<32x5xf32>, vector<5x384xf32>, vector<32x384xf32> -> vector<32x384xf32>
    %7 = arith.addf %3, %6 : vector<32x384xf32>
    %c0_9 = arith.constant 0 : index
    %c0_10 = arith.constant 0 : index
    %8 = vector.load %arg7[%c0_9, %c0_10] : memref<1x384xf32, #tpu.memory_space<vmem>>, vector<1x384xf32>
    %9 = vector.broadcast %8 : vector<1x384xf32> to vector<32x384xf32>
    %10 = arith.addf %7, %9 : vector<32x384xf32>
    %11 = vector.extract_strided_slice %10 {offsets = [0, 0], sizes = [4, 384], strides = [1, 1]} : vector<32x384xf32> to vector<4x384xf32>
    %12 = vector.extract_strided_slice %10 {offsets = [4, 0], sizes = [4, 384], strides = [1, 1]} : vector<32x384xf32> to vector<4x384xf32>
    %13 = vector.extract_strided_slice %10 {offsets = [8, 0], sizes = [4, 384], strides = [1, 1]} : vector<32x384xf32> to vector<4x384xf32>
    %14 = vector.extract_strided_slice %10 {offsets = [12, 0], sizes = [4, 384], strides = [1, 1]} : vector<32x384xf32> to vector<4x384xf32>
    %15 = vector.extract_strided_slice %10 {offsets = [16, 0], sizes = [4, 384], strides = [1, 1]} : vector<32x384xf32> to vector<4x384xf32>
    %16 = vector.extract_strided_slice %10 {offsets = [20, 0], sizes = [4, 384], strides = [1, 1]} : vector<32x384xf32> to vector<4x384xf32>
    %17 = vector.extract_strided_slice %10 {offsets = [24, 0], sizes = [4, 384], strides = [1, 1]} : vector<32x384xf32> to vector<4x384xf32>
    %18 = vector.extract_strided_slice %10 {offsets = [28, 0], sizes = [4, 384], strides = [1, 1]} : vector<32x384xf32> to vector<4x384xf32>
    %c0_11 = arith.constant 0 : index
    %c0_12 = arith.constant 0 : index
    %19 = vector.load %arg8[%c0_11, %c0_12] : memref<128x384xf32, #tpu.memory_space<vmem>>, vector<128x384xf32>
    %c0_13 = arith.constant 0 : index
    %c0_14 = arith.constant 0 : index
    %20 = vector.load %arg9[%c0_13, %c0_14] : memref<1x128xf32, #tpu.memory_space<vmem>>, vector<1x128xf32>
    %cst_15 = arith.constant dense<0.000000e+00> : vector<4x384xf32>
    %21 = tpu.matmul %0, %19, %cst_15 {dimension_numbers = #tpu.dot_dimension_numbers<[1], [0], [0], [1], [0, 0, 1, 1], [], []>} : vector<4x128xf32>, vector<128x384xf32>, vector<4x384xf32> -> vector<4x384xf32>
    %22 = vector.extract_strided_slice %11 {offsets = [0, 0], sizes = [4, 256], strides = [1, 1]} : vector<4x384xf32> to vector<4x256xf32>
    %23 = vector.extract_strided_slice %21 {offsets = [0, 0], sizes = [4, 256], strides = [1, 1]} : vector<4x384xf32> to vector<4x256xf32>
    %24 = arith.addf %22, %23 : vector<4x256xf32>
    %25 = arith.negf %24 : vector<4x256xf32>
    %26 = math.exp %25 : vector<4x256xf32>
    %cst_16 = arith.constant 1.000000e+00 : f32
    %27 = vector.broadcast %cst_16 : f32 to vector<4x256xf32>
    %28 = arith.addf %27, %26 : vector<4x256xf32>
    %29 = arith.divf %27, %28 : vector<4x256xf32>
    %30 = vector.extract_strided_slice %29 {offsets = [0, 0], sizes = [4, 128], strides = [1, 1]} : vector<4x256xf32> to vector<4x128xf32>
    %31 = vector.extract_strided_slice %29 {offsets = [0, 128], sizes = [4, 128], strides = [1, 1]} : vector<4x256xf32> to vector<4x128xf32>
    %32 = vector.extract_strided_slice %11 {offsets = [0, 256], sizes = [4, 128], strides = [1, 1]} : vector<4x384xf32> to vector<4x128xf32>
    %33 = vector.extract_strided_slice %21 {offsets = [0, 256], sizes = [4, 128], strides = [1, 1]} : vector<4x384xf32> to vector<4x128xf32>
    %34 = vector.broadcast %20 : vector<1x128xf32> to vector<4x128xf32>
    %35 = arith.addf %33, %34 : vector<4x128xf32>
    %36 = arith.mulf %30, %35 : vector<4x128xf32>
    %37 = arith.addf %32, %36 : vector<4x128xf32>
    %38 = math.tanh %37 : vector<4x128xf32>
    %cst_17 = arith.constant 1.000000e+00 : f32
    %39 = vector.broadcast %cst_17 : f32 to vector<4x128xf32>
    %40 = arith.subf %39, %31 : vector<4x128xf32>
    %41 = arith.mulf %40, %38 : vector<4x128xf32>
    %42 = arith.mulf %31, %0 : vector<4x128xf32>
    %43 = arith.addf %41, %42 : vector<4x128xf32>
    %cst_18 = arith.constant dense<0.000000e+00> : vector<4x384xf32>
    %44 = tpu.matmul %43, %19, %cst_18 {dimension_numbers = #tpu.dot_dimension_numbers<[1], [0], [0], [1], [0, 0, 1, 1], [], []>} : vector<4x128xf32>, vector<128x384xf32>, vector<4x384xf32> -> vector<4x384xf32>
    %45 = vector.extract_strided_slice %12 {offsets = [0, 0], sizes = [4, 256], strides = [1, 1]} : vector<4x384xf32> to vector<4x256xf32>
    %46 = vector.extract_strided_slice %44 {offsets = [0, 0], sizes = [4, 256], strides = [1, 1]} : vector<4x384xf32> to vector<4x256xf32>
    %47 = arith.addf %45, %46 : vector<4x256xf32>
    %48 = arith.negf %47 : vector<4x256xf32>
    %49 = math.exp %48 : vector<4x256xf32>
    %cst_19 = arith.constant 1.000000e+00 : f32
    %50 = vector.broadcast %cst_19 : f32 to vector<4x256xf32>
    %51 = arith.addf %50, %49 : vector<4x256xf32>
    %52 = arith.divf %50, %51 : vector<4x256xf32>
    %53 = vector.extract_strided_slice %52 {offsets = [0, 0], sizes = [4, 128], strides = [1, 1]} : vector<4x256xf32> to vector<4x128xf32>
    %54 = vector.extract_strided_slice %52 {offsets = [0, 128], sizes = [4, 128], strides = [1, 1]} : vector<4x256xf32> to vector<4x128xf32>
    %55 = vector.extract_strided_slice %12 {offsets = [0, 256], sizes = [4, 128], strides = [1, 1]} : vector<4x384xf32> to vector<4x128xf32>
    %56 = vector.extract_strided_slice %44 {offsets = [0, 256], sizes = [4, 128], strides = [1, 1]} : vector<4x384xf32> to vector<4x128xf32>
    %57 = vector.broadcast %20 : vector<1x128xf32> to vector<4x128xf32>
    %58 = arith.addf %56, %57 : vector<4x128xf32>
    %59 = arith.mulf %53, %58 : vector<4x128xf32>
    %60 = arith.addf %55, %59 : vector<4x128xf32>
    %61 = math.tanh %60 : vector<4x128xf32>
    %cst_20 = arith.constant 1.000000e+00 : f32
    %62 = vector.broadcast %cst_20 : f32 to vector<4x128xf32>
    %63 = arith.subf %62, %54 : vector<4x128xf32>
    %64 = arith.mulf %63, %61 : vector<4x128xf32>
    %65 = arith.mulf %54, %43 : vector<4x128xf32>
    %66 = arith.addf %64, %65 : vector<4x128xf32>
    %cst_21 = arith.constant dense<0.000000e+00> : vector<4x384xf32>
    %67 = tpu.matmul %66, %19, %cst_21 {dimension_numbers = #tpu.dot_dimension_numbers<[1], [0], [0], [1], [0, 0, 1, 1], [], []>} : vector<4x128xf32>, vector<128x384xf32>, vector<4x384xf32> -> vector<4x384xf32>
    %68 = vector.extract_strided_slice %13 {offsets = [0, 0], sizes = [4, 256], strides = [1, 1]} : vector<4x384xf32> to vector<4x256xf32>
    %69 = vector.extract_strided_slice %67 {offsets = [0, 0], sizes = [4, 256], strides = [1, 1]} : vector<4x384xf32> to vector<4x256xf32>
    %70 = arith.addf %68, %69 : vector<4x256xf32>
    %71 = arith.negf %70 : vector<4x256xf32>
    %72 = math.exp %71 : vector<4x256xf32>
    %cst_22 = arith.constant 1.000000e+00 : f32
    %73 = vector.broadcast %cst_22 : f32 to vector<4x256xf32>
    %74 = arith.addf %73, %72 : vector<4x256xf32>
    %75 = arith.divf %73, %74 : vector<4x256xf32>
    %76 = vector.extract_strided_slice %75 {offsets = [0, 0], sizes = [4, 128], strides = [1, 1]} : vector<4x256xf32> to vector<4x128xf32>
    %77 = vector.extract_strided_slice %75 {offsets = [0, 128], sizes = [4, 128], strides = [1, 1]} : vector<4x256xf32> to vector<4x128xf32>
    %78 = vector.extract_strided_slice %13 {offsets = [0, 256], sizes = [4, 128], strides = [1, 1]} : vector<4x384xf32> to vector<4x128xf32>
    %79 = vector.extract_strided_slice %67 {offsets = [0, 256], sizes = [4, 128], strides = [1, 1]} : vector<4x384xf32> to vector<4x128xf32>
    %80 = vector.broadcast %20 : vector<1x128xf32> to vector<4x128xf32>
    %81 = arith.addf %79, %80 : vector<4x128xf32>
    %82 = arith.mulf %76, %81 : vector<4x128xf32>
    %83 = arith.addf %78, %82 : vector<4x128xf32>
    %84 = math.tanh %83 : vector<4x128xf32>
    %cst_23 = arith.constant 1.000000e+00 : f32
    %85 = vector.broadcast %cst_23 : f32 to vector<4x128xf32>
    %86 = arith.subf %85, %77 : vector<4x128xf32>
    %87 = arith.mulf %86, %84 : vector<4x128xf32>
    %88 = arith.mulf %77, %66 : vector<4x128xf32>
    %89 = arith.addf %87, %88 : vector<4x128xf32>
    %cst_24 = arith.constant dense<0.000000e+00> : vector<4x384xf32>
    %90 = tpu.matmul %89, %19, %cst_24 {dimension_numbers = #tpu.dot_dimension_numbers<[1], [0], [0], [1], [0, 0, 1, 1], [], []>} : vector<4x128xf32>, vector<128x384xf32>, vector<4x384xf32> -> vector<4x384xf32>
    %91 = vector.extract_strided_slice %14 {offsets = [0, 0], sizes = [4, 256], strides = [1, 1]} : vector<4x384xf32> to vector<4x256xf32>
    %92 = vector.extract_strided_slice %90 {offsets = [0, 0], sizes = [4, 256], strides = [1, 1]} : vector<4x384xf32> to vector<4x256xf32>
    %93 = arith.addf %91, %92 : vector<4x256xf32>
    %94 = arith.negf %93 : vector<4x256xf32>
    %95 = math.exp %94 : vector<4x256xf32>
    %cst_25 = arith.constant 1.000000e+00 : f32
    %96 = vector.broadcast %cst_25 : f32 to vector<4x256xf32>
    %97 = arith.addf %96, %95 : vector<4x256xf32>
    %98 = arith.divf %96, %97 : vector<4x256xf32>
    %99 = vector.extract_strided_slice %98 {offsets = [0, 0], sizes = [4, 128], strides = [1, 1]} : vector<4x256xf32> to vector<4x128xf32>
    %100 = vector.extract_strided_slice %98 {offsets = [0, 128], sizes = [4, 128], strides = [1, 1]} : vector<4x256xf32> to vector<4x128xf32>
    %101 = vector.extract_strided_slice %14 {offsets = [0, 256], sizes = [4, 128], strides = [1, 1]} : vector<4x384xf32> to vector<4x128xf32>
    %102 = vector.extract_strided_slice %90 {offsets = [0, 256], sizes = [4, 128], strides = [1, 1]} : vector<4x384xf32> to vector<4x128xf32>
    %103 = vector.broadcast %20 : vector<1x128xf32> to vector<4x128xf32>
    %104 = arith.addf %102, %103 : vector<4x128xf32>
    %105 = arith.mulf %99, %104 : vector<4x128xf32>
    %106 = arith.addf %101, %105 : vector<4x128xf32>
    %107 = math.tanh %106 : vector<4x128xf32>
    %cst_26 = arith.constant 1.000000e+00 : f32
    %108 = vector.broadcast %cst_26 : f32 to vector<4x128xf32>
    %109 = arith.subf %108, %100 : vector<4x128xf32>
    %110 = arith.mulf %109, %107 : vector<4x128xf32>
    %111 = arith.mulf %100, %89 : vector<4x128xf32>
    %112 = arith.addf %110, %111 : vector<4x128xf32>
    %cst_27 = arith.constant dense<0.000000e+00> : vector<4x384xf32>
    %113 = tpu.matmul %112, %19, %cst_27 {dimension_numbers = #tpu.dot_dimension_numbers<[1], [0], [0], [1], [0, 0, 1, 1], [], []>} : vector<4x128xf32>, vector<128x384xf32>, vector<4x384xf32> -> vector<4x384xf32>
    %114 = vector.extract_strided_slice %15 {offsets = [0, 0], sizes = [4, 256], strides = [1, 1]} : vector<4x384xf32> to vector<4x256xf32>
    %115 = vector.extract_strided_slice %113 {offsets = [0, 0], sizes = [4, 256], strides = [1, 1]} : vector<4x384xf32> to vector<4x256xf32>
    %116 = arith.addf %114, %115 : vector<4x256xf32>
    %117 = arith.negf %116 : vector<4x256xf32>
    %118 = math.exp %117 : vector<4x256xf32>
    %cst_28 = arith.constant 1.000000e+00 : f32
    %119 = vector.broadcast %cst_28 : f32 to vector<4x256xf32>
    %120 = arith.addf %119, %118 : vector<4x256xf32>
    %121 = arith.divf %119, %120 : vector<4x256xf32>
    %122 = vector.extract_strided_slice %121 {offsets = [0, 0], sizes = [4, 128], strides = [1, 1]} : vector<4x256xf32> to vector<4x128xf32>
    %123 = vector.extract_strided_slice %121 {offsets = [0, 128], sizes = [4, 128], strides = [1, 1]} : vector<4x256xf32> to vector<4x128xf32>
    %124 = vector.extract_strided_slice %15 {offsets = [0, 256], sizes = [4, 128], strides = [1, 1]} : vector<4x384xf32> to vector<4x128xf32>
    %125 = vector.extract_strided_slice %113 {offsets = [0, 256], sizes = [4, 128], strides = [1, 1]} : vector<4x384xf32> to vector<4x128xf32>
    %126 = vector.broadcast %20 : vector<1x128xf32> to vector<4x128xf32>
    %127 = arith.addf %125, %126 : vector<4x128xf32>
    %128 = arith.mulf %122, %127 : vector<4x128xf32>
    %129 = arith.addf %124, %128 : vector<4x128xf32>
    %130 = math.tanh %129 : vector<4x128xf32>
    %cst_29 = arith.constant 1.000000e+00 : f32
    %131 = vector.broadcast %cst_29 : f32 to vector<4x128xf32>
    %132 = arith.subf %131, %123 : vector<4x128xf32>
    %133 = arith.mulf %132, %130 : vector<4x128xf32>
    %134 = arith.mulf %123, %112 : vector<4x128xf32>
    %135 = arith.addf %133, %134 : vector<4x128xf32>
    %cst_30 = arith.constant dense<0.000000e+00> : vector<4x384xf32>
    %136 = tpu.matmul %135, %19, %cst_30 {dimension_numbers = #tpu.dot_dimension_numbers<[1], [0], [0], [1], [0, 0, 1, 1], [], []>} : vector<4x128xf32>, vector<128x384xf32>, vector<4x384xf32> -> vector<4x384xf32>
    %137 = vector.extract_strided_slice %16 {offsets = [0, 0], sizes = [4, 256], strides = [1, 1]} : vector<4x384xf32> to vector<4x256xf32>
    %138 = vector.extract_strided_slice %136 {offsets = [0, 0], sizes = [4, 256], strides = [1, 1]} : vector<4x384xf32> to vector<4x256xf32>
    %139 = arith.addf %137, %138 : vector<4x256xf32>
    %140 = arith.negf %139 : vector<4x256xf32>
    %141 = math.exp %140 : vector<4x256xf32>
    %cst_31 = arith.constant 1.000000e+00 : f32
    %142 = vector.broadcast %cst_31 : f32 to vector<4x256xf32>
    %143 = arith.addf %142, %141 : vector<4x256xf32>
    %144 = arith.divf %142, %143 : vector<4x256xf32>
    %145 = vector.extract_strided_slice %144 {offsets = [0, 0], sizes = [4, 128], strides = [1, 1]} : vector<4x256xf32> to vector<4x128xf32>
    %146 = vector.extract_strided_slice %144 {offsets = [0, 128], sizes = [4, 128], strides = [1, 1]} : vector<4x256xf32> to vector<4x128xf32>
    %147 = vector.extract_strided_slice %16 {offsets = [0, 256], sizes = [4, 128], strides = [1, 1]} : vector<4x384xf32> to vector<4x128xf32>
    %148 = vector.extract_strided_slice %136 {offsets = [0, 256], sizes = [4, 128], strides = [1, 1]} : vector<4x384xf32> to vector<4x128xf32>
    %149 = vector.broadcast %20 : vector<1x128xf32> to vector<4x128xf32>
    %150 = arith.addf %148, %149 : vector<4x128xf32>
    %151 = arith.mulf %145, %150 : vector<4x128xf32>
    %152 = arith.addf %147, %151 : vector<4x128xf32>
    %153 = math.tanh %152 : vector<4x128xf32>
    %cst_32 = arith.constant 1.000000e+00 : f32
    %154 = vector.broadcast %cst_32 : f32 to vector<4x128xf32>
    %155 = arith.subf %154, %146 : vector<4x128xf32>
    %156 = arith.mulf %155, %153 : vector<4x128xf32>
    %157 = arith.mulf %146, %135 : vector<4x128xf32>
    %158 = arith.addf %156, %157 : vector<4x128xf32>
    %cst_33 = arith.constant dense<0.000000e+00> : vector<4x384xf32>
    %159 = tpu.matmul %158, %19, %cst_33 {dimension_numbers = #tpu.dot_dimension_numbers<[1], [0], [0], [1], [0, 0, 1, 1], [], []>} : vector<4x128xf32>, vector<128x384xf32>, vector<4x384xf32> -> vector<4x384xf32>
    %160 = vector.extract_strided_slice %17 {offsets = [0, 0], sizes = [4, 256], strides = [1, 1]} : vector<4x384xf32> to vector<4x256xf32>
    %161 = vector.extract_strided_slice %159 {offsets = [0, 0], sizes = [4, 256], strides = [1, 1]} : vector<4x384xf32> to vector<4x256xf32>
    %162 = arith.addf %160, %161 : vector<4x256xf32>
    %163 = arith.negf %162 : vector<4x256xf32>
    %164 = math.exp %163 : vector<4x256xf32>
    %cst_34 = arith.constant 1.000000e+00 : f32
    %165 = vector.broadcast %cst_34 : f32 to vector<4x256xf32>
    %166 = arith.addf %165, %164 : vector<4x256xf32>
    %167 = arith.divf %165, %166 : vector<4x256xf32>
    %168 = vector.extract_strided_slice %167 {offsets = [0, 0], sizes = [4, 128], strides = [1, 1]} : vector<4x256xf32> to vector<4x128xf32>
    %169 = vector.extract_strided_slice %167 {offsets = [0, 128], sizes = [4, 128], strides = [1, 1]} : vector<4x256xf32> to vector<4x128xf32>
    %170 = vector.extract_strided_slice %17 {offsets = [0, 256], sizes = [4, 128], strides = [1, 1]} : vector<4x384xf32> to vector<4x128xf32>
    %171 = vector.extract_strided_slice %159 {offsets = [0, 256], sizes = [4, 128], strides = [1, 1]} : vector<4x384xf32> to vector<4x128xf32>
    %172 = vector.broadcast %20 : vector<1x128xf32> to vector<4x128xf32>
    %173 = arith.addf %171, %172 : vector<4x128xf32>
    %174 = arith.mulf %168, %173 : vector<4x128xf32>
    %175 = arith.addf %170, %174 : vector<4x128xf32>
    %176 = math.tanh %175 : vector<4x128xf32>
    %cst_35 = arith.constant 1.000000e+00 : f32
    %177 = vector.broadcast %cst_35 : f32 to vector<4x128xf32>
    %178 = arith.subf %177, %169 : vector<4x128xf32>
    %179 = arith.mulf %178, %176 : vector<4x128xf32>
    %180 = arith.mulf %169, %158 : vector<4x128xf32>
    %181 = arith.addf %179, %180 : vector<4x128xf32>
    %cst_36 = arith.constant dense<0.000000e+00> : vector<4x384xf32>
    %182 = tpu.matmul %181, %19, %cst_36 {dimension_numbers = #tpu.dot_dimension_numbers<[1], [0], [0], [1], [0, 0, 1, 1], [], []>} : vector<4x128xf32>, vector<128x384xf32>, vector<4x384xf32> -> vector<4x384xf32>
    %183 = vector.extract_strided_slice %18 {offsets = [0, 0], sizes = [4, 256], strides = [1, 1]} : vector<4x384xf32> to vector<4x256xf32>
    %184 = vector.extract_strided_slice %182 {offsets = [0, 0], sizes = [4, 256], strides = [1, 1]} : vector<4x384xf32> to vector<4x256xf32>
    %185 = arith.addf %183, %184 : vector<4x256xf32>
    %186 = arith.negf %185 : vector<4x256xf32>
    %187 = math.exp %186 : vector<4x256xf32>
    %cst_37 = arith.constant 1.000000e+00 : f32
    %188 = vector.broadcast %cst_37 : f32 to vector<4x256xf32>
    %189 = arith.addf %188, %187 : vector<4x256xf32>
    %190 = arith.divf %188, %189 : vector<4x256xf32>
    %191 = vector.extract_strided_slice %190 {offsets = [0, 0], sizes = [4, 128], strides = [1, 1]} : vector<4x256xf32> to vector<4x128xf32>
    %192 = vector.extract_strided_slice %190 {offsets = [0, 128], sizes = [4, 128], strides = [1, 1]} : vector<4x256xf32> to vector<4x128xf32>
    %193 = vector.extract_strided_slice %18 {offsets = [0, 256], sizes = [4, 128], strides = [1, 1]} : vector<4x384xf32> to vector<4x128xf32>
    %194 = vector.extract_strided_slice %182 {offsets = [0, 256], sizes = [4, 128], strides = [1, 1]} : vector<4x384xf32> to vector<4x128xf32>
    %195 = vector.broadcast %20 : vector<1x128xf32> to vector<4x128xf32>
    %196 = arith.addf %194, %195 : vector<4x128xf32>
    %197 = arith.mulf %191, %196 : vector<4x128xf32>
    %198 = arith.addf %193, %197 : vector<4x128xf32>
    %199 = math.tanh %198 : vector<4x128xf32>
    %cst_38 = arith.constant 1.000000e+00 : f32
    %200 = vector.broadcast %cst_38 : f32 to vector<4x128xf32>
    %201 = arith.subf %200, %192 : vector<4x128xf32>
    %202 = arith.mulf %201, %199 : vector<4x128xf32>
    %203 = arith.mulf %192, %181 : vector<4x128xf32>
    %204 = arith.addf %202, %203 : vector<4x128xf32>
    %205 = tpu.concatenate %43, %66, %89, %112, %135, %158, %181, %204 in 0 : vector<4x128xf32>, vector<4x128xf32>, vector<4x128xf32>, vector<4x128xf32>, vector<4x128xf32>, vector<4x128xf32>, vector<4x128xf32>, vector<4x128xf32> -> vector<32x128xf32>
    %206 = tpu.concatenate %204, %181, %158, %135, %112, %89, %66, %43 in 0 : vector<4x128xf32>, vector<4x128xf32>, vector<4x128xf32>, vector<4x128xf32>, vector<4x128xf32>, vector<4x128xf32>, vector<4x128xf32>, vector<4x128xf32> -> vector<32x128xf32>
    %c0_39 = arith.constant 0 : index
    %c0_40 = arith.constant 0 : index
    %207 = vector.load %arg10[%c0_39, %c0_40] : memref<128x384xf32, #tpu.memory_space<vmem>>, vector<128x384xf32>
    %cst_41 = arith.constant dense<0.000000e+00> : vector<32x384xf32>
    %208 = tpu.matmul %205, %207, %cst_41 {dimension_numbers = #tpu.dot_dimension_numbers<[1], [0], [0], [1], [0, 0, 1, 1], [], []>} : vector<32x128xf32>, vector<128x384xf32>, vector<32x384xf32> -> vector<32x384xf32>
    %c0_42 = arith.constant 0 : index
    %c0_43 = arith.constant 0 : index
    %209 = vector.load %arg11[%c0_42, %c0_43] : memref<128x384xf32, #tpu.memory_space<vmem>>, vector<128x384xf32>
    %cst_44 = arith.constant dense<0.000000e+00> : vector<32x384xf32>
    %210 = tpu.matmul %206, %209, %cst_44 {dimension_numbers = #tpu.dot_dimension_numbers<[1], [0], [0], [1], [0, 0, 1, 1], [], []>} : vector<32x128xf32>, vector<128x384xf32>, vector<32x384xf32> -> vector<32x384xf32>
    %211 = arith.addf %208, %210 : vector<32x384xf32>
    %c0_45 = arith.constant 0 : index
    %c0_46 = arith.constant 0 : index
    %212 = vector.load %arg12[%c0_45, %c0_46] : memref<1x384xf32, #tpu.memory_space<vmem>>, vector<1x384xf32>
    %213 = vector.broadcast %212 : vector<1x384xf32> to vector<32x384xf32>
    %214 = arith.addf %211, %213 : vector<32x384xf32>
    %215 = vector.extract_strided_slice %214 {offsets = [0, 0], sizes = [4, 384], strides = [1, 1]} : vector<32x384xf32> to vector<4x384xf32>
    %216 = vector.extract_strided_slice %214 {offsets = [4, 0], sizes = [4, 384], strides = [1, 1]} : vector<32x384xf32> to vector<4x384xf32>
    %217 = vector.extract_strided_slice %214 {offsets = [8, 0], sizes = [4, 384], strides = [1, 1]} : vector<32x384xf32> to vector<4x384xf32>
    %218 = vector.extract_strided_slice %214 {offsets = [12, 0], sizes = [4, 384], strides = [1, 1]} : vector<32x384xf32> to vector<4x384xf32>
    %219 = vector.extract_strided_slice %214 {offsets = [16, 0], sizes = [4, 384], strides = [1, 1]} : vector<32x384xf32> to vector<4x384xf32>
    %220 = vector.extract_strided_slice %214 {offsets = [20, 0], sizes = [4, 384], strides = [1, 1]} : vector<32x384xf32> to vector<4x384xf32>
    %221 = vector.extract_strided_slice %214 {offsets = [24, 0], sizes = [4, 384], strides = [1, 1]} : vector<32x384xf32> to vector<4x384xf32>
    %222 = vector.extract_strided_slice %214 {offsets = [28, 0], sizes = [4, 384], strides = [1, 1]} : vector<32x384xf32> to vector<4x384xf32>
    %c0_47 = arith.constant 0 : index
    %c0_48 = arith.constant 0 : index
    %223 = vector.load %arg13[%c0_47, %c0_48] : memref<128x384xf32, #tpu.memory_space<vmem>>, vector<128x384xf32>
    %c0_49 = arith.constant 0 : index
    %c0_50 = arith.constant 0 : index
    %224 = vector.load %arg14[%c0_49, %c0_50] : memref<1x128xf32, #tpu.memory_space<vmem>>, vector<1x128xf32>
    %cst_51 = arith.constant dense<0.000000e+00> : vector<4x384xf32>
    %225 = tpu.matmul %0, %223, %cst_51 {dimension_numbers = #tpu.dot_dimension_numbers<[1], [0], [0], [1], [0, 0, 1, 1], [], []>} : vector<4x128xf32>, vector<128x384xf32>, vector<4x384xf32> -> vector<4x384xf32>
    %226 = vector.extract_strided_slice %215 {offsets = [0, 0], sizes = [4, 256], strides = [1, 1]} : vector<4x384xf32> to vector<4x256xf32>
    %227 = vector.extract_strided_slice %225 {offsets = [0, 0], sizes = [4, 256], strides = [1, 1]} : vector<4x384xf32> to vector<4x256xf32>
    %228 = arith.addf %226, %227 : vector<4x256xf32>
    %229 = arith.negf %228 : vector<4x256xf32>
    %230 = math.exp %229 : vector<4x256xf32>
    %cst_52 = arith.constant 1.000000e+00 : f32
    %231 = vector.broadcast %cst_52 : f32 to vector<4x256xf32>
    %232 = arith.addf %231, %230 : vector<4x256xf32>
    %233 = arith.divf %231, %232 : vector<4x256xf32>
    %234 = vector.extract_strided_slice %233 {offsets = [0, 0], sizes = [4, 128], strides = [1, 1]} : vector<4x256xf32> to vector<4x128xf32>
    %235 = vector.extract_strided_slice %233 {offsets = [0, 128], sizes = [4, 128], strides = [1, 1]} : vector<4x256xf32> to vector<4x128xf32>
    %236 = vector.extract_strided_slice %215 {offsets = [0, 256], sizes = [4, 128], strides = [1, 1]} : vector<4x384xf32> to vector<4x128xf32>
    %237 = vector.extract_strided_slice %225 {offsets = [0, 256], sizes = [4, 128], strides = [1, 1]} : vector<4x384xf32> to vector<4x128xf32>
    %238 = vector.broadcast %224 : vector<1x128xf32> to vector<4x128xf32>
    %239 = arith.addf %237, %238 : vector<4x128xf32>
    %240 = arith.mulf %234, %239 : vector<4x128xf32>
    %241 = arith.addf %236, %240 : vector<4x128xf32>
    %242 = math.tanh %241 : vector<4x128xf32>
    %cst_53 = arith.constant 1.000000e+00 : f32
    %243 = vector.broadcast %cst_53 : f32 to vector<4x128xf32>
    %244 = arith.subf %243, %235 : vector<4x128xf32>
    %245 = arith.mulf %244, %242 : vector<4x128xf32>
    %246 = arith.mulf %235, %0 : vector<4x128xf32>
    %247 = arith.addf %245, %246 : vector<4x128xf32>
    %cst_54 = arith.constant dense<0.000000e+00> : vector<4x384xf32>
    %248 = tpu.matmul %247, %223, %cst_54 {dimension_numbers = #tpu.dot_dimension_numbers<[1], [0], [0], [1], [0, 0, 1, 1], [], []>} : vector<4x128xf32>, vector<128x384xf32>, vector<4x384xf32> -> vector<4x384xf32>
    %249 = vector.extract_strided_slice %216 {offsets = [0, 0], sizes = [4, 256], strides = [1, 1]} : vector<4x384xf32> to vector<4x256xf32>
    %250 = vector.extract_strided_slice %248 {offsets = [0, 0], sizes = [4, 256], strides = [1, 1]} : vector<4x384xf32> to vector<4x256xf32>
    %251 = arith.addf %249, %250 : vector<4x256xf32>
    %252 = arith.negf %251 : vector<4x256xf32>
    %253 = math.exp %252 : vector<4x256xf32>
    %cst_55 = arith.constant 1.000000e+00 : f32
    %254 = vector.broadcast %cst_55 : f32 to vector<4x256xf32>
    %255 = arith.addf %254, %253 : vector<4x256xf32>
    %256 = arith.divf %254, %255 : vector<4x256xf32>
    %257 = vector.extract_strided_slice %256 {offsets = [0, 0], sizes = [4, 128], strides = [1, 1]} : vector<4x256xf32> to vector<4x128xf32>
    %258 = vector.extract_strided_slice %256 {offsets = [0, 128], sizes = [4, 128], strides = [1, 1]} : vector<4x256xf32> to vector<4x128xf32>
    %259 = vector.extract_strided_slice %216 {offsets = [0, 256], sizes = [4, 128], strides = [1, 1]} : vector<4x384xf32> to vector<4x128xf32>
    %260 = vector.extract_strided_slice %248 {offsets = [0, 256], sizes = [4, 128], strides = [1, 1]} : vector<4x384xf32> to vector<4x128xf32>
    %261 = vector.broadcast %224 : vector<1x128xf32> to vector<4x128xf32>
    %262 = arith.addf %260, %261 : vector<4x128xf32>
    %263 = arith.mulf %257, %262 : vector<4x128xf32>
    %264 = arith.addf %259, %263 : vector<4x128xf32>
    %265 = math.tanh %264 : vector<4x128xf32>
    %cst_56 = arith.constant 1.000000e+00 : f32
    %266 = vector.broadcast %cst_56 : f32 to vector<4x128xf32>
    %267 = arith.subf %266, %258 : vector<4x128xf32>
    %268 = arith.mulf %267, %265 : vector<4x128xf32>
    %269 = arith.mulf %258, %247 : vector<4x128xf32>
    %270 = arith.addf %268, %269 : vector<4x128xf32>
    %cst_57 = arith.constant dense<0.000000e+00> : vector<4x384xf32>
    %271 = tpu.matmul %270, %223, %cst_57 {dimension_numbers = #tpu.dot_dimension_numbers<[1], [0], [0], [1], [0, 0, 1, 1], [], []>} : vector<4x128xf32>, vector<128x384xf32>, vector<4x384xf32> -> vector<4x384xf32>
    %272 = vector.extract_strided_slice %217 {offsets = [0, 0], sizes = [4, 256], strides = [1, 1]} : vector<4x384xf32> to vector<4x256xf32>
    %273 = vector.extract_strided_slice %271 {offsets = [0, 0], sizes = [4, 256], strides = [1, 1]} : vector<4x384xf32> to vector<4x256xf32>
    %274 = arith.addf %272, %273 : vector<4x256xf32>
    %275 = arith.negf %274 : vector<4x256xf32>
    %276 = math.exp %275 : vector<4x256xf32>
    %cst_58 = arith.constant 1.000000e+00 : f32
    %277 = vector.broadcast %cst_58 : f32 to vector<4x256xf32>
    %278 = arith.addf %277, %276 : vector<4x256xf32>
    %279 = arith.divf %277, %278 : vector<4x256xf32>
    %280 = vector.extract_strided_slice %279 {offsets = [0, 0], sizes = [4, 128], strides = [1, 1]} : vector<4x256xf32> to vector<4x128xf32>
    %281 = vector.extract_strided_slice %279 {offsets = [0, 128], sizes = [4, 128], strides = [1, 1]} : vector<4x256xf32> to vector<4x128xf32>
    %282 = vector.extract_strided_slice %217 {offsets = [0, 256], sizes = [4, 128], strides = [1, 1]} : vector<4x384xf32> to vector<4x128xf32>
    %283 = vector.extract_strided_slice %271 {offsets = [0, 256], sizes = [4, 128], strides = [1, 1]} : vector<4x384xf32> to vector<4x128xf32>
    %284 = vector.broadcast %224 : vector<1x128xf32> to vector<4x128xf32>
    %285 = arith.addf %283, %284 : vector<4x128xf32>
    %286 = arith.mulf %280, %285 : vector<4x128xf32>
    %287 = arith.addf %282, %286 : vector<4x128xf32>
    %288 = math.tanh %287 : vector<4x128xf32>
    %cst_59 = arith.constant 1.000000e+00 : f32
    %289 = vector.broadcast %cst_59 : f32 to vector<4x128xf32>
    %290 = arith.subf %289, %281 : vector<4x128xf32>
    %291 = arith.mulf %290, %288 : vector<4x128xf32>
    %292 = arith.mulf %281, %270 : vector<4x128xf32>
    %293 = arith.addf %291, %292 : vector<4x128xf32>
    %cst_60 = arith.constant dense<0.000000e+00> : vector<4x384xf32>
    %294 = tpu.matmul %293, %223, %cst_60 {dimension_numbers = #tpu.dot_dimension_numbers<[1], [0], [0], [1], [0, 0, 1, 1], [], []>} : vector<4x128xf32>, vector<128x384xf32>, vector<4x384xf32> -> vector<4x384xf32>
    %295 = vector.extract_strided_slice %218 {offsets = [0, 0], sizes = [4, 256], strides = [1, 1]} : vector<4x384xf32> to vector<4x256xf32>
    %296 = vector.extract_strided_slice %294 {offsets = [0, 0], sizes = [4, 256], strides = [1, 1]} : vector<4x384xf32> to vector<4x256xf32>
    %297 = arith.addf %295, %296 : vector<4x256xf32>
    %298 = arith.negf %297 : vector<4x256xf32>
    %299 = math.exp %298 : vector<4x256xf32>
    %cst_61 = arith.constant 1.000000e+00 : f32
    %300 = vector.broadcast %cst_61 : f32 to vector<4x256xf32>
    %301 = arith.addf %300, %299 : vector<4x256xf32>
    %302 = arith.divf %300, %301 : vector<4x256xf32>
    %303 = vector.extract_strided_slice %302 {offsets = [0, 0], sizes = [4, 128], strides = [1, 1]} : vector<4x256xf32> to vector<4x128xf32>
    %304 = vector.extract_strided_slice %302 {offsets = [0, 128], sizes = [4, 128], strides = [1, 1]} : vector<4x256xf32> to vector<4x128xf32>
    %305 = vector.extract_strided_slice %218 {offsets = [0, 256], sizes = [4, 128], strides = [1, 1]} : vector<4x384xf32> to vector<4x128xf32>
    %306 = vector.extract_strided_slice %294 {offsets = [0, 256], sizes = [4, 128], strides = [1, 1]} : vector<4x384xf32> to vector<4x128xf32>
    %307 = vector.broadcast %224 : vector<1x128xf32> to vector<4x128xf32>
    %308 = arith.addf %306, %307 : vector<4x128xf32>
    %309 = arith.mulf %303, %308 : vector<4x128xf32>
    %310 = arith.addf %305, %309 : vector<4x128xf32>
    %311 = math.tanh %310 : vector<4x128xf32>
    %cst_62 = arith.constant 1.000000e+00 : f32
    %312 = vector.broadcast %cst_62 : f32 to vector<4x128xf32>
    %313 = arith.subf %312, %304 : vector<4x128xf32>
    %314 = arith.mulf %313, %311 : vector<4x128xf32>
    %315 = arith.mulf %304, %293 : vector<4x128xf32>
    %316 = arith.addf %314, %315 : vector<4x128xf32>
    %cst_63 = arith.constant dense<0.000000e+00> : vector<4x384xf32>
    %317 = tpu.matmul %316, %223, %cst_63 {dimension_numbers = #tpu.dot_dimension_numbers<[1], [0], [0], [1], [0, 0, 1, 1], [], []>} : vector<4x128xf32>, vector<128x384xf32>, vector<4x384xf32> -> vector<4x384xf32>
    %318 = vector.extract_strided_slice %219 {offsets = [0, 0], sizes = [4, 256], strides = [1, 1]} : vector<4x384xf32> to vector<4x256xf32>
    %319 = vector.extract_strided_slice %317 {offsets = [0, 0], sizes = [4, 256], strides = [1, 1]} : vector<4x384xf32> to vector<4x256xf32>
    %320 = arith.addf %318, %319 : vector<4x256xf32>
    %321 = arith.negf %320 : vector<4x256xf32>
    %322 = math.exp %321 : vector<4x256xf32>
    %cst_64 = arith.constant 1.000000e+00 : f32
    %323 = vector.broadcast %cst_64 : f32 to vector<4x256xf32>
    %324 = arith.addf %323, %322 : vector<4x256xf32>
    %325 = arith.divf %323, %324 : vector<4x256xf32>
    %326 = vector.extract_strided_slice %325 {offsets = [0, 0], sizes = [4, 128], strides = [1, 1]} : vector<4x256xf32> to vector<4x128xf32>
    %327 = vector.extract_strided_slice %325 {offsets = [0, 128], sizes = [4, 128], strides = [1, 1]} : vector<4x256xf32> to vector<4x128xf32>
    %328 = vector.extract_strided_slice %219 {offsets = [0, 256], sizes = [4, 128], strides = [1, 1]} : vector<4x384xf32> to vector<4x128xf32>
    %329 = vector.extract_strided_slice %317 {offsets = [0, 256], sizes = [4, 128], strides = [1, 1]} : vector<4x384xf32> to vector<4x128xf32>
    %330 = vector.broadcast %224 : vector<1x128xf32> to vector<4x128xf32>
    %331 = arith.addf %329, %330 : vector<4x128xf32>
    %332 = arith.mulf %326, %331 : vector<4x128xf32>
    %333 = arith.addf %328, %332 : vector<4x128xf32>
    %334 = math.tanh %333 : vector<4x128xf32>
    %cst_65 = arith.constant 1.000000e+00 : f32
    %335 = vector.broadcast %cst_65 : f32 to vector<4x128xf32>
    %336 = arith.subf %335, %327 : vector<4x128xf32>
    %337 = arith.mulf %336, %334 : vector<4x128xf32>
    %338 = arith.mulf %327, %316 : vector<4x128xf32>
    %339 = arith.addf %337, %338 : vector<4x128xf32>
    %cst_66 = arith.constant dense<0.000000e+00> : vector<4x384xf32>
    %340 = tpu.matmul %339, %223, %cst_66 {dimension_numbers = #tpu.dot_dimension_numbers<[1], [0], [0], [1], [0, 0, 1, 1], [], []>} : vector<4x128xf32>, vector<128x384xf32>, vector<4x384xf32> -> vector<4x384xf32>
    %341 = vector.extract_strided_slice %220 {offsets = [0, 0], sizes = [4, 256], strides = [1, 1]} : vector<4x384xf32> to vector<4x256xf32>
    %342 = vector.extract_strided_slice %340 {offsets = [0, 0], sizes = [4, 256], strides = [1, 1]} : vector<4x384xf32> to vector<4x256xf32>
    %343 = arith.addf %341, %342 : vector<4x256xf32>
    %344 = arith.negf %343 : vector<4x256xf32>
    %345 = math.exp %344 : vector<4x256xf32>
    %cst_67 = arith.constant 1.000000e+00 : f32
    %346 = vector.broadcast %cst_67 : f32 to vector<4x256xf32>
    %347 = arith.addf %346, %345 : vector<4x256xf32>
    %348 = arith.divf %346, %347 : vector<4x256xf32>
    %349 = vector.extract_strided_slice %348 {offsets = [0, 0], sizes = [4, 128], strides = [1, 1]} : vector<4x256xf32> to vector<4x128xf32>
    %350 = vector.extract_strided_slice %348 {offsets = [0, 128], sizes = [4, 128], strides = [1, 1]} : vector<4x256xf32> to vector<4x128xf32>
    %351 = vector.extract_strided_slice %220 {offsets = [0, 256], sizes = [4, 128], strides = [1, 1]} : vector<4x384xf32> to vector<4x128xf32>
    %352 = vector.extract_strided_slice %340 {offsets = [0, 256], sizes = [4, 128], strides = [1, 1]} : vector<4x384xf32> to vector<4x128xf32>
    %353 = vector.broadcast %224 : vector<1x128xf32> to vector<4x128xf32>
    %354 = arith.addf %352, %353 : vector<4x128xf32>
    %355 = arith.mulf %349, %354 : vector<4x128xf32>
    %356 = arith.addf %351, %355 : vector<4x128xf32>
    %357 = math.tanh %356 : vector<4x128xf32>
    %cst_68 = arith.constant 1.000000e+00 : f32
    %358 = vector.broadcast %cst_68 : f32 to vector<4x128xf32>
    %359 = arith.subf %358, %350 : vector<4x128xf32>
    %360 = arith.mulf %359, %357 : vector<4x128xf32>
    %361 = arith.mulf %350, %339 : vector<4x128xf32>
    %362 = arith.addf %360, %361 : vector<4x128xf32>
    %cst_69 = arith.constant dense<0.000000e+00> : vector<4x384xf32>
    %363 = tpu.matmul %362, %223, %cst_69 {dimension_numbers = #tpu.dot_dimension_numbers<[1], [0], [0], [1], [0, 0, 1, 1], [], []>} : vector<4x128xf32>, vector<128x384xf32>, vector<4x384xf32> -> vector<4x384xf32>
    %364 = vector.extract_strided_slice %221 {offsets = [0, 0], sizes = [4, 256], strides = [1, 1]} : vector<4x384xf32> to vector<4x256xf32>
    %365 = vector.extract_strided_slice %363 {offsets = [0, 0], sizes = [4, 256], strides = [1, 1]} : vector<4x384xf32> to vector<4x256xf32>
    %366 = arith.addf %364, %365 : vector<4x256xf32>
    %367 = arith.negf %366 : vector<4x256xf32>
    %368 = math.exp %367 : vector<4x256xf32>
    %cst_70 = arith.constant 1.000000e+00 : f32
    %369 = vector.broadcast %cst_70 : f32 to vector<4x256xf32>
    %370 = arith.addf %369, %368 : vector<4x256xf32>
    %371 = arith.divf %369, %370 : vector<4x256xf32>
    %372 = vector.extract_strided_slice %371 {offsets = [0, 0], sizes = [4, 128], strides = [1, 1]} : vector<4x256xf32> to vector<4x128xf32>
    %373 = vector.extract_strided_slice %371 {offsets = [0, 128], sizes = [4, 128], strides = [1, 1]} : vector<4x256xf32> to vector<4x128xf32>
    %374 = vector.extract_strided_slice %221 {offsets = [0, 256], sizes = [4, 128], strides = [1, 1]} : vector<4x384xf32> to vector<4x128xf32>
    %375 = vector.extract_strided_slice %363 {offsets = [0, 256], sizes = [4, 128], strides = [1, 1]} : vector<4x384xf32> to vector<4x128xf32>
    %376 = vector.broadcast %224 : vector<1x128xf32> to vector<4x128xf32>
    %377 = arith.addf %375, %376 : vector<4x128xf32>
    %378 = arith.mulf %372, %377 : vector<4x128xf32>
    %379 = arith.addf %374, %378 : vector<4x128xf32>
    %380 = math.tanh %379 : vector<4x128xf32>
    %cst_71 = arith.constant 1.000000e+00 : f32
    %381 = vector.broadcast %cst_71 : f32 to vector<4x128xf32>
    %382 = arith.subf %381, %373 : vector<4x128xf32>
    %383 = arith.mulf %382, %380 : vector<4x128xf32>
    %384 = arith.mulf %373, %362 : vector<4x128xf32>
    %385 = arith.addf %383, %384 : vector<4x128xf32>
    %cst_72 = arith.constant dense<0.000000e+00> : vector<4x384xf32>
    %386 = tpu.matmul %385, %223, %cst_72 {dimension_numbers = #tpu.dot_dimension_numbers<[1], [0], [0], [1], [0, 0, 1, 1], [], []>} : vector<4x128xf32>, vector<128x384xf32>, vector<4x384xf32> -> vector<4x384xf32>
    %387 = vector.extract_strided_slice %222 {offsets = [0, 0], sizes = [4, 256], strides = [1, 1]} : vector<4x384xf32> to vector<4x256xf32>
    %388 = vector.extract_strided_slice %386 {offsets = [0, 0], sizes = [4, 256], strides = [1, 1]} : vector<4x384xf32> to vector<4x256xf32>
    %389 = arith.addf %387, %388 : vector<4x256xf32>
    %390 = arith.negf %389 : vector<4x256xf32>
    %391 = math.exp %390 : vector<4x256xf32>
    %cst_73 = arith.constant 1.000000e+00 : f32
    %392 = vector.broadcast %cst_73 : f32 to vector<4x256xf32>
    %393 = arith.addf %392, %391 : vector<4x256xf32>
    %394 = arith.divf %392, %393 : vector<4x256xf32>
    %395 = vector.extract_strided_slice %394 {offsets = [0, 0], sizes = [4, 128], strides = [1, 1]} : vector<4x256xf32> to vector<4x128xf32>
    %396 = vector.extract_strided_slice %394 {offsets = [0, 128], sizes = [4, 128], strides = [1, 1]} : vector<4x256xf32> to vector<4x128xf32>
    %397 = vector.extract_strided_slice %222 {offsets = [0, 256], sizes = [4, 128], strides = [1, 1]} : vector<4x384xf32> to vector<4x128xf32>
    %398 = vector.extract_strided_slice %386 {offsets = [0, 256], sizes = [4, 128], strides = [1, 1]} : vector<4x384xf32> to vector<4x128xf32>
    %399 = vector.broadcast %224 : vector<1x128xf32> to vector<4x128xf32>
    %400 = arith.addf %398, %399 : vector<4x128xf32>
    %401 = arith.mulf %395, %400 : vector<4x128xf32>
    %402 = arith.addf %397, %401 : vector<4x128xf32>
    %403 = math.tanh %402 : vector<4x128xf32>
    %cst_74 = arith.constant 1.000000e+00 : f32
    %404 = vector.broadcast %cst_74 : f32 to vector<4x128xf32>
    %405 = arith.subf %404, %396 : vector<4x128xf32>
    %406 = arith.mulf %405, %403 : vector<4x128xf32>
    %407 = arith.mulf %396, %385 : vector<4x128xf32>
    %408 = arith.addf %406, %407 : vector<4x128xf32>
    %409 = tpu.concatenate %247, %270, %293, %316, %339, %362, %385, %408 in 0 : vector<4x128xf32>, vector<4x128xf32>, vector<4x128xf32>, vector<4x128xf32>, vector<4x128xf32>, vector<4x128xf32>, vector<4x128xf32>, vector<4x128xf32> -> vector<32x128xf32>
    %410 = tpu.concatenate %408, %385, %362, %339, %316, %293, %270, %247 in 0 : vector<4x128xf32>, vector<4x128xf32>, vector<4x128xf32>, vector<4x128xf32>, vector<4x128xf32>, vector<4x128xf32>, vector<4x128xf32>, vector<4x128xf32> -> vector<32x128xf32>
    %c0_75 = arith.constant 0 : index
    %c0_76 = arith.constant 0 : index
    %411 = vector.load %arg15[%c0_75, %c0_76] : memref<128x384xf32, #tpu.memory_space<vmem>>, vector<128x384xf32>
    %cst_77 = arith.constant dense<0.000000e+00> : vector<32x384xf32>
    %412 = tpu.matmul %409, %411, %cst_77 {dimension_numbers = #tpu.dot_dimension_numbers<[1], [0], [0], [1], [0, 0, 1, 1], [], []>} : vector<32x128xf32>, vector<128x384xf32>, vector<32x384xf32> -> vector<32x384xf32>
    %c0_78 = arith.constant 0 : index
    %c0_79 = arith.constant 0 : index
    %413 = vector.load %arg16[%c0_78, %c0_79] : memref<128x384xf32, #tpu.memory_space<vmem>>, vector<128x384xf32>
    %cst_80 = arith.constant dense<0.000000e+00> : vector<32x384xf32>
    %414 = tpu.matmul %410, %413, %cst_80 {dimension_numbers = #tpu.dot_dimension_numbers<[1], [0], [0], [1], [0, 0, 1, 1], [], []>} : vector<32x128xf32>, vector<128x384xf32>, vector<32x384xf32> -> vector<32x384xf32>
    %415 = arith.addf %412, %414 : vector<32x384xf32>
    %c0_81 = arith.constant 0 : index
    %c0_82 = arith.constant 0 : index
    %416 = vector.load %arg17[%c0_81, %c0_82] : memref<1x384xf32, #tpu.memory_space<vmem>>, vector<1x384xf32>
    %417 = vector.broadcast %416 : vector<1x384xf32> to vector<32x384xf32>
    %418 = arith.addf %415, %417 : vector<32x384xf32>
    %419 = vector.extract_strided_slice %418 {offsets = [0, 0], sizes = [32, 128], strides = [1, 1]} : vector<32x384xf32> to vector<32x128xf32>
    %420 = vector.extract_strided_slice %418 {offsets = [0, 128], sizes = [32, 128], strides = [1, 1]} : vector<32x384xf32> to vector<32x128xf32>
    %421 = vector.extract_strided_slice %418 {offsets = [0, 256], sizes = [32, 128], strides = [1, 1]} : vector<32x384xf32> to vector<32x128xf32>
    %cst_83 = arith.constant dense<0.000000e+00> : vector<32x32xf32>
    %422 = tpu.matmul %419, %420, %cst_83 {dimension_numbers = #tpu.dot_dimension_numbers<[1], [1], [0], [0], [0, 0, 1, 0], [], []>} : vector<32x128xf32>, vector<32x128xf32>, vector<32x32xf32> -> vector<32x32xf32>
    %cst_84 = arith.constant 1.250000e-01 : f32
    %423 = vector.broadcast %cst_84 : f32 to vector<32x32xf32>
    %424 = arith.mulf %422, %423 : vector<32x32xf32>
    %425 = tpu.iota {dimensions = array<i32: 0>} : vector<32x32xi32>
    %c4_i32 = arith.constant 4 : i32
    %c0_i32 = arith.constant 0 : i32
    %426 = arith.cmpi eq, %c4_i32, %c0_i32 : i32
    %c1_i32 = arith.constant 1 : i32
    %427 = arith.select %426, %c1_i32, %c4_i32 : i32
    %428 = vector.broadcast %427 : i32 to vector<32x32xi32>
    %429 = arith.remsi %425, %428 : vector<32x32xi32>
    %c0_i32_85 = arith.constant 0 : i32
    %430 = vector.broadcast %c0_i32_85 : i32 to vector<32x32xi32>
    %431 = arith.cmpi ne, %429, %430 : vector<32x32xi32>
    %c0_i32_86 = arith.constant 0 : i32
    %432 = vector.broadcast %c0_i32_86 : i32 to vector<32x32xi32>
    %433 = arith.cmpi slt, %429, %432 : vector<32x32xi32>
    %c0_i32_87 = arith.constant 0 : i32
    %434 = arith.cmpi slt, %427, %c0_i32_87 : i32
    %435 = vector.broadcast %434 : i1 to vector<32x32xi1>
    %436 = vector.broadcast %435 : vector<32x32xi1> to vector<32x32xi1>
    %437 = arith.xori %433, %436 : vector<32x32xi1>
    %438 = arith.andi %437, %431 : vector<32x32xi1>
    %439 = vector.broadcast %427 : i32 to vector<32x32xi32>
    %440 = arith.addi %429, %439 : vector<32x32xi32>
    %441 = arith.select %438, %440, %429 : vector<32x32xi1>, vector<32x32xi32>
    %442 = tpu.iota {dimensions = array<i32: 1>} : vector<32x32xi32>
    %c4_i32_88 = arith.constant 4 : i32
    %c0_i32_89 = arith.constant 0 : i32
    %443 = arith.cmpi eq, %c4_i32_88, %c0_i32_89 : i32
    %c1_i32_90 = arith.constant 1 : i32
    %444 = arith.select %443, %c1_i32_90, %c4_i32_88 : i32
    %445 = vector.broadcast %444 : i32 to vector<32x32xi32>
    %446 = arith.remsi %442, %445 : vector<32x32xi32>
    %c0_i32_91 = arith.constant 0 : i32
    %447 = vector.broadcast %c0_i32_91 : i32 to vector<32x32xi32>
    %448 = arith.cmpi ne, %446, %447 : vector<32x32xi32>
    %c0_i32_92 = arith.constant 0 : i32
    %449 = vector.broadcast %c0_i32_92 : i32 to vector<32x32xi32>
    %450 = arith.cmpi slt, %446, %449 : vector<32x32xi32>
    %c0_i32_93 = arith.constant 0 : i32
    %451 = arith.cmpi slt, %444, %c0_i32_93 : i32
    %452 = vector.broadcast %451 : i1 to vector<32x32xi1>
    %453 = vector.broadcast %452 : vector<32x32xi1> to vector<32x32xi1>
    %454 = arith.xori %450, %453 : vector<32x32xi1>
    %455 = arith.andi %454, %448 : vector<32x32xi1>
    %456 = vector.broadcast %444 : i32 to vector<32x32xi32>
    %457 = arith.addi %446, %456 : vector<32x32xi32>
    %458 = arith.select %455, %457, %446 : vector<32x32xi1>, vector<32x32xi32>
    %459 = arith.cmpi eq, %441, %458 : vector<32x32xi32>
    %cst_94 = arith.constant -1.000000e+30 : f32
    %460 = vector.broadcast %cst_94 : f32 to vector<32x32xf32>
    %461 = arith.select %459, %424, %460 : vector<32x32xi1>, vector<32x32xf32>
    %cst_95 = arith.constant dense<0xFF800000> : vector<32xf32>
    %462 = vector.multi_reduction <maximumf>, %461, %cst_95 [1] : vector<32x32xf32> to vector<32xf32>
    %463 = vector.shape_cast %462 : vector<32xf32> to vector<32x1xf32>
    %464 = vector.broadcast %463 : vector<32x1xf32> to vector<32x32xf32>
    %465 = arith.subf %461, %464 : vector<32x32xf32>
    %466 = math.exp %465 : vector<32x32xf32>
    %cst_96 = arith.constant dense<0.000000e+00> : vector<32xf32>
    %467 = vector.multi_reduction <add>, %466, %cst_96 [1] : vector<32x32xf32> to vector<32xf32>
    %468 = vector.shape_cast %467 : vector<32xf32> to vector<32x1xf32>
    %469 = tpu.reciprocal %468 {approx = true} : vector<32x1xf32> -> vector<32x1xf32>
    %470 = vector.broadcast %469 : vector<32x1xf32> to vector<32x32xf32>
    %471 = arith.mulf %466, %470 : vector<32x32xf32>
    %cst_97 = arith.constant dense<0.000000e+00> : vector<32x128xf32>
    %472 = tpu.matmul %471, %421, %cst_97 {dimension_numbers = #tpu.dot_dimension_numbers<[1], [0], [0], [1], [0, 0, 1, 1], [], []>} : vector<32x32xf32>, vector<32x128xf32>, vector<32x128xf32> -> vector<32x128xf32>
    %473 = tpu.iota {dimensions = array<i32: 0>} : vector<4x32xi32>
    %474 = tpu.iota {dimensions = array<i32: 1>} : vector<4x32xi32>
    %c4_i32_98 = arith.constant 4 : i32
    %c0_i32_99 = arith.constant 0 : i32
    %475 = arith.cmpi eq, %c4_i32_98, %c0_i32_99 : i32
    %c1_i32_100 = arith.constant 1 : i32
    %476 = arith.select %475, %c1_i32_100, %c4_i32_98 : i32
    %477 = vector.broadcast %476 : i32 to vector<4x32xi32>
    %478 = arith.remsi %474, %477 : vector<4x32xi32>
    %c0_i32_101 = arith.constant 0 : i32
    %479 = vector.broadcast %c0_i32_101 : i32 to vector<4x32xi32>
    %480 = arith.cmpi ne, %478, %479 : vector<4x32xi32>
    %c0_i32_102 = arith.constant 0 : i32
    %481 = vector.broadcast %c0_i32_102 : i32 to vector<4x32xi32>
    %482 = arith.cmpi slt, %478, %481 : vector<4x32xi32>
    %c0_i32_103 = arith.constant 0 : i32
    %483 = arith.cmpi slt, %476, %c0_i32_103 : i32
    %484 = vector.broadcast %483 : i1 to vector<4x32xi1>
    %485 = vector.broadcast %484 : vector<4x32xi1> to vector<4x32xi1>
    %486 = arith.xori %482, %485 : vector<4x32xi1>
    %487 = arith.andi %486, %480 : vector<4x32xi1>
    %488 = vector.broadcast %476 : i32 to vector<4x32xi32>
    %489 = arith.addi %478, %488 : vector<4x32xi32>
    %490 = arith.select %487, %489, %478 : vector<4x32xi1>, vector<4x32xi32>
    %491 = arith.cmpi eq, %473, %490 : vector<4x32xi32>
    %492 = arith.extui %491 : vector<4x32xi1> to vector<4x32xi32>
    %493 = arith.sitofp %492 : vector<4x32xi32> to vector<4x32xf32>
    %cst_104 = arith.constant dense<0.000000e+00> : vector<4x128xf32>
    %494 = tpu.matmul %493, %472, %cst_104 {dimension_numbers = #tpu.dot_dimension_numbers<[1], [0], [0], [1], [0, 0, 1, 1], [], []>} : vector<4x32xf32>, vector<32x128xf32>, vector<4x128xf32> -> vector<4x128xf32>
    %c0_105 = arith.constant 0 : index
    %c0_106 = arith.constant 0 : index
    %495 = vector.load %arg18[%c0_105, %c0_106] : memref<128x64xf32, #tpu.memory_space<vmem>>, vector<128x64xf32>
    %cst_107 = arith.constant dense<0.000000e+00> : vector<4x64xf32>
    %496 = tpu.matmul %494, %495, %cst_107 {dimension_numbers = #tpu.dot_dimension_numbers<[1], [0], [0], [1], [0, 0, 1, 1], [], []>} : vector<4x128xf32>, vector<128x64xf32>, vector<4x64xf32> -> vector<4x64xf32>
    %c0_108 = arith.constant 0 : index
    %c0_109 = arith.constant 0 : index
    %497 = vector.load %arg2[%c0_108, %c0_109] : memref<4x3xf32, #tpu.memory_space<vmem>>, vector<4x3xf32>
    %c0_110 = arith.constant 0 : index
    %c0_111 = arith.constant 0 : index
    %498 = vector.load %arg19[%c0_110, %c0_111] : memref<3x64xf32, #tpu.memory_space<vmem>>, vector<3x64xf32>
    %cst_112 = arith.constant dense<0.000000e+00> : vector<4x64xf32>
    %499 = tpu.matmul %497, %498, %cst_112 {dimension_numbers = #tpu.dot_dimension_numbers<[1], [0], [0], [1], [0, 0, 1, 1], [], []>} : vector<4x3xf32>, vector<3x64xf32>, vector<4x64xf32> -> vector<4x64xf32>
    %500 = arith.addf %496, %499 : vector<4x64xf32>
    %c0_113 = arith.constant 0 : index
    %c0_114 = arith.constant 0 : index
    %501 = vector.load %arg20[%c0_113, %c0_114] : memref<1x64xf32, #tpu.memory_space<vmem>>, vector<1x64xf32>
    %502 = vector.broadcast %501 : vector<1x64xf32> to vector<4x64xf32>
    %503 = arith.addf %500, %502 : vector<4x64xf32>
    %504 = math.tanh %503 : vector<4x64xf32>
    %c0_115 = arith.constant 0 : index
    %c0_116 = arith.constant 0 : index
    %505 = vector.load %arg3[%c0_115, %c0_116] : memref<12x1xf32, #tpu.memory_space<vmem>>, vector<12x1xf32>
    %c0_117 = arith.constant 0 : index
    %c0_118 = arith.constant 0 : index
    %506 = vector.load %arg21[%c0_117, %c0_118] : memref<1x64xf32, #tpu.memory_space<vmem>>, vector<1x64xf32>
    %507 = vector.broadcast %505 : vector<12x1xf32> to vector<12x64xf32>
    %508 = vector.broadcast %506 : vector<1x64xf32> to vector<12x64xf32>
    %509 = arith.mulf %507, %508 : vector<12x64xf32>
    %c0_119 = arith.constant 0 : index
    %c0_120 = arith.constant 0 : index
    %510 = vector.load %arg22[%c0_119, %c0_120] : memref<1x64xf32, #tpu.memory_space<vmem>>, vector<1x64xf32>
    %511 = vector.broadcast %510 : vector<1x64xf32> to vector<12x64xf32>
    %512 = arith.addf %509, %511 : vector<12x64xf32>
    %c0_121 = arith.constant 0 : index
    %c0_122 = arith.constant 0 : index
    %513 = vector.load %arg4[%c0_121, %c0_122] : memref<12x1xf32, #tpu.memory_space<vmem>>, vector<12x1xf32>
    %c0_123 = arith.constant 0 : index
    %c0_124 = arith.constant 0 : index
    %514 = vector.load %arg21[%c0_123, %c0_124] : memref<1x64xf32, #tpu.memory_space<vmem>>, vector<1x64xf32>
    %515 = vector.broadcast %513 : vector<12x1xf32> to vector<12x64xf32>
    %516 = vector.broadcast %514 : vector<1x64xf32> to vector<12x64xf32>
    %517 = arith.mulf %515, %516 : vector<12x64xf32>
    %c0_125 = arith.constant 0 : index
    %c0_126 = arith.constant 0 : index
    %518 = vector.load %arg22[%c0_125, %c0_126] : memref<1x64xf32, #tpu.memory_space<vmem>>, vector<1x64xf32>
    %519 = vector.broadcast %518 : vector<1x64xf32> to vector<12x64xf32>
    %520 = arith.addf %517, %519 : vector<12x64xf32>
    %c0_127 = arith.constant 0 : index
    %c0_128 = arith.constant 0 : index
    %521 = vector.load %arg23[%c0_127, %c0_128] : memref<64x64xf32, #tpu.memory_space<vmem>>, vector<64x64xf32>
    %cst_129 = arith.constant dense<0.000000e+00> : vector<12x64xf32>
    %522 = tpu.matmul %512, %521, %cst_129 {dimension_numbers = #tpu.dot_dimension_numbers<[1], [0], [0], [1], [0, 0, 1, 1], [], []>} : vector<12x64xf32>, vector<64x64xf32>, vector<12x64xf32> -> vector<12x64xf32>
    %c0_130 = arith.constant 0 : index
    %c0_131 = arith.constant 0 : index
    %523 = vector.load %arg23[%c0_130, %c0_131] : memref<64x64xf32, #tpu.memory_space<vmem>>, vector<64x64xf32>
    %cst_132 = arith.constant dense<0.000000e+00> : vector<12x64xf32>
    %524 = tpu.matmul %520, %523, %cst_132 {dimension_numbers = #tpu.dot_dimension_numbers<[1], [0], [0], [1], [0, 0, 1, 1], [], []>} : vector<12x64xf32>, vector<64x64xf32>, vector<12x64xf32> -> vector<12x64xf32>
    %c0_133 = arith.constant 0 : index
    %c0_134 = arith.constant 0 : index
    %525 = vector.load %arg24[%c0_133, %c0_134] : memref<64x64xf32, #tpu.memory_space<vmem>>, vector<64x64xf32>
    %cst_135 = arith.constant dense<0.000000e+00> : vector<4x64xf32>
    %526 = tpu.matmul %504, %525, %cst_135 {dimension_numbers = #tpu.dot_dimension_numbers<[1], [0], [0], [1], [0, 0, 1, 1], [], []>} : vector<4x64xf32>, vector<64x64xf32>, vector<4x64xf32> -> vector<4x64xf32>
    %c0_136 = arith.constant 0 : index
    %c0_137 = arith.constant 0 : index
    %527 = vector.load %arg25[%c0_136, %c0_137] : memref<1x64xf32, #tpu.memory_space<vmem>>, vector<1x64xf32>
    %528 = vector.broadcast %527 : vector<1x64xf32> to vector<4x64xf32>
    %529 = arith.addf %526, %528 : vector<4x64xf32>
    %c0_138 = arith.constant 0 : index
    %c0_139 = arith.constant 0 : index
    %530 = vector.load %arg26[%c0_138, %c0_139] : memref<64x384xf32, #tpu.memory_space<vmem>>, vector<64x384xf32>
    %c0_140 = arith.constant 0 : index
    %c0_141 = arith.constant 0 : index
    %531 = vector.load %arg27[%c0_140, %c0_141] : memref<64x384xf32, #tpu.memory_space<vmem>>, vector<64x384xf32>
    %cst_142 = arith.constant dense<0.000000e+00> : vector<12x384xf32>
    %532 = tpu.matmul %522, %530, %cst_142 {dimension_numbers = #tpu.dot_dimension_numbers<[1], [0], [0], [1], [0, 0, 1, 1], [], []>} : vector<12x64xf32>, vector<64x384xf32>, vector<12x384xf32> -> vector<12x384xf32>
    %cst_143 = arith.constant dense<0.000000e+00> : vector<12x384xf32>
    %533 = tpu.matmul %524, %531, %cst_143 {dimension_numbers = #tpu.dot_dimension_numbers<[1], [0], [0], [1], [0, 0, 1, 1], [], []>} : vector<12x64xf32>, vector<64x384xf32>, vector<12x384xf32> -> vector<12x384xf32>
    %534 = arith.addf %532, %533 : vector<12x384xf32>
    %535 = arith.addf %530, %531 : vector<64x384xf32>
    %cst_144 = arith.constant dense<0.000000e+00> : vector<4x384xf32>
    %536 = tpu.matmul %529, %535, %cst_144 {dimension_numbers = #tpu.dot_dimension_numbers<[1], [0], [0], [1], [0, 0, 1, 1], [], []>} : vector<4x64xf32>, vector<64x384xf32>, vector<4x384xf32> -> vector<4x384xf32>
    %c0_145 = arith.constant 0 : index
    %c0_146 = arith.constant 0 : index
    %537 = vector.load %arg28[%c0_145, %c0_146] : memref<1x384xf32, #tpu.memory_space<vmem>>, vector<1x384xf32>
    %538 = vector.broadcast %537 : vector<1x384xf32> to vector<4x384xf32>
    %539 = arith.addf %536, %538 : vector<4x384xf32>
    %540 = vector.extract_strided_slice %534 {offsets = [0, 0], sizes = [1, 384], strides = [1, 1]} : vector<12x384xf32> to vector<1x384xf32>
    %541 = vector.broadcast %540 : vector<1x384xf32> to vector<4x384xf32>
    %542 = arith.addf %541, %539 : vector<4x384xf32>
    %543 = vector.extract_strided_slice %534 {offsets = [1, 0], sizes = [1, 384], strides = [1, 1]} : vector<12x384xf32> to vector<1x384xf32>
    %544 = vector.broadcast %543 : vector<1x384xf32> to vector<4x384xf32>
    %545 = arith.addf %544, %539 : vector<4x384xf32>
    %546 = vector.extract_strided_slice %534 {offsets = [2, 0], sizes = [1, 384], strides = [1, 1]} : vector<12x384xf32> to vector<1x384xf32>
    %547 = vector.broadcast %546 : vector<1x384xf32> to vector<4x384xf32>
    %548 = arith.addf %547, %539 : vector<4x384xf32>
    %549 = vector.extract_strided_slice %534 {offsets = [3, 0], sizes = [1, 384], strides = [1, 1]} : vector<12x384xf32> to vector<1x384xf32>
    %550 = vector.broadcast %549 : vector<1x384xf32> to vector<4x384xf32>
    %551 = arith.addf %550, %539 : vector<4x384xf32>
    %552 = vector.extract_strided_slice %534 {offsets = [4, 0], sizes = [1, 384], strides = [1, 1]} : vector<12x384xf32> to vector<1x384xf32>
    %553 = vector.broadcast %552 : vector<1x384xf32> to vector<4x384xf32>
    %554 = arith.addf %553, %539 : vector<4x384xf32>
    %555 = vector.extract_strided_slice %534 {offsets = [5, 0], sizes = [1, 384], strides = [1, 1]} : vector<12x384xf32> to vector<1x384xf32>
    %556 = vector.broadcast %555 : vector<1x384xf32> to vector<4x384xf32>
    %557 = arith.addf %556, %539 : vector<4x384xf32>
    %558 = vector.extract_strided_slice %534 {offsets = [6, 0], sizes = [1, 384], strides = [1, 1]} : vector<12x384xf32> to vector<1x384xf32>
    %559 = vector.broadcast %558 : vector<1x384xf32> to vector<4x384xf32>
    %560 = arith.addf %559, %539 : vector<4x384xf32>
    %561 = vector.extract_strided_slice %534 {offsets = [7, 0], sizes = [1, 384], strides = [1, 1]} : vector<12x384xf32> to vector<1x384xf32>
    %562 = vector.broadcast %561 : vector<1x384xf32> to vector<4x384xf32>
    %563 = arith.addf %562, %539 : vector<4x384xf32>
    %564 = vector.extract_strided_slice %534 {offsets = [8, 0], sizes = [1, 384], strides = [1, 1]} : vector<12x384xf32> to vector<1x384xf32>
    %565 = vector.broadcast %564 : vector<1x384xf32> to vector<4x384xf32>
    %566 = arith.addf %565, %539 : vector<4x384xf32>
    %567 = vector.extract_strided_slice %534 {offsets = [9, 0], sizes = [1, 384], strides = [1, 1]} : vector<12x384xf32> to vector<1x384xf32>
    %568 = vector.broadcast %567 : vector<1x384xf32> to vector<4x384xf32>
    %569 = arith.addf %568, %539 : vector<4x384xf32>
    %570 = vector.extract_strided_slice %534 {offsets = [10, 0], sizes = [1, 384], strides = [1, 1]} : vector<12x384xf32> to vector<1x384xf32>
    %571 = vector.broadcast %570 : vector<1x384xf32> to vector<4x384xf32>
    %572 = arith.addf %571, %539 : vector<4x384xf32>
    %573 = vector.extract_strided_slice %534 {offsets = [11, 0], sizes = [1, 384], strides = [1, 1]} : vector<12x384xf32> to vector<1x384xf32>
    %574 = vector.broadcast %573 : vector<1x384xf32> to vector<4x384xf32>
    %575 = arith.addf %574, %539 : vector<4x384xf32>
    %c0_147 = arith.constant 0 : index
    %c0_148 = arith.constant 0 : index
    %576 = vector.load %arg29[%c0_147, %c0_148] : memref<128x384xf32, #tpu.memory_space<vmem>>, vector<128x384xf32>
    %c0_149 = arith.constant 0 : index
    %c0_150 = arith.constant 0 : index
    %577 = vector.load %arg30[%c0_149, %c0_150] : memref<1x128xf32, #tpu.memory_space<vmem>>, vector<1x128xf32>
    %cst_151 = arith.constant dense<0.000000e+00> : vector<4x384xf32>
    %578 = tpu.matmul %408, %576, %cst_151 {dimension_numbers = #tpu.dot_dimension_numbers<[1], [0], [0], [1], [0, 0, 1, 1], [], []>} : vector<4x128xf32>, vector<128x384xf32>, vector<4x384xf32> -> vector<4x384xf32>
    %579 = vector.extract_strided_slice %542 {offsets = [0, 0], sizes = [4, 256], strides = [1, 1]} : vector<4x384xf32> to vector<4x256xf32>
    %580 = vector.extract_strided_slice %578 {offsets = [0, 0], sizes = [4, 256], strides = [1, 1]} : vector<4x384xf32> to vector<4x256xf32>
    %581 = arith.addf %579, %580 : vector<4x256xf32>
    %582 = arith.negf %581 : vector<4x256xf32>
    %583 = math.exp %582 : vector<4x256xf32>
    %cst_152 = arith.constant 1.000000e+00 : f32
    %584 = vector.broadcast %cst_152 : f32 to vector<4x256xf32>
    %585 = arith.addf %584, %583 : vector<4x256xf32>
    %586 = arith.divf %584, %585 : vector<4x256xf32>
    %587 = vector.extract_strided_slice %586 {offsets = [0, 0], sizes = [4, 128], strides = [1, 1]} : vector<4x256xf32> to vector<4x128xf32>
    %588 = vector.extract_strided_slice %586 {offsets = [0, 128], sizes = [4, 128], strides = [1, 1]} : vector<4x256xf32> to vector<4x128xf32>
    %589 = vector.extract_strided_slice %542 {offsets = [0, 256], sizes = [4, 128], strides = [1, 1]} : vector<4x384xf32> to vector<4x128xf32>
    %590 = vector.extract_strided_slice %578 {offsets = [0, 256], sizes = [4, 128], strides = [1, 1]} : vector<4x384xf32> to vector<4x128xf32>
    %591 = vector.broadcast %577 : vector<1x128xf32> to vector<4x128xf32>
    %592 = arith.addf %590, %591 : vector<4x128xf32>
    %593 = arith.mulf %587, %592 : vector<4x128xf32>
    %594 = arith.addf %589, %593 : vector<4x128xf32>
    %595 = math.tanh %594 : vector<4x128xf32>
    %cst_153 = arith.constant 1.000000e+00 : f32
    %596 = vector.broadcast %cst_153 : f32 to vector<4x128xf32>
    %597 = arith.subf %596, %588 : vector<4x128xf32>
    %598 = arith.mulf %597, %595 : vector<4x128xf32>
    %599 = arith.mulf %588, %408 : vector<4x128xf32>
    %600 = arith.addf %598, %599 : vector<4x128xf32>
    %cst_154 = arith.constant dense<0.000000e+00> : vector<4x384xf32>
    %601 = tpu.matmul %600, %576, %cst_154 {dimension_numbers = #tpu.dot_dimension_numbers<[1], [0], [0], [1], [0, 0, 1, 1], [], []>} : vector<4x128xf32>, vector<128x384xf32>, vector<4x384xf32> -> vector<4x384xf32>
    %602 = vector.extract_strided_slice %545 {offsets = [0, 0], sizes = [4, 256], strides = [1, 1]} : vector<4x384xf32> to vector<4x256xf32>
    %603 = vector.extract_strided_slice %601 {offsets = [0, 0], sizes = [4, 256], strides = [1, 1]} : vector<4x384xf32> to vector<4x256xf32>
    %604 = arith.addf %602, %603 : vector<4x256xf32>
    %605 = arith.negf %604 : vector<4x256xf32>
    %606 = math.exp %605 : vector<4x256xf32>
    %cst_155 = arith.constant 1.000000e+00 : f32
    %607 = vector.broadcast %cst_155 : f32 to vector<4x256xf32>
    %608 = arith.addf %607, %606 : vector<4x256xf32>
    %609 = arith.divf %607, %608 : vector<4x256xf32>
    %610 = vector.extract_strided_slice %609 {offsets = [0, 0], sizes = [4, 128], strides = [1, 1]} : vector<4x256xf32> to vector<4x128xf32>
    %611 = vector.extract_strided_slice %609 {offsets = [0, 128], sizes = [4, 128], strides = [1, 1]} : vector<4x256xf32> to vector<4x128xf32>
    %612 = vector.extract_strided_slice %545 {offsets = [0, 256], sizes = [4, 128], strides = [1, 1]} : vector<4x384xf32> to vector<4x128xf32>
    %613 = vector.extract_strided_slice %601 {offsets = [0, 256], sizes = [4, 128], strides = [1, 1]} : vector<4x384xf32> to vector<4x128xf32>
    %614 = vector.broadcast %577 : vector<1x128xf32> to vector<4x128xf32>
    %615 = arith.addf %613, %614 : vector<4x128xf32>
    %616 = arith.mulf %610, %615 : vector<4x128xf32>
    %617 = arith.addf %612, %616 : vector<4x128xf32>
    %618 = math.tanh %617 : vector<4x128xf32>
    %cst_156 = arith.constant 1.000000e+00 : f32
    %619 = vector.broadcast %cst_156 : f32 to vector<4x128xf32>
    %620 = arith.subf %619, %611 : vector<4x128xf32>
    %621 = arith.mulf %620, %618 : vector<4x128xf32>
    %622 = arith.mulf %611, %600 : vector<4x128xf32>
    %623 = arith.addf %621, %622 : vector<4x128xf32>
    %cst_157 = arith.constant dense<0.000000e+00> : vector<4x384xf32>
    %624 = tpu.matmul %623, %576, %cst_157 {dimension_numbers = #tpu.dot_dimension_numbers<[1], [0], [0], [1], [0, 0, 1, 1], [], []>} : vector<4x128xf32>, vector<128x384xf32>, vector<4x384xf32> -> vector<4x384xf32>
    %625 = vector.extract_strided_slice %548 {offsets = [0, 0], sizes = [4, 256], strides = [1, 1]} : vector<4x384xf32> to vector<4x256xf32>
    %626 = vector.extract_strided_slice %624 {offsets = [0, 0], sizes = [4, 256], strides = [1, 1]} : vector<4x384xf32> to vector<4x256xf32>
    %627 = arith.addf %625, %626 : vector<4x256xf32>
    %628 = arith.negf %627 : vector<4x256xf32>
    %629 = math.exp %628 : vector<4x256xf32>
    %cst_158 = arith.constant 1.000000e+00 : f32
    %630 = vector.broadcast %cst_158 : f32 to vector<4x256xf32>
    %631 = arith.addf %630, %629 : vector<4x256xf32>
    %632 = arith.divf %630, %631 : vector<4x256xf32>
    %633 = vector.extract_strided_slice %632 {offsets = [0, 0], sizes = [4, 128], strides = [1, 1]} : vector<4x256xf32> to vector<4x128xf32>
    %634 = vector.extract_strided_slice %632 {offsets = [0, 128], sizes = [4, 128], strides = [1, 1]} : vector<4x256xf32> to vector<4x128xf32>
    %635 = vector.extract_strided_slice %548 {offsets = [0, 256], sizes = [4, 128], strides = [1, 1]} : vector<4x384xf32> to vector<4x128xf32>
    %636 = vector.extract_strided_slice %624 {offsets = [0, 256], sizes = [4, 128], strides = [1, 1]} : vector<4x384xf32> to vector<4x128xf32>
    %637 = vector.broadcast %577 : vector<1x128xf32> to vector<4x128xf32>
    %638 = arith.addf %636, %637 : vector<4x128xf32>
    %639 = arith.mulf %633, %638 : vector<4x128xf32>
    %640 = arith.addf %635, %639 : vector<4x128xf32>
    %641 = math.tanh %640 : vector<4x128xf32>
    %cst_159 = arith.constant 1.000000e+00 : f32
    %642 = vector.broadcast %cst_159 : f32 to vector<4x128xf32>
    %643 = arith.subf %642, %634 : vector<4x128xf32>
    %644 = arith.mulf %643, %641 : vector<4x128xf32>
    %645 = arith.mulf %634, %623 : vector<4x128xf32>
    %646 = arith.addf %644, %645 : vector<4x128xf32>
    %cst_160 = arith.constant dense<0.000000e+00> : vector<4x384xf32>
    %647 = tpu.matmul %646, %576, %cst_160 {dimension_numbers = #tpu.dot_dimension_numbers<[1], [0], [0], [1], [0, 0, 1, 1], [], []>} : vector<4x128xf32>, vector<128x384xf32>, vector<4x384xf32> -> vector<4x384xf32>
    %648 = vector.extract_strided_slice %551 {offsets = [0, 0], sizes = [4, 256], strides = [1, 1]} : vector<4x384xf32> to vector<4x256xf32>
    %649 = vector.extract_strided_slice %647 {offsets = [0, 0], sizes = [4, 256], strides = [1, 1]} : vector<4x384xf32> to vector<4x256xf32>
    %650 = arith.addf %648, %649 : vector<4x256xf32>
    %651 = arith.negf %650 : vector<4x256xf32>
    %652 = math.exp %651 : vector<4x256xf32>
    %cst_161 = arith.constant 1.000000e+00 : f32
    %653 = vector.broadcast %cst_161 : f32 to vector<4x256xf32>
    %654 = arith.addf %653, %652 : vector<4x256xf32>
    %655 = arith.divf %653, %654 : vector<4x256xf32>
    %656 = vector.extract_strided_slice %655 {offsets = [0, 0], sizes = [4, 128], strides = [1, 1]} : vector<4x256xf32> to vector<4x128xf32>
    %657 = vector.extract_strided_slice %655 {offsets = [0, 128], sizes = [4, 128], strides = [1, 1]} : vector<4x256xf32> to vector<4x128xf32>
    %658 = vector.extract_strided_slice %551 {offsets = [0, 256], sizes = [4, 128], strides = [1, 1]} : vector<4x384xf32> to vector<4x128xf32>
    %659 = vector.extract_strided_slice %647 {offsets = [0, 256], sizes = [4, 128], strides = [1, 1]} : vector<4x384xf32> to vector<4x128xf32>
    %660 = vector.broadcast %577 : vector<1x128xf32> to vector<4x128xf32>
    %661 = arith.addf %659, %660 : vector<4x128xf32>
    %662 = arith.mulf %656, %661 : vector<4x128xf32>
    %663 = arith.addf %658, %662 : vector<4x128xf32>
    %664 = math.tanh %663 : vector<4x128xf32>
    %cst_162 = arith.constant 1.000000e+00 : f32
    %665 = vector.broadcast %cst_162 : f32 to vector<4x128xf32>
    %666 = arith.subf %665, %657 : vector<4x128xf32>
    %667 = arith.mulf %666, %664 : vector<4x128xf32>
    %668 = arith.mulf %657, %646 : vector<4x128xf32>
    %669 = arith.addf %667, %668 : vector<4x128xf32>
    %cst_163 = arith.constant dense<0.000000e+00> : vector<4x384xf32>
    %670 = tpu.matmul %669, %576, %cst_163 {dimension_numbers = #tpu.dot_dimension_numbers<[1], [0], [0], [1], [0, 0, 1, 1], [], []>} : vector<4x128xf32>, vector<128x384xf32>, vector<4x384xf32> -> vector<4x384xf32>
    %671 = vector.extract_strided_slice %554 {offsets = [0, 0], sizes = [4, 256], strides = [1, 1]} : vector<4x384xf32> to vector<4x256xf32>
    %672 = vector.extract_strided_slice %670 {offsets = [0, 0], sizes = [4, 256], strides = [1, 1]} : vector<4x384xf32> to vector<4x256xf32>
    %673 = arith.addf %671, %672 : vector<4x256xf32>
    %674 = arith.negf %673 : vector<4x256xf32>
    %675 = math.exp %674 : vector<4x256xf32>
    %cst_164 = arith.constant 1.000000e+00 : f32
    %676 = vector.broadcast %cst_164 : f32 to vector<4x256xf32>
    %677 = arith.addf %676, %675 : vector<4x256xf32>
    %678 = arith.divf %676, %677 : vector<4x256xf32>
    %679 = vector.extract_strided_slice %678 {offsets = [0, 0], sizes = [4, 128], strides = [1, 1]} : vector<4x256xf32> to vector<4x128xf32>
    %680 = vector.extract_strided_slice %678 {offsets = [0, 128], sizes = [4, 128], strides = [1, 1]} : vector<4x256xf32> to vector<4x128xf32>
    %681 = vector.extract_strided_slice %554 {offsets = [0, 256], sizes = [4, 128], strides = [1, 1]} : vector<4x384xf32> to vector<4x128xf32>
    %682 = vector.extract_strided_slice %670 {offsets = [0, 256], sizes = [4, 128], strides = [1, 1]} : vector<4x384xf32> to vector<4x128xf32>
    %683 = vector.broadcast %577 : vector<1x128xf32> to vector<4x128xf32>
    %684 = arith.addf %682, %683 : vector<4x128xf32>
    %685 = arith.mulf %679, %684 : vector<4x128xf32>
    %686 = arith.addf %681, %685 : vector<4x128xf32>
    %687 = math.tanh %686 : vector<4x128xf32>
    %cst_165 = arith.constant 1.000000e+00 : f32
    %688 = vector.broadcast %cst_165 : f32 to vector<4x128xf32>
    %689 = arith.subf %688, %680 : vector<4x128xf32>
    %690 = arith.mulf %689, %687 : vector<4x128xf32>
    %691 = arith.mulf %680, %669 : vector<4x128xf32>
    %692 = arith.addf %690, %691 : vector<4x128xf32>
    %cst_166 = arith.constant dense<0.000000e+00> : vector<4x384xf32>
    %693 = tpu.matmul %692, %576, %cst_166 {dimension_numbers = #tpu.dot_dimension_numbers<[1], [0], [0], [1], [0, 0, 1, 1], [], []>} : vector<4x128xf32>, vector<128x384xf32>, vector<4x384xf32> -> vector<4x384xf32>
    %694 = vector.extract_strided_slice %557 {offsets = [0, 0], sizes = [4, 256], strides = [1, 1]} : vector<4x384xf32> to vector<4x256xf32>
    %695 = vector.extract_strided_slice %693 {offsets = [0, 0], sizes = [4, 256], strides = [1, 1]} : vector<4x384xf32> to vector<4x256xf32>
    %696 = arith.addf %694, %695 : vector<4x256xf32>
    %697 = arith.negf %696 : vector<4x256xf32>
    %698 = math.exp %697 : vector<4x256xf32>
    %cst_167 = arith.constant 1.000000e+00 : f32
    %699 = vector.broadcast %cst_167 : f32 to vector<4x256xf32>
    %700 = arith.addf %699, %698 : vector<4x256xf32>
    %701 = arith.divf %699, %700 : vector<4x256xf32>
    %702 = vector.extract_strided_slice %701 {offsets = [0, 0], sizes = [4, 128], strides = [1, 1]} : vector<4x256xf32> to vector<4x128xf32>
    %703 = vector.extract_strided_slice %701 {offsets = [0, 128], sizes = [4, 128], strides = [1, 1]} : vector<4x256xf32> to vector<4x128xf32>
    %704 = vector.extract_strided_slice %557 {offsets = [0, 256], sizes = [4, 128], strides = [1, 1]} : vector<4x384xf32> to vector<4x128xf32>
    %705 = vector.extract_strided_slice %693 {offsets = [0, 256], sizes = [4, 128], strides = [1, 1]} : vector<4x384xf32> to vector<4x128xf32>
    %706 = vector.broadcast %577 : vector<1x128xf32> to vector<4x128xf32>
    %707 = arith.addf %705, %706 : vector<4x128xf32>
    %708 = arith.mulf %702, %707 : vector<4x128xf32>
    %709 = arith.addf %704, %708 : vector<4x128xf32>
    %710 = math.tanh %709 : vector<4x128xf32>
    %cst_168 = arith.constant 1.000000e+00 : f32
    %711 = vector.broadcast %cst_168 : f32 to vector<4x128xf32>
    %712 = arith.subf %711, %703 : vector<4x128xf32>
    %713 = arith.mulf %712, %710 : vector<4x128xf32>
    %714 = arith.mulf %703, %692 : vector<4x128xf32>
    %715 = arith.addf %713, %714 : vector<4x128xf32>
    %cst_169 = arith.constant dense<0.000000e+00> : vector<4x384xf32>
    %716 = tpu.matmul %715, %576, %cst_169 {dimension_numbers = #tpu.dot_dimension_numbers<[1], [0], [0], [1], [0, 0, 1, 1], [], []>} : vector<4x128xf32>, vector<128x384xf32>, vector<4x384xf32> -> vector<4x384xf32>
    %717 = vector.extract_strided_slice %560 {offsets = [0, 0], sizes = [4, 256], strides = [1, 1]} : vector<4x384xf32> to vector<4x256xf32>
    %718 = vector.extract_strided_slice %716 {offsets = [0, 0], sizes = [4, 256], strides = [1, 1]} : vector<4x384xf32> to vector<4x256xf32>
    %719 = arith.addf %717, %718 : vector<4x256xf32>
    %720 = arith.negf %719 : vector<4x256xf32>
    %721 = math.exp %720 : vector<4x256xf32>
    %cst_170 = arith.constant 1.000000e+00 : f32
    %722 = vector.broadcast %cst_170 : f32 to vector<4x256xf32>
    %723 = arith.addf %722, %721 : vector<4x256xf32>
    %724 = arith.divf %722, %723 : vector<4x256xf32>
    %725 = vector.extract_strided_slice %724 {offsets = [0, 0], sizes = [4, 128], strides = [1, 1]} : vector<4x256xf32> to vector<4x128xf32>
    %726 = vector.extract_strided_slice %724 {offsets = [0, 128], sizes = [4, 128], strides = [1, 1]} : vector<4x256xf32> to vector<4x128xf32>
    %727 = vector.extract_strided_slice %560 {offsets = [0, 256], sizes = [4, 128], strides = [1, 1]} : vector<4x384xf32> to vector<4x128xf32>
    %728 = vector.extract_strided_slice %716 {offsets = [0, 256], sizes = [4, 128], strides = [1, 1]} : vector<4x384xf32> to vector<4x128xf32>
    %729 = vector.broadcast %577 : vector<1x128xf32> to vector<4x128xf32>
    %730 = arith.addf %728, %729 : vector<4x128xf32>
    %731 = arith.mulf %725, %730 : vector<4x128xf32>
    %732 = arith.addf %727, %731 : vector<4x128xf32>
    %733 = math.tanh %732 : vector<4x128xf32>
    %cst_171 = arith.constant 1.000000e+00 : f32
    %734 = vector.broadcast %cst_171 : f32 to vector<4x128xf32>
    %735 = arith.subf %734, %726 : vector<4x128xf32>
    %736 = arith.mulf %735, %733 : vector<4x128xf32>
    %737 = arith.mulf %726, %715 : vector<4x128xf32>
    %738 = arith.addf %736, %737 : vector<4x128xf32>
    %cst_172 = arith.constant dense<0.000000e+00> : vector<4x384xf32>
    %739 = tpu.matmul %738, %576, %cst_172 {dimension_numbers = #tpu.dot_dimension_numbers<[1], [0], [0], [1], [0, 0, 1, 1], [], []>} : vector<4x128xf32>, vector<128x384xf32>, vector<4x384xf32> -> vector<4x384xf32>
    %740 = vector.extract_strided_slice %563 {offsets = [0, 0], sizes = [4, 256], strides = [1, 1]} : vector<4x384xf32> to vector<4x256xf32>
    %741 = vector.extract_strided_slice %739 {offsets = [0, 0], sizes = [4, 256], strides = [1, 1]} : vector<4x384xf32> to vector<4x256xf32>
    %742 = arith.addf %740, %741 : vector<4x256xf32>
    %743 = arith.negf %742 : vector<4x256xf32>
    %744 = math.exp %743 : vector<4x256xf32>
    %cst_173 = arith.constant 1.000000e+00 : f32
    %745 = vector.broadcast %cst_173 : f32 to vector<4x256xf32>
    %746 = arith.addf %745, %744 : vector<4x256xf32>
    %747 = arith.divf %745, %746 : vector<4x256xf32>
    %748 = vector.extract_strided_slice %747 {offsets = [0, 0], sizes = [4, 128], strides = [1, 1]} : vector<4x256xf32> to vector<4x128xf32>
    %749 = vector.extract_strided_slice %747 {offsets = [0, 128], sizes = [4, 128], strides = [1, 1]} : vector<4x256xf32> to vector<4x128xf32>
    %750 = vector.extract_strided_slice %563 {offsets = [0, 256], sizes = [4, 128], strides = [1, 1]} : vector<4x384xf32> to vector<4x128xf32>
    %751 = vector.extract_strided_slice %739 {offsets = [0, 256], sizes = [4, 128], strides = [1, 1]} : vector<4x384xf32> to vector<4x128xf32>
    %752 = vector.broadcast %577 : vector<1x128xf32> to vector<4x128xf32>
    %753 = arith.addf %751, %752 : vector<4x128xf32>
    %754 = arith.mulf %748, %753 : vector<4x128xf32>
    %755 = arith.addf %750, %754 : vector<4x128xf32>
    %756 = math.tanh %755 : vector<4x128xf32>
    %cst_174 = arith.constant 1.000000e+00 : f32
    %757 = vector.broadcast %cst_174 : f32 to vector<4x128xf32>
    %758 = arith.subf %757, %749 : vector<4x128xf32>
    %759 = arith.mulf %758, %756 : vector<4x128xf32>
    %760 = arith.mulf %749, %738 : vector<4x128xf32>
    %761 = arith.addf %759, %760 : vector<4x128xf32>
    %cst_175 = arith.constant dense<0.000000e+00> : vector<4x384xf32>
    %762 = tpu.matmul %761, %576, %cst_175 {dimension_numbers = #tpu.dot_dimension_numbers<[1], [0], [0], [1], [0, 0, 1, 1], [], []>} : vector<4x128xf32>, vector<128x384xf32>, vector<4x384xf32> -> vector<4x384xf32>
    %763 = vector.extract_strided_slice %566 {offsets = [0, 0], sizes = [4, 256], strides = [1, 1]} : vector<4x384xf32> to vector<4x256xf32>
    %764 = vector.extract_strided_slice %762 {offsets = [0, 0], sizes = [4, 256], strides = [1, 1]} : vector<4x384xf32> to vector<4x256xf32>
    %765 = arith.addf %763, %764 : vector<4x256xf32>
    %766 = arith.negf %765 : vector<4x256xf32>
    %767 = math.exp %766 : vector<4x256xf32>
    %cst_176 = arith.constant 1.000000e+00 : f32
    %768 = vector.broadcast %cst_176 : f32 to vector<4x256xf32>
    %769 = arith.addf %768, %767 : vector<4x256xf32>
    %770 = arith.divf %768, %769 : vector<4x256xf32>
    %771 = vector.extract_strided_slice %770 {offsets = [0, 0], sizes = [4, 128], strides = [1, 1]} : vector<4x256xf32> to vector<4x128xf32>
    %772 = vector.extract_strided_slice %770 {offsets = [0, 128], sizes = [4, 128], strides = [1, 1]} : vector<4x256xf32> to vector<4x128xf32>
    %773 = vector.extract_strided_slice %566 {offsets = [0, 256], sizes = [4, 128], strides = [1, 1]} : vector<4x384xf32> to vector<4x128xf32>
    %774 = vector.extract_strided_slice %762 {offsets = [0, 256], sizes = [4, 128], strides = [1, 1]} : vector<4x384xf32> to vector<4x128xf32>
    %775 = vector.broadcast %577 : vector<1x128xf32> to vector<4x128xf32>
    %776 = arith.addf %774, %775 : vector<4x128xf32>
    %777 = arith.mulf %771, %776 : vector<4x128xf32>
    %778 = arith.addf %773, %777 : vector<4x128xf32>
    %779 = math.tanh %778 : vector<4x128xf32>
    %cst_177 = arith.constant 1.000000e+00 : f32
    %780 = vector.broadcast %cst_177 : f32 to vector<4x128xf32>
    %781 = arith.subf %780, %772 : vector<4x128xf32>
    %782 = arith.mulf %781, %779 : vector<4x128xf32>
    %783 = arith.mulf %772, %761 : vector<4x128xf32>
    %784 = arith.addf %782, %783 : vector<4x128xf32>
    %cst_178 = arith.constant dense<0.000000e+00> : vector<4x384xf32>
    %785 = tpu.matmul %784, %576, %cst_178 {dimension_numbers = #tpu.dot_dimension_numbers<[1], [0], [0], [1], [0, 0, 1, 1], [], []>} : vector<4x128xf32>, vector<128x384xf32>, vector<4x384xf32> -> vector<4x384xf32>
    %786 = vector.extract_strided_slice %569 {offsets = [0, 0], sizes = [4, 256], strides = [1, 1]} : vector<4x384xf32> to vector<4x256xf32>
    %787 = vector.extract_strided_slice %785 {offsets = [0, 0], sizes = [4, 256], strides = [1, 1]} : vector<4x384xf32> to vector<4x256xf32>
    %788 = arith.addf %786, %787 : vector<4x256xf32>
    %789 = arith.negf %788 : vector<4x256xf32>
    %790 = math.exp %789 : vector<4x256xf32>
    %cst_179 = arith.constant 1.000000e+00 : f32
    %791 = vector.broadcast %cst_179 : f32 to vector<4x256xf32>
    %792 = arith.addf %791, %790 : vector<4x256xf32>
    %793 = arith.divf %791, %792 : vector<4x256xf32>
    %794 = vector.extract_strided_slice %793 {offsets = [0, 0], sizes = [4, 128], strides = [1, 1]} : vector<4x256xf32> to vector<4x128xf32>
    %795 = vector.extract_strided_slice %793 {offsets = [0, 128], sizes = [4, 128], strides = [1, 1]} : vector<4x256xf32> to vector<4x128xf32>
    %796 = vector.extract_strided_slice %569 {offsets = [0, 256], sizes = [4, 128], strides = [1, 1]} : vector<4x384xf32> to vector<4x128xf32>
    %797 = vector.extract_strided_slice %785 {offsets = [0, 256], sizes = [4, 128], strides = [1, 1]} : vector<4x384xf32> to vector<4x128xf32>
    %798 = vector.broadcast %577 : vector<1x128xf32> to vector<4x128xf32>
    %799 = arith.addf %797, %798 : vector<4x128xf32>
    %800 = arith.mulf %794, %799 : vector<4x128xf32>
    %801 = arith.addf %796, %800 : vector<4x128xf32>
    %802 = math.tanh %801 : vector<4x128xf32>
    %cst_180 = arith.constant 1.000000e+00 : f32
    %803 = vector.broadcast %cst_180 : f32 to vector<4x128xf32>
    %804 = arith.subf %803, %795 : vector<4x128xf32>
    %805 = arith.mulf %804, %802 : vector<4x128xf32>
    %806 = arith.mulf %795, %784 : vector<4x128xf32>
    %807 = arith.addf %805, %806 : vector<4x128xf32>
    %cst_181 = arith.constant dense<0.000000e+00> : vector<4x384xf32>
    %808 = tpu.matmul %807, %576, %cst_181 {dimension_numbers = #tpu.dot_dimension_numbers<[1], [0], [0], [1], [0, 0, 1, 1], [], []>} : vector<4x128xf32>, vector<128x384xf32>, vector<4x384xf32> -> vector<4x384xf32>
    %809 = vector.extract_strided_slice %572 {offsets = [0, 0], sizes = [4, 256], strides = [1, 1]} : vector<4x384xf32> to vector<4x256xf32>
    %810 = vector.extract_strided_slice %808 {offsets = [0, 0], sizes = [4, 256], strides = [1, 1]} : vector<4x384xf32> to vector<4x256xf32>
    %811 = arith.addf %809, %810 : vector<4x256xf32>
    %812 = arith.negf %811 : vector<4x256xf32>
    %813 = math.exp %812 : vector<4x256xf32>
    %cst_182 = arith.constant 1.000000e+00 : f32
    %814 = vector.broadcast %cst_182 : f32 to vector<4x256xf32>
    %815 = arith.addf %814, %813 : vector<4x256xf32>
    %816 = arith.divf %814, %815 : vector<4x256xf32>
    %817 = vector.extract_strided_slice %816 {offsets = [0, 0], sizes = [4, 128], strides = [1, 1]} : vector<4x256xf32> to vector<4x128xf32>
    %818 = vector.extract_strided_slice %816 {offsets = [0, 128], sizes = [4, 128], strides = [1, 1]} : vector<4x256xf32> to vector<4x128xf32>
    %819 = vector.extract_strided_slice %572 {offsets = [0, 256], sizes = [4, 128], strides = [1, 1]} : vector<4x384xf32> to vector<4x128xf32>
    %820 = vector.extract_strided_slice %808 {offsets = [0, 256], sizes = [4, 128], strides = [1, 1]} : vector<4x384xf32> to vector<4x128xf32>
    %821 = vector.broadcast %577 : vector<1x128xf32> to vector<4x128xf32>
    %822 = arith.addf %820, %821 : vector<4x128xf32>
    %823 = arith.mulf %817, %822 : vector<4x128xf32>
    %824 = arith.addf %819, %823 : vector<4x128xf32>
    %825 = math.tanh %824 : vector<4x128xf32>
    %cst_183 = arith.constant 1.000000e+00 : f32
    %826 = vector.broadcast %cst_183 : f32 to vector<4x128xf32>
    %827 = arith.subf %826, %818 : vector<4x128xf32>
    %828 = arith.mulf %827, %825 : vector<4x128xf32>
    %829 = arith.mulf %818, %807 : vector<4x128xf32>
    %830 = arith.addf %828, %829 : vector<4x128xf32>
    %cst_184 = arith.constant dense<0.000000e+00> : vector<4x384xf32>
    %831 = tpu.matmul %830, %576, %cst_184 {dimension_numbers = #tpu.dot_dimension_numbers<[1], [0], [0], [1], [0, 0, 1, 1], [], []>} : vector<4x128xf32>, vector<128x384xf32>, vector<4x384xf32> -> vector<4x384xf32>
    %832 = vector.extract_strided_slice %575 {offsets = [0, 0], sizes = [4, 256], strides = [1, 1]} : vector<4x384xf32> to vector<4x256xf32>
    %833 = vector.extract_strided_slice %831 {offsets = [0, 0], sizes = [4, 256], strides = [1, 1]} : vector<4x384xf32> to vector<4x256xf32>
    %834 = arith.addf %832, %833 : vector<4x256xf32>
    %835 = arith.negf %834 : vector<4x256xf32>
    %836 = math.exp %835 : vector<4x256xf32>
    %cst_185 = arith.constant 1.000000e+00 : f32
    %837 = vector.broadcast %cst_185 : f32 to vector<4x256xf32>
    %838 = arith.addf %837, %836 : vector<4x256xf32>
    %839 = arith.divf %837, %838 : vector<4x256xf32>
    %840 = vector.extract_strided_slice %839 {offsets = [0, 0], sizes = [4, 128], strides = [1, 1]} : vector<4x256xf32> to vector<4x128xf32>
    %841 = vector.extract_strided_slice %839 {offsets = [0, 128], sizes = [4, 128], strides = [1, 1]} : vector<4x256xf32> to vector<4x128xf32>
    %842 = vector.extract_strided_slice %575 {offsets = [0, 256], sizes = [4, 128], strides = [1, 1]} : vector<4x384xf32> to vector<4x128xf32>
    %843 = vector.extract_strided_slice %831 {offsets = [0, 256], sizes = [4, 128], strides = [1, 1]} : vector<4x384xf32> to vector<4x128xf32>
    %844 = vector.broadcast %577 : vector<1x128xf32> to vector<4x128xf32>
    %845 = arith.addf %843, %844 : vector<4x128xf32>
    %846 = arith.mulf %840, %845 : vector<4x128xf32>
    %847 = arith.addf %842, %846 : vector<4x128xf32>
    %848 = math.tanh %847 : vector<4x128xf32>
    %cst_186 = arith.constant 1.000000e+00 : f32
    %849 = vector.broadcast %cst_186 : f32 to vector<4x128xf32>
    %850 = arith.subf %849, %841 : vector<4x128xf32>
    %851 = arith.mulf %850, %848 : vector<4x128xf32>
    %852 = arith.mulf %841, %830 : vector<4x128xf32>
    %853 = arith.addf %851, %852 : vector<4x128xf32>
    %854 = tpu.concatenate %600, %623, %646, %669, %692, %715, %738, %761, %784, %807, %830, %853 in 0 : vector<4x128xf32>, vector<4x128xf32>, vector<4x128xf32>, vector<4x128xf32>, vector<4x128xf32>, vector<4x128xf32>, vector<4x128xf32>, vector<4x128xf32>, vector<4x128xf32>, vector<4x128xf32>, vector<4x128xf32>, vector<4x128xf32> -> vector<48x128xf32>
    %855 = tpu.concatenate %853, %830, %807, %784, %761, %738, %715, %692, %669, %646, %623, %600 in 0 : vector<4x128xf32>, vector<4x128xf32>, vector<4x128xf32>, vector<4x128xf32>, vector<4x128xf32>, vector<4x128xf32>, vector<4x128xf32>, vector<4x128xf32>, vector<4x128xf32>, vector<4x128xf32>, vector<4x128xf32>, vector<4x128xf32> -> vector<48x128xf32>
    %c0_187 = arith.constant 0 : index
    %c0_188 = arith.constant 0 : index
    %856 = vector.load %arg31[%c0_187, %c0_188] : memref<128x32xf32, #tpu.memory_space<vmem>>, vector<128x32xf32>
    %cst_189 = arith.constant dense<0.000000e+00> : vector<48x32xf32>
    %857 = tpu.matmul %854, %856, %cst_189 {dimension_numbers = #tpu.dot_dimension_numbers<[1], [0], [0], [1], [0, 0, 1, 1], [], []>} : vector<48x128xf32>, vector<128x32xf32>, vector<48x32xf32> -> vector<48x32xf32>
    %c0_190 = arith.constant 0 : index
    %c0_191 = arith.constant 0 : index
    %858 = vector.load %arg32[%c0_190, %c0_191] : memref<128x32xf32, #tpu.memory_space<vmem>>, vector<128x32xf32>
    %cst_192 = arith.constant dense<0.000000e+00> : vector<48x32xf32>
    %859 = tpu.matmul %855, %858, %cst_192 {dimension_numbers = #tpu.dot_dimension_numbers<[1], [0], [0], [1], [0, 0, 1, 1], [], []>} : vector<48x128xf32>, vector<128x32xf32>, vector<48x32xf32> -> vector<48x32xf32>
    %860 = arith.addf %857, %859 : vector<48x32xf32>
    %c0_193 = arith.constant 0 : index
    %c0_194 = arith.constant 0 : index
    %861 = vector.load %arg33[%c0_193, %c0_194] : memref<1x32xf32, #tpu.memory_space<vmem>>, vector<1x32xf32>
    %862 = vector.broadcast %861 : vector<1x32xf32> to vector<48x32xf32>
    %863 = arith.addf %860, %862 : vector<48x32xf32>
    %864 = math.tanh %863 : vector<48x32xf32>
    %c0_195 = arith.constant 0 : index
    %c0_196 = arith.constant 0 : index
    %865 = vector.load %arg34[%c0_195, %c0_196] : memref<32x16xf32, #tpu.memory_space<vmem>>, vector<32x16xf32>
    %cst_197 = arith.constant dense<0.000000e+00> : vector<48x16xf32>
    %866 = tpu.matmul %864, %865, %cst_197 {dimension_numbers = #tpu.dot_dimension_numbers<[1], [0], [0], [1], [0, 0, 1, 1], [], []>} : vector<48x32xf32>, vector<32x16xf32>, vector<48x16xf32> -> vector<48x16xf32>
    %c0_198 = arith.constant 0 : index
    %c0_199 = arith.constant 0 : index
    %867 = vector.load %arg35[%c0_198, %c0_199] : memref<1x16xf32, #tpu.memory_space<vmem>>, vector<1x16xf32>
    %868 = vector.broadcast %867 : vector<1x16xf32> to vector<48x16xf32>
    %869 = arith.addf %866, %868 : vector<48x16xf32>
    %cst_200 = arith.constant 0.000000e+00 : f32
    %870 = vector.broadcast %cst_200 : f32 to vector<48x16xf32>
    %871 = arith.maximumf %869, %870 : vector<48x16xf32>
    %c0_201 = arith.constant 0 : index
    %c0_202 = arith.constant 0 : index
    %872 = vector.load %arg36[%c0_201, %c0_202] : memref<16x3xf32, #tpu.memory_space<vmem>>, vector<16x3xf32>
    %cst_203 = arith.constant dense<0.000000e+00> : vector<48x3xf32>
    %873 = tpu.matmul %871, %872, %cst_203 {dimension_numbers = #tpu.dot_dimension_numbers<[1], [0], [0], [1], [0, 0, 1, 1], [], []>} : vector<48x16xf32>, vector<16x3xf32>, vector<48x3xf32> -> vector<48x3xf32>
    %c0_204 = arith.constant 0 : index
    %c0_205 = arith.constant 0 : index
    %874 = vector.load %arg37[%c0_204, %c0_205] : memref<1x3xf32, #tpu.memory_space<vmem>>, vector<1x3xf32>
    %875 = vector.broadcast %874 : vector<1x3xf32> to vector<48x3xf32>
    %876 = arith.addf %873, %875 : vector<48x3xf32>
    %c0_206 = arith.constant 0 : index
    %c0_207 = arith.constant 0 : index
    %877 = vector.load %arg38[%c0_206, %c0_207] : memref<1x3xf32, #tpu.memory_space<vmem>>, vector<1x3xf32>
    %c0_208 = arith.constant 0 : index
    %c0_209 = arith.constant 0 : index
    %878 = vector.load %arg39[%c0_208, %c0_209] : memref<1x3xf32, #tpu.memory_space<vmem>>, vector<1x3xf32>
    %879 = arith.subf %878, %877 : vector<1x3xf32>
    %880 = arith.negf %876 : vector<48x3xf32>
    %881 = math.exp %880 : vector<48x3xf32>
    %cst_210 = arith.constant 1.000000e+00 : f32
    %882 = vector.broadcast %cst_210 : f32 to vector<48x3xf32>
    %883 = arith.addf %882, %881 : vector<48x3xf32>
    %884 = arith.divf %882, %883 : vector<48x3xf32>
    %885 = vector.broadcast %879 : vector<1x3xf32> to vector<48x3xf32>
    %886 = arith.mulf %885, %884 : vector<48x3xf32>
    %887 = vector.broadcast %877 : vector<1x3xf32> to vector<48x3xf32>
    %888 = arith.addf %887, %886 : vector<48x3xf32>
    %c0_211 = arith.constant 0 : index
    %c0_212 = arith.constant 0 : index
    %889 = vector.load %arg40[%c0_211, %c0_212] : memref<48x3xf32, #tpu.memory_space<vmem>>, vector<48x3xf32>
    tpu.vector_store %arg40[%c0_211, %c0_212], %888 {strides = array<i32>} : memref<48x3xf32, #tpu.memory_space<vmem>>, vector<48x3xf32>,
    return
  }
}

</mosaic_0001>

<bundles_post_ra>
// kernel: reverse.3
= control target key start
LH: loop header
LB: loop body
LE: loop exit
PB: predicated region body
PF: predicated region fallthrough
CT: control target
= control target key end

     0   :  { %v2_v0 = vlaneseq  ;;  %s127_s0 = inlined_call_operand.vmem [shape: f32[12], index: 0, kind: input, shape index: {}]   ;;  %s128_s1 = inlined_call_operand.vmem [shape: f32[12], index: 1, kind: output, shape index: {}]  }
   0x2   :  { %v3_v1 = vsub.s32 11, %v2_v0 }
   0x4   :  { %4 = vset.pattern.permute.xlu0 %v3_v1 }
   0x5   :  { %v45_v2 = vld [vmem:[#allocation1] sm:$0x1]  ;;  %v22_v3 = vld [vmem:[%s127_s0] sm:$0x1]  ;;  %v60_v10 = vshrl.u32 %v2_v0, 7 }
   0x6   :  { %46 = vst [vmem:[#allocation0] sm:$0x1] %v45_v2 }
   0x7   :  { %23 = vst [vmem:[#allocation1 + $0x1] sm:$0x1] %v22_v3  ;;  %vm61_vm0 = vcmp.lt.s32.totalorder %v60_v10, 1 }
   0xd   :  { %v48_v4 = vld [vmem:[#allocation0 + $0x7] ss:$-1 sm:$0xff] }
   0xe   :  { %v49_v5 = vrot.slane %v48_v4, 7  ;;  %v42_v6 = vld [vmem:[#allocation1 + $0x1] sm:$0x1] }
   0xf   :  { %44 = vst [vmem:[#allocation0 + $0x8] sm:$0x1] %v42_v6 }
  0x10   :  { %50 = vperm.xlu0 %4, %v49_v5  }
  0x16   :  { %v55_v7 = vld [vmem:[#allocation0 + $0xf] ss:$-1 sm:$0xff] }
  0x17   :  { %v56_v8 = vrot.slane %v55_v7, 7 }
  0x19   :  { %57 = vperm.xlu0 %4, %v56_v8  }
  0x82   :  { %v51_v9 = vpop.permute.xlu0 %50 }
  0x83   :  { %52 = vst [vmem:[#allocation2] sm:$0xff] %v51_v9 }
  0x8b   :  { %v58_v11 = vpop.permute.xlu0 %57 }
  0x8c   :  { %62 = vst.msk [vmem:[#allocation2] sm:$0xff] %vm61_vm0, %v58_v11 }
  0x93   :  { %v65_v12 = vld [vmem:[#allocation2] sm:$0x1] }
  0x94   :  { %68 = vst [vmem:[#allocation3] sm:$0x1] %v65_v12 }
  0x9b   :  { %v85_v13 = vld [vmem:[#allocation3] sm:$0x1] }
  0x9c   :  { %86 = vst [vmem:[%s128_s1] sm:$0x1] %v85_v13 }

// kernel: calibnn_forward.1
= control target key start
LH: loop header
LB: loop body
LE: loop exit
PB: predicated region body
PF: predicated region fallthrough
CT: control target
= control target key end

     0   :  { %s6310_s3 = smov 6   ;;  %s6311_s7 = smov 5   ;;  %vm193_vm0 = vcmask 1044480   ;;  %vm180_vm1 = vcmask 39936   ;;  %v10241_v54 = vmov 0.0   ;;  %s10240_s0 = inlined_call_operand.smem [shape: u32[41], index: -1, kind: input, shape index: {}] }
   0x1   :  { %s5557_s6 = sld [smem:[%s10240_s0 + %s6310_s3]]   ;;  %s6312_s11 = smov 1  }
   0x2   :  { %s6363_s10 = sld [smem:[%s10240_s0 + %s6311_s7]]   ;;  %s6313_s18 = smov 8  }
   0x3   :  { %s6368_s14 = sld [smem:[%s10240_s0 + %s6312_s11]]   ;;  %s6315_s22 = smov 9  }
   0x4   :  { %s6373_s17 = sld [smem:[%s10240_s0]]   ;;  %s6316_s26 = smov 7  }
   0x5   :  { %s6378_s21 = sld [smem:[%s10240_s0 + %s6313_s18]]   ;;  %s6317_s30 = smov 10  }
   0x6   :  { %s6678_s25 = sld [smem:[%s10240_s0 + %s6315_s22]]   ;;  %s6318_s4 = smov 11  }
   0x7   :  { %v178_v0 = vld [vmem:[%s5557_s6 + $0x8] sm:$0x1f]  ;;  %v179_v1 = vld [vmem:[%s5557_s6 + $0x10] sm:$0x1f]  ;;  %v177_v2 = vld [vmem:[%s5557_s6] sm:$0x1f]  ;;  %s5558_s29 = sld [smem:[%s10240_s0 + %s6316_s26]]  }
   0x8   :  { %5597 = vmatpush.msk.msra.mxu1 %vm193_vm0, %v178_v0  ;;  %5602 = vmatpush.msk.msra.mxu2 %vm193_vm0, %v179_v1  ;;  %v170_v3 = vld [vmem:[%s6363_s10] sm:$0x1f]  ;;  %v171_v6 = vld [vmem:[%s6363_s10 + $0x8] sm:$0x1f]  ;;  %v172_v22 = vld [vmem:[%s6363_s10 + $0x10] sm:$0x1f]  ;;  %s7288_s3 = sld [smem:[%s10240_s0 + %s6317_s30]]  }
   0x9   :  { %5607 = vmatpush.msk.msra.mxu3 %vm193_vm0, %v170_v3  ;;  %v173_v4 = vld [vmem:[%s6368_s14] sm:$0xff]  ;;  %5592 = vmatpush.msk.msra.mxu0 %vm193_vm0, %v177_v2  ;;  %v174_v15 = vld [vmem:[%s6368_s14 + $0x8] sm:$0xff]  ;;  %v175_v28 = vld [vmem:[%s6368_s14 + $0x10] sm:$0xff]  ;;  %s7352_s7 = sld [smem:[%s10240_s0 + %s6318_s4]]   ;;  %s6319_s8 = smov 13  }
   0xa   :  { %5598 = vmatmul.msk.f32.vlgmr.msra.gmra.mxu1 %vm180_vm1, %v173_v4  ;;  %5603 = vmatmul.msk.f32.vlgmr.msra.gmra.mxu2 %vm180_vm1, %v173_v4  ;;  %v6389_v5 = vld [vmem:[%s6373_s17] sm:$0xff]  ;;  %v6428_v16 = vld [vmem:[%s6373_s17 + $0x8] sm:$0xff]  ;;  %v6479_v29 = vld [vmem:[%s6373_s17 + $0x10] sm:$0xff]  ;;  %s7403_s11 = sld [smem:[%s10240_s0 + %s6319_s8]]   ;;  %s6320_s12 = smov 14  }
   0xb   :  { %5608 = vmatmul.msk.f32.vlgmr.msra.gmra.mxu3 %vm180_vm1, %v6389_v5  ;;  %v6395_v7 = vld [vmem:[%s6378_s21 + $0x168] sm:$0xff]  ;;  %v6398_v8 = vld [vmem:[%s6378_s21 + $0x170] sm:$0xff]  ;;  %5593 = vmatmul.msk.f32.vlgmr.msra.gmra.mxu0 %vm180_vm1, %v173_v4  ;;  %v6407_v10 = vld [vmem:[%s6378_s21 + $0x158] sm:$0xff]  ;;  %s7776_s15 = sld [smem:[%s10240_s0 + %s6320_s12]]   ;;  %s6321_s16 = smov 12  }
   0xc   :  { %v6402_v9 = vld [vmem:[%s6378_s21 + $0x150] sm:$0xff]  ;;  %467 = vmatpush.msrb.mxu2 %v6395_v7  ;;  %487 = vmatpush.msrb.mxu3 %v6398_v8  ;;  %v6410_v11 = vld [vmem:[%s6378_s21 + $0x138] sm:$0xff]  ;;  %v6413_v12 = vld [vmem:[%s6378_s21 + $0x140] sm:$0xff]  ;;  %s5563_s19 = sld [smem:[%s10240_s0 + %s6321_s16]]   ;;  %s6322_s20 = smov 15  }
   0xd   :  { %5612 = vmatpush.msk.msrb.mxu0 %vm193_vm0, %v171_v6  ;;  %v6419_v13 = vld [vmem:[%s6378_s21 + $0x120] sm:$0xff]  ;;  %v6422_v14 = vld [vmem:[%s6378_s21 + $0x128] sm:$0xff]  ;;  %v6436_v18 = vld [vmem:[%s6378_s21 + $0x110] sm:$0xff]  ;;  %5617 = vmatpush.msk.msrb.mxu1 %vm193_vm0, %v172_v22  ;;  %s8349_s23 = sld [smem:[%s10240_s0 + %s6322_s20]]   ;;  %s6323_s24 = smov 16  }
   0xe   :  { %468 = vmatpush.msrb.mxu2 %v6402_v9  ;;  %488 = vmatpush.msrb.mxu3 %v6407_v10  ;;  %v6431_v17 = vld [vmem:[%s6378_s21 + $0x108] sm:$0xff]  ;;  %v6441_v19 = vld [vmem:[%s6378_s21 + $0xf0] sm:$0xff]  ;;  %v6447_v20 = vld [vmem:[%s6378_s21 + $0xf8] sm:$0xff]  ;;  %s8416_s27 = sld [smem:[%s10240_s0 + %s6323_s24]]   ;;  %s6324_s28 = smov 17  }
   0xf   :  { %v6452_v21 = vld [vmem:[%s6378_s21 + $0xd8] sm:$0xff]  ;;  %v6457_v23 = vld [vmem:[%s6378_s21 + $0xe0] sm:$0xff]  ;;  %v6473_v27 = vld [vmem:[%s6378_s21 + $0xc8] sm:$0xff]  ;;  %578 = vmatpush.msra.mxu1 %v6395_v7  ;;  %s5568_s1 = sld [smem:[%s10240_s0 + %s6324_s28]]   ;;  %s6326_s2 = smov 21  }
  0x10   :  { %469 = vmatpush.msrb.mxu2 %v6410_v11  ;;  %489 = vmatpush.msrb.mxu3 %v6413_v12  ;;  %v6461_v24 = vld [vmem:[%s6378_s21 + $0x178] sm:$0xff]  ;;  %v6465_v25 = vld [vmem:[%s6378_s21 + $0xc0] sm:$0xff]  ;;  %v6484_v30 = vld [vmem:[%s6378_s21 + $0xa8] sm:$0xff]  ;;  %s8572_s5 = sld [smem:[%s10240_s0 + %s6326_s2]]   ;;  %s6327_s6 = smov 22  }
  0x11   :  { %507 = vmatpush.msra.mxu0 %v6461_v24  ;;  %v6469_v26 = vld [vmem:[%s6378_s21 + $0x160] sm:$0xff]  ;;  %v6487_v31 = vld [vmem:[%s6378_s21 + $0xb0] sm:$0xff]  ;;  %579 = vmatpush.msra.mxu1 %v6402_v9  ;;  %v6499_v33 = vld [vmem:[%s6378_s21 + $0x98] sm:$0xff]  ;;  %s8579_s9 = sld [smem:[%s10240_s0 + %s6327_s6]]   ;;  %s6328_s10 = smov 4  }
  0x12   :  { %470 = vmatpush.msrb.mxu2 %v6419_v13  ;;  %490 = vmatpush.msrb.mxu3 %v6422_v14  ;;  %v6496_v32 = vld [vmem:[%s6378_s21 + $0x90] sm:$0xff]  ;;  %v6504_v34 = vld [vmem:[%s6378_s21 + $0x148] sm:$0xff]  ;;  %v6508_v35 = vld [vmem:[%s6378_s21 + $0x78] sm:$0xff]  ;;  %s5555_s13 = sld [smem:[%s10240_s0 + %s6328_s10]]   ;;  %s6330_s18 = smov 23  }
  0x13   :  { %5599 = vmatmul.msk.f32.gmra.mxu1 %vm180_vm1, %v174_v15  ;;  %5604 = vmatmul.msk.f32.gmra.mxu2 %vm180_vm1, %v174_v15  ;;  %v6511_v36 = vld [vmem:[%s6378_s21 + $0x80] sm:$0xff]  ;;  %v6517_v37 = vld [vmem:[%s6378_s21 + $0x130] sm:$0xff]  ;;  %v6523_v39 = vld [vmem:[%s6378_s21 + $0x68] sm:$0xff]  ;;  %s6331_s22 = smov 27   ;;  %s6332_s26 = smov 26  }
  0x14   :  { %5609 = vmatmul.msk.f32.gmra.mxu3 %vm180_vm1, %v6428_v16  ;;  %471 = vmatpush.msrb.mxu2 %v6431_v17  ;;  %v6520_v38 = vld [vmem:[%s6378_s21 + $0x60] sm:$0xff]  ;;  %v176_v40 = vld [vmem:[%s6368_s14 + $0x18] sm:$0xff]  ;;  %v6534_v42 = vld [vmem:[%s6378_s21 + $0x48] sm:$0xff]  ;;  %s6329_s14 = smov 3   ;;  %s6333_s30 = smov 29  }
  0x15   :  { %491 = vmatpush.msrb.mxu3 %v6436_v18  ;;  %5594 = vmatmul.msk.f32.gmra.mxu0 %vm180_vm1, %v174_v15  ;;  %v6531_v41 = vld [vmem:[%s6373_s17 + $0x18] sm:$0xff]  ;;  %v6541_v43 = vld [vmem:[%s6378_s21 + $0x50] sm:$0xff]  ;;  %v6563_v48 = vld [vmem:[%s6378_s21 + $0x100] sm:$0xff]  ;;  %s5554_s17 = sld [smem:[%s10240_s0 + %s6329_s14]]   ;;  %s6334_s4 = smov 18  }
  0x16   :  { %472 = vmatpush.msrb.mxu2 %v6441_v19  ;;  %508 = vmatpush.msra.mxu0 %v6469_v26  ;;  %v6546_v44 = vld [vmem:[%s6378_s21 + $0x30] sm:$0xff]  ;;  %v6549_v45 = vld [vmem:[%s6378_s21 + $0x118] sm:$0xff]  ;;  %v6567_v49 = vld [vmem:[%s6378_s21 + $0x20] sm:$0xff]  ;;  %s6335_s8 = smov 19   ;;  %s6336_s12 = smov 2  }
  0x17   :  { %492 = vmatpush.msrb.mxu3 %v6447_v20  ;;  %580 = vmatpush.msra.mxu1 %v6410_v11  ;;  %10355 = vst [vmem:[#allocation2_spill] sm:$0xff] %v6546_v44  ;;  %v6555_v46 = vld [vmem:[%s6378_s21 + $0x38] sm:$0xff]  ;;  %v6572_v50 = vld [vmem:[%s6378_s21] sm:$0xff]  ;;  %v6575_v51 = vld [vmem:[%s6378_s21 + $0xe8] sm:$0xff]  ;;  %s6337_s16 = smov 20   ;;  %s6338_s20 = smov 24  }
  0x18   :  { %473 = vmatpush.msrb.mxu2 %v6452_v21  ;;  %509 = vmatpush.msra.mxu0 %v6504_v34  ;;  %10356 = vst [vmem:[#allocation3_spill] sm:$0xff] %v6555_v46  ;;  %v6560_v47 = vld [vmem:[%s6378_s21 + $0x18] sm:$0xff]  ;;  %v6580_v52 = vld [vmem:[%s6378_s21 + $0x8] sm:$0xff]  ;;  %v6591_v53 = vld [vmem:[%s6378_s21 + $0xd0] sm:$0xff]  ;;  %s6339_s24 = smov 25   ;;  %s6341_s2 = smov 28  }
  0x19   :  { %493 = vmatpush.msrb.mxu3 %v6457_v23  ;;  %581 = vmatpush.msra.mxu1 %v6419_v13  ;;  %10357 = vst [vmem:[#allocation4_spill] sm:$0xff] %v6560_v47  ;;  %v6598_v55 = vld [vmem:[%s6378_s21 + $0xb8] sm:$0xff]  ;;  %v6604_v56 = vld [vmem:[%s6378_s21 + $0xa0] sm:$0xff]  ;;  %v6611_v57 = vld [vmem:[%s6378_s21 + $0x88] sm:$0xff]  ;;  %s8808_s28 = sld [smem:[%s10240_s0 + %s6339_s24]]   ;;  %s6343_s10 = smov 32  }
  0x1a   :  { %474 = vmatpush.msrb.mxu2 %v6465_v25  ;;  %510 = vmatpush.msra.mxu0 %v6517_v37  ;;  %10358 = vst [vmem:[#allocation5_spill] sm:$0xff] %v6567_v49  ;;  %v6620_v58 = vld [vmem:[%s6378_s21 + $0x70] sm:$0xff]  ;;  %v6628_v59 = vld [vmem:[%s6378_s21 + $0x58] sm:$0xff]  ;;  %v6634_v60 = vld [vmem:[%s6378_s21 + $0x40] sm:$0xff]  ;;  %s5579_s6 = sld [smem:[%s10240_s0 + %s6341_s2]]   ;;  %s6344_s14 = smov 33  }
  0x1b   :  { %494 = vmatpush.msrb.mxu3 %v6473_v27  ;;  %5600 = vmatmul.msk.f32.gmra.mxu1 %vm180_vm1, %v175_v28  ;;  %10359 = vst [vmem:[#allocation6_spill] sm:$0xff] %v6572_v50  ;;  %v6641_v61 = vld [vmem:[%s6378_s21 + $0x28] sm:$0xff]  ;;  %v6650_v62 = vld [vmem:[%s6378_s21 + $0x10] sm:$0xff] }
  0x1c   :  { %5605 = vmatmul.msk.f32.gmra.mxu2 %vm180_vm1, %v175_v28  ;;  %5610 = vmatmul.msk.f32.gmra.mxu3 %vm180_vm1, %v6479_v29  ;;  %10360 = vst [vmem:[#allocation7_spill] sm:$0xff] %v6580_v52 }
  0x1d   :  { %475 = vmatpush.msrb.mxu2 %v6484_v30  ;;  %495 = vmatpush.msrb.mxu3 %v6487_v31  ;;  %10361 = vst [vmem:[#allocation8_spill] sm:$0xff] %v6641_v61 }
  0x1e   :  { %5595 = vmatmul.msk.f32.gmra.mxu0 %vm180_vm1, %v175_v28  ;;  %582 = vmatpush.msra.mxu1 %v6431_v17  ;;  %10362 = vst [vmem:[#allocation9_spill] sm:$0xff] %v6650_v62 }
  0x1f   :  { %476 = vmatpush.msrb.mxu2 %v6496_v32  ;;  %496 = vmatpush.msrb.mxu3 %v6499_v33 }
  0x20   :  { %511 = vmatpush.msra.mxu0 %v6549_v45  ;;  %583 = vmatpush.msra.mxu1 %v6441_v19 }
  0x21   :  { %477 = vmatpush.msrb.mxu2 %v6508_v35  ;;  %497 = vmatpush.msrb.mxu3 %v6511_v36 }
  0x22   :  { %512 = vmatpush.msra.mxu0 %v6563_v48  ;;  %584 = vmatpush.msra.mxu1 %v6452_v21 }
  0x23   :  { %478 = vmatpush.msrb.mxu2 %v6520_v38  ;;  %498 = vmatpush.msrb.mxu3 %v6523_v39 }
  0x24   :  { %5601 = vmatmul.msk.f32.gmra.mxu1 %vm180_vm1, %v176_v40  ;;  %5606 = vmatmul.msk.f32.gmra.mxu2 %vm180_vm1, %v176_v40 }
  0x25   :  { %5611 = vmatmul.msk.f32.gmra.mxu3 %vm180_vm1, %v6531_v41  ;;  %479 = vmatpush.msrb.mxu2 %v6534_v42 }
  0x26   :  { %499 = vmatpush.msrb.mxu3 %v6541_v43  ;;  %5596 = vmatmul.msk.f32.gmra.mxu0 %vm180_vm1, %v176_v40  ;;  %v398_v40 = vld [vmem:[%s5558_s29] sm:$0x7]  ;;  %s8627_s29 = sld [smem:[%s10240_s0 + %s6332_s26]]  }
  0x27   :  { %480 = vmatpush.msrb.mxu2 %v6546_v44  ;;  %513 = vmatpush.msra.mxu0 %v6575_v51 }
  0x28   :  { %500 = vmatpush.msrb.mxu3 %v6555_v46  ;;  %585 = vmatpush.msra.mxu1 %v6465_v25 }
  0x29   :  { %481 = vmatpush.msrb.mxu2 %v6560_v47  ;;  %514 = vmatpush.msra.mxu0 %v6591_v53 }
  0x2a   :  { %501 = vmatpush.msrb.mxu3 %v6567_v49  ;;  %586 = vmatpush.msra.mxu1 %v6484_v30 }
  0x2b   :  { %482 = vmatpush.msrb.mxu2 %v6572_v50  ;;  %515 = vmatpush.msra.mxu0 %v6598_v55 }
  0x2c   :  { %502 = vmatpush.msrb.mxu3 %v6580_v52  ;;  %5618 = vmatmul.msk.f32.vlgmr.msrb.gmra.mxu1 %vm180_vm1, %v6389_v5 }
  0x2d   :  { %483 = vmatmul.f32.vlgmr.msrb.gmra.mxu2 %v10241_v54  ;;  %503 = vmatmul.f32.vlgmr.msrb.gmra.mxu3 %v10241_v54 }
  0x2e   :  { %5613 = vmatmul.msk.f32.vlgmr.msrb.gmra.mxu0 %vm180_vm1, %v6389_v5  ;;  %598 = vmatpush.msra.mxu2 %v6398_v8 }
  0x2f   :  { %618 = vmatpush.msra.mxu3 %v6461_v24  ;;  %516 = vmatpush.msra.mxu0 %v6604_v56 }
  0x30   :  { %599 = vmatpush.msra.mxu2 %v6407_v10  ;;  %587 = vmatpush.msra.mxu1 %v6496_v32 }
  0x31   :  { %619 = vmatpush.msra.mxu3 %v6469_v26  ;;  %517 = vmatpush.msra.mxu0 %v6611_v57 }
  0x32   :  { %600 = vmatpush.msra.mxu2 %v6413_v12  ;;  %588 = vmatpush.msra.mxu1 %v6508_v35 }
  0x33   :  { %620 = vmatpush.msra.mxu3 %v6504_v34  ;;  %518 = vmatpush.msra.mxu0 %v6620_v58 }
  0x34   :  { %5619 = vmatmul.msk.f32.gmra.mxu1 %vm180_vm1, %v6428_v16  ;;  %601 = vmatpush.msra.mxu2 %v6422_v14 }
  0x35   :  { %621 = vmatpush.msra.mxu3 %v6517_v37  ;;  %519 = vmatpush.msra.mxu0 %v6628_v59 }
  0x36   :  { %5614 = vmatmul.msk.f32.gmra.mxu0 %vm180_vm1, %v6428_v16  ;;  %602 = vmatpush.msra.mxu2 %v6436_v18 }
  0x37   :  { %622 = vmatpush.msra.mxu3 %v6549_v45  ;;  %520 = vmatpush.msra.mxu0 %v6634_v60 }
  0x38   :  { %603 = vmatpush.msra.mxu2 %v6447_v20  ;;  %589 = vmatpush.msra.mxu1 %v6520_v38 }
  0x39   :  { %623 = vmatpush.msra.mxu3 %v6563_v48  ;;  %521 = vmatpush.msra.mxu0 %v6641_v61 }
  0x3a   :  { %604 = vmatpush.msra.mxu2 %v6457_v23  ;;  %590 = vmatpush.msra.mxu1 %v6534_v42 }
  0x3b   :  { %624 = vmatpush.msra.mxu3 %v6575_v51  ;;  %522 = vmatpush.msra.mxu0 %v6650_v62 }
  0x3c   :  { %5620 = vmatmul.msk.f32.gmra.mxu1 %vm180_vm1, %v6479_v29  ;;  %605 = vmatpush.msra.mxu2 %v6473_v27 }
  0x3d   :  { %625 = vmatpush.msra.mxu3 %v6591_v53  ;;  %701 = vmatpush.msrb.mxu0 %v6395_v7 }
  0x3e   :  { %5615 = vmatmul.msk.f32.gmra.mxu0 %vm180_vm1, %v6479_v29  ;;  %606 = vmatpush.msra.mxu2 %v6487_v31 }
  0x3f   :  { %626 = vmatpush.msra.mxu3 %v6598_v55  ;;  %702 = vmatpush.msrb.mxu0 %v6402_v9 }
  0x40   :  { %607 = vmatpush.msra.mxu2 %v6499_v33  ;;  %591 = vmatpush.msra.mxu1 %v6546_v44 }
  0x41   :  { %627 = vmatpush.msra.mxu3 %v6604_v56  ;;  %703 = vmatpush.msrb.mxu0 %v6410_v11 }
  0x42   :  { %608 = vmatpush.msra.mxu2 %v6511_v36  ;;  %592 = vmatpush.msra.mxu1 %v6560_v47 }
  0x43   :  { %628 = vmatpush.msra.mxu3 %v6611_v57  ;;  %704 = vmatpush.msrb.mxu0 %v6419_v13 }
  0x44   :  { %5621 = vmatmul.msk.f32.gmra.mxu1 %vm180_vm1, %v6531_v41  ;;  %609 = vmatpush.msra.mxu2 %v6523_v39 }
  0x45   :  { %629 = vmatpush.msra.mxu3 %v6620_v58  ;;  %593 = vmatpush.msra.mxu1 %v6572_v50 }
  0x46   :  { %5616 = vmatmul.msk.f32.gmra.mxu0 %vm180_vm1, %v6531_v41  ;;  %610 = vmatpush.msra.mxu2 %v6541_v43 }
  0x47   :  { %630 = vmatpush.msra.mxu3 %v6628_v59  ;;  %721 = vmatpush.msrb.mxu1 %v6398_v8 }
  0x48   :  { %611 = vmatpush.msra.mxu2 %v6555_v46  ;;  %705 = vmatpush.msrb.mxu0 %v6431_v17 }
  0x49   :  { %631 = vmatpush.msra.mxu3 %v6634_v60  ;;  %722 = vmatpush.msrb.mxu1 %v6407_v10 }
  0x4a   :  { %612 = vmatpush.msra.mxu2 %v6567_v49  ;;  %706 = vmatpush.msrb.mxu0 %v6441_v19 }
  0x4b   :  { %632 = vmatpush.msra.mxu3 %v6641_v61  ;;  %723 = vmatpush.msrb.mxu1 %v6413_v12 }
  0x4c   :  { %613 = vmatpush.msra.mxu2 %v6580_v52  ;;  %707 = vmatpush.msrb.mxu0 %v6452_v21 }
  0x4d   :  { %633 = vmatpush.msra.mxu3 %v6650_v62  ;;  %724 = vmatpush.msrb.mxu1 %v6422_v14 }
  0x4e   :  { %741 = vmatpush.msrb.mxu2 %v6461_v24  ;;  %523 = vmatmul.f32.vlgmr.msra.gmra.mxu0 %v10241_v54  ;;  %v6792_v54 = vperm.slane %v398_v40, 1 }
  0x4f   :  { %809 = vmatpush.msrb.mxu3 %v6395_v7  ;;  %725 = vmatpush.msrb.mxu1 %v6436_v18 }
  0x50   :  { %742 = vmatpush.msrb.mxu2 %v6469_v26  ;;  %708 = vmatpush.msrb.mxu0 %v6465_v25  ;;  %10373 = vst [vmem:[#allocation20_spill] sm:$0xff] %v6792_v54 }
  0x51   :  { %810 = vmatpush.msrb.mxu3 %v6402_v9  ;;  %726 = vmatpush.msrb.mxu1 %v6447_v20 }
  0x52   :  { %743 = vmatpush.msrb.mxu2 %v6504_v34  ;;  %709 = vmatpush.msrb.mxu0 %v6484_v30 }
  0x53   :  { %811 = vmatpush.msrb.mxu3 %v6410_v11  ;;  %727 = vmatpush.msrb.mxu1 %v6457_v23 }
  0x54   :  { %744 = vmatpush.msrb.mxu2 %v6517_v37  ;;  %710 = vmatpush.msrb.mxu0 %v6496_v32 }
  0x55   :  { %812 = vmatpush.msrb.mxu3 %v6419_v13  ;;  %728 = vmatpush.msrb.mxu1 %v6473_v27 }
  0x56   :  { %745 = vmatpush.msrb.mxu2 %v6549_v45  ;;  %711 = vmatpush.msrb.mxu0 %v6508_v35 }
  0x57   :  { %813 = vmatpush.msrb.mxu3 %v6431_v17  ;;  %729 = vmatpush.msrb.mxu1 %v6487_v31 }
  0x58   :  { %746 = vmatpush.msrb.mxu2 %v6563_v48  ;;  %712 = vmatpush.msrb.mxu0 %v6520_v38 }
  0x59   :  { %814 = vmatpush.msrb.mxu3 %v6441_v19  ;;  %730 = vmatpush.msrb.mxu1 %v6499_v33 }
  0x5a   :  { %747 = vmatpush.msrb.mxu2 %v6575_v51  ;;  %713 = vmatpush.msrb.mxu0 %v6534_v42 }
  0x5b   :  { %815 = vmatpush.msrb.mxu3 %v6452_v21  ;;  %731 = vmatpush.msrb.mxu1 %v6511_v36 }
  0x5c   :  { %748 = vmatpush.msrb.mxu2 %v6591_v53  ;;  %714 = vmatpush.msrb.mxu0 %v6546_v44 }
  0x5d   :  { %816 = vmatpush.msrb.mxu3 %v6465_v25  ;;  %732 = vmatpush.msrb.mxu1 %v6523_v39 }
  0x5e   :  { %749 = vmatpush.msrb.mxu2 %v6598_v55  ;;  %715 = vmatpush.msrb.mxu0 %v6560_v47 }
  0x5f   :  { %817 = vmatpush.msrb.mxu3 %v6484_v30  ;;  %733 = vmatpush.msrb.mxu1 %v6541_v43 }
  0x60   :  { %750 = vmatpush.msrb.mxu2 %v6604_v56  ;;  %716 = vmatpush.msrb.mxu0 %v6572_v50 }
  0x61   :  { %818 = vmatpush.msrb.mxu3 %v6496_v32  ;;  %734 = vmatpush.msrb.mxu1 %v6555_v46 }
  0x62   :  { %751 = vmatpush.msrb.mxu2 %v6611_v57  ;;  %829 = vmatpush.msra.mxu0 %v6398_v8 }
  0x63   :  { %819 = vmatpush.msrb.mxu3 %v6508_v35  ;;  %735 = vmatpush.msrb.mxu1 %v6567_v49 }
  0x64   :  { %752 = vmatpush.msrb.mxu2 %v6620_v58  ;;  %830 = vmatpush.msra.mxu0 %v6407_v10 }
  0x65   :  { %820 = vmatpush.msrb.mxu3 %v6520_v38  ;;  %736 = vmatpush.msrb.mxu1 %v6580_v52 }
  0x66   :  { %753 = vmatpush.msrb.mxu2 %v6628_v59  ;;  %831 = vmatpush.msra.mxu0 %v6413_v12 }
  0x67   :  { %821 = vmatpush.msrb.mxu3 %v6534_v42 }
  0x68   :  { %754 = vmatpush.msrb.mxu2 %v6634_v60  ;;  %832 = vmatpush.msra.mxu0 %v6422_v14 }
  0x69   :  { %822 = vmatpush.msrb.mxu3 %v6546_v44 }
  0x6a   :  { %755 = vmatpush.msrb.mxu2 %v6641_v61  ;;  %833 = vmatpush.msra.mxu0 %v6436_v18 }
  0x6b   :  { %823 = vmatpush.msrb.mxu3 %v6560_v47 }
  0x6c   :  { %756 = vmatpush.msrb.mxu2 %v6650_v62  ;;  %834 = vmatpush.msra.mxu0 %v6447_v20 }
  0x6d   :  { %824 = vmatpush.msrb.mxu3 %v6572_v50 }
  0x6e   :  { %835 = vmatpush.msra.mxu0 %v6457_v23 }
  0x70   :  { %836 = vmatpush.msra.mxu0 %v6473_v27 }
  0x72   :  { %837 = vmatpush.msra.mxu0 %v6487_v31 }
  0x74   :  { %838 = vmatpush.msra.mxu0 %v6499_v33 }
  0x76   :  { %839 = vmatpush.msra.mxu0 %v6511_v36 }
  0x78   :  { %840 = vmatpush.msra.mxu0 %v6523_v39 }
  0x7a   :  { %841 = vmatpush.msra.mxu0 %v6541_v43 }
  0x7c   :  { %842 = vmatpush.msra.mxu0 %v6555_v46 }
  0x7e   :  { %843 = vmatpush.msra.mxu0 %v6567_v49 }
  0x80   :  { %844 = vmatpush.msra.mxu0 %v6580_v52 }
  0x87   :  { %v249_v16 = vpop.f32.mrf.mxu1 }
  0x88   :  { %v220_v63 = vpop.f32.mrf.mxu0 }
  0x8d   :  { %v278_v0 = vpop.f32.mrf.mxu2 }
  0x8e   :  { %v328_v1 = vpop.f32.mrf.mxu3 }
  0x90   :  { %v6790_v41 = vpop.f32.mrf.mxu1 }
  0x91   :  { %10372 = vst [vmem:[#allocation19_spill] sm:$0xff] %v6790_v41 }
  0x92   :  { %v6769_v2 = vpop.f32.mrf.mxu0 }
  0x93   :  { %10363 = vst [vmem:[#allocation10_spill] sm:$0xff] %v6769_v2 }
  0x96   :  { %v6771_v3 = vpop.f32.mrf.mxu2 }
  0x97   :  { %10364 = vst [vmem:[#allocation11_spill] sm:$0xff] %v6771_v3  ;;  %v6773_v4 = vpop.f32.mrf.mxu3 }
  0x98   :  { %10365 = vst [vmem:[#allocation12_spill] sm:$0xff] %v6773_v4 }
  0x9b   :  { %v6775_v5 = vpop.f32.mrf.mxu0 }
  0x9c   :  { %10366 = vst [vmem:[#allocation13_spill] sm:$0xff] %v6775_v5 }
  0x9f   :  { %v6777_v6 = vpop.f32.mrf.mxu2  ;;  %v6779_v15 = vpop.f32.mrf.mxu3 }
  0xa0   :  { %10367 = vst [vmem:[#allocation14_spill] sm:$0xff] %v6777_v6  ;;  %v329_v6 = vadd.f32 %v328_v1, %v220_v63  ;;  %v6806_v63 = vpop.f32.mrf.mxu1 }
  0xa1   :  { %10368 = vst [vmem:[#allocation15_spill] sm:$0xff] %v6779_v15  ;;  %v6794_v15 = vperm.slane %v398_v40, 0 }
  0xa2   :  { %10378 = vst [vmem:[#allocation25_spill] sm:$0xff] %v6806_v63 }
  0xa3   :  { %v6784_v22 = vpop.f32.mrf.mxu0  ;;  %10374 = vst [vmem:[#allocation21_spill] sm:$0xff] %v6794_v15  ;;  %v6800_v2 = vadd.f32 %v6794_v15, %v329_v6 }
  0xa4   :  { %10369 = vst [vmem:[#allocation16_spill] sm:$0xff] %v6784_v22 }
  0xa5   :  { %10376 = vst [vmem:[#allocation23_spill] sm:$0xff] %v6800_v2 }
  0xa7   :  { %v6786_v28 = vpop.f32.mrf.mxu2 }
  0xa8   :  { %10370 = vst [vmem:[#allocation17_spill] sm:$0xff] %v6786_v28  ;;  %v6788_v29 = vpop.f32.mrf.mxu3 }
  0xa9   :  { %10371 = vst [vmem:[#allocation18_spill] sm:$0xff] %v6788_v29 }
  0xab   :  { %v357_v5 = vpop.f32.mrf.mxu0 }
  0xac   :  { %v358_v3 = vadd.f32 %v357_v5, %v249_v16 }
  0xae   :  { %v6797_v4 = vadd.f32 %v6792_v54, %v358_v3  ;;  %v6810_v54 = vpop.f32.mrf.mxu1 }
  0xaf   :  { %10380 = vst [vmem:[#allocation27_spill] sm:$0xff] %v6810_v54  ;;  %v6817_v54 = vperm.slane %v398_v40, 2 }
  0xb0   :  { %10375 = vst [vmem:[#allocation22_spill] sm:$0xff] %v6797_v4  ;;  %v484_v22 = vpop.f32.mrf.mxu2  ;;  %v504_v28 = vpop.f32.mrf.mxu3 }
  0xb1   :  { %v527_v29 = vadd.f32 %v484_v22, %v6800_v2  ;;  %v528_v52 = vadd.f32 %v504_v28, %v6797_v4  ;;  %v6815_v4 = vld [vmem:[%s6678_s25] ss:$0 sm:$0xff]  ;;  %10383 = vst [vmem:[#allocation30_spill] sm:$0xff] %v6817_v54 }
  0xb2   :  { %10382 = vst [vmem:[#allocation29_spill] sm:$0xff] %v6815_v4 }
  0xb3   :  { %v5622_v41 = vmul.f32 -1.442695, %v527_v29  ;;  %v5623_v50 = vmul.f32 -1.442695, %v528_v52  ;;  %v6804_v62 = vpop.f32.mrf.mxu0 }
  0xb4   :  { %10377 = vst [vmem:[#allocation24_spill] sm:$0xff] %v6804_v62 }
  0xb5   :  { %5780 = vpow2.f32 %v5622_v41 }
  0xb6   :  { %5782 = vpow2.f32 %v5623_v50  ;;  %v386_v41 = vpop.f32.mrf.mxu1 }
  0xb7   :  { %v387_v2 = vadd.f32 %v386_v41, %v278_v0 }
  0xbb   :  { %v5781_v1 = vpop.eup %5780  ;;  %v6808_v3 = vpop.f32.mrf.mxu0 }
  0xbc   :  { %10379 = vst [vmem:[#allocation26_spill] sm:$0xff] %v6808_v3  ;;  %v5783_v5 = vpop.eup %5782  ;;  %v535_v6 = vadd.f32 1.0, %v5781_v1 }
  0xbd   :  { %v536_v16 = vadd.f32 1.0, %v5783_v5 }
  0xbe   :  { %5784 = vrcp.f32 %v535_v6  ;;  %v548_v62 = vand.u32 2147483648, %v535_v6  ;;  %v546_v1 = vand.u32 2147483647, %v535_v6  ;;  %vm542_vm3 = vweird.f32 %v535_v6 }
  0xbf   :  { %5786 = vrcp.f32 %v536_v16  ;;  %v563_v44 = vand.u32 2147483648, %v536_v16  ;;  %vm557_vm7 = vweird.f32 %v536_v16  ;;  %v561_v0 = vand.u32 2147483647, %v536_v16 }
  0xc0   :  { %vm547_vm5 = vcmp.eq.f32.partialorder %v546_v1, 8.507059e+37  ;;  %v10391_v1 = vld [vmem:[#allocation6_spill] sm:$0xff] }
  0xc1   :  { %vm562_vm9 = vcmp.eq.f32.partialorder %v561_v0, 8.507059e+37 }
  0xc3   :  { %v6812_v22 = vpop.f32.mrf.mxu0 }
  0xc4   :  { %10381 = vst [vmem:[#allocation28_spill] sm:$0xff] %v6812_v22  ;;  %v5785_v52 = vpop.eup %5784  ;;  %v549_v22 = vor.u32 1.1754944e-38, %v548_v62 }
  0xc5   :  { %v5787_v28 = vpop.eup %5786  ;;  %v538_v29 = vmul.f32 %v5785_v52, %v535_v6  ;;  %vm543_vm2 = vweird.f32 %v5785_v52  ;;  %v564_v6 = vor.u32 1.1754944e-38, %v563_v44  ;;  %v10385_v44 = vld [vmem:[#allocation2_spill] sm:$0xff] }
  0xc6   :  { %v553_v15 = vmul.f32 %v5787_v28, %v536_v16  ;;  %vm544_vm4 = vmor %vm542_vm3, %vm543_vm2  ;;  %vm558_vm6 = vweird.f32 %v5787_v28  ;;  %v10389_v16 = vld [vmem:[#allocation5_spill] sm:$0xff] }
  0xc7   :  { %v539_v63 = vsub.f32 1.0, %v538_v29  ;;  %vm559_vm8 = vmor %vm557_vm7, %vm558_vm6 }
  0xc8   :  { %v554_v50 = vsub.f32 1.0, %v553_v15 }
  0xc9   :  { %v540_v3 = vmul.f32 %v5785_v52, %v539_v63  ;;  %v6821_v63 = vadd.f32 %v6817_v54, %v387_v2  ;;  %v10388_v2 = vld [vmem:[#allocation4_spill] sm:$0xff] }
  0xca   :  { %v555_v5 = vmul.f32 %v5787_v28, %v554_v50 }
  0xcb   :  { %v524_v49 = vpop.f32.mrf.mxu0  ;;  %v541_v47 = vadd.f32 %v5785_v52, %v540_v3 }
  0xcc   :  { %v570_v61 = vadd.f32 %v6815_v4, %v524_v49  ;;  %v556_v15 = vadd.f32 %v5787_v28, %v555_v5  ;;  %v10392_v5 = vld [vmem:[#allocation7_spill] sm:$0xff] }
  0xcd   :  { %v545_v29 = vsel %vm544_vm4, %v5785_v52, %v541_v47 }
  0xce   :  { %v550_v46 = vsel %vm547_vm5, %v549_v22, %v545_v29  ;;  %v560_v3 = vsel %vm559_vm8, %v5787_v28, %v556_v15  ;;  %v10390_v28 = vld [vmem:[#allocation9_spill] sm:$0xff]  ;;  %v6877_v29 = vpop.f32.mrf.mxu1 }
  0xcf   :  { %v571_v50 = vmul.f32 %v570_v61, %v550_v46  ;;  %v565_v49 = vsel %vm562_vm9, %v564_v6, %v560_v3  ;;  %v10386_v46 = vld [vmem:[#allocation3_spill] sm:$0xff]  ;;  %v10387_v61 = vld [vmem:[#allocation8_spill] sm:$0xff]  ;;  %10393 = vst [vmem:[#allocation32_spill] sm:$0xff] %v6877_v29 }
  0xd0   :  { %v574_v47 = vsub.f32 1.0, %v565_v49  ;;  %v576_v41 = vmul.f32 0.0, %v565_v49  ;;  %v10396_v3 = vld [vmem:[#allocation23_spill] sm:$0xff] }
  0xd1   :  { %v572_v40 = vadd.f32 %v571_v50, %v6821_v63 }
  0xd3   :  { %5788 = vtanh.f32 %v572_v40 }
  0xd6   :  { %v6879_v15 = vpop.f32.mrf.mxu1 }
  0xd7   :  { %10394 = vst [vmem:[#allocation33_spill] sm:$0xff] %v6879_v15 }
  0xd9   :  { %v5789_v62 = vpop.eup %5788 }
  0xda   :  { %v575_v52 = vmul.f32 %v5789_v62, %v574_v47 }
  0xdc   :  { %v6824_v22 = vadd.f32 %v576_v41, %v575_v52  ;;  %v10397_v52 = vld [vmem:[#allocation22_spill] sm:$0xff] }
  0xde   :  { %10384 = vst [vmem:[#allocation31_spill] sm:$0xff] %v6824_v22  ;;  %594 = vmatmul.f32.vlgmr.msra.gmra.mxu1 %v6824_v22  ;;  %614 = vmatmul.f32.vlgmr.msra.gmra.mxu2 %v6824_v22  ;;  %v6881_v50 = vpop.f32.mrf.mxu1 }
  0xdf   :  { %634 = vmatmul.f32.vlgmr.msra.gmra.mxu3 %v6824_v22  ;;  %849 = vmatpush.msra.mxu1 %v6461_v24  ;;  %10395 = vst [vmem:[#allocation34_spill] sm:$0xff] %v6881_v50 }
  0xe0   :  { %932 = vmatpush.msra.mxu2 %v6395_v7  ;;  %952 = vmatpush.msra.mxu3 %v6398_v8 }
  0xe1   :  { %850 = vmatpush.msra.mxu1 %v6469_v26 }
  0xe2   :  { %933 = vmatpush.msra.mxu2 %v6402_v9  ;;  %953 = vmatpush.msra.mxu3 %v6407_v10 }
  0xe3   :  { %851 = vmatpush.msra.mxu1 %v6504_v34 }
  0xe4   :  { %934 = vmatpush.msra.mxu2 %v6410_v11  ;;  %954 = vmatpush.msra.mxu3 %v6413_v12 }
  0xe5   :  { %852 = vmatpush.msra.mxu1 %v6517_v37 }
  0xe6   :  { %935 = vmatpush.msra.mxu2 %v6419_v13  ;;  %955 = vmatpush.msra.mxu3 %v6422_v14 }
  0xe7   :  { %853 = vmatpush.msra.mxu1 %v6549_v45 }
  0xe8   :  { %936 = vmatpush.msra.mxu2 %v6431_v17  ;;  %956 = vmatpush.msra.mxu3 %v6436_v18 }
  0xe9   :  { %854 = vmatpush.msra.mxu1 %v6563_v48 }
  0xea   :  { %937 = vmatpush.msra.mxu2 %v6441_v19  ;;  %957 = vmatpush.msra.mxu3 %v6447_v20 }
  0xeb   :  { %855 = vmatpush.msra.mxu1 %v6575_v51 }
  0xec   :  { %938 = vmatpush.msra.mxu2 %v6452_v21  ;;  %958 = vmatpush.msra.mxu3 %v6457_v23 }
  0xed   :  { %856 = vmatpush.msra.mxu1 %v6591_v53 }
  0xee   :  { %939 = vmatpush.msra.mxu2 %v6465_v25  ;;  %959 = vmatpush.msra.mxu3 %v6473_v27 }
  0xef   :  { %857 = vmatpush.msra.mxu1 %v6598_v55 }
  0xf0   :  { %940 = vmatpush.msra.mxu2 %v6484_v30  ;;  %960 = vmatpush.msra.mxu3 %v6487_v31 }
  0xf1   :  { %858 = vmatpush.msra.mxu1 %v6604_v56 }
  0xf2   :  { %941 = vmatpush.msra.mxu2 %v6496_v32  ;;  %961 = vmatpush.msra.mxu3 %v6499_v33 }
  0xf3   :  { %859 = vmatpush.msra.mxu1 %v6611_v57 }
  0xf4   :  { %942 = vmatpush.msra.mxu2 %v6508_v35  ;;  %962 = vmatpush.msra.mxu3 %v6511_v36 }
  0xf5   :  { %860 = vmatpush.msra.mxu1 %v6620_v58 }
  0xf6   :  { %943 = vmatpush.msra.mxu2 %v6520_v38  ;;  %963 = vmatpush.msra.mxu3 %v6523_v39 }
  0xf7   :  { %861 = vmatpush.msra.mxu1 %v6628_v59 }
  0xf8   :  { %944 = vmatpush.msra.mxu2 %v6534_v42  ;;  %964 = vmatpush.msra.mxu3 %v6541_v43 }
  0xf9   :  { %862 = vmatpush.msra.mxu1 %v6634_v60 }
  0xfa   :  { %945 = vmatpush.msra.mxu2 %v10385_v44  ;;  %965 = vmatpush.msra.mxu3 %v10386_v46 }
  0xfb   :  { %863 = vmatpush.msra.mxu1 %v10387_v61 }
  0xfc   :  { %946 = vmatpush.msra.mxu2 %v10388_v2  ;;  %966 = vmatpush.msra.mxu3 %v10389_v16 }
  0xfd   :  { %864 = vmatpush.msra.mxu1 %v10390_v28 }
  0xfe   :  { %947 = vmatpush.msra.mxu2 %v10391_v1  ;;  %967 = vmatpush.msra.mxu3 %v10392_v5 }
 0x15b   :  { %v595_v0 = vpop.f32.mrf.mxu1 }
 0x15c   :  { %v640_v40 = vrot.slane %v595_v0, 4 }
 0x15e   :  { %v644_v6 = vadd.f32 %v640_v40, %v10396_v3 }
 0x160   :  { %v5624_v49 = vmul.f32 -1.442695, %v644_v6 }
 0x161   :  { %v615_v47 = vpop.f32.mrf.mxu2 }
 0x162   :  { %5790 = vpow2.f32 %v5624_v49  ;;  %v641_v62 = vrot.slane %v615_v47, 4  ;;  %v635_v16 = vpop.f32.mrf.mxu3 }
 0x163   :  { %v684_v6 = vadd.f32 %v6815_v4, %v635_v16 }
 0x164   :  { %v645_v41 = vadd.f32 %v641_v62, %v10397_v52 }
 0x166   :  { %v5625_v54 = vmul.f32 -1.442695, %v645_v41 }
 0x168   :  { %v5791_v1 = vpop.eup %5790  ;;  %5792 = vpow2.f32 %v5625_v54 }
 0x169   :  { %v652_v5 = vadd.f32 1.0, %v5791_v1 }
 0x16b   :  { %5794 = vrcp.f32 %v652_v5  ;;  %v665_v2 = vand.u32 2147483648, %v652_v5  ;;  %v663_v3 = vand.u32 2147483647, %v652_v5  ;;  %vm659_vm11 = vweird.f32 %v652_v5 }
 0x16d   :  { %v666_v54 = vor.u32 1.1754944e-38, %v665_v2  ;;  %vm664_vm13 = vcmp.eq.f32.partialorder %v663_v3, 8.507059e+37 }
 0x16e   :  { %v5793_v29 = vpop.eup %5792 }
 0x16f   :  { %v653_v28 = vadd.f32 1.0, %v5793_v29  ;;  %v686_v29 = vrot.slane %v684_v6, 4 }
 0x171   :  { %v5795_v15 = vpop.eup %5794  ;;  %5796 = vrcp.f32 %v653_v28  ;;  %vm674_vm15 = vweird.f32 %v653_v28 }
 0x172   :  { %v655_v50 = vmul.f32 %v5795_v15, %v652_v5  ;;  %vm660_vm10 = vweird.f32 %v5795_v15 }
 0x173   :  { %vm661_vm12 = vmor %vm659_vm11, %vm660_vm10 }
 0x174   :  { %v656_v0 = vsub.f32 1.0, %v655_v50  ;;  %v680_v50 = vand.u32 2147483648, %v653_v28 }
 0x176   :  { %v657_v40 = vmul.f32 %v5795_v15, %v656_v0  ;;  %v678_v0 = vand.u32 2147483647, %v653_v28  ;;  %v681_v4 = vor.u32 1.1754944e-38, %v680_v50 }
 0x177   :  { %v5797_v49 = vpop.eup %5796 }
 0x178   :  { %v670_v47 = vmul.f32 %v5797_v49, %v653_v28  ;;  %v658_v62 = vadd.f32 %v5795_v15, %v657_v40  ;;  %vm675_vm14 = vweird.f32 %v5797_v49  ;;  %vm679_vm1 = vcmp.eq.f32.partialorder %v678_v0, 8.507059e+37 }
 0x179   :  { %vm676_vm0 = vmor %vm674_vm15, %vm675_vm14 }
 0x17a   :  { %v671_v1 = vsub.f32 1.0, %v670_v47  ;;  %v662_v52 = vsel %vm661_vm12, %v5795_v15, %v658_v62  ;;  %v10269_v15 = vrot.slane %v6824_v22, 4 }
 0x17b   :  { %v667_v41 = vsel %vm664_vm13, %v666_v54, %v662_v52 }
 0x17c   :  { %v672_v61 = vmul.f32 %v5797_v49, %v671_v1  ;;  %v688_v46 = vmul.f32 %v686_v29, %v667_v41  ;;  %v10414_v29 = vld [vmem:[#allocation11_spill] sm:$0xff]  ;;  %v10415_v41 = vld [vmem:[#allocation32_spill] sm:$0xff] }
 0x17d   :  { %v390_v50 = vadd.f32 %v10415_v41, %v10414_v29  ;;  %v7079_v29 = vld [vmem:[%s6378_s21 + $0x80] sm:$0xff]  ;;  %v7088_v41 = vld [vmem:[%s6378_s21 + $0x68] sm:$0xff] }
 0x17e   :  { %v673_v44 = vadd.f32 %v5797_v49, %v672_v61  ;;  %v689_v16 = vadd.f32 %v688_v46, %v6821_v63 }
 0x180   :  { %v677_v40 = vsel %vm676_vm0, %v5797_v49, %v673_v44  ;;  %5798 = vtanh.f32 %v689_v16 }
 0x181   :  { %v682_v2 = vsel %vm679_vm1, %v681_v4, %v677_v40 }
 0x182   :  { %v691_v5 = vsub.f32 1.0, %v682_v2  ;;  %v696_v47 = vmul.f32 %v10269_v15, %v682_v2  ;;  %v10416_v2 = vld [vmem:[#allocation29_spill] sm:$0xff] }
 0x186   :  { %v5799_v3 = vpop.eup %5798 }
 0x187   :  { %v692_v6 = vmul.f32 %v5799_v3, %v691_v5 }
 0x189   :  { %v6890_v62 = vadd.f32 %v696_v47, %v692_v6  ;;  %v10417_v47 = vld [vmem:[#allocation30_spill] sm:$0xff] }
 0x18b   :  { %10398 = vst [vmem:[#allocation23_spill] sm:$0xff] %v6890_v62  ;;  %v6893_v61 = vrot.slane %v6890_v62, 4 }
 0x18d   :  { %10399 = vst [vmem:[#allocation22_spill] sm:$0xff] %v6893_v61  ;;  %717 = vmatmul.f32.vlgmr.msrb.gmra.mxu0 %v6893_v61  ;;  %737 = vmatmul.f32.vlgmr.msrb.gmra.mxu1 %v6893_v61 }
 0x18e   :  { %757 = vmatmul.f32.vlgmr.msrb.gmra.mxu2 %v6893_v61  ;;  %972 = vmatpush.msrb.mxu0 %v6461_v24  ;;  %v10412_v24 = vld [vmem:[#allocation21_spill] sm:$0xff] }
 0x18f   :  { %1040 = vmatpush.msrb.mxu1 %v6395_v7  ;;  %1060 = vmatpush.msrb.mxu2 %v6398_v8  ;;  %v10400_v7 = vld [vmem:[#allocation2_spill] sm:$0xff]  ;;  %v10401_v8 = vld [vmem:[#allocation3_spill] sm:$0xff] }
 0x190   :  { %973 = vmatpush.msrb.mxu0 %v6469_v26  ;;  %v10413_v26 = vld [vmem:[#allocation20_spill] sm:$0xff] }
 0x191   :  { %1041 = vmatpush.msrb.mxu1 %v6402_v9  ;;  %1061 = vmatpush.msrb.mxu2 %v6407_v10  ;;  %v10402_v9 = vld [vmem:[#allocation8_spill] sm:$0xff] }
 0x192   :  { %974 = vmatpush.msrb.mxu0 %v6504_v34  ;;  %v10403_v10 = vld [vmem:[#allocation4_spill] sm:$0xff] }
 0x193   :  { %1042 = vmatpush.msrb.mxu1 %v6410_v11  ;;  %1062 = vmatpush.msrb.mxu2 %v6413_v12  ;;  %v10404_v11 = vld [vmem:[#allocation5_spill] sm:$0xff] }
 0x194   :  { %975 = vmatpush.msrb.mxu0 %v6517_v37  ;;  %v10405_v12 = vld [vmem:[#allocation9_spill] sm:$0xff] }
 0x195   :  { %1043 = vmatpush.msrb.mxu1 %v6419_v13  ;;  %1063 = vmatpush.msrb.mxu2 %v6422_v14  ;;  %v10406_v13 = vld [vmem:[#allocation6_spill] sm:$0xff]  ;;  %v10407_v14 = vld [vmem:[#allocation7_spill] sm:$0xff] }
 0x196   :  { %976 = vmatpush.msrb.mxu0 %v6549_v45 }
 0x197   :  { %1044 = vmatpush.msrb.mxu1 %v6431_v17  ;;  %1064 = vmatpush.msrb.mxu2 %v6436_v18  ;;  %v10408_v17 = vld [vmem:[#allocation10_spill] sm:$0xff]  ;;  %v10409_v18 = vld [vmem:[#allocation12_spill] sm:$0xff] }
 0x198   :  { %977 = vmatpush.msrb.mxu0 %v6563_v48 }
 0x199   :  { %1045 = vmatpush.msrb.mxu1 %v6441_v19  ;;  %1065 = vmatpush.msrb.mxu2 %v6447_v20  ;;  %v332_v19 = vadd.f32 %v10409_v18, %v10408_v17  ;;  %v10410_v20 = vld [vmem:[#allocation19_spill] sm:$0xff] }
 0x19a   :  { %978 = vmatpush.msrb.mxu0 %v6575_v51 }
 0x19b   :  { %1046 = vmatpush.msrb.mxu1 %v6452_v21  ;;  %1066 = vmatpush.msrb.mxu2 %v6457_v23  ;;  %v10411_v21 = vld [vmem:[#allocation24_spill] sm:$0xff] }
 0x19c   :  { %979 = vmatpush.msrb.mxu0 %v6591_v53  ;;  %v361_v23 = vadd.f32 %v10411_v21, %v10410_v20 }
 0x19d   :  { %1047 = vmatpush.msrb.mxu1 %v6465_v25  ;;  %1067 = vmatpush.msrb.mxu2 %v6473_v27  ;;  %v6951_v25 = vadd.f32 %v10412_v24, %v332_v19 }
 0x19e   :  { %980 = vmatpush.msrb.mxu0 %v6598_v55  ;;  %v6954_v27 = vadd.f32 %v10413_v26, %v361_v23 }
 0x19f   :  { %1048 = vmatpush.msrb.mxu1 %v6484_v30  ;;  %1068 = vmatpush.msrb.mxu2 %v6487_v31 }
 0x1a0   :  { %981 = vmatpush.msrb.mxu0 %v6604_v56 }
 0x1a1   :  { %1049 = vmatpush.msrb.mxu1 %v6496_v32  ;;  %1069 = vmatpush.msrb.mxu2 %v6499_v33 }
 0x1a2   :  { %982 = vmatpush.msrb.mxu0 %v6611_v57 }
 0x1a3   :  { %1050 = vmatpush.msrb.mxu1 %v6508_v35  ;;  %1070 = vmatpush.msrb.mxu2 %v6511_v36 }
 0x1a4   :  { %983 = vmatpush.msrb.mxu0 %v6620_v58 }
 0x1a5   :  { %1051 = vmatpush.msrb.mxu1 %v6520_v38  ;;  %1071 = vmatpush.msrb.mxu2 %v6523_v39 }
 0x1a6   :  { %984 = vmatpush.msrb.mxu0 %v6628_v59 }
 0x1a7   :  { %1052 = vmatpush.msrb.mxu1 %v6534_v42  ;;  %1072 = vmatpush.msrb.mxu2 %v6541_v43 }
 0x1a8   :  { %985 = vmatpush.msrb.mxu0 %v6634_v60 }
 0x1a9   :  { %1053 = vmatpush.msrb.mxu1 %v10400_v7  ;;  %1073 = vmatpush.msrb.mxu2 %v10401_v8  ;;  %v6962_v7 = vadd.f32 %v10417_v47, %v390_v50  ;;  %v7097_v50 = vld [vmem:[%s6378_s21 + $0x50] sm:$0xff] }
 0x1aa   :  { %986 = vmatpush.msrb.mxu0 %v10402_v9 }
 0x1ab   :  { %1054 = vmatpush.msrb.mxu1 %v10403_v10  ;;  %1074 = vmatpush.msrb.mxu2 %v10404_v11 }
 0x1ac   :  { %987 = vmatpush.msrb.mxu0 %v10405_v12 }
 0x1ad   :  { %1055 = vmatpush.msrb.mxu1 %v10406_v13  ;;  %1075 = vmatpush.msrb.mxu2 %v10407_v14 }
 0x20a   :  { %v718_v30 = vpop.f32.mrf.mxu0  ;;  %v738_v31 = vpop.f32.mrf.mxu1 }
 0x20b   :  { %v761_v32 = vadd.f32 %v718_v30, %v6951_v25  ;;  %v762_v33 = vadd.f32 %v738_v31, %v6954_v27  ;;  %v6972_v31 = vld [vmem:[%s6378_s21 + $0x178] sm:$0xff] }
 0x20d   :  { %v5626_v34 = vmul.f32 -1.442695, %v761_v32  ;;  %v5627_v35 = vmul.f32 -1.442695, %v762_v33  ;;  %v6976_v32 = vld [vmem:[%s6378_s21 + $0x168] sm:$0xff]  ;;  %v6980_v33 = vld [vmem:[%s6378_s21 + $0x170] sm:$0xff] }
 0x20f   :  { %5800 = vpow2.f32 %v5626_v34  ;;  %v6984_v34 = vld [vmem:[%s6378_s21 + $0x160] sm:$0xff] }
 0x210   :  { %5802 = vpow2.f32 %v5627_v35  ;;  %v6988_v35 = vld [vmem:[%s6378_s21 + $0x150] sm:$0xff] }
 0x211   :  { %v758_v52 = vpop.f32.mrf.mxu2 }
 0x212   :  { %v801_v5 = vadd.f32 %v10416_v2, %v758_v52  ;;  %v7070_v52 = vld [vmem:[%s6378_s21 + $0x98] sm:$0xff] }
 0x215   :  { %v5801_v36 = vpop.eup %5800 }
 0x216   :  { %v5803_v37 = vpop.eup %5802  ;;  %v769_v38 = vadd.f32 1.0, %v5801_v36  ;;  %v6992_v36 = vld [vmem:[%s6378_s21 + $0x158] sm:$0xff] }
 0x217   :  { %v770_v39 = vadd.f32 1.0, %v5803_v37  ;;  %v6996_v37 = vld [vmem:[%s6378_s21 + $0x148] sm:$0xff] }
 0x218   :  { %5804 = vrcp.f32 %v769_v38  ;;  %v782_v28 = vand.u32 2147483648, %v769_v38  ;;  %v780_v54 = vand.u32 2147483647, %v769_v38  ;;  %vm776_vm3 = vweird.f32 %v769_v38 }
 0x219   :  { %5806 = vrcp.f32 %v770_v39  ;;  %v797_v8 = vand.u32 2147483648, %v770_v39  ;;  %vm791_vm7 = vweird.f32 %v770_v39  ;;  %v795_v11 = vand.u32 2147483647, %v770_v39 }
 0x21a   :  { %v783_v16 = vor.u32 1.1754944e-38, %v782_v28  ;;  %vm781_vm5 = vcmp.eq.f32.partialorder %v780_v54, 8.507059e+37  ;;  %v7034_v28 = vld [vmem:[%s6378_s21 + $0xf8] sm:$0xff]  ;;  %v7052_v54 = vld [vmem:[%s6378_s21 + $0xc8] sm:$0xff] }
 0x21b   :  { %v798_v17 = vor.u32 1.1754944e-38, %v797_v8  ;;  %vm796_vm9 = vcmp.eq.f32.partialorder %v795_v11, 8.507059e+37 }
 0x21e   :  { %v5805_v42 = vpop.eup %5804 }
 0x21f   :  { %v5807_v43 = vpop.eup %5806  ;;  %v772_v4 = vmul.f32 %v5805_v42, %v769_v38  ;;  %vm777_vm2 = vweird.f32 %v5805_v42  ;;  %v7000_v38 = vld [vmem:[%s6378_s21 + $0x138] sm:$0xff] }
 0x220   :  { %v787_v63 = vmul.f32 %v5807_v43, %v770_v39  ;;  %vm778_vm4 = vmor %vm776_vm3, %vm777_vm2  ;;  %vm792_vm6 = vweird.f32 %v5807_v43  ;;  %v7004_v39 = vld [vmem:[%s6378_s21 + $0x140] sm:$0xff] }
 0x221   :  { %v773_v44 = vsub.f32 1.0, %v772_v4  ;;  %vm793_vm8 = vmor %vm791_vm7, %vm792_vm6  ;;  %v7016_v4 = vld [vmem:[%s6378_s21 + $0x128] sm:$0xff] }
 0x222   :  { %v788_v46 = vsub.f32 1.0, %v787_v63  ;;  %v7021_v63 = vld [vmem:[%s6378_s21 + $0x108] sm:$0xff] }
 0x223   :  { %v774_v49 = vmul.f32 %v5805_v42, %v773_v44  ;;  %v7025_v44 = vld [vmem:[%s6378_s21 + $0x110] sm:$0xff] }
 0x224   :  { %v789_v1 = vmul.f32 %v5807_v43, %v788_v46  ;;  %v7030_v46 = vld [vmem:[%s6378_s21 + $0xf0] sm:$0xff] }
 0x225   :  { %v775_v0 = vadd.f32 %v5805_v42, %v774_v49  ;;  %v7043_v49 = vld [vmem:[%s6378_s21 + $0xe0] sm:$0xff] }
 0x226   :  { %v790_v3 = vadd.f32 %v5807_v43, %v789_v1  ;;  %v7061_v1 = vld [vmem:[%s6378_s21 + $0xb0] sm:$0xff] }
 0x227   :  { %v779_v40 = vsel %vm778_vm4, %v5805_v42, %v775_v0  ;;  %v7008_v42 = vld [vmem:[%s6378_s21 + $0x130] sm:$0xff]  ;;  %v7106_v0 = vld [vmem:[%s6378_s21 + $0x38] sm:$0xff] }
 0x228   :  { %v784_v6 = vsel %vm781_vm5, %v783_v16, %v779_v40  ;;  %v794_v14 = vsel %vm793_vm8, %v5807_v43, %v790_v3  ;;  %v7012_v43 = vld [vmem:[%s6378_s21 + $0x120] sm:$0xff]  ;;  %v7124_v40 = vld [vmem:[%s6378_s21 + $0x8] sm:$0xff] }
 0x229   :  { %v802_v10 = vmul.f32 %v801_v5, %v784_v6  ;;  %v799_v18 = vsel %vm796_vm9, %v798_v17, %v794_v14  ;;  %v7115_v16 = vld [vmem:[%s6378_s21 + $0x20] sm:$0xff] }
 0x22a   :  { %v805_v19 = vsub.f32 1.0, %v799_v18  ;;  %v807_v23 = vmul.f32 %v799_v18, %v6893_v61 }
 0x22b   :  { %v803_v13 = vadd.f32 %v802_v10, %v6962_v7 }
 0x22d   :  { %5808 = vtanh.f32 %v803_v13 }
 0x233   :  { %v5809_v20 = vpop.eup %5808 }
 0x234   :  { %v806_v21 = vmul.f32 %v5809_v20, %v805_v19 }
 0x236   :  { %v6966_v30 = vadd.f32 %v807_v23, %v806_v21 }
 0x238   :  { %825 = vmatmul.f32.vlgmr.msrb.gmra.mxu3 %v6966_v30  ;;  %845 = vmatmul.f32.vlgmr.msra.gmra.mxu0 %v6966_v30 }
 0x239   :  { %865 = vmatmul.f32.vlgmr.msra.gmra.mxu1 %v6966_v30  ;;  %1080 = vmatpush.msrb.mxu3 %v6972_v31 }
 0x23a   :  { %1163 = vmatpush.msra.mxu0 %v6976_v32  ;;  %1183 = vmatpush.msra.mxu1 %v6980_v33 }
 0x23b   :  { %1081 = vmatpush.msrb.mxu3 %v6984_v34 }
 0x23c   :  { %1164 = vmatpush.msra.mxu0 %v6988_v35  ;;  %1184 = vmatpush.msra.mxu1 %v6992_v36 }
 0x23d   :  { %1082 = vmatpush.msrb.mxu3 %v6996_v37 }
 0x23e   :  { %1165 = vmatpush.msra.mxu0 %v7000_v38  ;;  %1185 = vmatpush.msra.mxu1 %v7004_v39 }
 0x23f   :  { %1083 = vmatpush.msrb.mxu3 %v7008_v42 }
 0x240   :  { %1166 = vmatpush.msra.mxu0 %v7012_v43  ;;  %1186 = vmatpush.msra.mxu1 %v7016_v4 }
 0x241   :  { %1084 = vmatpush.msrb.mxu3 %v6549_v45  ;;  %v7039_v45 = vld [vmem:[%s6378_s21 + $0xd8] sm:$0xff] }
 0x242   :  { %1167 = vmatpush.msra.mxu0 %v7021_v63  ;;  %1187 = vmatpush.msra.mxu1 %v7025_v44 }
 0x243   :  { %1085 = vmatpush.msrb.mxu3 %v6563_v48  ;;  %v7048_v48 = vld [vmem:[%s6378_s21 + $0xc0] sm:$0xff] }
 0x244   :  { %1168 = vmatpush.msra.mxu0 %v7030_v46  ;;  %1188 = vmatpush.msra.mxu1 %v7034_v28 }
 0x245   :  { %1086 = vmatpush.msrb.mxu3 %v6575_v51  ;;  %v7057_v51 = vld [vmem:[%s6378_s21 + $0xa8] sm:$0xff] }
 0x246   :  { %1169 = vmatpush.msra.mxu0 %v7039_v45  ;;  %1189 = vmatpush.msra.mxu1 %v7043_v49 }
 0x247   :  { %1087 = vmatpush.msrb.mxu3 %v6591_v53  ;;  %v7066_v53 = vld [vmem:[%s6378_s21 + $0x90] sm:$0xff] }
 0x248   :  { %1170 = vmatpush.msra.mxu0 %v7048_v48  ;;  %1190 = vmatpush.msra.mxu1 %v7052_v54 }
 0x249   :  { %1088 = vmatpush.msrb.mxu3 %v6598_v55  ;;  %v7075_v55 = vld [vmem:[%s6378_s21 + $0x78] sm:$0xff] }
 0x24a   :  { %1171 = vmatpush.msra.mxu0 %v7057_v51  ;;  %1191 = vmatpush.msra.mxu1 %v7061_v1 }
 0x24b   :  { %1089 = vmatpush.msrb.mxu3 %v6604_v56  ;;  %v7084_v56 = vld [vmem:[%s6378_s21 + $0x60] sm:$0xff] }
 0x24c   :  { %1172 = vmatpush.msra.mxu0 %v7066_v53  ;;  %1192 = vmatpush.msra.mxu1 %v7070_v52 }
 0x24d   :  { %1090 = vmatpush.msrb.mxu3 %v6611_v57  ;;  %v7093_v57 = vld [vmem:[%s6378_s21 + $0x48] sm:$0xff] }
 0x24e   :  { %1173 = vmatpush.msra.mxu0 %v7075_v55  ;;  %1193 = vmatpush.msra.mxu1 %v7079_v29 }
 0x24f   :  { %1091 = vmatpush.msrb.mxu3 %v6620_v58  ;;  %v7102_v58 = vld [vmem:[%s6378_s21 + $0x30] sm:$0xff] }
 0x250   :  { %1174 = vmatpush.msra.mxu0 %v7084_v56  ;;  %1194 = vmatpush.msra.mxu1 %v7088_v41 }
 0x251   :  { %1092 = vmatpush.msrb.mxu3 %v6628_v59  ;;  %v7111_v59 = vld [vmem:[%s6378_s21 + $0x18] sm:$0xff] }
 0x252   :  { %1175 = vmatpush.msra.mxu0 %v7093_v57  ;;  %1195 = vmatpush.msra.mxu1 %v7097_v50 }
 0x253   :  { %1093 = vmatpush.msrb.mxu3 %v6634_v60  ;;  %v7120_v60 = vld [vmem:[%s6378_s21] sm:$0xff] }
 0x254   :  { %1176 = vmatpush.msra.mxu0 %v7102_v58  ;;  %1196 = vmatpush.msra.mxu1 %v7106_v0 }
 0x255   :  { %1094 = vmatpush.msrb.mxu3 %v10402_v9 }
 0x256   :  { %1177 = vmatpush.msra.mxu0 %v7111_v59  ;;  %1197 = vmatpush.msra.mxu1 %v7115_v16 }
 0x257   :  { %1095 = vmatpush.msrb.mxu3 %v10405_v12 }
 0x258   :  { %1178 = vmatpush.msra.mxu0 %v7120_v60  ;;  %1198 = vmatpush.msra.mxu1 %v7124_v40 }
 0x2b5   :  { %v846_v5 = vpop.f32.mrf.mxu0 }
 0x2b6   :  { %v872_v9 = vrot.slane %v846_v5, 4 }
 0x2b8   :  { %v876_v3 = vadd.f32 %v872_v9, %v6954_v27  ;;  %v866_v27 = vpop.f32.mrf.mxu1 }
 0x2ba   :  { %v5629_v6 = vmul.f32 -1.442695, %v876_v3 }
 0x2bb   :  { %v826_v8 = vpop.f32.mrf.mxu3 }
 0x2bc   :  { %5810 = vpow2.f32 %v5629_v6  ;;  %v871_v10 = vrot.slane %v826_v8, 4  ;;  %v915_v6 = vadd.f32 %v10416_v2, %v866_v27 }
 0x2be   :  { %v875_v11 = vadd.f32 %v871_v10, %v6951_v25 }
 0x2c0   :  { %v5628_v13 = vmul.f32 -1.442695, %v875_v11 }
 0x2c2   :  { %v5811_v12 = vpop.eup %5810  ;;  %5812 = vpow2.f32 %v5628_v13 }
 0x2c3   :  { %v884_v14 = vadd.f32 1.0, %v5811_v12  ;;  %v917_v12 = vrot.slane %v915_v6, 4 }
 0x2c5   :  { %5814 = vrcp.f32 %v884_v14  ;;  %vm905_vm15 = vweird.f32 %v884_v14 }
 0x2c8   :  { %v5813_v17 = vpop.eup %5812 }
 0x2c9   :  { %v883_v18 = vadd.f32 1.0, %v5813_v17 }
 0x2cb   :  { %5816 = vrcp.f32 %v883_v18  ;;  %v5815_v19 = vpop.eup %5814  ;;  %v896_v3 = vand.u32 2147483648, %v883_v18  ;;  %v894_v25 = vand.u32 2147483647, %v883_v18  ;;  %vm890_vm11 = vweird.f32 %v883_v18 }
 0x2cc   :  { %v901_v20 = vmul.f32 %v5815_v19, %v884_v14  ;;  %vm906_vm14 = vweird.f32 %v5815_v19 }
 0x2cd   :  { %v897_v13 = vor.u32 1.1754944e-38, %v896_v3  ;;  %vm895_vm13 = vcmp.eq.f32.partialorder %v894_v25, 8.507059e+37  ;;  %vm907_vm0 = vmor %vm905_vm15, %vm906_vm14  ;;  %v925_v3 = vrot.slane %v6966_v30, 4 }
 0x2ce   :  { %v902_v5 = vsub.f32 1.0, %v901_v20  ;;  %v911_v20 = vand.u32 2147483648, %v884_v14 }
 0x2d0   :  { %v903_v10 = vmul.f32 %v5815_v19, %v902_v5  ;;  %v912_v62 = vor.u32 1.1754944e-38, %v911_v20 }
 0x2d1   :  { %v5817_v21 = vpop.eup %5816 }
 0x2d2   :  { %v886_v23 = vmul.f32 %v5817_v21, %v883_v18  ;;  %vm891_vm10 = vweird.f32 %v5817_v21  ;;  %v904_v15 = vadd.f32 %v5815_v19, %v903_v10 }
 0x2d3   :  { %vm892_vm12 = vmor %vm890_vm11, %vm891_vm10 }
 0x2d4   :  { %v887_v9 = vsub.f32 1.0, %v886_v23  ;;  %v909_v23 = vand.u32 2147483647, %v884_v14 }
 0x2d6   :  { %v888_v8 = vmul.f32 %v5817_v21, %v887_v9  ;;  %v908_v9 = vsel %vm907_vm0, %v5815_v19, %v904_v15  ;;  %vm910_vm1 = vcmp.eq.f32.partialorder %v909_v23, 8.507059e+37  ;;  %v7161_v15 = vld [vmem:[%s6378_s21 + $0x100] sm:$0xff] }
 0x2d7   :  { %v913_v18 = vsel %vm910_vm1, %v912_v62, %v908_v9  ;;  %v7167_v62 = vld [vmem:[%s6378_s21 + $0xe8] sm:$0xff] }
 0x2d8   :  { %v889_v11 = vadd.f32 %v5817_v21, %v888_v8  ;;  %v922_v5 = vsub.f32 1.0, %v913_v18  ;;  %v927_v8 = vmul.f32 %v925_v3, %v913_v18 }
 0x2da   :  { %v893_v17 = vsel %vm892_vm12, %v5817_v21, %v889_v11 }
 0x2db   :  { %v898_v61 = vsel %vm895_vm13, %v897_v13, %v893_v17  ;;  %v10423_v17 = vld [vmem:[#allocation33_spill] sm:$0xff] }
 0x2dc   :  { %v919_v22 = vmul.f32 %v917_v12, %v898_v61  ;;  %v10422_v12 = vld [vmem:[#allocation14_spill] sm:$0xff] }
 0x2dd   :  { %v393_v20 = vadd.f32 %v10423_v17, %v10422_v12 }
 0x2de   :  { %v920_v27 = vadd.f32 %v919_v22, %v6962_v7  ;;  %v7155_v22 = vld [vmem:[%s6378_s21 + $0x118] sm:$0xff]  ;;  %v7173_v7 = vld [vmem:[%s6378_s21 + $0xd0] sm:$0xff] }
 0x2e0   :  { %5818 = vtanh.f32 %v920_v27 }
 0x2e6   :  { %v5819_v21 = vpop.eup %5818 }
 0x2e7   :  { %v923_v6 = vmul.f32 %v5819_v21, %v922_v5 }
 0x2e9   :  { %v7134_v25 = vadd.f32 %v927_v8, %v923_v6  ;;  %v7242_v6 = vadd.f32 %v10417_v47, %v393_v20 }
 0x2eb   :  { %v7137_v61 = vrot.slane %v7134_v25, 4 }
 0x2ed   :  { %948 = vmatmul.f32.vlgmr.msra.gmra.mxu2 %v7137_v61  ;;  %968 = vmatmul.f32.vlgmr.msra.gmra.mxu3 %v7137_v61 }
 0x2ee   :  { %988 = vmatmul.f32.vlgmr.msrb.gmra.mxu0 %v7137_v61  ;;  %1203 = vmatpush.msra.mxu2 %v6972_v31 }
 0x2ef   :  { %1271 = vmatpush.msra.mxu3 %v6976_v32  ;;  %1291 = vmatpush.msrb.mxu0 %v6980_v33  ;;  %v7179_v32 = vld [vmem:[%s6378_s21 + $0xb8] sm:$0xff]  ;;  %v7185_v33 = vld [vmem:[%s6378_s21 + $0xa0] sm:$0xff] }
 0x2f0   :  { %1204 = vmatpush.msra.mxu2 %v6984_v34 }
 0x2f1   :  { %1272 = vmatpush.msra.mxu3 %v6988_v35  ;;  %1292 = vmatpush.msrb.mxu0 %v6992_v36  ;;  %v7191_v35 = vld [vmem:[%s6378_s21 + $0x88] sm:$0xff]  ;;  %v7197_v36 = vld [vmem:[%s6378_s21 + $0x70] sm:$0xff] }
 0x2f2   :  { %1205 = vmatpush.msra.mxu2 %v6996_v37 }
 0x2f3   :  { %1273 = vmatpush.msra.mxu3 %v7000_v38  ;;  %1293 = vmatpush.msrb.mxu0 %v7004_v39  ;;  %v7203_v38 = vld [vmem:[%s6378_s21 + $0x58] sm:$0xff]  ;;  %v7209_v39 = vld [vmem:[%s6378_s21 + $0x40] sm:$0xff] }
 0x2f4   :  { %1206 = vmatpush.msra.mxu2 %v7008_v42 }
 0x2f5   :  { %1274 = vmatpush.msra.mxu3 %v7012_v43  ;;  %1294 = vmatpush.msrb.mxu0 %v7016_v4  ;;  %v7215_v43 = vld [vmem:[%s6378_s21 + $0x28] sm:$0xff]  ;;  %v7221_v4 = vld [vmem:[%s6378_s21 + $0x10] sm:$0xff]  ;;  %s5574_s21 = sld [smem:[%s10240_s0 + %s6330_s18]]   ;;  %s6345_s18 = smov 35  }
 0x2f6   :  { %1207 = vmatpush.msra.mxu2 %v7155_v22 }
 0x2f7   :  { %1275 = vmatpush.msra.mxu3 %v7021_v63  ;;  %1295 = vmatpush.msrb.mxu0 %v7025_v44  ;;  %v10418_v63 = vld [vmem:[#allocation13_spill] sm:$0xff]  ;;  %v10419_v44 = vld [vmem:[#allocation15_spill] sm:$0xff] }
 0x2f8   :  { %1208 = vmatpush.msra.mxu2 %v7161_v15 }
 0x2f9   :  { %1276 = vmatpush.msra.mxu3 %v7030_v46  ;;  %1296 = vmatpush.msrb.mxu0 %v7034_v28  ;;  %v335_v46 = vadd.f32 %v10419_v44, %v10418_v63  ;;  %v10420_v28 = vld [vmem:[#allocation25_spill] sm:$0xff] }
 0x2fa   :  { %1209 = vmatpush.msra.mxu2 %v7167_v62 }
 0x2fb   :  { %1277 = vmatpush.msra.mxu3 %v7039_v45  ;;  %1297 = vmatpush.msrb.mxu0 %v7043_v49  ;;  %v10421_v45 = vld [vmem:[#allocation26_spill] sm:$0xff] }
 0x2fc   :  { %1210 = vmatpush.msra.mxu2 %v7173_v7  ;;  %v364_v49 = vadd.f32 %v10421_v45, %v10420_v28 }
 0x2fd   :  { %1278 = vmatpush.msra.mxu3 %v7048_v48  ;;  %1298 = vmatpush.msrb.mxu0 %v7052_v54  ;;  %v7231_v48 = vadd.f32 %v10412_v24, %v335_v46 }
 0x2fe   :  { %1211 = vmatpush.msra.mxu2 %v7179_v32  ;;  %v7234_v54 = vadd.f32 %v10413_v26, %v364_v49 }
 0x2ff   :  { %1279 = vmatpush.msra.mxu3 %v7057_v51  ;;  %1299 = vmatpush.msrb.mxu0 %v7061_v1 }
 0x300   :  { %1212 = vmatpush.msra.mxu2 %v7185_v33 }
 0x301   :  { %1280 = vmatpush.msra.mxu3 %v7066_v53  ;;  %1300 = vmatpush.msrb.mxu0 %v7070_v52 }
 0x302   :  { %1213 = vmatpush.msra.mxu2 %v7191_v35 }
 0x303   :  { %1281 = vmatpush.msra.mxu3 %v7075_v55  ;;  %1301 = vmatpush.msrb.mxu0 %v7079_v29 }
 0x304   :  { %1214 = vmatpush.msra.mxu2 %v7197_v36 }
 0x305   :  { %1282 = vmatpush.msra.mxu3 %v7084_v56  ;;  %1302 = vmatpush.msrb.mxu0 %v7088_v41 }
 0x306   :  { %1215 = vmatpush.msra.mxu2 %v7203_v38 }
 0x307   :  { %1283 = vmatpush.msra.mxu3 %v7093_v57  ;;  %1303 = vmatpush.msrb.mxu0 %v7097_v50 }
 0x308   :  { %1216 = vmatpush.msra.mxu2 %v7209_v39 }
 0x309   :  { %1284 = vmatpush.msra.mxu3 %v7102_v58  ;;  %1304 = vmatpush.msrb.mxu0 %v7106_v0 }
 0x30a   :  { %1217 = vmatpush.msra.mxu2 %v7215_v43 }
 0x30b   :  { %1285 = vmatpush.msra.mxu3 %v7111_v59  ;;  %1305 = vmatpush.msrb.mxu0 %v7115_v16 }
 0x30c   :  { %1218 = vmatpush.msra.mxu2 %v7221_v4 }
 0x30d   :  { %1286 = vmatpush.msra.mxu3 %v7120_v60  ;;  %1306 = vmatpush.msrb.mxu0 %v7124_v40 }
 0x36b   :  { %v989_v11 = vpop.f32.mrf.mxu0 }
 0x36c   :  { %v1032_v9 = vadd.f32 %v10416_v2, %v989_v11 }
 0x370   :  { %v949_v51 = vpop.f32.mrf.mxu2  ;;  %v969_v1 = vpop.f32.mrf.mxu3 }
 0x371   :  { %v992_v53 = vadd.f32 %v949_v51, %v7231_v48  ;;  %v993_v52 = vadd.f32 %v969_v1, %v7234_v54 }
 0x373   :  { %v5630_v55 = vmul.f32 -1.442695, %v992_v53  ;;  %v5631_v29 = vmul.f32 -1.442695, %v993_v52 }
 0x375   :  { %5820 = vpow2.f32 %v5630_v55 }
 0x376   :  { %5822 = vpow2.f32 %v5631_v29 }
 0x37b   :  { %v5821_v56 = vpop.eup %5820 }
 0x37c   :  { %v5823_v41 = vpop.eup %5822  ;;  %v1000_v57 = vadd.f32 1.0, %v5821_v56  ;;  %v7270_v56 = vld [vmem:[%s6678_s25] ss:$0 sm:$0xff]  ;;  %s8601_s25 = sld [smem:[%s10240_s0 + %s6331_s22]]   ;;  %s6346_s22 = smov 34  }
 0x37d   :  { %v1001_v50 = vadd.f32 1.0, %v5823_v41  ;;  %s5585_s26 = sld [smem:[%s10240_s0 + %s6346_s22]]  }
 0x37e   :  { %5824 = vrcp.f32 %v1000_v57  ;;  %v1013_v40 = vand.u32 2147483648, %v1000_v57  ;;  %v1011_v10 = vand.u32 2147483647, %v1000_v57  ;;  %vm1007_vm3 = vweird.f32 %v1000_v57 }
 0x37f   :  { %5826 = vrcp.f32 %v1001_v50  ;;  %v1028_v63 = vand.u32 2147483648, %v1001_v50  ;;  %vm1022_vm7 = vweird.f32 %v1001_v50  ;;  %v1026_v44 = vand.u32 2147483647, %v1001_v50 }
 0x380   :  { %v1014_v27 = vor.u32 1.1754944e-38, %v1013_v40  ;;  %vm1012_vm5 = vcmp.eq.f32.partialorder %v1011_v10, 8.507059e+37 }
 0x381   :  { %v1029_v45 = vor.u32 1.1754944e-38, %v1028_v63  ;;  %vm1027_vm9 = vcmp.eq.f32.partialorder %v1026_v44, 8.507059e+37  ;;  %v1445_v63 = vld [vmem:[%s7288_s3 + $0x150] sm:$0xff] }
 0x382   :  { %v10424_v44 = vld [vmem:[#allocation16_spill] sm:$0xff] }
 0x384   :  { %v5825_v58 = vpop.eup %5824 }
 0x385   :  { %v5827_v0 = vpop.eup %5826  ;;  %v1003_v59 = vmul.f32 %v5825_v58, %v1000_v57  ;;  %vm1008_vm2 = vweird.f32 %v5825_v58 }
 0x386   :  { %v1018_v16 = vmul.f32 %v5827_v0, %v1001_v50  ;;  %vm1009_vm4 = vmor %vm1007_vm3, %vm1008_vm2  ;;  %vm1023_vm6 = vweird.f32 %v5827_v0 }
 0x387   :  { %v1004_v60 = vsub.f32 1.0, %v1003_v59  ;;  %vm1024_vm8 = vmor %vm1022_vm7, %vm1023_vm6 }
 0x388   :  { %v1019_v14 = vsub.f32 1.0, %v1018_v16 }
 0x389   :  { %v1005_v19 = vmul.f32 %v5825_v58, %v1004_v60 }
 0x38a   :  { %v1020_v13 = vmul.f32 %v5827_v0, %v1019_v14 }
 0x38b   :  { %v1006_v23 = vadd.f32 %v5825_v58, %v1005_v19 }
 0x38c   :  { %v1021_v21 = vadd.f32 %v5827_v0, %v1020_v13 }
 0x38d   :  { %v1010_v18 = vsel %vm1009_vm4, %v5825_v58, %v1006_v23 }
 0x38e   :  { %v1015_v5 = vsel %vm1012_vm5, %v1014_v27, %v1010_v18  ;;  %v1025_v28 = vsel %vm1024_vm8, %v5827_v0, %v1021_v21 }
 0x38f   :  { %v1033_v8 = vmul.f32 %v1032_v9, %v1015_v5  ;;  %v1030_v2 = vsel %vm1027_vm9, %v1029_v45, %v1025_v28  ;;  %v10426_v45 = vld [vmem:[#allocation27_spill] sm:$0xff] }
 0x390   :  { %v1036_v49 = vsub.f32 1.0, %v1030_v2  ;;  %v1038_v53 = vmul.f32 %v1030_v2, %v7137_v61  ;;  %v10427_v2 = vld [vmem:[#allocation28_spill] sm:$0xff] }
 0x391   :  { %v1034_v46 = vadd.f32 %v1033_v8, %v7242_v6 }
 0x393   :  { %5828 = vtanh.f32 %v1034_v46  ;;  %v10425_v46 = vld [vmem:[#allocation18_spill] sm:$0xff] }
 0x394   :  { %v338_v28 = vadd.f32 %v10425_v46, %v10424_v44 }
 0x399   :  { %v5829_v51 = vpop.eup %5828 }
 0x39a   :  { %v1037_v1 = vmul.f32 %v5829_v51, %v1036_v49  ;;  %v367_v49 = vadd.f32 %v10427_v2, %v10426_v45  ;;  %v1442_v51 = vld [vmem:[%s7288_s3 + $0x138] sm:$0xff] }
 0x39c   :  { %v7246_v52 = vadd.f32 %v1038_v53, %v1037_v1  ;;  %v1439_v1 = vld [vmem:[%s7288_s3 + $0x120] sm:$0xff]  ;;  %v7299_v53 = vadd.f32 %v10412_v24, %v338_v28 }
 0x39e   :  { %1056 = vmatmul.f32.vlgmr.msrb.gmra.mxu1 %v7246_v52  ;;  %1076 = vmatmul.f32.vlgmr.msrb.gmra.mxu2 %v7246_v52  ;;  %v1156_v27 = vrot.slane %v7246_v52, 4 }
 0x39f   :  { %1096 = vmatmul.f32.vlgmr.msrb.gmra.mxu3 %v7246_v52  ;;  %1311 = vmatpush.msrb.mxu1 %v6972_v31 }
 0x3a1   :  { %1312 = vmatpush.msrb.mxu1 %v6984_v34 }
 0x3a3   :  { %1313 = vmatpush.msrb.mxu1 %v6996_v37 }
 0x3a5   :  { %1314 = vmatpush.msrb.mxu1 %v7008_v42 }
 0x3a7   :  { %1315 = vmatpush.msrb.mxu1 %v7155_v22 }
 0x3a9   :  { %1316 = vmatpush.msrb.mxu1 %v7161_v15 }
 0x3ab   :  { %1317 = vmatpush.msrb.mxu1 %v7167_v62 }
 0x3ad   :  { %1318 = vmatpush.msrb.mxu1 %v7173_v7 }
 0x3af   :  { %1319 = vmatpush.msrb.mxu1 %v7179_v32 }
 0x3b1   :  { %1320 = vmatpush.msrb.mxu1 %v7185_v33 }
 0x3b3   :  { %1321 = vmatpush.msrb.mxu1 %v7191_v35 }
 0x3b5   :  { %1322 = vmatpush.msrb.mxu1 %v7197_v36 }
 0x3b7   :  { %1323 = vmatpush.msrb.mxu1 %v7203_v38 }
 0x3b9   :  { %1324 = vmatpush.msrb.mxu1 %v7209_v39 }
 0x3bb   :  { %1325 = vmatpush.msrb.mxu1 %v7215_v43 }
 0x3bd   :  { %1326 = vmatpush.msrb.mxu1 %v7221_v4 }
 0x41b   :  { %v1057_v31 = vpop.f32.mrf.mxu1 }
 0x41c   :  { %v1102_v34 = vrot.slane %v1057_v31, 4  ;;  %v7302_v31 = vadd.f32 %v10413_v26, %v367_v49  ;;  %v1427_v26 = vld [vmem:[%s7288_s3 + $0xc0] sm:$0xff] }
 0x41e   :  { %v1106_v37 = vadd.f32 %v1102_v34, %v7231_v48  ;;  %v1436_v34 = vld [vmem:[%s7288_s3 + $0x108] sm:$0xff] }
 0x420   :  { %v5632_v42 = vmul.f32 -1.442695, %v1106_v37 }
 0x421   :  { %v1077_v22 = vpop.f32.mrf.mxu2 }
 0x422   :  { %5830 = vpow2.f32 %v5632_v42  ;;  %v1103_v15 = vrot.slane %v1077_v22, 4  ;;  %v1097_v43 = vpop.f32.mrf.mxu3 }
 0x424   :  { %v1107_v62 = vadd.f32 %v1103_v15, %v7234_v54  ;;  %v1146_v54 = vadd.f32 %v7270_v56, %v1097_v43 }
 0x426   :  { %v5633_v7 = vmul.f32 -1.442695, %v1107_v62  ;;  %v1148_v16 = vrot.slane %v1146_v54, 4  ;;  %v1433_v62 = vld [vmem:[%s7288_s3 + $0xf0] sm:$0xff]  ;;  %v1406_v54 = vld [vmem:[%s7288_s3 + $0x18] sm:$0xff] }
 0x428   :  { %v5831_v32 = vpop.eup %5830  ;;  %5832 = vpow2.f32 %v5633_v7 }
 0x429   :  { %v1114_v33 = vadd.f32 1.0, %v5831_v32  ;;  %v1430_v32 = vld [vmem:[%s7288_s3 + $0xd8] sm:$0xff] }
 0x42b   :  { %5834 = vrcp.f32 %v1114_v33  ;;  %v1127_v48 = vand.u32 2147483648, %v1114_v33  ;;  %v1125_v29 = vand.u32 2147483647, %v1114_v33  ;;  %vm1121_vm11 = vweird.f32 %v1114_v33 }
 0x42d   :  { %v1128_v58 = vor.u32 1.1754944e-38, %v1127_v48  ;;  %vm1126_vm13 = vcmp.eq.f32.partialorder %v1125_v29, 8.507059e+37  ;;  %v1409_v29 = vld [vmem:[%s7288_s3 + $0x30] sm:$0xff] }
 0x42e   :  { %v5833_v35 = vpop.eup %5832 }
 0x42f   :  { %v1115_v36 = vadd.f32 1.0, %v5833_v35  ;;  %v1421_v35 = vld [vmem:[%s7288_s3 + $0x90] sm:$0xff] }
 0x431   :  { %v5835_v38 = vpop.eup %5834  ;;  %5836 = vrcp.f32 %v1115_v36  ;;  %v1142_v14 = vand.u32 2147483648, %v1115_v36  ;;  %v1140_v10 = vand.u32 2147483647, %v1115_v36  ;;  %vm1136_vm15 = vweird.f32 %v1115_v36 }
 0x432   :  { %v1117_v39 = vmul.f32 %v5835_v38, %v1114_v33  ;;  %vm1122_vm10 = vweird.f32 %v5835_v38  ;;  %v1424_v33 = vld [vmem:[%s7288_s3 + $0xa8] sm:$0xff] }
 0x433   :  { %vm1123_vm12 = vmor %vm1121_vm11, %vm1122_vm10  ;;  %v1143_v12 = vor.u32 1.1754944e-38, %v1142_v14  ;;  %vm1141_vm1 = vcmp.eq.f32.partialorder %v1140_v10, 8.507059e+37  ;;  %vm1391_vm10 = vcmask 1043456  }
 0x434   :  { %v1118_v4 = vsub.f32 1.0, %v1117_v39  ;;  %v1415_v39 = vld [vmem:[%s7288_s3 + $0x60] sm:$0xff] }
 0x436   :  { %v1119_v55 = vmul.f32 %v5835_v38, %v1118_v4 }
 0x437   :  { %v5837_v41 = vpop.eup %5836 }
 0x438   :  { %v1132_v57 = vmul.f32 %v5837_v41, %v1115_v36  ;;  %v1120_v50 = vadd.f32 %v5835_v38, %v1119_v55  ;;  %vm1137_vm14 = vweird.f32 %v5837_v41  ;;  %v1418_v36 = vld [vmem:[%s7288_s3 + $0x78] sm:$0xff]  ;;  %v1412_v55 = vld [vmem:[%s7288_s3 + $0x48] sm:$0xff] }
 0x439   :  { %vm1138_vm0 = vmor %vm1136_vm15, %vm1137_vm14 }
 0x43a   :  { %v1133_v0 = vsub.f32 1.0, %v1132_v57  ;;  %v1124_v59 = vsel %vm1123_vm12, %v5835_v38, %v1120_v50 }
 0x43b   :  { %v1129_v60 = vsel %vm1126_vm13, %v1128_v58, %v1124_v59 }
 0x43c   :  { %v1134_v40 = vmul.f32 %v5837_v41, %v1133_v0  ;;  %v1150_v19 = vmul.f32 %v1148_v16, %v1129_v60 }
 0x43e   :  { %v1135_v11 = vadd.f32 %v5837_v41, %v1134_v40  ;;  %v1151_v13 = vadd.f32 %v1150_v19, %v7242_v6  ;;  %v1448_v6 = vld [vmem:[%s7288_s3 + $0x168] sm:$0xff] }
 0x440   :  { %v1139_v17 = vsel %vm1138_vm0, %v5837_v41, %v1135_v11  ;;  %5838 = vtanh.f32 %v1151_v13  ;;  %v1403_v41 = vld [vmem:[%s7288_s3] sm:$0xff]  ;;  %v10428_v11 = vld [vmem:[#allocation17_spill] sm:$0xff] }
 0x441   :  { %v1144_v20 = vsel %vm1141_vm1, %v1143_v12, %v1139_v17  ;;  %v10429_v13 = vld [vmem:[#allocation34_spill] sm:$0xff] }
 0x442   :  { %v1153_v23 = vsub.f32 1.0, %v1144_v20  ;;  %v1158_v5 = vmul.f32 %v1156_v27, %v1144_v20  ;;  %v396_v12 = vadd.f32 %v10429_v13, %v10428_v11  ;;  %v1477_v11 = vld [vmem:[%s7352_s7 + $0xd0] sm:$0xff]  ;;  %v1472_v13 = vld [vmem:[%s7352_s7 + $0xa8] sm:$0xff] }
 0x446   :  { %v5839_v9 = vpop.eup %5838 }
 0x447   :  { %v1154_v18 = vmul.f32 %v5839_v9, %v1153_v23 }
 0x449   :  { %v7277_v21 = vadd.f32 %v1158_v5, %v1154_v18 }
 0x44b   :  { %v7280_v8 = vrot.slane %v7277_v21, 4 }
 0x44d   :  { %1179 = vmatmul.f32.vlgmr.msra.gmra.mxu0 %v7280_v8  ;;  %1199 = vmatmul.f32.vlgmr.msra.gmra.mxu1 %v7280_v8 }
 0x44e   :  { %1219 = vmatmul.f32.vlgmr.msra.gmra.mxu2 %v7280_v8  ;;  %1586 = vmatpush.msra.mxu1 %v1448_v6  ;;  %v7322_v6 = vadd.f32 %v10417_v47, %v396_v12  ;;  %v10430_v47 = vld [vmem:[#allocation23_spill] sm:$0xff]  ;;  %v1473_v12 = vld [vmem:[%s7352_s7 + $0xb0] sm:$0xff] }
 0x450   :  { %1587 = vmatpush.msra.mxu1 %v1445_v63 }
 0x452   :  { %1588 = vmatpush.msra.mxu1 %v1442_v51 }
 0x454   :  { %1589 = vmatpush.msra.mxu1 %v1439_v1 }
 0x456   :  { %1590 = vmatpush.msra.mxu1 %v1436_v34 }
 0x458   :  { %1591 = vmatpush.msra.mxu1 %v1433_v62  ;;  %v7340_v62 = vsel %vm1391_vm10, %v6966_v30, %v7134_v25  ;;  %v1496_v25 = vld [vmem:[%s7352_s7 + $0x168] sm:$0xff]  ;;  %v7667_v30 = vld [vmem:[%s7403_s11 + $0xb8] sm:$0xff] }
 0x459   :  { %1499 = vmatpush.msrb.mxu2 %v1496_v25 }
 0x45a   :  { %1592 = vmatpush.msra.mxu1 %v1430_v32  ;;  %v1493_v32 = vld [vmem:[%s7352_s7 + $0x150] sm:$0xff] }
 0x45b   :  { %1500 = vmatpush.msrb.mxu2 %v1493_v32  ;;  %v1454_v32 = vld [vmem:[%s7352_s7 + $0x18] sm:$0xff] }
 0x45c   :  { %1593 = vmatpush.msra.mxu1 %v1427_v26  ;;  %v1494_v26 = vld [vmem:[%s7352_s7 + $0x158] sm:$0xff] }
 0x45e   :  { %1594 = vmatpush.msra.mxu1 %v1424_v33  ;;  %v1495_v33 = vld [vmem:[%s7352_s7 + $0x160] sm:$0xff] }
 0x460   :  { %1595 = vmatpush.msra.mxu1 %v1421_v35  ;;  %v1490_v35 = vld [vmem:[%s7352_s7 + $0x138] sm:$0xff] }
 0x461   :  { %1501 = vmatpush.msrb.mxu2 %v1490_v35 }
 0x462   :  { %1596 = vmatpush.msra.mxu1 %v1418_v36  ;;  %v1491_v36 = vld [vmem:[%s7352_s7 + $0x140] sm:$0xff] }
 0x464   :  { %1597 = vmatpush.msra.mxu1 %v1415_v39 }
 0x466   :  { %1598 = vmatpush.msra.mxu1 %v1412_v55 }
 0x468   :  { %1599 = vmatpush.msra.mxu1 %v1409_v29  ;;  %v1484_v29 = vld [vmem:[%s7352_s7 + $0x108] sm:$0xff] }
 0x46a   :  { %1600 = vmatpush.msra.mxu1 %v1406_v54  ;;  %v1485_v54 = vld [vmem:[%s7352_s7 + $0x110] sm:$0xff] }
 0x46c   :  { %1601 = vmatpush.msra.mxu1 %v1403_v41  ;;  %v1486_v41 = vld [vmem:[%s7352_s7 + $0x118] sm:$0xff] }
 0x4ca   :  { %v1180_v37 = vpop.f32.mrf.mxu0  ;;  %v1200_v42 = vpop.f32.mrf.mxu1 }
 0x4cb   :  { %v1223_v22 = vadd.f32 %v1180_v37, %v7299_v53  ;;  %v1224_v15 = vadd.f32 %v1200_v42, %v7302_v31 }
 0x4cd   :  { %v5634_v7 = vmul.f32 -1.442695, %v1223_v22  ;;  %v5635_v24 = vmul.f32 -1.442695, %v1224_v15  ;;  %v10431_v22 = vld [vmem:[#allocation31_spill] sm:$0xff] }
 0x4ce   :  { %v7334_v15 = vsel %vm1391_vm10, %v10431_v22, %v10430_v47  ;;  %v1458_v47 = vld [vmem:[%s7352_s7 + $0x38] sm:$0xff] }
 0x4cf   :  { %5840 = vpow2.f32 %v5634_v7  ;;  %v7346_v7 = vsel %vm1391_vm10, %v7246_v52, %v7277_v21  ;;  %v1497_v21 = vld [vmem:[%s7352_s7 + $0x170] sm:$0xff]  ;;  %v7632_v52 = vld [vmem:[%s7403_s11 + $0x8] sm:$0xff] }
 0x4d0   :  { %5842 = vpow2.f32 %v5635_v24  ;;  %v1498_v24 = vld [vmem:[%s7352_s7 + $0x178] sm:$0xff]  ;;  %1528 = vmatpush.msrb.mxu3 %v1497_v21  ;;  %v1459_v21 = vld [vmem:[%s7352_s7 + $0x40] sm:$0xff]  ;;  %10440 = vst [vmem:[#allocation5_spill] sm:$0xff] %v7632_v52 }
 0x4d1   :  { %v1220_v10 = vpop.f32.mrf.mxu2  ;;  %1557 = vmatpush.msra.mxu0 %v1498_v24 }
 0x4d2   :  { %v1263_v9 = vadd.f32 %v7270_v56, %v1220_v10  ;;  %1529 = vmatpush.msrb.mxu3 %v1494_v26  ;;  %v1455_v26 = vld [vmem:[%s7352_s7 + $0x20] sm:$0xff] }
 0x4d3   :  { %1558 = vmatpush.msra.mxu0 %v1495_v33  ;;  %v1456_v33 = vld [vmem:[%s7352_s7 + $0x28] sm:$0xff] }
 0x4d4   :  { %1530 = vmatpush.msrb.mxu3 %v1491_v36  ;;  %v1451_v36 = vld [vmem:[%s7352_s7] sm:$0xff] }
 0x4d5   :  { %v5841_v38 = vpop.eup %5840 }
 0x4d6   :  { %v5843_v43 = vpop.eup %5842  ;;  %v1231_v4 = vadd.f32 1.0, %v5841_v38  ;;  %v1492_v38 = vld [vmem:[%s7352_s7 + $0x148] sm:$0xff] }
 0x4d7   :  { %v1232_v48 = vadd.f32 1.0, %v5843_v43  ;;  %1559 = vmatpush.msra.mxu0 %v1492_v38  ;;  %v1487_v43 = vld [vmem:[%s7352_s7 + $0x120] sm:$0xff]  ;;  %v1452_v38 = vld [vmem:[%s7352_s7 + $0x8] sm:$0xff] }
 0x4d8   :  { %5844 = vrcp.f32 %v1231_v4  ;;  %v1244_v60 = vand.u32 2147483648, %v1231_v4  ;;  %v1242_v14 = vand.u32 2147483647, %v1231_v4  ;;  %vm1238_vm3 = vweird.f32 %v1231_v4  ;;  %1502 = vmatpush.msrb.mxu2 %v1487_v43 }
 0x4d9   :  { %5846 = vrcp.f32 %v1232_v48  ;;  %v1259_v63 = vand.u32 2147483648, %v1232_v48  ;;  %vm1253_vm7 = vweird.f32 %v1232_v48  ;;  %v1257_v46 = vand.u32 2147483647, %v1232_v48 }
 0x4da   :  { %v1245_v20 = vor.u32 1.1754944e-38, %v1244_v60  ;;  %vm1243_vm5 = vcmp.eq.f32.partialorder %v1242_v14, 8.507059e+37  ;;  %1503 = vmatpush.msrb.mxu2 %v1484_v29  ;;  %v1446_v29 = vld [vmem:[%s7288_s3 + $0x158] sm:$0xff] }
 0x4db   :  { %v1260_v2 = vor.u32 1.1754944e-38, %v1259_v63  ;;  %vm1258_vm9 = vcmp.eq.f32.partialorder %v1257_v46, 8.507059e+37  ;;  %v1466_v63 = vld [vmem:[%s7352_s7 + $0x78] sm:$0xff]  ;;  %v1468_v46 = vld [vmem:[%s7352_s7 + $0x88] sm:$0xff] }
 0x4de   :  { %v5845_v57 = vpop.eup %5844 }
 0x4df   :  { %v5847_v50 = vpop.eup %5846  ;;  %v1234_v58 = vmul.f32 %v5845_v57, %v1231_v4  ;;  %vm1239_vm2 = vweird.f32 %v5845_v57  ;;  %v1488_v4 = vld [vmem:[%s7352_s7 + $0x128] sm:$0xff] }
 0x4e0   :  { %v1249_v0 = vmul.f32 %v5847_v50, %v1232_v48  ;;  %vm1240_vm4 = vmor %vm1238_vm3, %vm1239_vm2  ;;  %vm1254_vm6 = vweird.f32 %v5847_v50  ;;  %v1489_v48 = vld [vmem:[%s7352_s7 + $0x130] sm:$0xff]  ;;  %1531 = vmatpush.msrb.mxu3 %v1488_v4 }
 0x4e1   :  { %v1235_v59 = vsub.f32 1.0, %v1234_v58  ;;  %vm1255_vm8 = vmor %vm1253_vm7, %vm1254_vm6  ;;  %1560 = vmatpush.msra.mxu0 %v1489_v48  ;;  %v1482_v58 = vld [vmem:[%s7352_s7 + $0xf8] sm:$0xff]  ;;  %v1449_v4 = vld [vmem:[%s7288_s3 + $0x170] sm:$0xff] }
 0x4e2   :  { %v1250_v16 = vsub.f32 1.0, %v1249_v0  ;;  %1532 = vmatpush.msrb.mxu3 %v1485_v54  ;;  %v1483_v0 = vld [vmem:[%s7352_s7 + $0x100] sm:$0xff]  ;;  %v1450_v48 = vld [vmem:[%s7288_s3 + $0x178] sm:$0xff] }
 0x4e3   :  { %v1236_v40 = vmul.f32 %v5845_v57, %v1235_v59  ;;  %1561 = vmatpush.msra.mxu0 %v1486_v41  ;;  %v1478_v59 = vld [vmem:[%s7352_s7 + $0xd8] sm:$0xff]  ;;  %v1447_v54 = vld [vmem:[%s7288_s3 + $0x160] sm:$0xff]  ;;  %v7427_v41 = vld [vmem:[%s7403_s11 + $0x150] sm:$0xff] }
 0x4e4   :  { %v1251_v19 = vmul.f32 %v5847_v50, %v1250_v16  ;;  %v1479_v16 = vld [vmem:[%s7352_s7 + $0xe0] sm:$0xff]  ;;  %1533 = vmatpush.msrb.mxu3 %v1482_v58  ;;  %v1444_v58 = vld [vmem:[%s7288_s3 + $0x148] sm:$0xff] }
 0x4e5   :  { %v1237_v17 = vadd.f32 %v5845_v57, %v1236_v40  ;;  %v1480_v40 = vld [vmem:[%s7352_s7 + $0xe8] sm:$0xff]  ;;  %1562 = vmatpush.msra.mxu0 %v1483_v0 }
 0x4e6   :  { %v1252_v18 = vadd.f32 %v5847_v50, %v1251_v19  ;;  %v1476_v19 = vld [vmem:[%s7352_s7 + $0xc8] sm:$0xff]  ;;  %1534 = vmatpush.msrb.mxu3 %v1479_v16 }
 0x4e7   :  { %v1241_v23 = vsel %vm1240_vm4, %v5845_v57, %v1237_v17  ;;  %1563 = vmatpush.msra.mxu0 %v1480_v40  ;;  %v1440_v40 = vld [vmem:[%s7288_s3 + $0x128] sm:$0xff] }
 0x4e8   :  { %v1246_v5 = vsel %vm1243_vm5, %v1245_v20, %v1241_v23  ;;  %v1256_v45 = vsel %vm1255_vm8, %v5847_v50, %v1252_v18  ;;  %v1481_v50 = vld [vmem:[%s7352_s7 + $0xf0] sm:$0xff]  ;;  %1535 = vmatpush.msrb.mxu3 %v1476_v19  ;;  %v1474_v20 = vld [vmem:[%s7352_s7 + $0xb8] sm:$0xff]  ;;  %v7440_v19 = vld [vmem:[%s7403_s11 + $0x120] sm:$0xff] }
 0x4e9   :  { %v1264_v44 = vmul.f32 %v1263_v9, %v1246_v5  ;;  %v1261_v49 = vsel %vm1258_vm9, %v1260_v2, %v1256_v45  ;;  %1504 = vmatpush.msrb.mxu2 %v1481_v50  ;;  %1564 = vmatpush.msra.mxu0 %v1477_v11  ;;  %v1469_v23 = vld [vmem:[%s7352_s7 + $0x90] sm:$0xff]  ;;  %v1470_v9 = vld [vmem:[%s7352_s7 + $0x98] sm:$0xff]  ;;  %v1471_v5 = vld [vmem:[%s7352_s7 + $0xa0] sm:$0xff] }
 0x4ea   :  { %v1267_v51 = vsub.f32 1.0, %v1261_v49  ;;  %v1269_v37 = vmul.f32 %v1261_v49, %v7280_v8  ;;  %1536 = vmatpush.msrb.mxu3 %v1473_v12  ;;  %v1463_v45 = vld [vmem:[%s7352_s7 + $0x60] sm:$0xff]  ;;  %v1464_v2 = vld [vmem:[%s7352_s7 + $0x68] sm:$0xff]  ;;  %v1465_v49 = vld [vmem:[%s7352_s7 + $0x70] sm:$0xff] }
 0x4eb   :  { %v1265_v28 = vadd.f32 %v1264_v44, %v7322_v6  ;;  %1505 = vmatpush.msrb.mxu2 %v1478_v59  ;;  %1565 = vmatpush.msra.mxu0 %v1474_v20  ;;  %v1467_v44 = vld [vmem:[%s7352_s7 + $0x80] sm:$0xff]  ;;  %v7434_v59 = vld [vmem:[%s7403_s11 + $0x138] sm:$0xff] }
 0x4ec   :  { %1537 = vmatpush.msrb.mxu3 %v1470_v9  ;;  %v1443_v50 = vld [vmem:[%s7288_s3 + $0x140] sm:$0xff]  ;;  %v1438_v9 = vld [vmem:[%s7288_s3 + $0x118] sm:$0xff] }
 0x4ed   :  { %5848 = vtanh.f32 %v1265_v28  ;;  %1566 = vmatpush.msra.mxu0 %v1471_v5  ;;  %v1434_v5 = vld [vmem:[%s7288_s3 + $0xf8] sm:$0xff] }
 0x4ee   :  { %1538 = vmatpush.msrb.mxu3 %v1467_v44  ;;  %v7461_v44 = vld [vmem:[%s7403_s11 + $0xf0] sm:$0xff] }
 0x4ef   :  { %1567 = vmatpush.msra.mxu0 %v1468_v46  ;;  %v7465_v46 = vld [vmem:[%s7403_s11 + $0x170] sm:$0xff] }
 0x4f0   :  { %1539 = vmatpush.msrb.mxu3 %v1464_v2  ;;  %v1432_v2 = vld [vmem:[%s7288_s3 + $0xe8] sm:$0xff] }
 0x4f1   :  { %1568 = vmatpush.msra.mxu0 %v1465_v49 }
 0x4f3   :  { %v5849_v1 = vpop.eup %5848 }
 0x4f4   :  { %v1268_v34 = vmul.f32 %v5849_v1, %v1267_v51  ;;  %v1460_v51 = vld [vmem:[%s7352_s7 + $0x48] sm:$0xff]  ;;  %v1461_v1 = vld [vmem:[%s7352_s7 + $0x50] sm:$0xff] }
 0x4f5   :  { %1540 = vmatpush.msrb.mxu3 %v1461_v1  ;;  %v7472_v1 = vld [vmem:[%s7403_s11 + $0xd8] sm:$0xff] }
 0x4f6   :  { %v7326_v42 = vadd.f32 %v1269_v37, %v1268_v34  ;;  %v1462_v34 = vld [vmem:[%s7352_s7 + $0x58] sm:$0xff]  ;;  %v1457_v37 = vld [vmem:[%s7352_s7 + $0x30] sm:$0xff] }
 0x4f7   :  { %1569 = vmatpush.msra.mxu0 %v1462_v34  ;;  %1541 = vmatpush.msrb.mxu3 %v1458_v47  ;;  %v7475_v34 = vld [vmem:[%s7403_s11 + $0x158] sm:$0xff] }
 0x4f8   :  { %1287 = vmatmul.f32.vlgmr.msra.gmra.mxu3 %v7326_v42  ;;  %1307 = vmatmul.f32.vlgmr.msrb.gmra.mxu0 %v7326_v42  ;;  %v1387_v12 = vrot.slane %v7326_v42, 4 }
 0x4f9   :  { %1327 = vmatmul.f32.vlgmr.msrb.gmra.mxu1 %v7326_v42  ;;  %1570 = vmatpush.msra.mxu0 %v1459_v21  ;;  %v1429_v21 = vld [vmem:[%s7288_s3 + $0xd0] sm:$0xff] }
 0x4fa   :  { %1542 = vmatpush.msrb.mxu3 %v1455_v26  ;;  %1762 = vmatpush.msrb.mxu1 %v7465_v46  ;;  %v7485_v26 = vld [vmem:[%s7403_s11 + $0xc0] sm:$0xff] }
 0x4fb   :  { %1571 = vmatpush.msra.mxu0 %v1456_v33  ;;  %v7488_v33 = vld [vmem:[%s7403_s11 + $0x140] sm:$0xff] }
 0x4fc   :  { %1543 = vmatpush.msrb.mxu3 %v1452_v38  ;;  %1763 = vmatpush.msrb.mxu1 %v7475_v34  ;;  %v1405_v38 = vld [vmem:[%s7288_s3 + $0x10] sm:$0xff] }
 0x4fe   :  { %1644 = vmatpush.msra.mxu3 %v1450_v48  ;;  %1764 = vmatpush.msrb.mxu1 %v7488_v33  ;;  %v7509_v48 = vld [vmem:[%s7403_s11 + $0xa8] sm:$0xff] }
 0x500   :  { %1645 = vmatpush.msra.mxu3 %v1447_v54  ;;  %v1423_v54 = vld [vmem:[%s7288_s3 + $0xa0] sm:$0xff] }
 0x501   :  { %1602 = vmatmul.f32.vlgmr.msra.gmra.mxu1 %v7334_v15 }
 0x502   :  { %1646 = vmatpush.msra.mxu3 %v1444_v58  ;;  %v1419_v58 = vld [vmem:[%s7288_s3 + $0x80] sm:$0xff] }
 0x509   :  { %1605 = vmatmul.f32.gmra.mxu1 %v7340_v62 }
 0x511   :  { %1608 = vmatmul.f32.gmra.mxu1 %v7346_v7 }
 0x575   :  { %v1308_v39 = vpop.f32.mrf.mxu0 }
 0x576   :  { %v1334_v55 = vrot.slane %v1308_v39, 4  ;;  %v1453_v39 = vld [vmem:[%s7352_s7 + $0x10] sm:$0xff] }
 0x577   :  { %1572 = vmatpush.msra.mxu0 %v1453_v39 }
 0x578   :  { %v1338_v57 = vadd.f32 %v1334_v55, %v7302_v31  ;;  %v1475_v31 = vld [vmem:[%s7352_s7 + $0xc0] sm:$0xff]  ;;  %v7422_v55 = vld [vmem:[%s7403_s11 + $0x168] sm:$0xff]  ;;  %s8725_s7 = sld [smem:[%s10240_s0 + %s6334_s4]]  }
 0x579   :  { %1506 = vmatpush.msrb.mxu2 %v1475_v31  ;;  %1742 = vmatpush.msrb.mxu0 %v7422_v55 }
 0x57a   :  { %v5637_v60 = vmul.f32 -1.442695, %v1338_v57 }
 0x57b   :  { %v1288_v14 = vpop.f32.mrf.mxu3  ;;  %1507 = vmatpush.msrb.mxu2 %v1472_v13  ;;  %1743 = vmatpush.msrb.mxu0 %v7427_v41 }
 0x57c   :  { %5850 = vpow2.f32 %v5637_v60  ;;  %v1333_v10 = vrot.slane %v1288_v14, 4  ;;  %v1328_v60 = vpop.f32.mrf.mxu1  ;;  %v1441_v14 = vld [vmem:[%s7288_s3 + $0x130] sm:$0xff] }
 0x57d   :  { %1508 = vmatpush.msrb.mxu2 %v1469_v23  ;;  %1744 = vmatpush.msrb.mxu0 %v7434_v59  ;;  %v1377_v11 = vadd.f32 %v7270_v56, %v1328_v60  ;;  %v1437_v23 = vld [vmem:[%s7288_s3 + $0x110] sm:$0xff]  ;;  %v7456_v56 = vld [vmem:[%s7403_s11 + $0x108] sm:$0xff]  ;;  %v7527_v60 = vld [vmem:[%s7403_s11 + $0x78] sm:$0xff] }
 0x57e   :  { %v1337_v17 = vadd.f32 %v1333_v10, %v7299_v53  ;;  %1647 = vmatpush.msra.mxu3 %v1441_v14  ;;  %v1416_v14 = vld [vmem:[%s7288_s3 + $0x68] sm:$0xff] }
 0x57f   :  { %1509 = vmatpush.msrb.mxu2 %v1466_v63  ;;  %1745 = vmatpush.msrb.mxu0 %v7440_v19  ;;  %v1435_v63 = vld [vmem:[%s7288_s3 + $0x100] sm:$0xff]  ;;  %v1379_v49 = vrot.slane %v1377_v11, 4 }
 0x580   :  { %v5636_v18 = vmul.f32 -1.442695, %v1337_v17  ;;  %1648 = vmatpush.msra.mxu3 %v1438_v9  ;;  %v7540_v11 = vld [vmem:[%s7403_s11 + $0xe0] sm:$0xff]  ;;  %v1413_v9 = vld [vmem:[%s7288_s3 + $0x50] sm:$0xff] }
 0x581   :  { %1510 = vmatpush.msrb.mxu2 %v1463_v45  ;;  %1746 = vmatpush.msrb.mxu0 %v7456_v56  ;;  %v1431_v45 = vld [vmem:[%s7288_s3 + $0xe0] sm:$0xff] }
 0x582   :  { %v5851_v53 = vpop.eup %5850  ;;  %5852 = vpow2.f32 %v5636_v18  ;;  %1649 = vmatpush.msra.mxu3 %v1435_v63  ;;  %v7553_v63 = vld [vmem:[%s7403_s11 + $0xc8] sm:$0xff] }
 0x583   :  { %v7389_v28 = vadd.f32 1.0, %v5851_v53  ;;  %1511 = vmatpush.msrb.mxu2 %v1460_v51  ;;  %1747 = vmatpush.msrb.mxu0 %v7461_v44 }
 0x584   :  { %1650 = vmatpush.msra.mxu3 %v1432_v2 }
 0x585   :  { %5854 = vrcp.f32 %v7389_v28  ;;  %1512 = vmatpush.msrb.mxu2 %v1457_v37  ;;  %vm1367_vm0 = vweird.f32 %v7389_v28  ;;  %1748 = vmatpush.msrb.mxu0 %v7472_v1 }
 0x586   :  { %1651 = vmatpush.msra.mxu3 %v1429_v21 }
 0x587   :  { %1513 = vmatpush.msrb.mxu2 %v1454_v32  ;;  %1749 = vmatpush.msrb.mxu0 %v7485_v26 }
 0x588   :  { %v5853_v25 = vpop.eup %5852 }
 0x589   :  { %v7406_v24 = vadd.f32 1.0, %v5853_v25  ;;  %1514 = vmatpush.msrb.mxu2 %v1451_v36  ;;  %v1428_v25 = vld [vmem:[%s7288_s3 + $0xc8] sm:$0xff]  ;;  %v1371_v36 = vand.u32 2147483647, %v7389_v28  ;;  %1750 = vmatpush.msrb.mxu0 %v7509_v48 }
 0x58b   :  { %5856 = vrcp.f32 %v7406_v24  ;;  %v7412_v35 = vpop.eup %5854  ;;  %1615 = vmatpush.msra.mxu2 %v1449_v4  ;;  %vm1352_vm12 = vweird.f32 %v7406_v24  ;;  %v1358_v10 = vand.u32 2147483648, %v7406_v24  ;;  %v1356_v17 = vand.u32 2147483647, %v7406_v24  ;;  %v1426_v4 = vld [vmem:[%s7288_s3 + $0xb8] sm:$0xff] }
 0x58c   :  { %v1363_v43 = vmul.f32 %v7412_v35, %v7389_v28  ;;  %vm1368_vm15 = vweird.f32 %v7412_v35  ;;  %1652 = vmatpush.msra.mxu3 %v1426_v4  ;;  %vm1372_vm2 = vcmp.eq.f32.partialorder %v1371_v36, 8.507059e+37  ;;  %v7595_v4 = vld [vmem:[%s7403_s11 + $0x68] sm:$0xff] }
 0x58d   :  { %1616 = vmatpush.msra.mxu2 %v1446_v29  ;;  %v1359_v53 = vor.u32 1.1754944e-38, %v1358_v10  ;;  %vm1357_vm14 = vcmp.eq.f32.partialorder %v1356_v17, 8.507059e+37  ;;  %vm7496_vm1 = vmor %vm1367_vm0, %vm1368_vm15  ;;  %v7537_v10 = vld [vmem:[%s7403_s11 + $0x60] sm:$0xff] }
 0x58e   :  { %v1364_v16 = vsub.f32 1.0, %v1363_v43  ;;  %v1425_v43 = vld [vmem:[%s7288_s3 + $0xb0] sm:$0xff]  ;;  %1653 = vmatpush.msra.mxu3 %v1423_v54  ;;  %v7611_v54 = vld [vmem:[%s7403_s11 + $0x38] sm:$0xff] }
 0x58f   :  { %1617 = vmatpush.msra.mxu2 %v1443_v50  ;;  %v7522_v50 = vld [vmem:[%s7403_s11 + $0x110] sm:$0xff]  ;;  %10438 = vst [vmem:[#allocation8_spill] sm:$0xff] %v7611_v54 }
 0x590   :  { %v1365_v20 = vmul.f32 %v7412_v35, %v1364_v16  ;;  %v1420_v16 = vld [vmem:[%s7288_s3 + $0x88] sm:$0xff] }
 0x591   :  { %v5857_v57 = vpop.eup %5856  ;;  %1618 = vmatpush.msra.mxu2 %v1440_v40  ;;  %v7530_v40 = vld [vmem:[%s7403_s11 + $0xf8] sm:$0xff]  ;;  %1654 = vmatpush.msra.mxu3 %v1420_v16  ;;  %v7624_v16 = vld [vmem:[%s7403_s11 + $0x20] sm:$0xff] }
 0x592   :  { %v1348_v0 = vmul.f32 %v5857_v57, %v7406_v24  ;;  %vm1353_vm11 = vweird.f32 %v5857_v57  ;;  %v1366_v47 = vadd.f32 %v7412_v35, %v1365_v20  ;;  %v1373_v24 = vand.u32 2147483648, %v7389_v28  ;;  %10439 = vst [vmem:[#allocation4_spill] sm:$0xff] %v7624_v16 }
 0x593   :  { %vm7446_vm13 = vmor %vm1352_vm12, %vm1353_vm11  ;;  %1619 = vmatpush.msra.mxu2 %v1437_v23 }
 0x594   :  { %v1349_v31 = vsub.f32 1.0, %v1348_v0  ;;  %v1370_v28 = vsel %vm7496_vm1, %v7412_v35, %v1366_v47  ;;  %v1374_v29 = vor.u32 1.1754944e-38, %v1373_v24  ;;  %v1422_v35 = vld [vmem:[%s7288_s3 + $0x98] sm:$0xff]  ;;  %v1408_v47 = vld [vmem:[%s7288_s3 + $0x28] sm:$0xff] }
 0x595   :  { %1620 = vmatpush.msra.mxu2 %v1434_v5  ;;  %v7550_v5 = vld [vmem:[%s7403_s11 + $0x48] sm:$0xff] }
 0x596   :  { %v1350_v13 = vmul.f32 %v5857_v57, %v1349_v31  ;;  %v1375_v0 = vsel %vm1372_vm2, %v1374_v29, %v1370_v28  ;;  %v1417_v31 = vld [vmem:[%s7288_s3 + $0x70] sm:$0xff]  ;;  %v7588_v28 = vld [vmem:[%s7403_s11 + $0x80] sm:$0xff] }
 0x597   :  { %1621 = vmatpush.msra.mxu2 %v1431_v45  ;;  %1655 = vmatpush.msra.mxu3 %v1417_v31  ;;  %v1389_v23 = vmul.f32 %v1387_v12, %v1375_v0  ;;  %v1411_v45 = vld [vmem:[%s7288_s3 + $0x40] sm:$0xff] }
 0x598   :  { %v1351_v18 = vadd.f32 %v5857_v57, %v1350_v13  ;;  %v1384_v13 = vsub.f32 1.0, %v1375_v0  ;;  %v7600_v29 = vld [vmem:[%s7403_s11 + $0x160] sm:$0xff]  ;;  %v7620_v0 = vld [vmem:[%s7403_s11 + $0x148] sm:$0xff] }
 0x599   :  { %1622 = vmatpush.msra.mxu2 %v1428_v25  ;;  %v7568_v25 = vld [vmem:[%s7403_s11 + $0x18] sm:$0xff]  ;;  %v7647_v31 = vld [vmem:[%s7403_s11 + $0x100] sm:$0xff] }
 0x59a   :  { %v1355_v51 = vsel %vm7446_vm13, %v5857_v57, %v1351_v18  ;;  %v7519_v57 = vld [vmem:[%s7403_s11 + $0x90] sm:$0xff]  ;;  %v1414_v18 = vld [vmem:[%s7288_s3 + $0x58] sm:$0xff]  ;;  %10436 = vst [vmem:[#allocation2_spill] sm:$0xff] %v7568_v25 }
 0x59b   :  { %v1360_v37 = vsel %vm1357_vm14, %v1359_v53, %v1355_v51  ;;  %1623 = vmatpush.msra.mxu2 %v1425_v43  ;;  %1751 = vmatpush.msrb.mxu0 %v7519_v57  ;;  %v1410_v53 = vld [vmem:[%s7288_s3 + $0x38] sm:$0xff]  ;;  %v7563_v51 = vld [vmem:[%s7403_s11 + $0xb0] sm:$0xff] }
 0x59c   :  { %v1381_v32 = vmul.f32 %v1379_v49, %v1360_v37  ;;  %1656 = vmatpush.msra.mxu3 %v1414_v18  ;;  %v7560_v49 = vld [vmem:[%s7403_s11 + $0x30] sm:$0xff]  ;;  %v1407_v37 = vld [vmem:[%s7288_s3 + $0x20] sm:$0xff]  ;;  %v7592_v43 = vld [vmem:[%s7403_s11 + $0x178] sm:$0xff] }
 0x59d   :  { %1624 = vmatpush.msra.mxu2 %v1422_v35  ;;  %1752 = vmatpush.msrb.mxu0 %v7527_v60  ;;  %v7604_v35 = vld [vmem:[%s7403_s11 + $0x50] sm:$0xff] }
 0x59e   :  { %v1382_v39 = vadd.f32 %v1381_v32, %v7322_v6  ;;  %v7512_v6 = vld [vmem:[%s7403_s11 + $0x128] sm:$0xff]  ;;  %1657 = vmatpush.msra.mxu3 %v1411_v45  ;;  %v7578_v32 = vld [vmem:[%s7403_s11 + $0x98] sm:$0xff]  ;;  %v7689_v18 = vld [vmem:[%s7403_s11 + $0x70] sm:$0xff] }
 0x59f   :  { %1765 = vmatpush.msrb.mxu1 %v7512_v6  ;;  %1625 = vmatpush.msra.mxu2 %v1419_v58  ;;  %v1400_v58 = vsel %vm1391_vm10, %v7280_v8, %v1156_v27  ;;  %v7637_v27 = vld [vmem:[%s7403_s11 + $0x118] sm:$0xff]  ;;  %v10441_v8 = vmov 0.0   ;;  %v7712_v45 = vld [vmem:[%s7403_s11 + $0x28] sm:$0xff] }
 0x5a0   :  { %5858 = vtanh.f32 %v1382_v39  ;;  %1753 = vmatpush.msrb.mxu0 %v7537_v10  ;;  %1658 = vmatpush.msra.mxu3 %v1408_v47  ;;  %v7585_v39 = vld [vmem:[%s7403_s11] sm:$0xff]  ;;  %10444 = vst [vmem:[#allocation9_spill] sm:$0xff] %v7712_v45 }
 0x5a1   :  { %1766 = vmatpush.msrb.mxu1 %v7522_v50  ;;  %1626 = vmatpush.msra.mxu2 %v1416_v14  ;;  %10437 = vst [vmem:[#allocation3_spill] sm:$0xff] %v7585_v39  ;;  %v7628_v14 = vld [vmem:[%s7403_s11 + $0x130] sm:$0xff] }
 0x5a2   :  { %1754 = vmatpush.msrb.mxu0 %v7550_v5  ;;  %1659 = vmatpush.msra.mxu3 %v1405_v38 }
 0x5a3   :  { %1767 = vmatpush.msrb.mxu1 %v7530_v40  ;;  %1627 = vmatpush.msra.mxu2 %v1413_v9  ;;  %v7685_v9 = vld [vmem:[%s7403_s11 + $0x88] sm:$0xff] }
 0x5a4   :  { %1755 = vmatpush.msrb.mxu0 %v7560_v49 }
 0x5a5   :  { %1768 = vmatpush.msrb.mxu1 %v7540_v11  ;;  %1628 = vmatpush.msra.mxu2 %v1410_v53  ;;  %v7703_v53 = vld [vmem:[%s7403_s11 + $0x40] sm:$0xff] }
 0x5a6   :  { %v5859_v17 = vpop.eup %5858  ;;  %1756 = vmatpush.msrb.mxu0 %v7568_v25 }
 0x5a7   :  { %v1385_v20 = vmul.f32 %v5859_v17, %v1384_v13  ;;  %1769 = vmatpush.msrb.mxu1 %v7553_v63  ;;  %1629 = vmatpush.msra.mxu2 %v1407_v37  ;;  %v1401_v13 = vsel %vm1391_vm10, %v7137_v61, %v925_v3  ;;  %v7660_v17 = vld [vmem:[%s7403_s11 + $0xd0] sm:$0xff]  ;;  %v7674_v3 = vld [vmem:[%s7403_s11 + $0xa0] sm:$0xff]  ;;  %v10442_v61 = vrot.slane %v10431_v22, 4  ;;  %v7696_v22 = vld [vmem:[%s7403_s11 + $0x58] sm:$0xff] }
 0x5a8   :  { %1757 = vmatpush.msrb.mxu0 %v7585_v39 }
 0x5a9   :  { %v1390_v2 = vadd.f32 %v1389_v23, %v1385_v20  ;;  %1770 = vmatpush.msrb.mxu1 %v7563_v51  ;;  %v10443_v20 = vld [vmem:[#allocation22_spill] sm:$0xff] }
 0x5aa   :  { %v1402_v23 = vsel %vm1391_vm10, %v10443_v20, %v10442_v61 }
 0x5ab   :  { %v7572_v21 = vsel %vm1391_vm10, %v7326_v42, %v1390_v2  ;;  %v1397_v24 = vrot.slane %v1390_v2, 4  ;;  %v1404_v42 = vld [vmem:[%s7288_s3 + $0x8] sm:$0xff]  ;;  %1771 = vmatpush.msrb.mxu1 %v7578_v32  ;;  %v7717_v2 = vld [vmem:[%s7403_s11 + $0x10] sm:$0xff]  ;;  %s8681_s3 = sld [smem:[%s10240_s0 + %s6333_s30]]   ;;  %s6348_s30 = smov 36  }
 0x5ac   :  { %1611 = vmatmul.f32.gmra.mxu1 %v7572_v21  ;;  %1630 = vmatpush.msra.mxu2 %v1404_v42  ;;  %10445 = vst [vmem:[#allocation6_spill] sm:$0xff] %v7717_v2  ;;  %s5587_s4 = sld [smem:[%s10240_s0 + %s6348_s30]]  }
 0x5ad   :  { %v1399_v36 = vsel %vm1391_vm10, %v1397_v24, %v1387_v12  ;;  %1772 = vmatpush.msrb.mxu1 %v7588_v28  ;;  %v7656_v12 = vld [vmem:[%s7403_s11 + $0xe8] sm:$0xff] }
 0x5ae   :  { %1515 = vmatmul.f32.vlgmr.msrb.gmra.mxu2 %v1399_v36  ;;  %1544 = vmatmul.f32.vlgmr.msrb.gmra.mxu3 %v1399_v36 }
 0x5af   :  { %1573 = vmatmul.f32.vlgmr.msra.gmra.mxu0 %v1399_v36  ;;  %1782 = vmatpush.msrb.mxu2 %v7592_v43 }
 0x5b0   :  { %1853 = vmatpush.msrb.mxu3 %v7422_v55  ;;  %1773 = vmatpush.msrb.mxu1 %v7595_v4 }
 0x5b1   :  { %1873 = vmatpush.msra.mxu0 %v7465_v46  ;;  %1783 = vmatpush.msrb.mxu2 %v7600_v29 }
 0x5b2   :  { %1854 = vmatpush.msrb.mxu3 %v7427_v41  ;;  %1774 = vmatpush.msrb.mxu1 %v7604_v35 }
 0x5b3   :  { %1874 = vmatpush.msra.mxu0 %v7475_v34  ;;  %1784 = vmatpush.msrb.mxu2 %v7620_v0 }
 0x5b4   :  { %1775 = vmatpush.msrb.mxu1 %v7611_v54  ;;  %1855 = vmatpush.msrb.mxu3 %v7434_v59 }
 0x5b5   :  { %1875 = vmatpush.msra.mxu0 %v7488_v33  ;;  %1785 = vmatpush.msrb.mxu2 %v7628_v14 }
 0x5b6   :  { %1518 = vmatmul.f32.gmra.mxu2 %v1400_v58  ;;  %1547 = vmatmul.f32.gmra.mxu3 %v1400_v58 }
 0x5b7   :  { %1576 = vmatmul.f32.gmra.mxu0 %v1400_v58  ;;  %1776 = vmatpush.msrb.mxu1 %v7624_v16  ;;  %v1673_v58 = vld [vmem:[%s5563_s19] sm:$0x7]  ;;  %s8799_s19 = sld [smem:[%s10240_s0 + %s6337_s16]]  }
 0x5b8   :  { %1856 = vmatpush.msrb.mxu3 %v7440_v19  ;;  %1876 = vmatpush.msra.mxu0 %v7512_v6  ;;  %v7850_v20 = vperm.slane %v1673_v58, 0 }
 0x5b9   :  { %1777 = vmatpush.msrb.mxu1 %v7632_v52  ;;  %1786 = vmatpush.msrb.mxu2 %v7637_v27 }
 0x5ba   :  { %1778 = vmatmul.f32.vlgmr.msrb.gmra.mxu1 %v10441_v8  ;;  %1857 = vmatpush.msrb.mxu3 %v7456_v56  ;;  %10453 = vst [vmem:[#allocation11_spill] sm:$0xff] %v7850_v20 }
 0x5bb   :  { %1893 = vmatpush.msra.mxu1 %v7592_v43  ;;  %1787 = vmatpush.msrb.mxu2 %v7647_v31 }
 0x5bc   :  { %1877 = vmatpush.msra.mxu0 %v7522_v50  ;;  %1858 = vmatpush.msrb.mxu3 %v7461_v44 }
 0x5bd   :  { %1894 = vmatpush.msra.mxu1 %v7600_v29  ;;  %1788 = vmatpush.msrb.mxu2 %v7656_v12 }
 0x5be   :  { %1521 = vmatmul.f32.gmra.mxu2 %v1401_v13  ;;  %1550 = vmatmul.f32.gmra.mxu3 %v1401_v13 }
 0x5bf   :  { %1579 = vmatmul.f32.gmra.mxu0 %v1401_v13  ;;  %1895 = vmatpush.msra.mxu1 %v7620_v0 }
 0x5c0   :  { %1878 = vmatpush.msra.mxu0 %v7530_v40  ;;  %1789 = vmatpush.msrb.mxu2 %v7660_v17 }
 0x5c1   :  { %1859 = vmatpush.msrb.mxu3 %v7472_v1  ;;  %1896 = vmatpush.msra.mxu1 %v7628_v14 }
 0x5c2   :  { %1879 = vmatpush.msra.mxu0 %v7540_v11  ;;  %1790 = vmatpush.msrb.mxu2 %v7667_v30 }
 0x5c3   :  { %1860 = vmatpush.msrb.mxu3 %v7485_v26  ;;  %1897 = vmatpush.msra.mxu1 %v7637_v27 }
 0x5c4   :  { %1791 = vmatpush.msrb.mxu2 %v7674_v3  ;;  %1880 = vmatpush.msra.mxu0 %v7553_v63 }
 0x5c5   :  { %1861 = vmatpush.msrb.mxu3 %v7509_v48  ;;  %1898 = vmatpush.msra.mxu1 %v7647_v31 }
 0x5c6   :  { %1524 = vmatmul.f32.gmra.mxu2 %v1402_v23  ;;  %1553 = vmatmul.f32.gmra.mxu3 %v1402_v23 }
 0x5c7   :  { %1582 = vmatmul.f32.gmra.mxu0 %v1402_v23  ;;  %1792 = vmatpush.msrb.mxu2 %v7685_v9 }
 0x5c8   :  { %1881 = vmatpush.msra.mxu0 %v7563_v51  ;;  %1862 = vmatpush.msrb.mxu3 %v7519_v57 }
 0x5c9   :  { %1793 = vmatpush.msrb.mxu2 %v7689_v18  ;;  %1899 = vmatpush.msra.mxu1 %v7656_v12 }
 0x5ca   :  { %1882 = vmatpush.msra.mxu0 %v7578_v32  ;;  %1863 = vmatpush.msrb.mxu3 %v7527_v60 }
 0x5cb   :  { %1794 = vmatpush.msrb.mxu2 %v7696_v22  ;;  %1900 = vmatpush.msra.mxu1 %v7660_v17 }
 0x5cc   :  { %1883 = vmatpush.msra.mxu0 %v7588_v28  ;;  %1864 = vmatpush.msrb.mxu3 %v7537_v10 }
 0x5cd   :  { %1795 = vmatpush.msrb.mxu2 %v7703_v53  ;;  %1901 = vmatpush.msra.mxu1 %v7667_v30 }
 0x5ce   :  { %1631 = vmatmul.f32.vlgmr.msra.gmra.mxu2 %v7334_v15  ;;  %1660 = vmatmul.f32.vlgmr.msra.gmra.mxu3 %v7334_v15 }
 0x5cf   :  { %1758 = vmatmul.f32.vlgmr.msrb.gmra.mxu0 %v10441_v8  ;;  %1796 = vmatpush.msrb.mxu2 %v7712_v45 }
 0x5d0   :  { %1884 = vmatpush.msra.mxu0 %v7595_v4  ;;  %1865 = vmatpush.msrb.mxu3 %v7550_v5 }
 0x5d1   :  { %1797 = vmatpush.msrb.mxu2 %v7717_v2  ;;  %1902 = vmatpush.msra.mxu1 %v7674_v3 }
 0x5d2   :  { %1885 = vmatpush.msra.mxu0 %v7604_v35  ;;  %1866 = vmatpush.msrb.mxu3 %v7560_v49 }
 0x5d3   :  { %1976 = vmatpush.msra.mxu2 %v7422_v55  ;;  %1903 = vmatpush.msra.mxu1 %v7685_v9 }
 0x5d4   :  { %1886 = vmatpush.msra.mxu0 %v7611_v54  ;;  %1867 = vmatpush.msrb.mxu3 %v7568_v25 }
 0x5d5   :  { %1977 = vmatpush.msra.mxu2 %v7427_v41  ;;  %1904 = vmatpush.msra.mxu1 %v7689_v18 }
 0x5d6   :  { %1634 = vmatmul.f32.gmra.mxu2 %v7340_v62  ;;  %1663 = vmatmul.f32.gmra.mxu3 %v7340_v62  ;;  %v1603_v62 = vpop.f32.mrf.mxu1 }
 0x5d7   :  { %1887 = vmatpush.msra.mxu0 %v7624_v16  ;;  %1868 = vmatpush.msrb.mxu3 %v7585_v39 }
 0x5d8   :  { %1978 = vmatpush.msra.mxu2 %v7434_v59  ;;  %1905 = vmatpush.msra.mxu1 %v7696_v22 }
 0x5d9   :  { %1888 = vmatpush.msra.mxu0 %v7632_v52  ;;  %1996 = vmatpush.msra.mxu3 %v7465_v46 }
 0x5da   :  { %1906 = vmatpush.msra.mxu1 %v7703_v53  ;;  %1979 = vmatpush.msra.mxu2 %v7440_v19 }
 0x5db   :  { %2016 = vmatpush.msrb.mxu0 %v7592_v43  ;;  %1997 = vmatpush.msra.mxu3 %v7475_v34 }
 0x5dc   :  { %1907 = vmatpush.msra.mxu1 %v7712_v45  ;;  %1980 = vmatpush.msra.mxu2 %v7456_v56 }
 0x5dd   :  { %2017 = vmatpush.msrb.mxu0 %v7600_v29  ;;  %1998 = vmatpush.msra.mxu3 %v7488_v33 }
 0x5de   :  { %1637 = vmatmul.f32.gmra.mxu2 %v7346_v7  ;;  %1666 = vmatmul.f32.gmra.mxu3 %v7346_v7  ;;  %v7835_v47 = vpop.f32.mrf.mxu1 }
 0x5df   :  { %1908 = vmatpush.msra.mxu1 %v7717_v2  ;;  %2018 = vmatpush.msrb.mxu0 %v7620_v0  ;;  %10447 = vst [vmem:[#allocation10_spill] sm:$0xff] %v7835_v47 }
 0x5e0   :  { %1981 = vmatpush.msra.mxu2 %v7461_v44  ;;  %1999 = vmatpush.msra.mxu3 %v7512_v6 }
 0x5e1   :  { %2084 = vmatpush.msrb.mxu1 %v7422_v55  ;;  %2019 = vmatpush.msrb.mxu0 %v7628_v14 }
 0x5e2   :  { %1982 = vmatpush.msra.mxu2 %v7472_v1  ;;  %2000 = vmatpush.msra.mxu3 %v7522_v50 }
 0x5e3   :  { %2085 = vmatpush.msrb.mxu1 %v7427_v41  ;;  %2020 = vmatpush.msrb.mxu0 %v7637_v27 }
 0x5e4   :  { %2001 = vmatpush.msra.mxu3 %v7530_v40  ;;  %1983 = vmatpush.msra.mxu2 %v7485_v26 }
 0x5e5   :  { %2086 = vmatpush.msrb.mxu1 %v7434_v59  ;;  %2021 = vmatpush.msrb.mxu0 %v7647_v31 }
 0x5e6   :  { %1640 = vmatmul.f32.gmra.mxu2 %v7572_v21  ;;  %1669 = vmatmul.f32.gmra.mxu3 %v7572_v21  ;;  %v7846_v42 = vpop.f32.mrf.mxu1 }
 0x5e7   :  { %2002 = vmatpush.msra.mxu3 %v7540_v11  ;;  %1984 = vmatpush.msra.mxu2 %v7509_v48  ;;  %10451 = vst [vmem:[#allocation21_spill] sm:$0xff] %v7846_v42 }
 0x5e8   :  { %2087 = vmatpush.msrb.mxu1 %v7440_v19  ;;  %2022 = vmatpush.msrb.mxu0 %v7656_v12 }
 0x5e9   :  { %2003 = vmatpush.msra.mxu3 %v7553_v63  ;;  %1985 = vmatpush.msra.mxu2 %v7519_v57 }
 0x5ea   :  { %2088 = vmatpush.msrb.mxu1 %v7456_v56  ;;  %2023 = vmatpush.msrb.mxu0 %v7660_v17 }
 0x5eb   :  { %2004 = vmatpush.msra.mxu3 %v7563_v51  ;;  %1986 = vmatpush.msra.mxu2 %v7527_v60 }
 0x5ec   :  { %2089 = vmatpush.msrb.mxu1 %v7461_v44  ;;  %2024 = vmatpush.msrb.mxu0 %v7667_v30 }
 0x5ed   :  { %2005 = vmatpush.msra.mxu3 %v7578_v32  ;;  %1987 = vmatpush.msra.mxu2 %v7537_v10 }
 0x5ee   :  { %1798 = vmatmul.f32.vlgmr.msrb.gmra.mxu2 %v10441_v8  ;;  %2090 = vmatpush.msrb.mxu1 %v7472_v1 }
 0x5ef   :  { %2025 = vmatpush.msrb.mxu0 %v7674_v3  ;;  %2006 = vmatpush.msra.mxu3 %v7588_v28 }
 0x5f0   :  { %2091 = vmatpush.msrb.mxu1 %v7485_v26  ;;  %1988 = vmatpush.msra.mxu2 %v7550_v5 }
 0x5f1   :  { %2026 = vmatpush.msrb.mxu0 %v7685_v9  ;;  %2007 = vmatpush.msra.mxu3 %v7595_v4 }
 0x5f2   :  { %2092 = vmatpush.msrb.mxu1 %v7509_v48  ;;  %1989 = vmatpush.msra.mxu2 %v7560_v49 }
 0x5f3   :  { %2027 = vmatpush.msrb.mxu0 %v7689_v18  ;;  %2008 = vmatpush.msra.mxu3 %v7604_v35 }
 0x5f4   :  { %2093 = vmatpush.msrb.mxu1 %v7519_v57  ;;  %1990 = vmatpush.msra.mxu2 %v7568_v25 }
 0x5f5   :  { %2028 = vmatpush.msrb.mxu0 %v7696_v22  ;;  %2009 = vmatpush.msra.mxu3 %v7611_v54 }
 0x5f6   :  { %2094 = vmatpush.msrb.mxu1 %v7527_v60  ;;  %1991 = vmatpush.msra.mxu2 %v7585_v39 }
 0x5f7   :  { %2029 = vmatpush.msrb.mxu0 %v7703_v53  ;;  %2010 = vmatpush.msra.mxu3 %v7624_v16 }
 0x5f8   :  { %2095 = vmatpush.msrb.mxu1 %v7537_v10  ;;  %2104 = vmatpush.msrb.mxu2 %v7465_v46 }
 0x5f9   :  { %2030 = vmatpush.msrb.mxu0 %v7712_v45  ;;  %2011 = vmatpush.msra.mxu3 %v7632_v52 }
 0x5fa   :  { %2096 = vmatpush.msrb.mxu1 %v7550_v5  ;;  %2105 = vmatpush.msrb.mxu2 %v7475_v34 }
 0x5fb   :  { %2031 = vmatpush.msrb.mxu0 %v7717_v2 }
 0x5fc   :  { %2097 = vmatpush.msrb.mxu1 %v7560_v49  ;;  %2106 = vmatpush.msrb.mxu2 %v7488_v33 }
 0x5fe   :  { %2098 = vmatpush.msrb.mxu1 %v7568_v25  ;;  %2107 = vmatpush.msrb.mxu2 %v7512_v6 }
 0x600   :  { %2099 = vmatpush.msrb.mxu1 %v7585_v39  ;;  %2108 = vmatpush.msrb.mxu2 %v7522_v50 }
 0x602   :  { %2109 = vmatpush.msrb.mxu2 %v7530_v40 }
 0x604   :  { %2110 = vmatpush.msrb.mxu2 %v7540_v11 }
 0x606   :  { %2111 = vmatpush.msrb.mxu2 %v7553_v63 }
 0x608   :  { %2112 = vmatpush.msrb.mxu2 %v7563_v51 }
 0x60a   :  { %2113 = vmatpush.msrb.mxu2 %v7578_v32 }
 0x60c   :  { %2114 = vmatpush.msrb.mxu2 %v7588_v28 }
 0x60e   :  { %2115 = vmatpush.msrb.mxu2 %v7595_v4 }
 0x610   :  { %2116 = vmatpush.msrb.mxu2 %v7604_v35 }
 0x612   :  { %2117 = vmatpush.msrb.mxu2 %v7611_v54 }
 0x614   :  { %2118 = vmatpush.msrb.mxu2 %v7624_v16 }
 0x616   :  { %2119 = vmatpush.msrb.mxu2 %v7632_v52 }
 0x629   :  { %v7854_v8 = vpop.f32.mrf.mxu1 }
 0x62a   :  { %10455 = vst [vmem:[#allocation29_spill] sm:$0xff] %v7854_v8 }
 0x62c   :  { %v1574_v15 = vpop.f32.mrf.mxu0 }
 0x631   :  { %v1516_v7 = vpop.f32.mrf.mxu2  ;;  %v1545_v13 = vpop.f32.mrf.mxu3 }
 0x632   :  { %v1604_v61 = vadd.f32 %v1603_v62, %v1516_v7 }
 0x634   :  { %v7833_v37 = vpop.f32.mrf.mxu0 }
 0x635   :  { %10446 = vst [vmem:[#allocation7_spill] sm:$0xff] %v7833_v37 }
 0x637   :  { %v1779_v7 = vpop.f32.mrf.mxu1 }
 0x639   :  { %v7837_v21 = vpop.f32.mrf.mxu2 }
 0x63a   :  { %10448 = vst [vmem:[#allocation12_spill] sm:$0xff] %v7837_v21  ;;  %v7862_v21 = vperm.slane %v1673_v58, 1 }
 0x63c   :  { %v7839_v24 = vpop.f32.mrf.mxu0  ;;  %10458 = vst [vmem:[#allocation15_spill] sm:$0xff] %v7862_v21 }
 0x63d   :  { %10449 = vst [vmem:[#allocation19_spill] sm:$0xff] %v7839_v24  ;;  %v7857_v24 = vadd.f32 %v7850_v20, %v1604_v61 }
 0x63f   :  { %10456 = vst [vmem:[#allocation30_spill] sm:$0xff] %v7857_v24 }
 0x641   :  { %v7844_v36 = vpop.f32.mrf.mxu2 }
 0x642   :  { %10450 = vst [vmem:[#allocation24_spill] sm:$0xff] %v7844_v36  ;;  %v7860_v36 = vpop.f32.mrf.mxu3 }
 0x643   :  { %10457 = vst [vmem:[#allocation13_spill] sm:$0xff] %v7860_v36 }
 0x644   :  { %v7848_v38 = vpop.f32.mrf.mxu0 }
 0x645   :  { %10452 = vst [vmem:[#allocation20_spill] sm:$0xff] %v7848_v38 }
 0x649   :  { %v7852_v23 = vpop.f32.mrf.mxu2 }
 0x64a   :  { %10454 = vst [vmem:[#allocation32_spill] sm:$0xff] %v7852_v23  ;;  %v7868_v39 = vpop.f32.mrf.mxu3 }
 0x64b   :  { %10460 = vst [vmem:[#allocation26_spill] sm:$0xff] %v7868_v39 }
 0x64c   :  { %v1759_v37 = vpop.f32.mrf.mxu0 }
 0x64d   :  { %v1802_v47 = vadd.f32 %v1759_v37, %v7857_v24 }
 0x64f   :  { %v5638_v42 = vmul.f32 -1.442695, %v1802_v47 }
 0x651   :  { %5860 = vpow2.f32 %v5638_v42  ;;  %v1632_v38 = vpop.f32.mrf.mxu2 }
 0x652   :  { %v1633_v62 = vadd.f32 %v1632_v38, %v1545_v13 }
 0x654   :  { %v7865_v52 = vadd.f32 %v7862_v21, %v1633_v62  ;;  %v7874_v62 = vpop.f32.mrf.mxu3 }
 0x655   :  { %10463 = vst [vmem:[#allocation16_spill] sm:$0xff] %v7874_v62  ;;  %v7881_v62 = vperm.slane %v1673_v58, 2 }
 0x656   :  { %10459 = vst [vmem:[#allocation25_spill] sm:$0xff] %v7865_v52  ;;  %v1803_v8 = vadd.f32 %v1779_v7, %v7865_v52 }
 0x657   :  { %v5861_v23 = vpop.eup %5860  ;;  %10465 = vst [vmem:[#allocation27_spill] sm:$0xff] %v7881_v62 }
 0x658   :  { %v1810_v61 = vadd.f32 1.0, %v5861_v23  ;;  %v5639_v20 = vmul.f32 -1.442695, %v1803_v8 }
 0x659   :  { %v7870_v37 = vpop.f32.mrf.mxu2 }
 0x65a   :  { %10461 = vst [vmem:[#allocation14_spill] sm:$0xff] %v7870_v37  ;;  %5862 = vrcp.f32 %v1810_v61  ;;  %v1823_v52 = vand.u32 2147483648, %v1810_v61  ;;  %vm1817_vm4 = vweird.f32 %v1810_v61  ;;  %v1821_v2 = vand.u32 2147483647, %v1810_v61 }
 0x65b   :  { %5864 = vpow2.f32 %v5639_v20 }
 0x65c   :  { %v1661_v37 = vpop.f32.mrf.mxu3  ;;  %v1824_v25 = vor.u32 1.1754944e-38, %v1823_v52  ;;  %vm1822_vm6 = vcmp.eq.f32.partialorder %v1821_v2, 8.507059e+37 }
 0x660   :  { %v5863_v47 = vpop.eup %5862 }
 0x661   :  { %v5865_v36 = vpop.eup %5864  ;;  %v7872_v42 = vpop.f32.mrf.mxu2  ;;  %v1813_v38 = vmul.f32 %v5863_v47, %v1810_v61  ;;  %vm1818_vm3 = vweird.f32 %v5863_v47 }
 0x662   :  { %10462 = vst [vmem:[#allocation33_spill] sm:$0xff] %v7872_v42  ;;  %v1811_v13 = vadd.f32 1.0, %v5865_v36  ;;  %v7879_v42 = vld [vmem:[%s7776_s15] ss:$0 sm:$0xff]  ;;  %vm1819_vm5 = vmor %vm1817_vm4, %vm1818_vm3  ;;  %v1662_v36 = vadd.f32 %v1661_v37, %v1574_v15 }
 0x663   :  { %v1814_v7 = vsub.f32 1.0, %v1813_v38 }
 0x664   :  { %5866 = vrcp.f32 %v1811_v13  ;;  %v1838_v61 = vand.u32 2147483648, %v1811_v13  ;;  %vm1832_vm8 = vweird.f32 %v1811_v13 }
 0x665   :  { %v1815_v21 = vmul.f32 %v5863_v47, %v1814_v7 }
 0x667   :  { %v1816_v24 = vadd.f32 %v5863_v47, %v1815_v21 }
 0x669   :  { %v7876_v23 = vpop.f32.mrf.mxu2  ;;  %v1820_v38 = vsel %vm1819_vm5, %v5863_v47, %v1816_v24  ;;  %v1839_v24 = vor.u32 1.1754944e-38, %v1838_v61 }
 0x66a   :  { %10464 = vst [vmem:[#allocation18_spill] sm:$0xff] %v7876_v23  ;;  %v5867_v8 = vpop.eup %5866  ;;  %v1825_v45 = vsel %vm1822_vm6, %v1824_v25, %v1820_v38 }
 0x66b   :  { %v1828_v39 = vmul.f32 %v5867_v8, %v1811_v13  ;;  %vm1833_vm7 = vweird.f32 %v5867_v8 }
 0x66c   :  { %vm1834_vm9 = vmor %vm1832_vm8, %vm1833_vm7 }
 0x66d   :  { %v1829_v20 = vsub.f32 1.0, %v1828_v39  ;;  %v7885_v39 = vadd.f32 %v7881_v62, %v1662_v36 }
 0x66f   :  { %v1830_v16 = vmul.f32 %v5867_v8, %v1829_v20  ;;  %v1836_v20 = vand.u32 2147483647, %v1811_v13 }
 0x671   :  { %v1799_v7 = vpop.f32.mrf.mxu2  ;;  %v1831_v21 = vadd.f32 %v5867_v8, %v1830_v16  ;;  %vm1837_vm11 = vcmp.eq.f32.partialorder %v1836_v20, 8.507059e+37 }
 0x672   :  { %v1845_v23 = vadd.f32 %v7879_v42, %v1799_v7 }
 0x673   :  { %v1835_v58 = vsel %vm1834_vm9, %v5867_v8, %v1831_v21  ;;  %v10476_v21 = vld [vmem:[#allocation30_spill] sm:$0xff] }
 0x674   :  { %v1846_v54 = vmul.f32 %v1845_v23, %v1825_v45  ;;  %v1840_v52 = vsel %vm1837_vm11, %v1839_v24, %v1835_v58  ;;  %v10475_v23 = vld [vmem:[#allocation25_spill] sm:$0xff] }
 0x675   :  { %v1849_v2 = vsub.f32 1.0, %v1840_v52  ;;  %v1851_v47 = vmul.f32 0.0, %v1840_v52 }
 0x676   :  { %v1847_v15 = vadd.f32 %v1846_v54, %v7885_v39 }
 0x678   :  { %5868 = vtanh.f32 %v1847_v15 }
 0x67e   :  { %v5869_v37 = vpop.eup %5868 }
 0x67f   :  { %v1850_v16 = vmul.f32 %v5869_v37, %v1849_v2 }
 0x681   :  { %v7888_v25 = vadd.f32 %v1851_v47, %v1850_v16 }
 0x683   :  { %1869 = vmatmul.f32.vlgmr.msrb.gmra.mxu3 %v7888_v25  ;;  %1889 = vmatmul.f32.vlgmr.msra.gmra.mxu0 %v7888_v25 }
 0x684   :  { %1909 = vmatmul.f32.vlgmr.msra.gmra.mxu1 %v7888_v25  ;;  %2124 = vmatpush.msrb.mxu3 %v7592_v43 }
 0x685   :  { %2207 = vmatpush.msra.mxu0 %v7422_v55  ;;  %2227 = vmatpush.msra.mxu1 %v7465_v46  ;;  %v10466_v55 = vld [vmem:[#allocation8_spill] sm:$0xff]  ;;  %v10472_v46 = vld [vmem:[#allocation5_spill] sm:$0xff] }
 0x686   :  { %2125 = vmatpush.msrb.mxu3 %v7600_v29 }
 0x687   :  { %2208 = vmatpush.msra.mxu0 %v7427_v41  ;;  %2228 = vmatpush.msra.mxu1 %v7475_v34  ;;  %v10467_v41 = vld [vmem:[#allocation9_spill] sm:$0xff] }
 0x688   :  { %2126 = vmatpush.msrb.mxu3 %v7620_v0 }
 0x689   :  { %2209 = vmatpush.msra.mxu0 %v7434_v59  ;;  %2229 = vmatpush.msra.mxu1 %v7488_v33  ;;  %v10468_v59 = vld [vmem:[#allocation2_spill] sm:$0xff] }
 0x68a   :  { %2127 = vmatpush.msrb.mxu3 %v7628_v14 }
 0x68b   :  { %2210 = vmatpush.msra.mxu0 %v7440_v19  ;;  %2230 = vmatpush.msra.mxu1 %v7512_v6  ;;  %v10469_v19 = vld [vmem:[#allocation4_spill] sm:$0xff] }
 0x68c   :  { %2128 = vmatpush.msrb.mxu3 %v7637_v27 }
 0x68d   :  { %2211 = vmatpush.msra.mxu0 %v7456_v56  ;;  %2231 = vmatpush.msra.mxu1 %v7522_v50  ;;  %v10470_v56 = vld [vmem:[#allocation6_spill] sm:$0xff] }
 0x68e   :  { %2129 = vmatpush.msrb.mxu3 %v7647_v31 }
 0x68f   :  { %2212 = vmatpush.msra.mxu0 %v7461_v44  ;;  %2232 = vmatpush.msra.mxu1 %v7530_v40  ;;  %v10471_v44 = vld [vmem:[#allocation3_spill] sm:$0xff] }
 0x690   :  { %2130 = vmatpush.msrb.mxu3 %v7656_v12 }
 0x691   :  { %2213 = vmatpush.msra.mxu0 %v7472_v1  ;;  %2233 = vmatpush.msra.mxu1 %v7540_v11  ;;  %v7941_v1 = vpop.f32.mrf.mxu3 }
 0x692   :  { %2131 = vmatpush.msrb.mxu3 %v7660_v17 }
 0x693   :  { %2214 = vmatpush.msra.mxu0 %v7485_v26  ;;  %2234 = vmatpush.msra.mxu1 %v7553_v63 }
 0x694   :  { %2132 = vmatpush.msrb.mxu3 %v7667_v30 }
 0x695   :  { %2215 = vmatpush.msra.mxu0 %v7509_v48  ;;  %2235 = vmatpush.msra.mxu1 %v7563_v51 }
 0x696   :  { %2133 = vmatpush.msrb.mxu3 %v7674_v3 }
 0x697   :  { %2216 = vmatpush.msra.mxu0 %v7519_v57  ;;  %2236 = vmatpush.msra.mxu1 %v7578_v32 }
 0x698   :  { %2134 = vmatpush.msrb.mxu3 %v7685_v9 }
 0x699   :  { %2217 = vmatpush.msra.mxu0 %v7527_v60  ;;  %2237 = vmatpush.msra.mxu1 %v7588_v28  ;;  %v7943_v26 = vpop.f32.mrf.mxu3 }
 0x69a   :  { %2135 = vmatpush.msrb.mxu3 %v7689_v18  ;;  %10473 = vst [vmem:[#allocation28_spill] sm:$0xff] %v7943_v26 }
 0x69b   :  { %2218 = vmatpush.msra.mxu0 %v7537_v10  ;;  %2238 = vmatpush.msra.mxu1 %v7595_v4 }
 0x69c   :  { %2136 = vmatpush.msrb.mxu3 %v7696_v22 }
 0x69d   :  { %2219 = vmatpush.msra.mxu0 %v7550_v5  ;;  %2239 = vmatpush.msra.mxu1 %v7604_v35 }
 0x69e   :  { %2137 = vmatpush.msrb.mxu3 %v7703_v53 }
 0x69f   :  { %2220 = vmatpush.msra.mxu0 %v7560_v49  ;;  %2240 = vmatpush.msra.mxu1 %v10466_v55 }
 0x6a0   :  { %2138 = vmatpush.msrb.mxu3 %v10467_v41 }
 0x6a1   :  { %2221 = vmatpush.msra.mxu0 %v10468_v59  ;;  %2241 = vmatpush.msra.mxu1 %v10469_v19  ;;  %v7945_v54 = vpop.f32.mrf.mxu3 }
 0x6a2   :  { %2139 = vmatpush.msrb.mxu3 %v10470_v56  ;;  %10474 = vst [vmem:[#allocation17_spill] sm:$0xff] %v7945_v54 }
 0x6a3   :  { %2222 = vmatpush.msra.mxu0 %v10471_v44  ;;  %2242 = vmatpush.msra.mxu1 %v10472_v46 }
 0x700   :  { %v1890_v45 = vpop.f32.mrf.mxu0 }
 0x701   :  { %v1916_v13 = vrot.slane %v1890_v45, 4 }
 0x703   :  { %v1920_v8 = vadd.f32 %v1916_v13, %v10475_v23  ;;  %v1910_v13 = vpop.f32.mrf.mxu1 }
 0x705   :  { %v5641_v36 = vmul.f32 -1.442695, %v1920_v8 }
 0x706   :  { %v1870_v38 = vpop.f32.mrf.mxu3 }
 0x707   :  { %5870 = vpow2.f32 %v5641_v36  ;;  %v1915_v7 = vrot.slane %v1870_v38, 4  ;;  %v1959_v36 = vadd.f32 %v7879_v42, %v1910_v13 }
 0x709   :  { %v1919_v61 = vadd.f32 %v1915_v7, %v10476_v21 }
 0x70b   :  { %v5640_v20 = vmul.f32 -1.442695, %v1919_v61 }
 0x70d   :  { %v5871_v15 = vpop.eup %5870  ;;  %5872 = vpow2.f32 %v5640_v20 }
 0x70e   :  { %v1928_v58 = vadd.f32 1.0, %v5871_v15  ;;  %v1961_v15 = vrot.slane %v1959_v36, 4 }
 0x710   :  { %5874 = vrcp.f32 %v1928_v58  ;;  %vm1949_vm1 = vweird.f32 %v1928_v58 }
 0x713   :  { %v5873_v24 = vpop.eup %5872 }
 0x714   :  { %v1927_v52 = vadd.f32 1.0, %v5873_v24 }
 0x716   :  { %5876 = vrcp.f32 %v1927_v52  ;;  %v5875_v2 = vpop.eup %5874  ;;  %v1940_v8 = vand.u32 2147483648, %v1927_v52  ;;  %v1938_v7 = vand.u32 2147483647, %v1927_v52  ;;  %vm1934_vm13 = vweird.f32 %v1927_v52 }
 0x717   :  { %v1945_v37 = vmul.f32 %v5875_v2, %v1928_v58  ;;  %vm1950_vm0 = vweird.f32 %v5875_v2 }
 0x718   :  { %v1941_v20 = vor.u32 1.1754944e-38, %v1940_v8  ;;  %vm1939_vm15 = vcmp.eq.f32.partialorder %v1938_v7, 8.507059e+37  ;;  %vm1951_vm2 = vmor %vm1949_vm1, %vm1950_vm0  ;;  %v7979_v7 = vld [vmem:[%s7403_s11 + $0x138] sm:$0xff] }
 0x719   :  { %v1946_v45 = vsub.f32 1.0, %v1945_v37  ;;  %v1955_v37 = vand.u32 2147483648, %v1928_v58 }
 0x71b   :  { %v1947_v21 = vmul.f32 %v5875_v2, %v1946_v45  ;;  %v1956_v45 = vor.u32 1.1754944e-38, %v1955_v37 }
 0x71c   :  { %v5877_v16 = vpop.eup %5876 }
 0x71d   :  { %v1930_v47 = vmul.f32 %v5877_v16, %v1927_v52  ;;  %vm1935_vm12 = vweird.f32 %v5877_v16  ;;  %v1948_v54 = vadd.f32 %v5875_v2, %v1947_v21  ;;  %v7985_v21 = vld [vmem:[%s7403_s11 + $0x120] sm:$0xff] }
 0x71e   :  { %vm1936_vm14 = vmor %vm1934_vm13, %vm1935_vm12 }
 0x71f   :  { %v1931_v23 = vsub.f32 1.0, %v1930_v47  ;;  %v1953_v47 = vand.u32 2147483647, %v1928_v58 }
 0x721   :  { %v1932_v38 = vmul.f32 %v5877_v16, %v1931_v23  ;;  %v1952_v23 = vsel %vm1951_vm2, %v5875_v2, %v1948_v54  ;;  %vm1954_vm3 = vcmp.eq.f32.partialorder %v1953_v47, 8.507059e+37  ;;  %v7968_v54 = vld [vmem:[%s7403_s11 + $0x170] sm:$0xff] }
 0x722   :  { %v1957_v52 = vsel %vm1954_vm3, %v1956_v45, %v1952_v23  ;;  %v7973_v2 = vld [vmem:[%s7403_s11 + $0x150] sm:$0xff] }
 0x723   :  { %v1933_v61 = vadd.f32 %v5877_v16, %v1932_v38  ;;  %v1966_v8 = vsub.f32 1.0, %v1957_v52 }
 0x725   :  { %v1937_v24 = vsel %vm1936_vm14, %v5877_v16, %v1933_v61  ;;  %v1969_v16 = vrot.slane %v7888_v25, 4  ;;  %v8003_v61 = vld [vmem:[%s7403_s11 + $0xd8] sm:$0xff] }
 0x726   :  { %v1942_v26 = vsel %vm1939_vm15, %v1941_v20, %v1937_v24 }
 0x727   :  { %v1963_v62 = vmul.f32 %v1961_v15, %v1942_v26  ;;  %v1971_v26 = vmul.f32 %v1969_v16, %v1957_v52 }
 0x729   :  { %v1964_v13 = vadd.f32 %v1963_v62, %v7885_v39  ;;  %v7964_v39 = vld [vmem:[%s7403_s11 + $0x168] sm:$0xff] }
 0x72b   :  { %5878 = vtanh.f32 %v1964_v13 }
 0x731   :  { %v5879_v36 = vpop.eup %5878 }
 0x732   :  { %v1967_v38 = vmul.f32 %v5879_v36, %v1966_v8 }
 0x734   :  { %v7954_v58 = vadd.f32 %v1971_v26, %v1967_v38  ;;  %v10483_v38 = vld [vmem:[#allocation7_spill] sm:$0xff] }
 0x735   :  { %v1665_v26 = vadd.f32 %v7941_v1, %v10483_v38  ;;  %v8176_v38 = vld [vmem:[%s7403_s11 + $0x8] sm:$0xff] }
 0x736   :  { %v7957_v62 = vrot.slane %v7954_v58, 4 }
 0x738   :  { %1992 = vmatmul.f32.vlgmr.msra.gmra.mxu2 %v7957_v62  ;;  %2012 = vmatmul.f32.vlgmr.msra.gmra.mxu3 %v7957_v62 }
 0x739   :  { %2032 = vmatmul.f32.vlgmr.msrb.gmra.mxu0 %v7957_v62  ;;  %2247 = vmatpush.msra.mxu2 %v7592_v43 }
 0x73a   :  { %2315 = vmatpush.msra.mxu3 %v7964_v39  ;;  %2335 = vmatpush.msrb.mxu0 %v7968_v54 }
 0x73b   :  { %2248 = vmatpush.msra.mxu2 %v7600_v29 }
 0x73c   :  { %2316 = vmatpush.msra.mxu3 %v7973_v2  ;;  %2336 = vmatpush.msrb.mxu0 %v7475_v34  ;;  %v7991_v34 = vld [vmem:[%s7403_s11 + $0x108] sm:$0xff] }
 0x73d   :  { %2249 = vmatpush.msra.mxu2 %v7620_v0 }
 0x73e   :  { %2317 = vmatpush.msra.mxu3 %v7979_v7  ;;  %2337 = vmatpush.msrb.mxu0 %v7488_v33  ;;  %v7997_v33 = vld [vmem:[%s7403_s11 + $0xf0] sm:$0xff] }
 0x73f   :  { %2250 = vmatpush.msra.mxu2 %v7628_v14 }
 0x740   :  { %2318 = vmatpush.msra.mxu3 %v7985_v21  ;;  %2338 = vmatpush.msrb.mxu0 %v7512_v6  ;;  %v8009_v6 = vld [vmem:[%s7403_s11 + $0xc0] sm:$0xff] }
 0x741   :  { %2251 = vmatpush.msra.mxu2 %v7637_v27 }
 0x742   :  { %2319 = vmatpush.msra.mxu3 %v7991_v34  ;;  %2339 = vmatpush.msrb.mxu0 %v7522_v50 }
 0x743   :  { %2252 = vmatpush.msra.mxu2 %v7647_v31 }
 0x744   :  { %2320 = vmatpush.msra.mxu3 %v7997_v33  ;;  %2340 = vmatpush.msrb.mxu0 %v7530_v40  ;;  %v10480_v40 = vld [vmem:[#allocation14_spill] sm:$0xff] }
 0x745   :  { %2253 = vmatpush.msra.mxu2 %v7656_v12 }
 0x746   :  { %2321 = vmatpush.msra.mxu3 %v8003_v61  ;;  %2341 = vmatpush.msrb.mxu0 %v7540_v11  ;;  %v10481_v11 = vld [vmem:[#allocation11_spill] sm:$0xff] }
 0x747   :  { %2254 = vmatpush.msra.mxu2 %v7660_v17 }
 0x748   :  { %2322 = vmatpush.msra.mxu3 %v8009_v6  ;;  %2342 = vmatpush.msrb.mxu0 %v7553_v63  ;;  %v10482_v63 = vld [vmem:[#allocation15_spill] sm:$0xff] }
 0x749   :  { %2255 = vmatpush.msra.mxu2 %v7667_v30 }
 0x74a   :  { %2323 = vmatpush.msra.mxu3 %v7509_v48  ;;  %2343 = vmatpush.msrb.mxu0 %v7563_v51  ;;  %v10477_v48 = vld [vmem:[#allocation12_spill] sm:$0xff] }
 0x74b   :  { %2256 = vmatpush.msra.mxu2 %v7674_v3 }
 0x74c   :  { %2324 = vmatpush.msra.mxu3 %v7519_v57  ;;  %2344 = vmatpush.msrb.mxu0 %v7578_v32  ;;  %v10478_v57 = vld [vmem:[#allocation10_spill] sm:$0xff] }
 0x74d   :  { %2257 = vmatpush.msra.mxu2 %v7685_v9  ;;  %v1607_v50 = vadd.f32 %v10478_v57, %v10477_v48 }
 0x74e   :  { %2325 = vmatpush.msra.mxu3 %v7527_v60  ;;  %2345 = vmatpush.msrb.mxu0 %v7588_v28  ;;  %v10479_v60 = vld [vmem:[#allocation13_spill] sm:$0xff] }
 0x74f   :  { %2258 = vmatpush.msra.mxu2 %v7689_v18 }
 0x750   :  { %2326 = vmatpush.msra.mxu3 %v7537_v10  ;;  %2346 = vmatpush.msrb.mxu0 %v7595_v4  ;;  %v1636_v10 = vadd.f32 %v10480_v40, %v10479_v60 }
 0x751   :  { %2259 = vmatpush.msra.mxu2 %v7696_v22 }
 0x752   :  { %2327 = vmatpush.msra.mxu3 %v7550_v5  ;;  %2347 = vmatpush.msrb.mxu0 %v7604_v35  ;;  %v8042_v5 = vadd.f32 %v10481_v11, %v1607_v50 }
 0x753   :  { %2260 = vmatpush.msra.mxu2 %v7703_v53 }
 0x754   :  { %2328 = vmatpush.msra.mxu3 %v7560_v49  ;;  %2348 = vmatpush.msrb.mxu0 %v10466_v55  ;;  %v8045_v49 = vadd.f32 %v10482_v63, %v1636_v10 }
 0x755   :  { %2261 = vmatpush.msra.mxu2 %v10467_v41 }
 0x756   :  { %2329 = vmatpush.msra.mxu3 %v10468_v59  ;;  %2349 = vmatpush.msrb.mxu0 %v10469_v19 }
 0x757   :  { %2262 = vmatpush.msra.mxu2 %v10470_v56 }
 0x758   :  { %2330 = vmatpush.msra.mxu3 %v10471_v44  ;;  %2350 = vmatpush.msrb.mxu0 %v10472_v46 }
 0x7b6   :  { %v2033_v8 = vpop.f32.mrf.mxu0 }
 0x7b7   :  { %v2076_v50 = vadd.f32 %v7879_v42, %v2033_v8  ;;  %v8158_v8 = vld [vmem:[%s7403_s11 + $0x38] sm:$0xff] }
 0x7bb   :  { %v1993_v51 = vpop.f32.mrf.mxu2  ;;  %v2013_v32 = vpop.f32.mrf.mxu3 }
 0x7bc   :  { %v2036_v28 = vadd.f32 %v1993_v51, %v8042_v5  ;;  %v2037_v4 = vadd.f32 %v2013_v32, %v8045_v49  ;;  %v10484_v51 = vld [vmem:[#allocation27_spill] sm:$0xff] }
 0x7bd   :  { %v8053_v32 = vadd.f32 %v10484_v51, %v1665_v26 }
 0x7be   :  { %v5642_v35 = vmul.f32 -1.442695, %v2036_v28  ;;  %v5643_v55 = vmul.f32 -1.442695, %v2037_v4 }
 0x7c0   :  { %5880 = vpow2.f32 %v5642_v35 }
 0x7c1   :  { %5882 = vpow2.f32 %v5643_v55 }
 0x7c6   :  { %v5881_v59 = vpop.eup %5880 }
 0x7c7   :  { %v5883_v19 = vpop.eup %5882  ;;  %v2044_v44 = vadd.f32 1.0, %v5881_v59 }
 0x7c8   :  { %v2045_v46 = vadd.f32 1.0, %v5883_v19 }
 0x7c9   :  { %5884 = vrcp.f32 %v2044_v44  ;;  %v2057_v13 = vand.u32 2147483648, %v2044_v44  ;;  %v2055_v52 = vand.u32 2147483647, %v2044_v44  ;;  %vm2051_vm5 = vweird.f32 %v2044_v44 }
 0x7ca   :  { %5886 = vrcp.f32 %v2045_v46  ;;  %v2072_v4 = vand.u32 2147483648, %v2045_v46  ;;  %vm2066_vm9 = vweird.f32 %v2045_v46  ;;  %v2070_v35 = vand.u32 2147483647, %v2045_v46 }
 0x7cb   :  { %v2058_v57 = vor.u32 1.1754944e-38, %v2057_v13  ;;  %vm2056_vm7 = vcmp.eq.f32.partialorder %v2055_v52, 8.507059e+37  ;;  %v8122_v13 = vld [vmem:[%s7403_s11 + $0x98] sm:$0xff]  ;;  %v8149_v52 = vld [vmem:[%s7403_s11 + $0x50] sm:$0xff] }
 0x7cc   :  { %v2073_v59 = vor.u32 1.1754944e-38, %v2072_v4  ;;  %vm2071_vm12 = vcmp.eq.f32.partialorder %v2070_v35, 8.507059e+37 }
 0x7cf   :  { %v5885_v20 = vpop.eup %5884 }
 0x7d0   :  { %v5887_v15 = vpop.eup %5886  ;;  %v2047_v24 = vmul.f32 %v5885_v20, %v2044_v44  ;;  %vm2052_vm4 = vweird.f32 %v5885_v20 }
 0x7d1   :  { %v2062_v37 = vmul.f32 %v5887_v15, %v2045_v46  ;;  %vm2053_vm6 = vmor %vm2051_vm5, %vm2052_vm4  ;;  %vm2067_vm8 = vweird.f32 %v5887_v15  ;;  %v8068_v46 = vld [vmem:[%s7403_s11 + $0x158] sm:$0xff] }
 0x7d2   :  { %v2048_v47 = vsub.f32 1.0, %v2047_v24  ;;  %vm2068_vm11 = vmor %vm2066_vm9, %vm2067_vm8 }
 0x7d3   :  { %v2063_v23 = vsub.f32 1.0, %v2062_v37 }
 0x7d4   :  { %v2049_v45 = vmul.f32 %v5885_v20, %v2048_v47 }
 0x7d5   :  { %v2064_v36 = vmul.f32 %v5887_v15, %v2063_v23  ;;  %v8131_v23 = vld [vmem:[%s7403_s11 + $0x80] sm:$0xff] }
 0x7d6   :  { %v2050_v48 = vadd.f32 %v5885_v20, %v2049_v45  ;;  %v8140_v45 = vld [vmem:[%s7403_s11 + $0x68] sm:$0xff] }
 0x7d7   :  { %v2065_v10 = vadd.f32 %v5887_v15, %v2064_v36  ;;  %v8167_v36 = vld [vmem:[%s7403_s11 + $0x20] sm:$0xff] }
 0x7d8   :  { %v2054_v60 = vsel %vm2053_vm6, %v5885_v20, %v2050_v48 }
 0x7d9   :  { %v2059_v40 = vsel %vm2056_vm7, %v2058_v57, %v2054_v60  ;;  %v2069_v55 = vsel %vm2068_vm11, %v5887_v15, %v2065_v10  ;;  %v8074_v15 = vld [vmem:[%s7403_s11 + $0x140] sm:$0xff] }
 0x7da   :  { %v2077_v28 = vmul.f32 %v2076_v50, %v2059_v40  ;;  %v2074_v19 = vsel %vm2071_vm12, %v2073_v59, %v2069_v55 }
 0x7db   :  { %v2080_v44 = vsub.f32 1.0, %v2074_v19  ;;  %v2082_v37 = vmul.f32 %v2074_v19, %v7957_v62 }
 0x7dc   :  { %v2078_v1 = vadd.f32 %v2077_v28, %v8053_v32 }
 0x7de   :  { %5888 = vtanh.f32 %v2078_v1 }
 0x7e4   :  { %v5889_v20 = vpop.eup %5888 }
 0x7e5   :  { %v2081_v24 = vmul.f32 %v5889_v20, %v2080_v44 }
 0x7e7   :  { %v8057_v47 = vadd.f32 %v2082_v37, %v2081_v24 }
 0x7e9   :  { %2100 = vmatmul.f32.vlgmr.msrb.gmra.mxu1 %v8057_v47  ;;  %2120 = vmatmul.f32.vlgmr.msrb.gmra.mxu2 %v8057_v47 }
 0x7ea   :  { %2140 = vmatmul.f32.vlgmr.msrb.gmra.mxu3 %v8057_v47  ;;  %2355 = vmatpush.msrb.mxu1 %v7592_v43  ;;  %v8080_v43 = vld [vmem:[%s7403_s11 + $0x128] sm:$0xff] }
 0x7eb   :  { %2438 = vmatpush.msrb.mxu2 %v7964_v39  ;;  %2458 = vmatpush.msrb.mxu3 %v7968_v54 }
 0x7ec   :  { %2356 = vmatpush.msrb.mxu1 %v7600_v29  ;;  %v8086_v29 = vld [vmem:[%s7403_s11 + $0x110] sm:$0xff] }
 0x7ed   :  { %2439 = vmatpush.msrb.mxu2 %v7973_v2  ;;  %2459 = vmatpush.msrb.mxu3 %v8068_v46 }
 0x7ee   :  { %2357 = vmatpush.msrb.mxu1 %v7620_v0  ;;  %v8092_v0 = vld [vmem:[%s7403_s11 + $0xf8] sm:$0xff] }
 0x7ef   :  { %2440 = vmatpush.msrb.mxu2 %v7979_v7  ;;  %2460 = vmatpush.msrb.mxu3 %v8074_v15 }
 0x7f0   :  { %2358 = vmatpush.msrb.mxu1 %v7628_v14  ;;  %v8098_v14 = vld [vmem:[%s7403_s11 + $0xe0] sm:$0xff] }
 0x7f1   :  { %2441 = vmatpush.msrb.mxu2 %v7985_v21  ;;  %2461 = vmatpush.msrb.mxu3 %v8080_v43 }
 0x7f2   :  { %2359 = vmatpush.msrb.mxu1 %v7637_v27  ;;  %v8104_v27 = vld [vmem:[%s7403_s11 + $0xc8] sm:$0xff] }
 0x7f3   :  { %2442 = vmatpush.msrb.mxu2 %v7991_v34  ;;  %2462 = vmatpush.msrb.mxu3 %v8086_v29 }
 0x7f4   :  { %2360 = vmatpush.msrb.mxu1 %v7647_v31  ;;  %v8109_v31 = vld [vmem:[%s7403_s11 + $0xa8] sm:$0xff] }
 0x7f5   :  { %2443 = vmatpush.msrb.mxu2 %v7997_v33  ;;  %2463 = vmatpush.msrb.mxu3 %v8092_v0 }
 0x7f6   :  { %2361 = vmatpush.msrb.mxu1 %v7656_v12  ;;  %v8113_v12 = vld [vmem:[%s7403_s11 + $0xb0] sm:$0xff] }
 0x7f7   :  { %2444 = vmatpush.msrb.mxu2 %v8003_v61  ;;  %2464 = vmatpush.msrb.mxu3 %v8098_v14 }
 0x7f8   :  { %2362 = vmatpush.msrb.mxu1 %v7660_v17  ;;  %v8118_v17 = vld [vmem:[%s7403_s11 + $0x90] sm:$0xff] }
 0x7f9   :  { %2445 = vmatpush.msrb.mxu2 %v8009_v6  ;;  %2465 = vmatpush.msrb.mxu3 %v8104_v27 }
 0x7fa   :  { %2363 = vmatpush.msrb.mxu1 %v7667_v30  ;;  %v8127_v30 = vld [vmem:[%s7403_s11 + $0x78] sm:$0xff] }
 0x7fb   :  { %2446 = vmatpush.msrb.mxu2 %v8109_v31  ;;  %2466 = vmatpush.msrb.mxu3 %v8113_v12 }
 0x7fc   :  { %2364 = vmatpush.msrb.mxu1 %v7674_v3  ;;  %v8136_v3 = vld [vmem:[%s7403_s11 + $0x60] sm:$0xff] }
 0x7fd   :  { %2447 = vmatpush.msrb.mxu2 %v8118_v17  ;;  %2467 = vmatpush.msrb.mxu3 %v8122_v13 }
 0x7fe   :  { %2365 = vmatpush.msrb.mxu1 %v7685_v9  ;;  %v8145_v9 = vld [vmem:[%s7403_s11 + $0x48] sm:$0xff] }
 0x7ff   :  { %2448 = vmatpush.msrb.mxu2 %v8127_v30  ;;  %2468 = vmatpush.msrb.mxu3 %v8131_v23 }
 0x800   :  { %2366 = vmatpush.msrb.mxu1 %v7689_v18  ;;  %v8154_v18 = vld [vmem:[%s7403_s11 + $0x30] sm:$0xff] }
 0x801   :  { %2449 = vmatpush.msrb.mxu2 %v8136_v3  ;;  %2469 = vmatpush.msrb.mxu3 %v8140_v45 }
 0x802   :  { %2367 = vmatpush.msrb.mxu1 %v7696_v22  ;;  %v8163_v22 = vld [vmem:[%s7403_s11 + $0x18] sm:$0xff] }
 0x803   :  { %2450 = vmatpush.msrb.mxu2 %v8145_v9  ;;  %2470 = vmatpush.msrb.mxu3 %v8149_v52 }
 0x804   :  { %2368 = vmatpush.msrb.mxu1 %v7703_v53  ;;  %v8172_v53 = vld [vmem:[%s7403_s11] sm:$0xff] }
 0x805   :  { %2451 = vmatpush.msrb.mxu2 %v8154_v18  ;;  %2471 = vmatpush.msrb.mxu3 %v8158_v8 }
 0x806   :  { %2369 = vmatpush.msrb.mxu1 %v10467_v41 }
 0x807   :  { %2452 = vmatpush.msrb.mxu2 %v8163_v22  ;;  %2472 = vmatpush.msrb.mxu3 %v8167_v36 }
 0x808   :  { %2370 = vmatpush.msrb.mxu1 %v10470_v56 }
 0x809   :  { %2453 = vmatpush.msrb.mxu2 %v8172_v53  ;;  %2473 = vmatpush.msrb.mxu3 %v8176_v38 }
 0x866   :  { %v2101_v26 = vpop.f32.mrf.mxu1 }
 0x867   :  { %v2146_v41 = vrot.slane %v2101_v26, 4 }
 0x869   :  { %v2150_v48 = vadd.f32 %v2146_v41, %v8042_v5 }
 0x86b   :  { %v5644_v57 = vmul.f32 -1.442695, %v2150_v48 }
 0x86c   :  { %v2121_v50 = vpop.f32.mrf.mxu2 }
 0x86d   :  { %5890 = vpow2.f32 %v5644_v57  ;;  %v2147_v60 = vrot.slane %v2121_v50, 4  ;;  %v2141_v59 = vpop.f32.mrf.mxu3 }
 0x86e   :  { %v2190_v24 = vadd.f32 %v7879_v42, %v2141_v59 }
 0x86f   :  { %v2151_v40 = vadd.f32 %v2147_v60, %v8045_v49 }
 0x870   :  { %v2192_v50 = vrot.slane %v2190_v24, 4 }
 0x871   :  { %v5645_v10 = vmul.f32 -1.442695, %v2151_v40 }
 0x873   :  { %v5891_v56 = vpop.eup %5890  ;;  %5892 = vpow2.f32 %v5645_v10 }
 0x874   :  { %v2158_v28 = vadd.f32 1.0, %v5891_v56 }
 0x876   :  { %5894 = vrcp.f32 %v2158_v28  ;;  %v2171_v44 = vand.u32 2147483648, %v2158_v28  ;;  %v2169_v20 = vand.u32 2147483647, %v2158_v28  ;;  %vm2165_vm14 = vweird.f32 %v2158_v28 }
 0x878   :  { %v2172_v41 = vor.u32 1.1754944e-38, %v2171_v44  ;;  %vm2170_vm0 = vcmp.eq.f32.partialorder %v2169_v20, 8.507059e+37 }
 0x879   :  { %v5893_v4 = vpop.eup %5892 }
 0x87a   :  { %v2159_v35 = vadd.f32 1.0, %v5893_v4 }
 0x87c   :  { %v5895_v1 = vpop.eup %5894  ;;  %5896 = vrcp.f32 %v2159_v35  ;;  %v2186_v10 = vand.u32 2147483648, %v2159_v35  ;;  %v2184_v4 = vand.u32 2147483647, %v2159_v35  ;;  %vm2180_vm2 = vweird.f32 %v2159_v35 }
 0x87d   :  { %v2161_v55 = vmul.f32 %v5895_v1, %v2158_v28  ;;  %vm2166_vm13 = vweird.f32 %v5895_v1 }
 0x87e   :  { %vm2167_vm15 = vmor %vm2165_vm14, %vm2166_vm13  ;;  %vm2185_vm4 = vcmp.eq.f32.partialorder %v2184_v4, 8.507059e+37 }
 0x87f   :  { %v2162_v19 = vsub.f32 1.0, %v2161_v55 }
 0x881   :  { %v2163_v5 = vmul.f32 %v5895_v1, %v2162_v19  ;;  %v2187_v19 = vor.u32 1.1754944e-38, %v2186_v10 }
 0x882   :  { %v5897_v37 = vpop.eup %5896 }
 0x883   :  { %v2176_v49 = vmul.f32 %v5897_v37, %v2159_v35  ;;  %v2164_v26 = vadd.f32 %v5895_v1, %v2163_v5  ;;  %vm2181_vm1 = vweird.f32 %v5897_v37  ;;  %v2200_v5 = vrot.slane %v8057_v47, 4 }
 0x884   :  { %vm2182_vm3 = vmor %vm2180_vm2, %vm2181_vm1 }
 0x885   :  { %v2177_v48 = vsub.f32 1.0, %v2176_v49  ;;  %v2168_v57 = vsel %vm2167_vm15, %v5895_v1, %v2164_v26  ;;  %v8201_v26 = vld [vmem:[%s7403_s11 + $0x160] sm:$0xff] }
 0x886   :  { %v2173_v60 = vsel %vm2170_vm0, %v2172_v41, %v2168_v57  ;;  %v8207_v41 = vld [vmem:[%s7403_s11 + $0x148] sm:$0xff] }
 0x887   :  { %v2178_v40 = vmul.f32 %v5897_v37, %v2177_v48  ;;  %v2194_v56 = vmul.f32 %v2192_v50, %v2173_v60 }
 0x889   :  { %v2179_v55 = vadd.f32 %v5897_v37, %v2178_v40  ;;  %v2195_v59 = vadd.f32 %v2194_v56, %v8053_v32 }
 0x88b   :  { %v2183_v28 = vsel %vm2182_vm3, %v5897_v37, %v2179_v55  ;;  %5898 = vtanh.f32 %v2195_v59  ;;  %v8195_v37 = vld [vmem:[%s7403_s11 + $0x178] sm:$0xff] }
 0x88c   :  { %v2188_v1 = vsel %vm2185_vm4, %v2187_v19, %v2183_v28  ;;  %v10489_v19 = vld [vmem:[#allocation19_spill] sm:$0xff]  ;;  %v10490_v28 = vld [vmem:[#allocation28_spill] sm:$0xff] }
 0x88d   :  { %v2197_v44 = vsub.f32 1.0, %v2188_v1  ;;  %v2202_v35 = vmul.f32 %v2200_v5, %v2188_v1  ;;  %v1668_v1 = vadd.f32 %v10490_v28, %v10489_v19 }
 0x891   :  { %v5899_v20 = vpop.eup %5898 }
 0x892   :  { %v2198_v24 = vmul.f32 %v5899_v20, %v2197_v44 }
 0x894   :  { %v8186_v49 = vadd.f32 %v2202_v35, %v2198_v24 }
 0x896   :  { %v8189_v32 = vrot.slane %v8186_v49, 4 }
 0x898   :  { %2223 = vmatmul.f32.vlgmr.msra.gmra.mxu0 %v8189_v32  ;;  %2243 = vmatmul.f32.vlgmr.msra.gmra.mxu1 %v8189_v32 }
 0x899   :  { %2263 = vmatmul.f32.vlgmr.msra.gmra.mxu2 %v8189_v32  ;;  %2478 = vmatpush.msra.mxu0 %v8195_v37 }
 0x89a   :  { %2546 = vmatpush.msra.mxu1 %v7964_v39  ;;  %2566 = vmatpush.msra.mxu2 %v7968_v54  ;;  %v8213_v39 = vld [vmem:[%s7403_s11 + $0x130] sm:$0xff]  ;;  %v8219_v54 = vld [vmem:[%s7403_s11 + $0x118] sm:$0xff] }
 0x89b   :  { %2479 = vmatpush.msra.mxu0 %v8201_v26 }
 0x89c   :  { %2547 = vmatpush.msra.mxu1 %v7973_v2  ;;  %2567 = vmatpush.msra.mxu2 %v8068_v46  ;;  %v8225_v2 = vld [vmem:[%s7403_s11 + $0x100] sm:$0xff]  ;;  %v8267_v46 = vld [vmem:[%s7403_s11 + $0x58] sm:$0xff] }
 0x89d   :  { %2480 = vmatpush.msra.mxu0 %v8207_v41 }
 0x89e   :  { %2548 = vmatpush.msra.mxu1 %v7979_v7  ;;  %2568 = vmatpush.msra.mxu2 %v8074_v15  ;;  %v8231_v7 = vld [vmem:[%s7403_s11 + $0xe8] sm:$0xff]  ;;  %v8273_v15 = vld [vmem:[%s7403_s11 + $0x40] sm:$0xff] }
 0x89f   :  { %2481 = vmatpush.msra.mxu0 %v8213_v39 }
 0x8a0   :  { %2549 = vmatpush.msra.mxu1 %v7985_v21  ;;  %2569 = vmatpush.msra.mxu2 %v8080_v43  ;;  %v8237_v21 = vld [vmem:[%s7403_s11 + $0xd0] sm:$0xff]  ;;  %v8279_v43 = vld [vmem:[%s7403_s11 + $0x28] sm:$0xff] }
 0x8a1   :  { %2482 = vmatpush.msra.mxu0 %v8219_v54 }
 0x8a2   :  { %2550 = vmatpush.msra.mxu1 %v7991_v34  ;;  %2570 = vmatpush.msra.mxu2 %v8086_v29  ;;  %v8243_v34 = vld [vmem:[%s7403_s11 + $0xb8] sm:$0xff]  ;;  %v8285_v29 = vld [vmem:[%s7403_s11 + $0x10] sm:$0xff] }
 0x8a3   :  { %2483 = vmatpush.msra.mxu0 %v8225_v2 }
 0x8a4   :  { %2551 = vmatpush.msra.mxu1 %v7997_v33  ;;  %2571 = vmatpush.msra.mxu2 %v8092_v0  ;;  %v8249_v33 = vld [vmem:[%s7403_s11 + $0xa0] sm:$0xff]  ;;  %v10485_v0 = vld [vmem:[#allocation24_spill] sm:$0xff] }
 0x8a5   :  { %2484 = vmatpush.msra.mxu0 %v8231_v7 }
 0x8a6   :  { %2552 = vmatpush.msra.mxu1 %v8003_v61  ;;  %2572 = vmatpush.msra.mxu2 %v8098_v14  ;;  %v8255_v61 = vld [vmem:[%s7403_s11 + $0x88] sm:$0xff]  ;;  %v10486_v14 = vld [vmem:[#allocation21_spill] sm:$0xff] }
 0x8a7   :  { %2485 = vmatpush.msra.mxu0 %v8237_v21 }
 0x8a8   :  { %2553 = vmatpush.msra.mxu1 %v8009_v6  ;;  %2573 = vmatpush.msra.mxu2 %v8104_v27  ;;  %v8261_v6 = vld [vmem:[%s7403_s11 + $0x70] sm:$0xff]  ;;  %v1610_v27 = vadd.f32 %v10486_v14, %v10485_v0  ;;  %s5570_s11 = sld [smem:[%s10240_s0 + %s6335_s8]]   ;;  %s6350_s8 = smov 39  }
 0x8a9   :  { %2486 = vmatpush.msra.mxu0 %v8243_v34 }
 0x8aa   :  { %2554 = vmatpush.msra.mxu1 %v8109_v31  ;;  %2574 = vmatpush.msra.mxu2 %v8113_v12  ;;  %v10487_v31 = vld [vmem:[#allocation26_spill] sm:$0xff]  ;;  %v10488_v12 = vld [vmem:[#allocation33_spill] sm:$0xff] }
 0x8ab   :  { %2487 = vmatpush.msra.mxu0 %v8249_v33 }
 0x8ac   :  { %2555 = vmatpush.msra.mxu1 %v8118_v17  ;;  %2575 = vmatpush.msra.mxu2 %v8122_v13  ;;  %v1639_v17 = vadd.f32 %v10488_v12, %v10487_v31  ;;  %v8295_v13 = vadd.f32 %v10481_v11, %v1610_v27  ;;  %v8306_v27 = vadd.f32 %v10484_v51, %v1668_v1 }
 0x8ad   :  { %2488 = vmatpush.msra.mxu0 %v8255_v61 }
 0x8ae   :  { %2556 = vmatpush.msra.mxu1 %v8127_v30  ;;  %2576 = vmatpush.msra.mxu2 %v8131_v23  ;;  %v8298_v30 = vadd.f32 %v10482_v63, %v1639_v17 }
 0x8af   :  { %2489 = vmatpush.msra.mxu0 %v8261_v6 }
 0x8b0   :  { %2557 = vmatpush.msra.mxu1 %v8136_v3  ;;  %2577 = vmatpush.msra.mxu2 %v8140_v45 }
 0x8b1   :  { %2490 = vmatpush.msra.mxu0 %v8267_v46 }
 0x8b2   :  { %2558 = vmatpush.msra.mxu1 %v8145_v9  ;;  %2578 = vmatpush.msra.mxu2 %v8149_v52 }
 0x8b3   :  { %2491 = vmatpush.msra.mxu0 %v8273_v15 }
 0x8b4   :  { %2559 = vmatpush.msra.mxu1 %v8154_v18  ;;  %2579 = vmatpush.msra.mxu2 %v8158_v8 }
 0x8b5   :  { %2492 = vmatpush.msra.mxu0 %v8279_v43 }
 0x8b6   :  { %2560 = vmatpush.msra.mxu1 %v8163_v22  ;;  %2580 = vmatpush.msra.mxu2 %v8167_v36 }
 0x8b7   :  { %2493 = vmatpush.msra.mxu0 %v8285_v29 }
 0x8b8   :  { %2561 = vmatpush.msra.mxu1 %v8172_v53  ;;  %2581 = vmatpush.msra.mxu2 %v8176_v38 }
 0x915   :  { %v2224_v23 = vpop.f32.mrf.mxu0  ;;  %v2244_v3 = vpop.f32.mrf.mxu1 }
 0x916   :  { %v2267_v45 = vadd.f32 %v2224_v23, %v8295_v13  ;;  %v2268_v9 = vadd.f32 %v2244_v3, %v8298_v30 }
 0x918   :  { %v5646_v52 = vmul.f32 -1.442695, %v2267_v45  ;;  %v5647_v18 = vmul.f32 -1.442695, %v2268_v9 }
 0x91a   :  { %5900 = vpow2.f32 %v5646_v52 }
 0x91b   :  { %5902 = vpow2.f32 %v5647_v18 }
 0x91c   :  { %v2264_v59 = vpop.f32.mrf.mxu2 }
 0x91d   :  { %v2307_v35 = vadd.f32 %v7879_v42, %v2264_v59 }
 0x920   :  { %v5901_v8 = vpop.eup %5900 }
 0x921   :  { %v5903_v22 = vpop.eup %5902  ;;  %v2275_v36 = vadd.f32 1.0, %v5901_v8 }
 0x922   :  { %v2276_v53 = vadd.f32 1.0, %v5903_v22 }
 0x923   :  { %5904 = vrcp.f32 %v2275_v36  ;;  %v2288_v10 = vand.u32 2147483648, %v2275_v36  ;;  %v2286_v4 = vand.u32 2147483647, %v2275_v36  ;;  %vm2282_vm6 = vweird.f32 %v2275_v36 }
 0x924   :  { %5906 = vrcp.f32 %v2276_v53  ;;  %v2303_v31 = vand.u32 2147483648, %v2276_v53  ;;  %vm2297_vm11 = vweird.f32 %v2276_v53  ;;  %v2301_v17 = vand.u32 2147483647, %v2276_v53 }
 0x925   :  { %v2289_v20 = vor.u32 1.1754944e-38, %v2288_v10  ;;  %vm2287_vm8 = vcmp.eq.f32.partialorder %v2286_v4, 8.507059e+37 }
 0x926   :  { %v2304_v45 = vor.u32 1.1754944e-38, %v2303_v31  ;;  %vm2302_vm13 = vcmp.eq.f32.partialorder %v2301_v17, 8.507059e+37 }
 0x929   :  { %v5905_v38 = vpop.eup %5904 }
 0x92a   :  { %v5907_v48 = vpop.eup %5906  ;;  %v2278_v57 = vmul.f32 %v5905_v38, %v2275_v36  ;;  %vm2283_vm5 = vweird.f32 %v5905_v38 }
 0x92b   :  { %v2293_v50 = vmul.f32 %v5907_v48, %v2276_v53  ;;  %vm2284_vm7 = vmor %vm2282_vm6, %vm2283_vm5  ;;  %vm2298_vm9 = vweird.f32 %v5907_v48 }
 0x92c   :  { %v2279_v60 = vsub.f32 1.0, %v2278_v57  ;;  %vm2299_vm12 = vmor %vm2297_vm11, %vm2298_vm9 }
 0x92d   :  { %v2294_v40 = vsub.f32 1.0, %v2293_v50 }
 0x92e   :  { %v2280_v56 = vmul.f32 %v5905_v38, %v2279_v60 }
 0x92f   :  { %v2295_v55 = vmul.f32 %v5907_v48, %v2294_v40 }
 0x930   :  { %v2281_v44 = vadd.f32 %v5905_v38, %v2280_v56 }
 0x931   :  { %v2296_v0 = vadd.f32 %v5907_v48, %v2295_v55 }
 0x932   :  { %v2285_v24 = vsel %vm2284_vm7, %v5905_v38, %v2281_v44 }
 0x933   :  { %v2290_v14 = vsel %vm2287_vm8, %v2289_v20, %v2285_v24  ;;  %v2300_v3 = vsel %vm2299_vm12, %v5907_v48, %v2296_v0 }
 0x934   :  { %v2308_v12 = vmul.f32 %v2307_v35, %v2290_v14  ;;  %v2305_v9 = vsel %vm2302_vm13, %v2304_v45, %v2300_v3  ;;  %v2719_v3 = vld [vmem:[%s8349_s23 + $0x150] sm:$0xff] }
 0x935   :  { %v2311_v52 = vsub.f32 1.0, %v2305_v9  ;;  %v2313_v22 = vmul.f32 %v2305_v9, %v8189_v32  ;;  %v10491_v45 = vld [vmem:[#allocation32_spill] sm:$0xff]  ;;  %v10492_v9 = vld [vmem:[#allocation29_spill] sm:$0xff] }
 0x936   :  { %v2309_v23 = vadd.f32 %v2308_v12, %v8306_v27 }
 0x938   :  { %5908 = vtanh.f32 %v2309_v23 }
 0x93e   :  { %v5909_v18 = vpop.eup %5908 }
 0x93f   :  { %v2312_v8 = vmul.f32 %v5909_v18, %v2311_v52  ;;  %v1613_v52 = vadd.f32 %v10492_v9, %v10491_v45  ;;  %v10493_v18 = vld [vmem:[#allocation16_spill] sm:$0xff] }
 0x941   :  { %v8310_v36 = vadd.f32 %v2313_v22, %v2312_v8  ;;  %v10494_v8 = vld [vmem:[#allocation18_spill] sm:$0xff] }
 0x942   :  { %v1642_v22 = vadd.f32 %v10494_v8, %v10493_v18 }
 0x943   :  { %2331 = vmatmul.f32.vlgmr.msra.gmra.mxu3 %v8310_v36  ;;  %2351 = vmatmul.f32.vlgmr.msrb.gmra.mxu0 %v8310_v36  ;;  %v2431_v0 = vrot.slane %v8310_v36, 4 }
 0x944   :  { %2371 = vmatmul.f32.vlgmr.msrb.gmra.mxu1 %v8310_v36  ;;  %2586 = vmatpush.msra.mxu3 %v8195_v37 }
 0x946   :  { %2587 = vmatpush.msra.mxu3 %v8201_v26 }
 0x948   :  { %2588 = vmatpush.msra.mxu3 %v8207_v41 }
 0x94a   :  { %2589 = vmatpush.msra.mxu3 %v8213_v39 }
 0x94c   :  { %2590 = vmatpush.msra.mxu3 %v8219_v54 }
 0x94e   :  { %2591 = vmatpush.msra.mxu3 %v8225_v2 }
 0x950   :  { %2592 = vmatpush.msra.mxu3 %v8231_v7 }
 0x952   :  { %2593 = vmatpush.msra.mxu3 %v8237_v21 }
 0x954   :  { %2594 = vmatpush.msra.mxu3 %v8243_v34 }
 0x956   :  { %2595 = vmatpush.msra.mxu3 %v8249_v33 }
 0x958   :  { %2596 = vmatpush.msra.mxu3 %v8255_v61 }
 0x95a   :  { %2597 = vmatpush.msra.mxu3 %v8261_v6 }
 0x95c   :  { %2598 = vmatpush.msra.mxu3 %v8267_v46 }
 0x95e   :  { %2599 = vmatpush.msra.mxu3 %v8273_v15 }
 0x960   :  { %2600 = vmatpush.msra.mxu3 %v8279_v43 }
 0x962   :  { %2601 = vmatpush.msra.mxu3 %v8285_v29 }
 0x9c0   :  { %v2352_v37 = vpop.f32.mrf.mxu0 }
 0x9c1   :  { %v2378_v26 = vrot.slane %v2352_v37, 4  ;;  %v2716_v37 = vld [vmem:[%s8349_s23 + $0x138] sm:$0xff] }
 0x9c3   :  { %v2382_v41 = vadd.f32 %v2378_v26, %v8298_v30  ;;  %v2372_v30 = vpop.f32.mrf.mxu1  ;;  %v2713_v26 = vld [vmem:[%s8349_s23 + $0x120] sm:$0xff] }
 0x9c4   :  { %v2421_v57 = vadd.f32 %v7879_v42, %v2372_v30 }
 0x9c5   :  { %v5649_v39 = vmul.f32 -1.442695, %v2382_v41  ;;  %v8360_v41 = vadd.f32 %v10481_v11, %v1613_v52 }
 0x9c6   :  { %v2332_v54 = vpop.f32.mrf.mxu3  ;;  %v2423_v56 = vrot.slane %v2421_v57, 4  ;;  %v2686_v57 = vld [vmem:[%s8349_s23 + $0x48] sm:$0xff] }
 0x9c7   :  { %5910 = vpow2.f32 %v5649_v39  ;;  %v2377_v2 = vrot.slane %v2332_v54, 4  ;;  %v8363_v39 = vadd.f32 %v10482_v63, %v1642_v22  ;;  %v2710_v54 = vld [vmem:[%s8349_s23 + $0x108] sm:$0xff]  ;;  %v2701_v63 = vld [vmem:[%s8349_s23 + $0xc0] sm:$0xff] }
 0x9c9   :  { %v2381_v7 = vadd.f32 %v2377_v2, %v8295_v13 }
 0x9cb   :  { %v5648_v21 = vmul.f32 -1.442695, %v2381_v7 }
 0x9cd   :  { %v5911_v34 = vpop.eup %5910  ;;  %5912 = vpow2.f32 %v5648_v21  ;;  %v2707_v21 = vld [vmem:[%s8349_s23 + $0xf0] sm:$0xff] }
 0x9ce   :  { %v2390_v33 = vadd.f32 1.0, %v5911_v34 }
 0x9d0   :  { %5914 = vrcp.f32 %v2390_v33  ;;  %v2417_v19 = vand.u32 2147483648, %v2390_v33  ;;  %vm2411_vm3 = vweird.f32 %v2390_v33  ;;  %v2415_v1 = vand.u32 2147483647, %v2390_v33 }
 0x9d2   :  { %v2418_v20 = vor.u32 1.1754944e-38, %v2417_v19  ;;  %vm2416_vm5 = vcmp.eq.f32.partialorder %v2415_v1, 8.507059e+37 }
 0x9d3   :  { %v5913_v61 = vpop.eup %5912 }
 0x9d4   :  { %v2389_v6 = vadd.f32 1.0, %v5913_v61  ;;  %v2704_v61 = vld [vmem:[%s8349_s23 + $0xd8] sm:$0xff] }
 0x9d6   :  { %5916 = vrcp.f32 %v2389_v6  ;;  %v5915_v46 = vpop.eup %5914  ;;  %v2402_v48 = vand.u32 2147483648, %v2389_v6  ;;  %v2400_v13 = vand.u32 2147483647, %v2389_v6  ;;  %vm2396_vm15 = vweird.f32 %v2389_v6 }
 0x9d7   :  { %v2407_v15 = vmul.f32 %v5915_v46, %v2390_v33  ;;  %vm2412_vm2 = vweird.f32 %v5915_v46 }
 0x9d8   :  { %v2403_v10 = vor.u32 1.1754944e-38, %v2402_v48  ;;  %vm2401_vm1 = vcmp.eq.f32.partialorder %v2400_v13, 8.507059e+37  ;;  %vm2413_vm4 = vmor %vm2411_vm3, %vm2412_vm2  ;;  %v2680_v13 = vld [vmem:[%s8349_s23 + $0x18] sm:$0xff] }
 0x9d9   :  { %v2408_v53 = vsub.f32 1.0, %v2407_v15  ;;  %v2695_v15 = vld [vmem:[%s8349_s23 + $0x90] sm:$0xff] }
 0x9db   :  { %v2409_v60 = vmul.f32 %v5915_v46, %v2408_v53 }
 0x9dc   :  { %v5917_v43 = vpop.eup %5916 }
 0x9dd   :  { %v2392_v29 = vmul.f32 %v5917_v43, %v2389_v6  ;;  %vm2397_vm14 = vweird.f32 %v5917_v43  ;;  %v2410_v55 = vadd.f32 %v5915_v46, %v2409_v60 }
 0x9de   :  { %vm2398_vm0 = vmor %vm2396_vm15, %vm2397_vm14 }
 0x9df   :  { %v2393_v38 = vsub.f32 1.0, %v2392_v29  ;;  %v2414_v44 = vsel %vm2413_vm4, %v5915_v46, %v2410_v55  ;;  %v2698_v46 = vld [vmem:[%s8349_s23 + $0xa8] sm:$0xff] }
 0x9e0   :  { %v2419_v24 = vsel %vm2416_vm5, %v2418_v20, %v2414_v44  ;;  %v10495_v20 = vld [vmem:[#allocation20_spill] sm:$0xff] }
 0x9e1   :  { %v2394_v50 = vmul.f32 %v5917_v43, %v2393_v38  ;;  %v2428_v35 = vsub.f32 1.0, %v2419_v24  ;;  %v2433_v12 = vmul.f32 %v2431_v0, %v2419_v24  ;;  %v2689_v38 = vld [vmem:[%s8349_s23 + $0x60] sm:$0xff]  ;;  %v10496_v24 = vld [vmem:[#allocation17_spill] sm:$0xff] }
 0x9e3   :  { %v2395_v40 = vadd.f32 %v5917_v43, %v2394_v50  ;;  %v2683_v50 = vld [vmem:[%s8349_s23 + $0x30] sm:$0xff] }
 0x9e5   :  { %v2399_v4 = vsel %vm2398_vm0, %v5917_v43, %v2395_v40  ;;  %v2692_v43 = vld [vmem:[%s8349_s23 + $0x78] sm:$0xff]  ;;  %v2677_v40 = vld [vmem:[%s8349_s23] sm:$0xff] }
 0x9e6   :  { %v2404_v59 = vsel %vm2401_vm1, %v2403_v10, %v2399_v4 }
 0x9e7   :  { %v2425_v28 = vmul.f32 %v2423_v56, %v2404_v59 }
 0x9e9   :  { %v2426_v42 = vadd.f32 %v2425_v28, %v8306_v27  ;;  %v2722_v27 = vld [vmem:[%s8349_s23 + $0x168] sm:$0xff] }
 0x9eb   :  { %5918 = vtanh.f32 %v2426_v42 }
 0x9f1   :  { %v5919_v14 = vpop.eup %5918 }
 0x9f2   :  { %v2429_v31 = vmul.f32 %v5919_v14, %v2428_v35  ;;  %v1671_v35 = vadd.f32 %v10496_v24, %v10495_v20  ;;  %v2746_v24 = vld [vmem:[%s8416_s27 + $0xa8] sm:$0xff] }
 0x9f4   :  { %v8338_v17 = vadd.f32 %v2433_v12, %v2429_v31  ;;  %v8382_v12 = vld [vmem:[%s7776_s15] ss:$0 sm:$0xff]  ;;  %v8386_v52 = vadd.f32 %v10484_v51, %v1671_v35  ;;  %v8398_v51 = vsel %vm1391_vm10, %v7888_v25, %v7954_v58  ;;  %v2770_v58 = vld [vmem:[%s8416_s27 + $0x168] sm:$0xff]  ;;  %v2747_v35 = vld [vmem:[%s8416_s27 + $0xb0] sm:$0xff]  ;;  %s5553_s15 = sld [smem:[%s10240_s0 + %s6336_s12]]   ;;  %s6351_s12 = smov 40  }
 0x9f5   :  { %2773 = vmatpush.msrb.mxu0 %v2770_v58  ;;  %v2732_v58 = vld [vmem:[%s8416_s27 + $0x38] sm:$0xff] }
 0x9f6   :  { %v8341_v23 = vrot.slane %v8338_v17, 4 }
 0x9f8   :  { %2454 = vmatmul.f32.vlgmr.msrb.gmra.mxu2 %v8341_v23  ;;  %2474 = vmatmul.f32.vlgmr.msrb.gmra.mxu3 %v8341_v23 }
 0x9f9   :  { %2494 = vmatmul.f32.vlgmr.msra.gmra.mxu0 %v8341_v23  ;;  %2860 = vmatpush.msrb.mxu3 %v2722_v27 }
 0x9fb   :  { %2861 = vmatpush.msrb.mxu3 %v2719_v3 }
 0x9fd   :  { %2862 = vmatpush.msrb.mxu3 %v2716_v37 }
 0x9ff   :  { %2863 = vmatpush.msrb.mxu3 %v2713_v26 }
 0xa01   :  { %2864 = vmatpush.msrb.mxu3 %v2710_v54 }
 0xa03   :  { %2865 = vmatpush.msrb.mxu3 %v2707_v21 }
 0xa05   :  { %2866 = vmatpush.msrb.mxu3 %v2704_v61 }
 0xa07   :  { %2867 = vmatpush.msrb.mxu3 %v2701_v63  ;;  %v2767_v63 = vld [vmem:[%s8416_s27 + $0x150] sm:$0xff] }
 0xa08   :  { %2774 = vmatpush.msrb.mxu0 %v2767_v63  ;;  %v2728_v63 = vld [vmem:[%s8416_s27 + $0x18] sm:$0xff] }
 0xa09   :  { %2868 = vmatpush.msrb.mxu3 %v2698_v46  ;;  %v2768_v46 = vld [vmem:[%s8416_s27 + $0x158] sm:$0xff] }
 0xa0b   :  { %2869 = vmatpush.msrb.mxu3 %v2695_v15  ;;  %v2769_v15 = vld [vmem:[%s8416_s27 + $0x160] sm:$0xff] }
 0xa0d   :  { %2870 = vmatpush.msrb.mxu3 %v2692_v43  ;;  %v2764_v43 = vld [vmem:[%s8416_s27 + $0x138] sm:$0xff] }
 0xa0e   :  { %2775 = vmatpush.msrb.mxu0 %v2764_v43  ;;  %v2725_v43 = vld [vmem:[%s8416_s27] sm:$0xff] }
 0xa0f   :  { %2871 = vmatpush.msrb.mxu3 %v2689_v38  ;;  %v2762_v38 = vld [vmem:[%s8416_s27 + $0x128] sm:$0xff] }
 0xa11   :  { %2872 = vmatpush.msrb.mxu3 %v2686_v57  ;;  %v2758_v57 = vld [vmem:[%s8416_s27 + $0x108] sm:$0xff] }
 0xa13   :  { %2873 = vmatpush.msrb.mxu3 %v2683_v50  ;;  %v2759_v50 = vld [vmem:[%s8416_s27 + $0x110] sm:$0xff] }
 0xa15   :  { %2874 = vmatpush.msrb.mxu3 %v2680_v13  ;;  %v2760_v13 = vld [vmem:[%s8416_s27 + $0x118] sm:$0xff] }
 0xa17   :  { %2875 = vmatpush.msrb.mxu3 %v2677_v40  ;;  %v2756_v40 = vld [vmem:[%s8416_s27 + $0xf8] sm:$0xff] }
 0xa76   :  { %v2495_v42 = vpop.f32.mrf.mxu0 }
 0xa77   :  { %v2538_v27 = vadd.f32 %v8382_v12, %v2495_v42  ;;  %v2750_v42 = vld [vmem:[%s8416_s27 + $0xc8] sm:$0xff] }
 0xa7b   :  { %v2455_v2 = vpop.f32.mrf.mxu2  ;;  %v2475_v7 = vpop.f32.mrf.mxu3 }
 0xa7c   :  { %v2498_v34 = vadd.f32 %v2455_v2, %v8360_v41  ;;  %v2499_v33 = vadd.f32 %v2475_v7, %v8363_v39 }
 0xa7e   :  { %v5650_v6 = vmul.f32 -1.442695, %v2498_v34  ;;  %v5651_v11 = vmul.f32 -1.442695, %v2499_v33 }
 0xa80   :  { %5920 = vpow2.f32 %v5650_v6  ;;  %v8404_v6 = vsel %vm1391_vm10, %v8057_v47, %v8186_v49  ;;  %v2771_v49 = vld [vmem:[%s8416_s27 + $0x170] sm:$0xff] }
 0xa81   :  { %5922 = vpow2.f32 %v5651_v11  ;;  %v8410_v11 = vsel %vm1391_vm10, %v8310_v36, %v8338_v17  ;;  %v2772_v17 = vld [vmem:[%s8416_s27 + $0x178] sm:$0xff]  ;;  %2802 = vmatpush.msrb.mxu1 %v2771_v49 }
 0xa82   :  { %2831 = vmatpush.msrb.mxu2 %v2772_v17  ;;  %v2733_v17 = vld [vmem:[%s8416_s27 + $0x40] sm:$0xff] }
 0xa83   :  { %2803 = vmatpush.msrb.mxu1 %v2768_v46  ;;  %v2729_v46 = vld [vmem:[%s8416_s27 + $0x20] sm:$0xff] }
 0xa84   :  { %2832 = vmatpush.msrb.mxu2 %v2769_v15  ;;  %v2730_v15 = vld [vmem:[%s8416_s27 + $0x28] sm:$0xff] }
 0xa86   :  { %v5921_v29 = vpop.eup %5920 }
 0xa87   :  { %v5923_v53 = vpop.eup %5922  ;;  %v2506_v30 = vadd.f32 1.0, %v5921_v29  ;;  %v2765_v29 = vld [vmem:[%s8416_s27 + $0x140] sm:$0xff] }
 0xa88   :  { %v2507_v48 = vadd.f32 1.0, %v5923_v53  ;;  %v2766_v53 = vld [vmem:[%s8416_s27 + $0x148] sm:$0xff]  ;;  %2804 = vmatpush.msrb.mxu1 %v2765_v29 }
 0xa89   :  { %5924 = vrcp.f32 %v2506_v30  ;;  %v2519_v59 = vand.u32 2147483648, %v2506_v30  ;;  %v2517_v1 = vand.u32 2147483647, %v2506_v30  ;;  %vm2513_vm7 = vweird.f32 %v2506_v30  ;;  %2833 = vmatpush.msrb.mxu2 %v2766_v53  ;;  %v2726_v29 = vld [vmem:[%s8416_s27 + $0x8] sm:$0xff]  ;;  %v2727_v53 = vld [vmem:[%s8416_s27 + $0x10] sm:$0xff] }
 0xa8a   :  { %5926 = vrcp.f32 %v2507_v48  ;;  %v2534_v8 = vand.u32 2147483648, %v2507_v48  ;;  %vm2528_vm12 = vweird.f32 %v2507_v48  ;;  %v2532_v22 = vand.u32 2147483647, %v2507_v48  ;;  %2805 = vmatpush.msrb.mxu1 %v2762_v38 }
 0xa8b   :  { %v2520_v31 = vor.u32 1.1754944e-38, %v2519_v59  ;;  %vm2518_vm9 = vcmp.eq.f32.partialorder %v2517_v1, 8.507059e+37  ;;  %v2753_v59 = vld [vmem:[%s8416_s27 + $0xe0] sm:$0xff] }
 0xa8c   :  { %v2535_v54 = vor.u32 1.1754944e-38, %v2534_v8  ;;  %vm2533_vm14 = vcmp.eq.f32.partialorder %v2532_v22, 8.507059e+37  ;;  %2806 = vmatpush.msrb.mxu1 %v2759_v50  ;;  %v2749_v1 = vld [vmem:[%s8416_s27 + $0xc0] sm:$0xff]  ;;  %v2742_v8 = vld [vmem:[%s8416_s27 + $0x88] sm:$0xff]  ;;  %v2720_v50 = vld [vmem:[%s8349_s23 + $0x158] sm:$0xff] }
 0xa8e   :  { %2807 = vmatpush.msrb.mxu1 %v2756_v40  ;;  %v2717_v40 = vld [vmem:[%s8349_s23 + $0x140] sm:$0xff] }
 0xa8f   :  { %v5925_v60 = vpop.eup %5924 }
 0xa90   :  { %v5927_v10 = vpop.eup %5926  ;;  %v2509_v56 = vmul.f32 %v5925_v60, %v2506_v30  ;;  %vm2514_vm6 = vweird.f32 %v5925_v60  ;;  %v2761_v30 = vld [vmem:[%s8416_s27 + $0x120] sm:$0xff]  ;;  %2808 = vmatpush.msrb.mxu1 %v2753_v59 }
 0xa91   :  { %v2524_v4 = vmul.f32 %v5927_v10, %v2507_v48  ;;  %vm2515_vm8 = vmor %vm2513_vm7, %vm2514_vm6  ;;  %vm2529_vm11 = vweird.f32 %v5927_v10  ;;  %v2763_v48 = vld [vmem:[%s8416_s27 + $0x130] sm:$0xff]  ;;  %2776 = vmatpush.msrb.mxu0 %v2761_v30 }
 0xa92   :  { %v2510_v55 = vsub.f32 1.0, %v2509_v56  ;;  %vm2530_vm13 = vmor %vm2528_vm12, %vm2529_vm11  ;;  %2834 = vmatpush.msrb.mxu2 %v2763_v48  ;;  %2809 = vmatpush.msrb.mxu1 %v2750_v42  ;;  %v2723_v48 = vld [vmem:[%s8349_s23 + $0x170] sm:$0xff] }
 0xa93   :  { %v2525_v19 = vsub.f32 1.0, %v2524_v4  ;;  %2777 = vmatpush.msrb.mxu0 %v2758_v57  ;;  %v2724_v57 = vld [vmem:[%s8349_s23 + $0x178] sm:$0xff] }
 0xa94   :  { %v2511_v28 = vmul.f32 %v5925_v60, %v2510_v55  ;;  %2835 = vmatpush.msrb.mxu2 %v2760_v13  ;;  %v2752_v55 = vld [vmem:[%s8416_s27 + $0xd8] sm:$0xff]  ;;  %2810 = vmatpush.msrb.mxu1 %v2747_v35  ;;  %v2721_v13 = vld [vmem:[%s8349_s23 + $0x160] sm:$0xff] }
 0xa95   :  { %v2526_v44 = vmul.f32 %v5927_v10, %v2525_v19  ;;  %v2754_v19 = vld [vmem:[%s8416_s27 + $0xe8] sm:$0xff]  ;;  %v2712_v35 = vld [vmem:[%s8349_s23 + $0x118] sm:$0xff] }
 0xa96   :  { %v2512_v14 = vadd.f32 %v5925_v60, %v2511_v28 }
 0xa97   :  { %v2527_v9 = vadd.f32 %v5927_v10, %v2526_v44  ;;  %v2751_v44 = vld [vmem:[%s8416_s27 + $0xd0] sm:$0xff] }
 0xa98   :  { %v2516_v3 = vsel %vm2515_vm8, %v5925_v60, %v2512_v14  ;;  %v2755_v60 = vld [vmem:[%s8416_s27 + $0xf0] sm:$0xff]  ;;  %v2748_v14 = vld [vmem:[%s8416_s27 + $0xb8] sm:$0xff]  ;;  %vm3075_vm8 = vcmask 261120  }
 0xa99   :  { %v2521_v45 = vsel %vm2518_vm9, %v2520_v31, %v2516_v3  ;;  %v2531_v26 = vsel %vm2530_vm13, %v5927_v10, %v2527_v9  ;;  %v2757_v10 = vld [vmem:[%s8416_s27 + $0x100] sm:$0xff]  ;;  %2778 = vmatpush.msrb.mxu0 %v2755_v60  ;;  %v2740_v9 = vld [vmem:[%s8416_s27 + $0x78] sm:$0xff]  ;;  %vm3307_vm13 = vcmask 523264  }
 0xa9a   :  { %v2539_v18 = vmul.f32 %v2538_v27, %v2521_v45  ;;  %v2536_v2 = vsel %vm2533_vm14, %v2535_v54, %v2531_v26  ;;  %2836 = vmatpush.msrb.mxu2 %v2757_v10  ;;  %v2744_v27 = vld [vmem:[%s8416_s27 + $0x98] sm:$0xff]  ;;  %v2745_v3 = vld [vmem:[%s8416_s27 + $0xa0] sm:$0xff]  ;;  %v2738_v26 = vld [vmem:[%s8416_s27 + $0x68] sm:$0xff] }
 0xa9b   :  { %v2542_v7 = vsub.f32 1.0, %v2536_v2  ;;  %v2544_v33 = vmul.f32 %v2536_v2, %v8341_v23  ;;  %2779 = vmatpush.msrb.mxu0 %v2752_v55  ;;  %2811 = vmatpush.msrb.mxu1 %v2744_v27  ;;  %v2739_v54 = vld [vmem:[%s8416_s27 + $0x70] sm:$0xff]  ;;  %v2714_v55 = vld [vmem:[%s8349_s23 + $0x128] sm:$0xff]  ;;  %v2709_v27 = vld [vmem:[%s8349_s23 + $0x100] sm:$0xff] }
 0xa9c   :  { %v2540_v37 = vadd.f32 %v2539_v18, %v8386_v52  ;;  %2837 = vmatpush.msrb.mxu2 %v2754_v19  ;;  %v2741_v18 = vld [vmem:[%s8416_s27 + $0x80] sm:$0xff]  ;;  %v2715_v19 = vld [vmem:[%s8349_s23 + $0x130] sm:$0xff] }
 0xa9d   :  { %2780 = vmatpush.msrb.mxu0 %v2749_v1  ;;  %2812 = vmatpush.msrb.mxu1 %v2741_v18 }
 0xa9e   :  { %5928 = vtanh.f32 %v2540_v37  ;;  %2838 = vmatpush.msrb.mxu2 %v2751_v44  ;;  %v2737_v37 = vld [vmem:[%s8416_s27 + $0x60] sm:$0xff] }
 0xa9f   :  { %2781 = vmatpush.msrb.mxu0 %v2746_v24  ;;  %2813 = vmatpush.msrb.mxu1 %v2738_v26  ;;  %v2711_v24 = vld [vmem:[%s8349_s23 + $0x110] sm:$0xff] }
 0xaa0   :  { %2839 = vmatpush.msrb.mxu2 %v2748_v14  ;;  %v2708_v14 = vld [vmem:[%s8349_s23 + $0xf8] sm:$0xff] }
 0xaa2   :  { %2840 = vmatpush.msrb.mxu2 %v2745_v3 }
 0xaa4   :  { %v5929_v21 = vpop.eup %5928  ;;  %2841 = vmatpush.msrb.mxu2 %v2742_v8  ;;  %v2706_v8 = vld [vmem:[%s8349_s23 + $0xe8] sm:$0xff] }
 0xaa5   :  { %v2543_v34 = vmul.f32 %v5929_v21, %v2542_v7  ;;  %v2734_v7 = vld [vmem:[%s8416_s27 + $0x48] sm:$0xff]  ;;  %v2735_v21 = vld [vmem:[%s8416_s27 + $0x50] sm:$0xff] }
 0xaa6   :  { %2842 = vmatpush.msrb.mxu2 %v2739_v54  ;;  %2814 = vmatpush.msrb.mxu1 %v2735_v21 }
 0xaa7   :  { %v8390_v61 = vadd.f32 %v2544_v33, %v2543_v34  ;;  %v2736_v34 = vld [vmem:[%s8416_s27 + $0x58] sm:$0xff]  ;;  %v2731_v33 = vld [vmem:[%s8416_s27 + $0x30] sm:$0xff] }
 0xaa8   :  { %2843 = vmatpush.msrb.mxu2 %v2736_v34  ;;  %2815 = vmatpush.msrb.mxu1 %v2732_v58  ;;  %v2700_v58 = vld [vmem:[%s8349_s23 + $0xb8] sm:$0xff] }
 0xaa9   :  { %2562 = vmatmul.f32.vlgmr.msra.gmra.mxu1 %v8390_v61  ;;  %2582 = vmatmul.f32.vlgmr.msra.gmra.mxu2 %v8390_v61 }
 0xaaa   :  { %2602 = vmatmul.f32.vlgmr.msra.gmra.mxu3 %v8390_v61  ;;  %2844 = vmatpush.msrb.mxu2 %v2733_v17 }
 0xaab   :  { %2816 = vmatpush.msrb.mxu1 %v2729_v46  ;;  %v2697_v46 = vld [vmem:[%s8349_s23 + $0xa0] sm:$0xff] }
 0xaac   :  { %2845 = vmatpush.msrb.mxu2 %v2730_v15  ;;  %v2693_v15 = vld [vmem:[%s8349_s23 + $0x80] sm:$0xff] }
 0xaad   :  { %2817 = vmatpush.msrb.mxu1 %v2726_v29  ;;  %v2690_v29 = vld [vmem:[%s8349_s23 + $0x68] sm:$0xff] }
 0xaae   :  { %2846 = vmatpush.msrb.mxu2 %v2727_v53  ;;  %v2691_v53 = vld [vmem:[%s8349_s23 + $0x70] sm:$0xff] }
 0xaaf   :  { %2918 = vmatpush.msra.mxu1 %v2724_v57 }
 0xab1   :  { %2919 = vmatpush.msra.mxu1 %v2721_v13  ;;  %v2687_v13 = vld [vmem:[%s8349_s23 + $0x50] sm:$0xff] }
 0xab2   :  { %2876 = vmatmul.f32.vlgmr.msrb.gmra.mxu3 %v8398_v51 }
 0xaba   :  { %2879 = vmatmul.f32.gmra.mxu3 %v8404_v6 }
 0xac2   :  { %2882 = vmatmul.f32.gmra.mxu3 %v8410_v11 }
 0xb26   :  { %v2563_v56 = vpop.f32.mrf.mxu1 }
 0xb27   :  { %v2608_v4 = vrot.slane %v2563_v56, 4  ;;  %v2718_v56 = vld [vmem:[%s8349_s23 + $0x148] sm:$0xff] }
 0xb28   :  { %2920 = vmatpush.msra.mxu1 %v2718_v56 }
 0xb29   :  { %v2612_v28 = vadd.f32 %v2608_v4, %v8360_v41  ;;  %v2743_v41 = vld [vmem:[%s8416_s27 + $0x90] sm:$0xff]  ;;  %s6347_s27 = smov 37  }
 0xb2a   :  { %2782 = vmatpush.msrb.mxu0 %v2743_v41  ;;  %2921 = vmatpush.msra.mxu1 %v2715_v19 }
 0xb2b   :  { %v5652_v20 = vmul.f32 -1.442695, %v2612_v28 }
 0xb2c   :  { %v2583_v31 = vpop.f32.mrf.mxu2  ;;  %2783 = vmatpush.msrb.mxu0 %v2740_v9  ;;  %2922 = vmatpush.msra.mxu1 %v2712_v35 }
 0xb2d   :  { %5930 = vpow2.f32 %v5652_v20  ;;  %v2609_v45 = vrot.slane %v2583_v31, 4  ;;  %v2603_v4 = vpop.f32.mrf.mxu3 }
 0xb2e   :  { %2784 = vmatpush.msrb.mxu0 %v2737_v37  ;;  %v2652_v44 = vadd.f32 %v8382_v12, %v2603_v4  ;;  %v2705_v12 = vld [vmem:[%s8349_s23 + $0xe0] sm:$0xff]  ;;  %2923 = vmatpush.msra.mxu1 %v2709_v27  ;;  %v2702_v37 = vld [vmem:[%s8349_s23 + $0xc8] sm:$0xff] }
 0xb2f   :  { %v2613_v22 = vadd.f32 %v2609_v45, %v8363_v39  ;;  %v2681_v4 = vld [vmem:[%s8349_s23 + $0x20] sm:$0xff] }
 0xb30   :  { %2785 = vmatpush.msrb.mxu0 %v2734_v7  ;;  %v2654_v18 = vrot.slane %v2652_v44, 4  ;;  %v2703_v7 = vld [vmem:[%s8349_s23 + $0xd0] sm:$0xff]  ;;  %2924 = vmatpush.msra.mxu1 %v2706_v8  ;;  %v2675_v44 = vsel %vm1391_vm10, %v8189_v32, %v2200_v5  ;;  %v2947_v27 = vld [vmem:[%s5568_s1] sm:$0x7] }
 0xb31   :  { %v5653_v2 = vmul.f32 -1.442695, %v2613_v22 }
 0xb32   :  { %2786 = vmatpush.msrb.mxu0 %v2731_v33  ;;  %2925 = vmatpush.msra.mxu1 %v2703_v7  ;;  %v2699_v33 = vld [vmem:[%s8349_s23 + $0xb0] sm:$0xff] }
 0xb33   :  { %v5931_v39 = vpop.eup %5930  ;;  %5932 = vpow2.f32 %v5653_v2 }
 0xb34   :  { %v8461_v49 = vadd.f32 1.0, %v5931_v39  ;;  %2787 = vmatpush.msrb.mxu0 %v2728_v63  ;;  %2926 = vmatpush.msra.mxu1 %v2700_v58 }
 0xb36   :  { %5934 = vrcp.f32 %v8461_v49  ;;  %2788 = vmatpush.msrb.mxu0 %v2725_v43  ;;  %v2633_v28 = vand.u32 2147483648, %v8461_v49  ;;  %v2631_v42 = vand.u32 2147483647, %v8461_v49  ;;  %vm2627_vm0 = vweird.f32 %v8461_v49  ;;  %v2694_v43 = vld [vmem:[%s8349_s23 + $0x88] sm:$0xff]  ;;  %2927 = vmatpush.msra.mxu1 %v2697_v46 }
 0xb38   :  { %2889 = vmatpush.msra.mxu0 %v2723_v48  ;;  %v2634_v3 = vor.u32 1.1754944e-38, %v2633_v28  ;;  %vm2632_vm2 = vcmp.eq.f32.partialorder %v2631_v42, 8.507059e+37  ;;  %2928 = vmatpush.msra.mxu1 %v2694_v43  ;;  %v2678_v28 = vld [vmem:[%s8349_s23 + $0x8] sm:$0xff]  ;;  %v2679_v42 = vld [vmem:[%s8349_s23 + $0x10] sm:$0xff] }
 0xb39   :  { %v5933_v30 = vpop.eup %5932 }
 0xb3a   :  { %v8471_v38 = vadd.f32 1.0, %v5933_v30  ;;  %2890 = vmatpush.msra.mxu0 %v2720_v50  ;;  %2929 = vmatpush.msra.mxu1 %v2691_v53 }
 0xb3c   :  { %v5935_v60 = vpop.eup %5934  ;;  %5936 = vrcp.f32 %v8471_v38  ;;  %2891 = vmatpush.msra.mxu0 %v2717_v40  ;;  %v2648_v2 = vand.u32 2147483648, %v8471_v38  ;;  %vm2642_vm4 = vweird.f32 %v8471_v38  ;;  %v2646_v21 = vand.u32 2147483647, %v8471_v38  ;;  %v2684_v40 = vld [vmem:[%s8349_s23 + $0x38] sm:$0xff] }
 0xb3d   :  { %v2623_v10 = vmul.f32 %v5935_v60, %v8461_v49  ;;  %vm2628_vm15 = vweird.f32 %v5935_v60  ;;  %v2696_v49 = vld [vmem:[%s8349_s23 + $0x98] sm:$0xff] }
 0xb3e   :  { %2892 = vmatpush.msra.mxu0 %v2714_v55  ;;  %vm2629_vm1 = vmor %vm2627_vm0, %vm2628_vm15  ;;  %v2649_v63 = vor.u32 1.1754944e-38, %v2648_v2  ;;  %vm2647_vm6 = vcmp.eq.f32.partialorder %v2646_v21, 8.507059e+37  ;;  %v2682_v55 = vld [vmem:[%s8349_s23 + $0x28] sm:$0xff]  ;;  %vm3209_vm15 = vcmask 1042432   ;;  %vm3205_vm0 = vcmask 23552  }
 0xb3f   :  { %v2624_v59 = vsub.f32 1.0, %v2623_v10  ;;  %v2685_v10 = vld [vmem:[%s8349_s23 + $0x40] sm:$0xff] }
 0xb40   :  { %2893 = vmatpush.msra.mxu0 %v2711_v24 }
 0xb41   :  { %v2625_v1 = vmul.f32 %v5935_v60, %v2624_v59 }
 0xb42   :  { %v5937_v20 = vpop.eup %5936  ;;  %2894 = vmatpush.msra.mxu0 %v2708_v14 }
 0xb43   :  { %v2638_v31 = vmul.f32 %v5937_v20, %v8471_v38  ;;  %v2626_v41 = vadd.f32 %v5935_v60, %v2625_v1  ;;  %vm2643_vm3 = vweird.f32 %v5937_v20  ;;  %v2662_v38 = vrot.slane %v8390_v61, 4 }
 0xb44   :  { %2895 = vmatpush.msra.mxu0 %v2705_v12  ;;  %vm2644_vm5 = vmor %vm2642_vm4, %vm2643_vm3  ;;  %v2950_v12 = vperm.slane %v2947_v27, 1 }
 0xb45   :  { %v2639_v45 = vsub.f32 1.0, %v2638_v31  ;;  %v2630_v9 = vsel %vm2629_vm1, %v5935_v60, %v2626_v41  ;;  %v2688_v60 = vld [vmem:[%s8349_s23 + $0x58] sm:$0xff]  ;;  %s5575_s23 = sld [smem:[%s10240_s0 + %s6338_s20]]  }
 0xb46   :  { %v2635_v22 = vsel %vm2632_vm2, %v2634_v3, %v2630_v9  ;;  %2896 = vmatpush.msra.mxu0 %v2702_v37  ;;  %2930 = vmatpush.msra.mxu1 %v2688_v60 }
 0xb47   :  { %v2656_v26 = vmul.f32 %v2654_v18, %v2635_v22  ;;  %v2640_v54 = vmul.f32 %v5937_v20, %v2639_v45  ;;  %v2951_v18 = vperm.slane %v2947_v27, 2 }
 0xb48   :  { %2897 = vmatpush.msra.mxu0 %v2699_v33  ;;  %2931 = vmatpush.msra.mxu1 %v2685_v10  ;;  %v3000_v10 = vlaneseq }
 0xb49   :  { %v2657_v34 = vadd.f32 %v2656_v26, %v8386_v52  ;;  %v2641_v39 = vadd.f32 %v5937_v20, %v2640_v54 }
 0xb4a   :  { %2898 = vmatpush.msra.mxu0 %v2696_v49  ;;  %2932 = vmatpush.msra.mxu1 %v2682_v55  ;;  %v2877_v49 = vpop.f32.mrf.mxu3 }
 0xb4b   :  { %5938 = vtanh.f32 %v2657_v34  ;;  %v2645_v17 = vsel %vm2644_vm5, %v5937_v20, %v2641_v39  ;;  %v2676_v20 = vsel %vm1391_vm10, %v7957_v62, %v1969_v16 }
 0xb4c   :  { %v2650_v52 = vsel %vm2647_vm6, %v2649_v63, %v2645_v17  ;;  %2899 = vmatpush.msra.mxu0 %v2693_v15  ;;  %2933 = vmatpush.msra.mxu1 %v2679_v42 }
 0xb4d   :  { %v2659_v30 = vsub.f32 1.0, %v2650_v52  ;;  %v2664_v50 = vmul.f32 %v2662_v38, %v2650_v52  ;;  %v2949_v52 = vperm.slane %v2947_v27, 0 }
 0xb4e   :  { %2900 = vmatpush.msra.mxu0 %v2690_v29 }
 0xb50   :  { %2901 = vmatpush.msra.mxu0 %v2687_v13 }
 0xb51   :  { %v5939_v48 = vpop.eup %5938 }
 0xb52   :  { %v2660_v57 = vmul.f32 %v5939_v48, %v2659_v30  ;;  %2902 = vmatpush.msra.mxu0 %v2684_v40  ;;  %v2880_v53 = vpop.f32.mrf.mxu3 }
 0xb54   :  { %v2665_v56 = vadd.f32 %v2664_v50, %v2660_v57  ;;  %2903 = vmatpush.msra.mxu0 %v2681_v4  ;;  %v3054_v4 = vand.u32 127, %v3000_v10 }
 0xb56   :  { %v2669_v59 = vsel %vm1391_vm10, %v8390_v61, %v2665_v56  ;;  %v8517_v19 = vrot.slane %v2665_v56, 4  ;;  %2904 = vmatpush.msra.mxu0 %v2678_v28  ;;  %v2674_v61 = vsel %vm1391_vm10, %v8341_v23, %v2431_v0  ;;  %v8544_v56 = vshrl.u32 %v3000_v10, 7  ;;  %v3299_v10 = vld [vmem:[%s5574_s21] sm:$0xff] }
 0xb57   :  { %2885 = vmatmul.f32.gmra.mxu3 %v2669_v59 }
 0xb58   :  { %10497 = vst [vmem:[#allocation34_spill] sm:$0xff] %v8517_v19  ;;  %v2673_v1 = vsel %vm1391_vm10, %v8517_v19, %v2662_v38  ;;  %v3009_v55 = vand.u32 3, %v8544_v56 }
 0xb59   :  { %2789 = vmatmul.f32.vlgmr.msrb.gmra.mxu0 %v2673_v1  ;;  %2818 = vmatmul.f32.vlgmr.msrb.gmra.mxu1 %v2673_v1 }
 0xb5a   :  { %2847 = vmatmul.f32.vlgmr.msrb.gmra.mxu2 %v2673_v1  ;;  %v2883_v48 = vpop.f32.mrf.mxu3  ;;  %v3002_v1 = vadd.s32 8, %v8544_v56 }
 0xb61   :  { %2792 = vmatmul.f32.gmra.mxu0 %v2674_v61  ;;  %2821 = vmatmul.f32.gmra.mxu1 %v2674_v61 }
 0xb62   :  { %2850 = vmatmul.f32.gmra.mxu2 %v2674_v61 }
 0xb69   :  { %2795 = vmatmul.f32.gmra.mxu0 %v2675_v44  ;;  %2824 = vmatmul.f32.gmra.mxu1 %v2675_v44 }
 0xb6a   :  { %2853 = vmatmul.f32.gmra.mxu2 %v2675_v44 }
 0xb71   :  { %2798 = vmatmul.f32.gmra.mxu0 %v2676_v20  ;;  %2827 = vmatmul.f32.gmra.mxu1 %v2676_v20 }
 0xb72   :  { %2856 = vmatmul.f32.gmra.mxu2 %v2676_v20  ;;  %v3016_v20 = vand.u32 3, %v3002_v1 }
 0xb79   :  { %2905 = vmatmul.f32.vlgmr.msra.gmra.mxu0 %v8398_v51  ;;  %2934 = vmatmul.f32.vlgmr.msra.gmra.mxu1 %v8398_v51 }
 0xb81   :  { %2908 = vmatmul.f32.gmra.mxu0 %v8404_v6  ;;  %2937 = vmatmul.f32.gmra.mxu1 %v8404_v6 }
 0xb89   :  { %2911 = vmatmul.f32.gmra.mxu0 %v8410_v11  ;;  %2940 = vmatmul.f32.gmra.mxu1 %v8410_v11 }
 0xb91   :  { %2914 = vmatmul.f32.gmra.mxu0 %v2669_v59  ;;  %2943 = vmatmul.f32.gmra.mxu1 %v2669_v59  ;;  %v8547_v59 = vand.u32 3, %v3054_v4  ;;  %v5771_v4 = vld [vmem:[%s8572_s5] ss:$0 sm:$0xff]  ;;  %s6349_s5 = smov 38  }
 0xb93   :  { %vm3067_vm7 = vcmp.eq.s32.totalorder %v3009_v55, %v8547_v59  ;;  %vm3068_vm9 = vcmp.eq.s32.totalorder %v3016_v20, %v8547_v59  ;;  %vm3161_vm14 = vcmp.eq.s32.totalorder %v8544_v56, %v8547_v59 }
 0xbd6   :  { %v2790_v25 = vpop.f32.mrf.mxu0  ;;  %v2819_v47 = vpop.f32.mrf.mxu1 }
 0xbd7   :  { %v2878_v15 = vadd.f32 %v2877_v49, %v2790_v25 }
 0xbd9   :  { %v2955_v29 = vadd.f32 %v2949_v52, %v2878_v15  ;;  %v3260_v15 = vld [vmem:[%s5554_s17 + $0x8] sm:$0xf] }
 0xbda   :  { %v2886_v13 = vpop.f32.mrf.mxu3 }
 0xbdd   :  { %v2848_v23 = vpop.f32.mrf.mxu2 }
 0xbde   :  { %v2793_v16 = vpop.f32.mrf.mxu0  ;;  %v2822_v62 = vpop.f32.mrf.mxu1 }
 0xbdf   :  { %v2881_v30 = vadd.f32 %v2880_v53, %v2793_v16  ;;  %v3304_v53 = vld [vmem:[%s5574_s21 + $0x28] sm:$0xff] }
 0xbe1   :  { %v2958_v38 = vadd.f32 %v2949_v52, %v2881_v30 }
 0xbe5   :  { %v2851_v35 = vpop.f32.mrf.mxu2 }
 0xbe6   :  { %v2796_v5 = vpop.f32.mrf.mxu0  ;;  %v2825_v32 = vpop.f32.mrf.mxu1 }
 0xbe7   :  { %v2884_v57 = vadd.f32 %v2883_v48, %v2796_v5  ;;  %v3302_v48 = vld [vmem:[%s5574_s21 + $0x18] sm:$0xff] }
 0xbe9   :  { %v2961_v50 = vadd.f32 %v2949_v52, %v2884_v57  ;;  %v3301_v57 = vld [vmem:[%s5574_s21 + $0x10] sm:$0xff] }
 0xbed   :  { %v2854_v31 = vpop.f32.mrf.mxu2 }
 0xbee   :  { %v2799_v36 = vpop.f32.mrf.mxu0  ;;  %v2828_v0 = vpop.f32.mrf.mxu1 }
 0xbef   :  { %v2887_v60 = vadd.f32 %v2886_v13, %v2799_v36 }
 0xbf1   :  { %v2964_v40 = vadd.f32 %v2949_v52, %v2887_v60  ;;  %v3259_v52 = vld [vmem:[%s5554_s17] sm:$0xff]  ;;  %s10139_s17 = sld [smem:[%s10240_s0 + %s6344_s14]]  }
 0xbf5   :  { %v2857_v3 = vpop.f32.mrf.mxu2 }
 0xbf6   :  { %v2906_v51 = vpop.f32.mrf.mxu0  ;;  %v2935_v24 = vpop.f32.mrf.mxu1 }
 0xbf7   :  { %v2936_v21 = vadd.f32 %v2935_v24, %v2848_v23  ;;  %v2907_v63 = vadd.f32 %v2906_v51, %v2819_v47  ;;  %v3003_v47 = vadd.s32 16, %v8544_v56 }
 0xbf9   :  { %v2957_v17 = vadd.f32 %v2951_v18, %v2936_v21  ;;  %v2956_v43 = vadd.f32 %v2950_v12, %v2907_v63  ;;  %v3283_v63 = vld [vmem:[%s5555_s13] sm:$0xff] }
 0xbfe   :  { %v2909_v14 = vpop.f32.mrf.mxu0  ;;  %v2938_v6 = vpop.f32.mrf.mxu1 }
 0xbff   :  { %v2939_v26 = vadd.f32 %v2938_v6, %v2851_v35  ;;  %v2910_v39 = vadd.f32 %v2909_v14, %v2822_v62 }
 0xc01   :  { %v2960_v33 = vadd.f32 %v2951_v18, %v2939_v26  ;;  %v2959_v46 = vadd.f32 %v2950_v12, %v2910_v39 }
 0xc06   :  { %v2912_v11 = vpop.f32.mrf.mxu0  ;;  %v2941_v41 = vpop.f32.mrf.mxu1 }
 0xc07   :  { %v2942_v8 = vadd.f32 %v2941_v41, %v2854_v31  ;;  %v2913_v54 = vadd.f32 %v2912_v11, %v2825_v32  ;;  %v3023_v32 = vand.u32 3, %v3003_v47 }
 0xc09   :  { %v2963_v34 = vadd.f32 %v2951_v18, %v2942_v8  ;;  %v2962_v58 = vadd.f32 %v2950_v12, %v2913_v54  ;;  %vm3069_vm11 = vcmp.eq.s32.totalorder %v3023_v32, %v8547_v59 }
 0xc0e   :  { %v2915_v45 = vpop.f32.mrf.mxu0  ;;  %v2944_v9 = vpop.f32.mrf.mxu1 }
 0xc0f   :  { %v2916_v22 = vadd.f32 %v2915_v45, %v2828_v0  ;;  %v2945_v37 = vadd.f32 %v2944_v9, %v2857_v3  ;;  %v3004_v0 = vadd.s32 24, %v8544_v56  ;;  %v3200_v56 = vld [vmem:[%s8725_s7 + $0x68] sm:$0xff] }
 0xc11   :  { %v2965_v2 = vadd.f32 %v2950_v12, %v2916_v22  ;;  %v2966_v7 = vadd.f32 %v2951_v18, %v2945_v37  ;;  %v3030_v35 = vand.u32 3, %v3004_v0  ;;  %v6325_v12 = vmov 0  }
 0xc12   :  { %5767 = vset.pattern.permute.xlu0 %v6325_v12  ;;  %5768 = vset.pattern.permute.xlu1 %v6325_v12 }
 0xc13   :  { %2979 = vmatpush.xpose.msra.mxu2 %v2965_v2  ;;  %3144 = vmatpush.msra.mxu3 %v2966_v7  ;;  %vm3070_vm12 = vcmp.eq.s32.totalorder %v3030_v35, %v8547_v59  ;;  %v8755_v59 = vld [vmem:[%s8681_s3 + $0x30] sm:$0xff] }
 0xc14   :  { %5766 = vset.pattern.permute.xlu2 %v6325_v12  ;;  %v8636_v12 = vld [vmem:[%s8601_s25 + $0x38] sm:$0xff]  ;;  %10499 = vst [vmem:[#allocation23_spill] sm:$0xff] %v8755_v59 }
 0xc15   :  { %3145 = vmatpush.msra.mxu3 %v2963_v34 }
 0xc17   :  { %2980 = vmatpush.xpose.msra.mxu2 %v2962_v58  ;;  %3146 = vmatpush.msra.mxu3 %v2960_v33 }
 0xc19   :  { %3147 = vmatpush.msra.mxu3 %v2957_v17 }
 0xc1b   :  { %2981 = vmatpush.xpose.msra.mxu2 %v2959_v46  ;;  %v3284_v46 = vld [vmem:[%s5555_s13 + $0x8] sm:$0xf]  ;;  %s10110_s13 = sld [smem:[%s10240_s0 + %s6343_s10]]  }
 0xc1f   :  { %2982 = vmatpush.xpose.msra.mxu2 %v2956_v43  ;;  %v3306_v43 = vld [vmem:[%s5574_s21 + $0x38] sm:$0xff] }
 0xc20   :  { %3351 = vmatpush.msrb.mxu0 %v3306_v43  ;;  %3322 = vmatpush.msrb.mxu3 %v3306_v43  ;;  %v8716_v43 = vld [vmem:[%s8681_s3 + $0xc0] sm:$0xff] }
 0xc22   :  { %2983 = vmatmul.f32.vlgmr.msra.gmra.mxu2 %v2955_v29  ;;  %v3305_v29 = vld [vmem:[%s5574_s21 + $0x30] sm:$0xff] }
 0xc23   :  { %3352 = vmatpush.msrb.mxu0 %v3305_v29  ;;  %3323 = vmatpush.msrb.mxu3 %v3305_v29  ;;  %v8720_v29 = vld [vmem:[%s8681_s3 + $0xa8] sm:$0xff] }
 0xc25   :  { %3353 = vmatpush.msrb.mxu0 %v3304_v53  ;;  %3324 = vmatpush.msrb.mxu3 %v3304_v53  ;;  %v8730_v53 = vld [vmem:[%s8681_s3 + $0x90] sm:$0xff] }
 0xc2a   :  { %2986 = vmatmul.f32.gmra.mxu2 %v2958_v38  ;;  %v3303_v38 = vld [vmem:[%s5574_s21 + $0x20] sm:$0xff] }
 0xc2b   :  { %3354 = vmatpush.msrb.mxu0 %v3303_v38  ;;  %3325 = vmatpush.msrb.mxu3 %v3303_v38 }
 0xc2d   :  { %3355 = vmatpush.msrb.mxu0 %v3302_v48  ;;  %3326 = vmatpush.msrb.mxu3 %v3302_v48  ;;  %v8737_v48 = vld [vmem:[%s8681_s3 + $0x78] sm:$0xff] }
 0xc2f   :  { %3356 = vmatpush.msrb.mxu0 %v3301_v57  ;;  %3327 = vmatpush.msrb.mxu3 %v3301_v57  ;;  %v8743_v57 = vld [vmem:[%s8681_s3 + $0x60] sm:$0xff] }
 0xc32   :  { %2989 = vmatmul.f32.gmra.mxu2 %v2961_v50  ;;  %v3300_v50 = vld [vmem:[%s5574_s21 + $0x8] sm:$0xff]  ;;  %s10161_s21 = sld [smem:[%s10240_s0 + %s6345_s18]]  }
 0xc33   :  { %3357 = vmatpush.msrb.mxu0 %v3300_v50  ;;  %3328 = vmatpush.msrb.mxu3 %v3300_v50  ;;  %v3202_v50 = vld [vmem:[%s8725_s7 + $0x78] sm:$0xff] }
 0xc34   :  { %3233 = vmatpush.msrb.mxu2 %v3202_v50  ;;  %v3367_v50 = vld [vmem:[%s5575_s23 + $0x8] sm:$0xff] }
 0xc35   :  { %3358 = vmatpush.msrb.mxu0 %v3299_v10  ;;  %3329 = vmatpush.msrb.mxu3 %v3299_v10  ;;  %v8750_v10 = vld [vmem:[%s8681_s3 + $0x48] sm:$0xff] }
 0xc3a   :  { %2992 = vmatmul.f32.gmra.mxu2 %v2964_v40 }
 0xca5   :  { %v2984_v28 = vpop.f32.mrf.mxu2 }
 0xca6   :  { %v2996_v42 = vmul.f32 0.125, %v2984_v28  ;;  %v5772_v28 = vld [vmem:[%s8579_s9] ss:$0 sm:$0xff] }
 0xca8   :  { %v3071_v61 = vsel %vm3067_vm7, %v2996_v42, -1e+30 }
 0xca9   :  { %v3076_v44 = vsel %vm3075_vm8, %v3071_v61, -inf }
 0xcaa   :  { %3077 = vmax.xlane.f32.xlu0 %v3076_v44 }
 0xcad   :  { %v2987_v25 = vpop.f32.mrf.mxu2 }
 0xcae   :  { %v2997_v16 = vmul.f32 0.125, %v2987_v25 }
 0xcb0   :  { %v3072_v62 = vsel %vm3068_vm9, %v2997_v16, -1e+30 }
 0xcb1   :  { %v3079_v5 = vsel %vm3075_vm8, %v3072_v62, -inf }
 0xcb2   :  { %3080 = vmax.xlane.f32.xlu0 %v3079_v5 }
 0xcb5   :  { %v2990_v36 = vpop.f32.mrf.mxu2 }
 0xcb6   :  { %v2998_v23 = vmul.f32 0.125, %v2990_v36 }
 0xcb8   :  { %v3073_v51 = vsel %vm3069_vm11, %v2998_v23, -1e+30 }
 0xcb9   :  { %v3082_v24 = vsel %vm3075_vm8, %v3073_v51, -inf }
 0xcba   :  { %3083 = vmax.xlane.f32.xlu1 %v3082_v24 }
 0xcbd   :  { %v2993_v14 = vpop.f32.mrf.mxu2 }
 0xcbe   :  { %v2999_v6 = vmul.f32 0.125, %v2993_v14 }
 0xcc0   :  { %v3074_v31 = vsel %vm3070_vm12, %v2999_v6, -1e+30 }
 0xcc1   :  { %v3085_v11 = vsel %vm3075_vm8, %v3074_v31, -inf }
 0xcc2   :  { %3086 = vmax.xlane.f32.xlu1 %v3085_v11  ;;  %v8615_v11 = vld [vmem:[%s8601_s25 + $0x98] sm:$0xff] }
 0xd1d   :  { %v3078_v41 = vpop.xlane.xlu0 %3077 }
 0xd1e   :  { %v3088_v27 = vsub.f32 %v3071_v61, %v3078_v41  ;;  %v8619_v41 = vld [vmem:[%s8601_s25 + $0x80] sm:$0xff] }
 0xd20   :  { %v3092_v3 = vmul.f32 1.442695, %v3088_v27  ;;  %v8622_v27 = vld [vmem:[%s8601_s25 + $0x68] sm:$0xff] }
 0xd22   :  { %5940 = vpow2.f32 %v3092_v3  ;;  %v8631_v3 = vld [vmem:[%s8601_s25 + $0x50] sm:$0xff] }
 0xd25   :  { %v3081_v45 = vpop.xlane.xlu0 %3080 }
 0xd26   :  { %v3089_v9 = vsub.f32 %v3072_v62, %v3081_v45  ;;  %v8606_v62 = vld [vmem:[%s8601_s25 + $0xb0] sm:$0xff]  ;;  %v8640_v45 = vld [vmem:[%s8601_s25 + $0x20] sm:$0xff] }
 0xd28   :  { %v5941_v18 = vpop.eup %5940  ;;  %v3094_v8 = vmul.f32 1.442695, %v3089_v9  ;;  %v8643_v9 = vld [vmem:[%s8601_s25 + $0x8] sm:$0xff] }
 0xd29   :  { %v3100_v22 = vsel %vm3075_vm8, %v5941_v18, 0.0 }
 0xd2a   :  { %5942 = vpow2.f32 %v3094_v8  ;;  %3101 = vadd.xlane.f32.xlu2 %v3100_v22  ;;  %v8652_v8 = vld [vmem:[%s8627_s29 + $0xa0] sm:$0xff]  ;;  %v8655_v22 = vld [vmem:[%s8627_s29 + $0x88] sm:$0xff] }
 0xd2d   :  { %v3084_v37 = vpop.xlane.xlu1 %3083 }
 0xd2e   :  { %v3090_v26 = vsub.f32 %v3073_v51, %v3084_v37  ;;  %v8659_v37 = vld [vmem:[%s8627_s29 + $0x70] sm:$0xff] }
 0xd30   :  { %v8561_v54 = vpop.eup %5942  ;;  %v3096_v2 = vmul.f32 1.442695, %v3090_v26  ;;  %v8663_v26 = vld [vmem:[%s8627_s29 + $0x58] sm:$0xff] }
 0xd31   :  { %v3103_v7 = vsel %vm3075_vm8, %v8561_v54, 0.0 }
 0xd32   :  { %5944 = vpow2.f32 %v3096_v2  ;;  %3104 = vadd.xlane.f32.xlu2 %v3103_v7  ;;  %v8672_v2 = vld [vmem:[%s8627_s29 + $0x28] sm:$0xff]  ;;  %v8676_v7 = vld [vmem:[%s8627_s29 + $0x10] sm:$0xff] }
 0xd35   :  { %v3087_v21 = vpop.xlane.xlu1 %3086 }
 0xd36   :  { %v3091_v34 = vsub.f32 %v3074_v31, %v3087_v21 }
 0xd38   :  { %v8565_v39 = vpop.eup %5944  ;;  %v3098_v33 = vmul.f32 1.442695, %v3091_v34  ;;  %v8685_v34 = vld [vmem:[%s8681_s3 + $0x168] sm:$0xff] }
 0xd39   :  { %v3106_v58 = vsel %vm3075_vm8, %v8565_v39, 0.0 }
 0xd3a   :  { %5946 = vpow2.f32 %v3098_v33  ;;  %3107 = vadd.xlane.f32.xlu0 %v3106_v58  ;;  %v8692_v33 = vld [vmem:[%s8681_s3 + $0x150] sm:$0xff] }
 0xd40   :  { %v8574_v49 = vpop.eup %5946 }
 0xd41   :  { %v3109_v17 = vsel %vm3075_vm8, %v8574_v49, 0.0 }
 0xd42   :  { %3110 = vadd.xlane.f32.xlu1 %v3109_v17  ;;  %v8700_v17 = vld [vmem:[%s8681_s3 + $0x120] sm:$0xff] }
 0xd4a   :  { %3287 = vperm.xlu2 %5766, %v3283_v63   ;;  %v8704_v63 = vld [vmem:[%s8681_s3 + $0x108] sm:$0xff] }
 0xd4e   :  { %3292 = vperm.xlu0 %5767, %v3284_v46   ;;  %v8708_v46 = vld [vmem:[%s8681_s3 + $0xf0] sm:$0xff] }
 0xd52   :  { %3269 = vperm.xlu2 %5766, %v3260_v15  }
 0xd5b   :  { %3264 = vperm.xlu1 %5768, %v3259_v52   ;;  %v8712_v52 = vld [vmem:[%s8681_s3 + $0xd8] sm:$0xff] }
 0xd9d   :  { %v3102_v30 = vpop.xlane.xlu2 %3101 }
 0xd9e   :  { %5948 = vrcp.f32 %v3102_v30 }
 0xda4   :  { %v5949_v13 = vpop.eup %5948 }
 0xda5   :  { %v3116_v60 = vmul.f32 %v5949_v13, %v5941_v18  ;;  %v3105_v40 = vpop.xlane.xlu2 %3104  ;;  %v8647_v18 = vld [vmem:[%s8627_s29 + $0xb8] sm:$0xff]  ;;  %v3201_v13 = vld [vmem:[%s8725_s7 + $0x70] sm:$0xff] }
 0xda6   :  { %5950 = vrcp.f32 %v3105_v40  ;;  %3234 = vmatpush.msrb.mxu2 %v3201_v13  ;;  %v3366_v13 = vld [vmem:[%s5575_s23] sm:$0xff] }
 0xda7   :  { %5654 = vmatmul.msk.f32.vlgmr.msra.gmra.mxu3 %vm3075_vm8, %v3116_v60  ;;  %v10498_v60 = vmov 0.0  }
 0xda8   :  { %3486 = vmatpush.msra.mxu3 %v8606_v62  ;;  %v5658_v40 = vsel %vm3161_vm14, 1.0, %v10498_v60  ;;  %3235 = vmatpush.msrb.mxu2 %v3200_v56  ;;  %v8811_v60 = vld [vmem:[%s8601_s25 + $0xb8] sm:$0xff]  ;;  %v8815_v56 = vld [vmem:[%s8601_s25 + $0xa0] sm:$0xff] }
 0xda9   :  { %3509 = vmatpush.msra.mxu0 %v8811_v60 }
 0xdaa   :  { %3487 = vmatpush.msra.mxu3 %v8615_v11 }
 0xdab   :  { %3510 = vmatpush.msra.mxu0 %v8815_v56 }
 0xdac   :  { %v5951_v55 = vpop.eup %5950  ;;  %3488 = vmatpush.msra.mxu3 %v8619_v41 }
 0xdad   :  { %v3108_v1 = vpop.xlane.xlu0 %3107  ;;  %v3117_v42 = vmul.f32 %v5951_v55, %v8561_v54  ;;  %v3288_v61 = vpop.permute.xlu2 %3287  ;;  %v8668_v54 = vld [vmem:[%s8627_s29 + $0x40] sm:$0xff]  ;;  %v8761_v55 = vld [vmem:[%s8681_s3 + $0x18] sm:$0xff] }
 0xdae   :  { %5952 = vrcp.f32 %v3108_v1  ;;  %v3295_v44 = vmul.f32 %v5771_v4, %v3288_v61  ;;  %3489 = vmatpush.msra.mxu3 %v8622_v27  ;;  %10500 = vst [vmem:[#allocation31_spill] sm:$0xff] %v8761_v55  ;;  %v8766_v1 = vld [vmem:[%s8681_s3] sm:$0xff]  ;;  %v3196_v61 = vld [vmem:[%s8725_s7 + $0x48] sm:$0xff] }
 0xdaf   :  { %5655 = vmatmul.msk.f32.gmra.mxu3 %vm3075_vm8, %v3117_v42  ;;  %10501 = vst [vmem:[#allocation22_spill] sm:$0xff] %v8766_v1  ;;  %v3197_v42 = vld [vmem:[%s8725_s7 + $0x50] sm:$0xff] }
 0xdb0   :  { %v3297_v20 = vadd.f32 %v5772_v28, %v3295_v44  ;;  %3490 = vmatpush.msra.mxu3 %v8631_v3  ;;  %v3195_v44 = vld [vmem:[%s8725_s7 + $0x40] sm:$0xff] }
 0xdb2   :  { %5664 = vmatmul.msk.f32.vlgmr.msrb.gmra.mxu0 %vm3307_vm13, %v3297_v20  ;;  %3491 = vmatpush.msra.mxu3 %v8636_v12  ;;  %v3194_v20 = vld [vmem:[%s8725_s7 + $0x38] sm:$0xff] }
 0xdb4   :  { %v5953_v25 = vpop.eup %5952  ;;  %3492 = vmatpush.msra.mxu3 %v8640_v45 }
 0xdb5   :  { %v3111_v47 = vpop.xlane.xlu1 %3110  ;;  %v3118_v16 = vmul.f32 %v5953_v25, %v8565_v39  ;;  %v3270_v35 = vpop.permute.xlu2 %3269 }
 0xdb6   :  { %5954 = vrcp.f32 %v3111_v47  ;;  %v3276_v6 = vmul.f32 %v5771_v4, %v3270_v35  ;;  %3493 = vmatpush.msra.mxu3 %v8643_v9  ;;  %v3193_v47 = vld [vmem:[%s8725_s7 + $0x30] sm:$0xff]  ;;  %v3203_v35 = vld [vmem:[%s5553_s15] sm:$0xf]  ;;  %s10207_s15 = sld [smem:[%s10240_s0 + %s6351_s12]]  }
 0xdb7   :  { %5656 = vmatmul.msk.f32.gmra.mxu3 %vm3075_vm8, %v3118_v16  ;;  %v3192_v16 = vld [vmem:[%s8725_s7 + $0x28] sm:$0xff] }
 0xdb8   :  { %v3282_v31 = vadd.f32 %v5772_v28, %v3276_v6  ;;  %v3373_v6 = vld [vmem:[%s5575_s23 + $0x38] sm:$0xff] }
 0xdbc   :  { %v5955_v5 = vpop.eup %5954 }
 0xdbd   :  { %v3119_v32 = vmul.f32 %v5955_v5, %v8574_v49  ;;  %v8696_v49 = vld [vmem:[%s8681_s3 + $0x138] sm:$0xff]  ;;  %v3191_v5 = vld [vmem:[%s8725_s7 + $0x20] sm:$0xff] }
 0xdbf   :  { %5657 = vmatmul.msk.f32.gmra.mxu3 %vm3075_vm8, %v3119_v32  ;;  %v3190_v32 = vld [vmem:[%s8725_s7 + $0x18] sm:$0xff] }
 0xdc0   :  { %v3293_v36 = vpop.permute.xlu0 %3292 }
 0xdc1   :  { %v3296_v0 = vmul.f32 %v5771_v4, %v3293_v36 }
 0xdc3   :  { %v3298_v23 = vadd.f32 %v5772_v28, %v3296_v0  ;;  %v3189_v0 = vld [vmem:[%s8725_s7 + $0x10] sm:$0xff] }
 0xdc5   :  { %5665 = vmatmul.msk.f32.gmra.mxu0 %vm3307_vm13, %v3298_v23  ;;  %v3188_v23 = vld [vmem:[%s8725_s7 + $0x8] sm:$0xff] }
 0xdcd   :  { %v3265_v51 = vpop.permute.xlu1 %3264 }
 0xdce   :  { %v3275_v24 = vmul.f32 %v5771_v4, %v3265_v51  ;;  %v3199_v4 = vld [vmem:[%s8725_s7 + $0x60] sm:$0xff] }
 0xdcf   :  { %3236 = vmatpush.msrb.mxu2 %v3199_v4  ;;  %v3187_v51 = vld [vmem:[%s8725_s7] sm:$0xff]  ;;  %v3419_v4 = vld [vmem:[%s8627_s29 + $0x90] sm:$0xff] }
 0xdd0   :  { %v3281_v14 = vadd.f32 %v5772_v28, %v3275_v24  ;;  %v3198_v28 = vld [vmem:[%s8725_s7 + $0x58] sm:$0xff]  ;;  %v3204_v24 = vld [vmem:[%s5570_s11] sm:$0x7]  ;;  %s10196_s7 = sld [smem:[%s10240_s0 + %s6349_s5]]  }
 0xdd1   :  { %3237 = vmatpush.msrb.mxu2 %v3198_v28  ;;  %v8820_v28 = vld [vmem:[%s8601_s25 + $0x88] sm:$0xff]  ;;  %s5590_s11 = sld [smem:[%s10240_s0 + %s6350_s8]]  }
 0xdd2   :  { %5662 = vmatmul.msk.f32.vlgmr.msrb.gmra.mxu3 %vm3307_vm13, %v3281_v14  ;;  %3511 = vmatpush.msra.mxu0 %v8820_v28 }
 0xdd3   :  { %3584 = vmatpush.msrb.mxu3 %v8647_v18  ;;  %3238 = vmatpush.msrb.mxu2 %v3197_v42  ;;  %v3446_v42 = vld [vmem:[%s8601_s25 + $0xa8] sm:$0xff] }
 0xdd5   :  { %3585 = vmatpush.msrb.mxu3 %v8652_v8  ;;  %3239 = vmatpush.msrb.mxu2 %v3196_v61  ;;  %v3416_v61 = vld [vmem:[%s8627_s29 + $0x78] sm:$0xff] }
 0xdd7   :  { %3586 = vmatpush.msrb.mxu3 %v8655_v22  ;;  %3240 = vmatpush.msrb.mxu2 %v3195_v44  ;;  %v3443_v44 = vld [vmem:[%s8601_s25 + $0x90] sm:$0xff] }
 0xdd9   :  { %3587 = vmatpush.msrb.mxu3 %v8659_v37  ;;  %3241 = vmatpush.msrb.mxu2 %v3194_v20  ;;  %v8827_v20 = vld [vmem:[%s8601_s25 + $0x70] sm:$0xff] }
 0xdda   :  { %5663 = vmatmul.msk.f32.gmra.mxu3 %vm3307_vm13, %v3282_v31  ;;  %v3372_v31 = vld [vmem:[%s5575_s23 + $0x30] sm:$0xff]  ;;  %3512 = vmatpush.msra.mxu0 %v8827_v20 }
 0xddb   :  { %3588 = vmatpush.msrb.mxu3 %v8663_v26  ;;  %3242 = vmatpush.msrb.mxu2 %v3193_v47  ;;  %v3440_v47 = vld [vmem:[%s8601_s25 + $0x78] sm:$0xff] }
 0xddd   :  { %3589 = vmatpush.msrb.mxu3 %v8668_v54  ;;  %3243 = vmatpush.msrb.mxu2 %v3192_v16  ;;  %v3413_v16 = vld [vmem:[%s8627_s29 + $0x60] sm:$0xff] }
 0xddf   :  { %3590 = vmatpush.msrb.mxu3 %v8672_v2  ;;  %3244 = vmatpush.msrb.mxu2 %v3191_v5  ;;  %v8833_v5 = vld [vmem:[%s8601_s25 + $0x58] sm:$0xff] }
 0xde0   :  { %3513 = vmatpush.msra.mxu0 %v8833_v5 }
 0xde1   :  { %3591 = vmatpush.msrb.mxu3 %v8676_v7  ;;  %3245 = vmatpush.msrb.mxu2 %v3190_v32  ;;  %v3437_v32 = vld [vmem:[%s8601_s25 + $0x60] sm:$0xff] }
 0xde3   :  { %3246 = vmatpush.msrb.mxu2 %v3189_v0  ;;  %v3410_v0 = vld [vmem:[%s8627_s29 + $0x48] sm:$0xff] }
 0xde5   :  { %3247 = vmatpush.msrb.mxu2 %v3188_v23  ;;  %v8839_v23 = vld [vmem:[%s8601_s25 + $0x40] sm:$0xff] }
 0xde6   :  { %3514 = vmatpush.msra.mxu0 %v8839_v23 }
 0xde7   :  { %3248 = vmatpush.msrb.mxu2 %v3187_v51  ;;  %v3434_v51 = vld [vmem:[%s8601_s25 + $0x48] sm:$0xff] }
 0xde9   :  { %3463 = vmatpush.msra.mxu2 %v3446_v42 }
 0xdeb   :  { %3464 = vmatpush.msra.mxu2 %v3443_v44 }
 0xded   :  { %3465 = vmatpush.msra.mxu2 %v3440_v47 }
 0xdef   :  { %3466 = vmatpush.msra.mxu2 %v3437_v32 }
 0xdf1   :  { %3467 = vmatpush.msra.mxu2 %v3434_v51 }
 0xe2a   :  { %v3149_v21 = vpop.f32.mrf.mxu3 }
 0xe2f   :  { %v8687_v39 = vpop.f32.mrf.mxu0 }
 0xe30   :  { %5669 = vmatmul.msk.f32.vlgmr.msra.gmra.mxu3 %vm3307_vm13, %v8687_v39 }
 0xe31   :  { %3815 = vmatpush.msra.mxu3 %v8685_v34 }
 0xe32   :  { %v3152_v58 = vpop.f32.mrf.mxu3 }
 0xe33   :  { %3816 = vmatpush.msra.mxu3 %v8692_v33 }
 0xe35   :  { %3817 = vmatpush.msra.mxu3 %v8696_v49 }
 0xe37   :  { %3818 = vmatpush.msra.mxu3 %v8700_v17 }
 0xe39   :  { %3819 = vmatpush.msra.mxu3 %v8704_v63 }
 0xe3a   :  { %v3155_v15 = vpop.f32.mrf.mxu3 }
 0xe3b   :  { %3820 = vmatpush.msra.mxu3 %v8708_v46 }
 0xe3d   :  { %3821 = vmatpush.msra.mxu3 %v8712_v52 }
 0xe3f   :  { %3822 = vmatpush.msra.mxu3 %v8716_v43 }
 0xe41   :  { %3823 = vmatpush.msra.mxu3 %v8720_v29 }
 0xe42   :  { %v3158_v30 = vpop.f32.mrf.mxu3  ;;  %v8732_v38 = vpop.f32.mrf.mxu0 }
 0xe43   :  { %3179 = vmatpush.msrb.mxu1 %v3158_v30  ;;  %5670 = vmatmul.msk.f32.gmra.mxu3 %vm3307_vm13, %v8732_v38  ;;  %v3368_v30 = vld [vmem:[%s5575_s23 + $0x10] sm:$0xff] }
 0xe44   :  { %3824 = vmatpush.msra.mxu3 %v8730_v53 }
 0xe45   :  { %3180 = vmatpush.msrb.mxu1 %v3155_v15  ;;  %v3369_v15 = vld [vmem:[%s5575_s23 + $0x18] sm:$0xff] }
 0xe46   :  { %3825 = vmatpush.msra.mxu3 %v8737_v48 }
 0xe47   :  { %3181 = vmatpush.msrb.mxu1 %v3152_v58  ;;  %v3370_v58 = vld [vmem:[%s5575_s23 + $0x20] sm:$0xff] }
 0xe48   :  { %3826 = vmatpush.msra.mxu3 %v8743_v57 }
 0xe49   :  { %3182 = vmatpush.msrb.mxu1 %v3149_v21  ;;  %v3371_v21 = vld [vmem:[%s5575_s23 + $0x28] sm:$0xff] }
 0xe4a   :  { %5659 = vmatmul.msk.f32.vlgmr.msrb.gmra.mxu1 %vm3075_vm8, %v5658_v40  ;;  %3827 = vmatpush.msra.mxu3 %v8750_v10  ;;  %v3422_v40 = vld [vmem:[%s8627_s29 + $0xa8] sm:$0xff] }
 0xe4b   :  { %5660 = vmatpush.msk.msra.mxu1 %vm3209_vm15, %v3204_v24  ;;  %v3407_v24 = vld [vmem:[%s8627_s29 + $0x30] sm:$0xff] }
 0xe4c   :  { %3828 = vmatpush.msra.mxu3 %v8755_v59 }
 0xe4d   :  { %3389 = vmatpush.msrb.mxu1 %v3373_v6  ;;  %v3404_v6 = vld [vmem:[%s8627_s29 + $0x18] sm:$0xff] }
 0xe4e   :  { %3829 = vmatpush.msra.mxu3 %v8761_v55  ;;  %v8871_v55 = vld [vmem:[%s8681_s3 + $0x158] sm:$0xff] }
 0xe4f   :  { %3390 = vmatpush.msrb.mxu1 %v3372_v31  ;;  %v3620_v31 = vadd.f32 %v3446_v42, %v3422_v40  ;;  %v3420_v42 = vld [vmem:[%s8627_s29 + $0x98] sm:$0xff] }
 0xe50   :  { %3830 = vmatpush.msra.mxu3 %v8766_v1  ;;  %v5773_v1 = vld [vmem:[%s8799_s19] ss:$0 sm:$0xff] }
 0xe51   :  { %3391 = vmatpush.msrb.mxu1 %v3371_v21  ;;  %v8851_v21 = vld [vmem:[%s8601_s25 + $0x10] sm:$0xff] }
 0xe52   :  { %5661 = vmatmul.msk.f32.vlgmr.msra.gmra.mxu1 %vm3205_vm0, %v3203_v35  ;;  %v8845_v35 = vld [vmem:[%s8601_s25 + $0x28] sm:$0xff] }
 0xe53   :  { %3392 = vmatpush.msrb.mxu1 %v3370_v58  ;;  %v3428_v58 = vld [vmem:[%s8601_s25 + $0x18] sm:$0xff]  ;;  %3515 = vmatpush.msra.mxu0 %v8845_v35 }
 0xe55   :  { %v8774_v25 = vpop.f32.mrf.mxu3  ;;  %3393 = vmatpush.msrb.mxu1 %v3369_v15  ;;  %v3401_v15 = vld [vmem:[%s8627_s29] sm:$0xff]  ;;  %3516 = vmatpush.msra.mxu0 %v8851_v21 }
 0xe56   :  { %5677 = vmatmul.msk.f32.vlgmr.msrb.gmra.mxu3 %vm3307_vm13, %v8774_v25  ;;  %5671 = vmatmul.msk.f32.vlgmr.msra.gmra.mxu0 %vm3307_vm13, %v8687_v39 }
 0xe57   :  { %3394 = vmatpush.msrb.mxu1 %v3368_v30  ;;  %v3617_v30 = vadd.f32 %v3443_v44, %v3419_v4  ;;  %3642 = vmatpush.msrb.mxu0 %v3620_v31  ;;  %v8865_v44 = vld [vmem:[%s8681_s3 + $0x170] sm:$0xff]  ;;  %v3608_v31 = vadd.f32 %v3434_v51, %v3410_v0  ;;  %v3602_v51 = vadd.f32 %v3428_v58, %v3404_v6 }
 0xe58   :  { %3946 = vmatpush.msrb.mxu3 %v8865_v44 }
 0xe59   :  { %3395 = vmatpush.msrb.mxu1 %v3367_v50  ;;  %v3425_v50 = vld [vmem:[%s8601_s25] sm:$0xff]  ;;  %3643 = vmatpush.msrb.mxu0 %v3617_v30 }
 0xe5a   :  { %3947 = vmatpush.msrb.mxu3 %v8871_v55 }
 0xe5b   :  { %3396 = vmatpush.msrb.mxu1 %v3366_v13  ;;  %v3423_v13 = vld [vmem:[%s8627_s29 + $0xb0] sm:$0xff] }
 0xe5d   :  { %v8782_v36 = vpop.f32.mrf.mxu3  ;;  %3538 = vmatpush.msra.mxu1 %v3422_v40  ;;  %v3614_v40 = vadd.f32 %v3440_v47, %v3416_v61 }
 0xe5e   :  { %5678 = vmatmul.msk.f32.gmra.mxu3 %vm3307_vm13, %v8782_v36  ;;  %5672 = vmatmul.msk.f32.gmra.mxu0 %vm3307_vm13, %v8732_v38 }
 0xe5f   :  { %3539 = vmatpush.msra.mxu1 %v3419_v4  ;;  %v3611_v4 = vadd.f32 %v3437_v32, %v3413_v16  ;;  %3644 = vmatpush.msrb.mxu0 %v3614_v40  ;;  %v8876_v32 = vld [vmem:[%s8681_s3 + $0x140] sm:$0xff] }
 0xe60   :  { %3948 = vmatpush.msrb.mxu3 %v8876_v32 }
 0xe61   :  { %3540 = vmatpush.msra.mxu1 %v3416_v61  ;;  %v3417_v61 = vld [vmem:[%s8627_s29 + $0x80] sm:$0xff]  ;;  %3645 = vmatpush.msrb.mxu0 %v3611_v4  ;;  %v10503_v4 = vld [vmem:[#allocation31_spill] sm:$0xff] }
 0xe63   :  { %3541 = vmatpush.msra.mxu1 %v3413_v16  ;;  %3646 = vmatpush.msrb.mxu0 %v3608_v31  ;;  %v9018_v31 = vld [vmem:[%s8681_s3 + $0x88] sm:$0xff] }
 0xe65   :  { %3542 = vmatpush.msra.mxu1 %v3410_v0  ;;  %v3411_v0 = vld [vmem:[%s8627_s29 + $0x50] sm:$0xff] }
 0xe66   :  { %3831 = vmatmul.f32.vlgmr.msra.gmra.mxu3 %v8517_v19 }
 0xe67   :  { %3543 = vmatpush.msra.mxu1 %v3407_v24 }
 0xe69   :  { %3544 = vmatpush.msra.mxu1 %v3404_v6  ;;  %v3621_v6 = vadd.f32 %v8606_v62, %v3423_v13  ;;  %v3615_v62 = vadd.f32 %v8619_v41, %v3417_v61  ;;  %v3619_v41 = vadd.f32 %v8815_v56, %v8652_v8 }
 0xe6b   :  { %3545 = vmatpush.msra.mxu1 %v3401_v15 }
 0xec7   :  { %v3184_v14 = vpop.f32.mrf.mxu1 }
 0xec8   :  { %3249 = vmatmul.f32.vlgmr.msrb.gmra.mxu2 %v3184_v14  ;;  %v3431_v14 = vld [vmem:[%s8601_s25 + $0x30] sm:$0xff]  ;;  %s6340_s25 = smov 30  }
 0xec9   :  { %3468 = vmatpush.msra.mxu2 %v3431_v14  ;;  %v3605_v16 = vadd.f32 %v3431_v14, %v3407_v24  ;;  %v3599_v24 = vadd.f32 %v3425_v50, %v3401_v15  ;;  %v8891_v14 = vld [vmem:[%s8681_s3 + $0x110] sm:$0xff]  ;;  %v3402_v15 = vld [vmem:[%s8627_s29 + $0x8] sm:$0xff]  ;;  %s9085_s1 = sld [smem:[%s10240_s0 + %s6340_s25]]  }
 0xecb   :  { %3469 = vmatpush.msra.mxu2 %v3428_v58  ;;  %3647 = vmatpush.msrb.mxu0 %v3605_v16  ;;  %v9026_v16 = vld [vmem:[%s8681_s3 + $0x70] sm:$0xff] }
 0xecd   :  { %3470 = vmatpush.msra.mxu2 %v3425_v50  ;;  %3648 = vmatpush.msrb.mxu0 %v3602_v51  ;;  %v8899_v50 = vld [vmem:[%s8681_s3 + $0xf8] sm:$0xff] }
 0xece   :  { %v9038_v51 = vld [vmem:[%s8681_s3 + $0x38] sm:$0xff] }
 0xecf   :  { %v3230_v19 = vpop.f32.mrf.mxu1  ;;  %3561 = vmatpush.msrb.mxu2 %v3423_v13  ;;  %3649 = vmatpush.msrb.mxu0 %v3599_v24  ;;  %v8906_v13 = vld [vmem:[%s8681_s3 + $0xe0] sm:$0xff]  ;;  %10505 = vst [vmem:[#allocation8_spill] sm:$0xff] %v9038_v51 }
 0xed0   :  { %5667 = vmatmul.msk.f32.vlgmr.msra.gmra.mxu2 %vm3307_vm13, %v8687_v39  ;;  %v3414_v39 = vld [vmem:[%s8627_s29 + $0x68] sm:$0xff]  ;;  %v9047_v24 = vld [vmem:[%s8681_s3 + $0x20] sm:$0xff] }
 0xed1   :  { %3562 = vmatpush.msrb.mxu2 %v3420_v42  ;;  %3835 = vmatpush.msra.mxu0 %v8865_v44  ;;  %v3612_v40 = vadd.f32 %v8622_v27, %v3414_v39  ;;  %v8924_v27 = vld [vmem:[%s8681_s3 + $0xb0] sm:$0xff]  ;;  %10507 = vst [vmem:[#allocation2_spill] sm:$0xff] %v9047_v24 }
 0xed3   :  { %3563 = vmatpush.msrb.mxu2 %v3417_v61  ;;  %3836 = vmatpush.msra.mxu0 %v8871_v55  ;;  %v10504_v61 = vld [vmem:[#allocation22_spill] sm:$0xff] }
 0xed5   :  { %3564 = vmatpush.msrb.mxu2 %v3414_v39  ;;  %3837 = vmatpush.msra.mxu0 %v8876_v32  ;;  %v9021_v39 = vld [vmem:[%s8681_s3 + $0x68] sm:$0xff] }
 0xed7   :  { %3565 = vmatpush.msrb.mxu2 %v3411_v0 }
 0xed8   :  { %5668 = vmatmul.msk.f32.gmra.mxu2 %vm3307_vm13, %v8732_v38  ;;  %v3618_v38 = vadd.f32 %v8615_v11, %v3420_v42  ;;  %v3622_v11 = vadd.f32 %v8811_v60, %v8647_v18  ;;  %v8914_v42 = vld [vmem:[%s8681_s3 + $0xc8] sm:$0xff]  ;;  %v3609_v18 = vadd.f32 %v8631_v3, %v3411_v0  ;;  %v3616_v60 = vadd.f32 %v8820_v28, %v8655_v22  ;;  %v8938_v22 = vld [vmem:[%s8681_s3 + $0x98] sm:$0xff] }
 0xed9   :  { %v3613_v3 = vadd.f32 %v8827_v20, %v8659_v37  ;;  %v3610_v37 = vadd.f32 %v8833_v5, %v8663_v26  ;;  %v8956_v26 = vld [vmem:[%s8681_s3 + $0x160] sm:$0xff]  ;;  %v8963_v28 = vld [vmem:[%s8681_s3 + $0x148] sm:$0xff]  ;;  %v8974_v20 = vld [vmem:[%s8681_s3 + $0x118] sm:$0xff] }
 0xeda   :  { %v8989_v5 = vld [vmem:[%s8681_s3 + $0xd0] sm:$0xff]  ;;  %v9035_v0 = vld [vmem:[%s8681_s3 + $0x58] sm:$0xff] }
 0xf4b   :  { %v3250_v47 = vpop.f32.mrf.mxu2 }
 0xf4c   :  { %v3251_v59 = vadd.f32 %v3250_v47, %v3230_v19  ;;  %v3408_v19 = vld [vmem:[%s8627_s29 + $0x38] sm:$0xff]  ;;  %v9015_v47 = vld [vmem:[%s8681_s3 + $0x80] sm:$0xff] }
 0xf4d   :  { %3566 = vmatpush.msrb.mxu2 %v3408_v19  ;;  %v3606_v8 = vadd.f32 %v8636_v12, %v3408_v19  ;;  %v3600_v12 = vadd.f32 %v8643_v9, %v3402_v15  ;;  %v3604_v9 = vadd.f32 %v8845_v35, %v8672_v2  ;;  %v8970_v2 = vld [vmem:[%s8681_s3 + $0x130] sm:$0xff]  ;;  %v8999_v35 = vld [vmem:[%s8681_s3 + $0xa0] sm:$0xff] }
 0xf4e   :  { %v3257_v30 = vadd.f32 %v5773_v1, %v3251_v59  ;;  %v8886_v59 = vld [vmem:[%s8681_s3 + $0x128] sm:$0xff]  ;;  %v3405_v1 = vld [vmem:[%s8627_s29 + $0x20] sm:$0xff]  ;;  %s10176_s29 = sld [smem:[%s10240_s0 + %s6347_s27]]  }
 0xf4f   :  { %3949 = vmatpush.msrb.mxu3 %v8886_v59  ;;  %3567 = vmatpush.msrb.mxu2 %v3405_v1  ;;  %v3603_v56 = vadd.f32 %v8640_v45, %v3405_v1  ;;  %v3607_v45 = vadd.f32 %v8839_v23, %v8668_v54  ;;  %v3601_v54 = vadd.f32 %v8851_v21, %v8676_v7  ;;  %v8979_v7 = vld [vmem:[%s8681_s3 + $0x100] sm:$0xff]  ;;  %v8994_v23 = vld [vmem:[%s8681_s3 + $0xb8] sm:$0xff]  ;;  %v10502_v21 = vld [vmem:[#allocation23_spill] sm:$0xff] }
 0xf50   :  { %5956 = vtanh.f32 %v3257_v30  ;;  %3838 = vmatpush.msra.mxu0 %v8886_v59  ;;  %v9032_v30 = vld [vmem:[%s8681_s3 + $0x50] sm:$0xff]  ;;  %v9041_v19 = vld [vmem:[%s8681_s3 + $0x40] sm:$0xff]  ;;  %v9050_v1 = vld [vmem:[%s8681_s3 + $0x28] sm:$0xff] }
 0xf51   :  { %3950 = vmatpush.msrb.mxu3 %v8891_v14  ;;  %3568 = vmatpush.msrb.mxu2 %v3402_v15  ;;  %10506 = vst [vmem:[#allocation9_spill] sm:$0xff] %v9041_v19 }
 0xf52   :  { %5675 = vmatmul.msk.f32.vlgmr.msrb.gmra.mxu2 %vm3307_vm13, %v8774_v25  ;;  %3839 = vmatpush.msra.mxu0 %v8891_v14  ;;  %10508 = vst [vmem:[#allocation4_spill] sm:$0xff] %v9050_v1 }
 0xf53   :  { %3951 = vmatpush.msrb.mxu3 %v8899_v50  ;;  %3682 = vmatpush.msra.mxu2 %v3622_v11  ;;  %v10511_v11 = vld [vmem:[#allocation34_spill] sm:$0xff] }
 0xf54   :  { %3840 = vmatpush.msra.mxu0 %v8899_v50 }
 0xf55   :  { %3952 = vmatpush.msrb.mxu3 %v8906_v13  ;;  %3683 = vmatpush.msra.mxu2 %v3619_v41 }
 0xf56   :  { %v5957_v58 = vpop.eup %5956  ;;  %3841 = vmatpush.msra.mxu0 %v8906_v13 }
 0xf57   :  { %5666 = vmatmul.msk.f32.vlgmr.msrb.gmra.mxu1 %vm3307_vm13, %v5957_v58  ;;  %3953 = vmatpush.msrb.mxu3 %v8914_v42  ;;  %v9059_v58 = vld [vmem:[%s8681_s3 + $0x10] sm:$0xff] }
 0xf58   :  { %3662 = vmatpush.msrb.mxu1 %v3621_v6  ;;  %3684 = vmatpush.msra.mxu2 %v3616_v60  ;;  %v9056_v6 = vld [vmem:[%s8681_s3 + $0x8] sm:$0xff]  ;;  %10510 = vst [vmem:[#allocation3_spill] sm:$0xff] %v9059_v58 }
 0xf59   :  { %3954 = vmatpush.msrb.mxu3 %v8924_v27  ;;  %3842 = vmatpush.msra.mxu0 %v8914_v42  ;;  %10509 = vst [vmem:[#allocation6_spill] sm:$0xff] %v9056_v6 }
 0xf5a   :  { %3663 = vmatpush.msrb.mxu1 %v3618_v38  ;;  %3685 = vmatpush.msra.mxu2 %v3613_v3  ;;  %v5774_v38 = vld [vmem:[%s8808_s28] ss:$0 sm:$0xff] }
 0xf5b   :  { %3955 = vmatpush.msrb.mxu3 %v8938_v22  ;;  %5676 = vmatmul.msk.f32.gmra.mxu2 %vm3307_vm13, %v8782_v36 }
 0xf5c   :  { %3664 = vmatpush.msrb.mxu1 %v3615_v62  ;;  %3686 = vmatpush.msra.mxu2 %v3610_v37 }
 0xf5d   :  { %3843 = vmatpush.msra.mxu0 %v8924_v27  ;;  %3956 = vmatpush.msrb.mxu3 %v9015_v47 }
 0xf5e   :  { %3665 = vmatpush.msrb.mxu1 %v3612_v40  ;;  %3687 = vmatpush.msra.mxu2 %v3607_v45 }
 0xf5f   :  { %5673 = vmatmul.msk.f32.vlgmr.msra.gmra.mxu1 %vm3307_vm13, %v8774_v25  ;;  %v8948_v25 = vld [vmem:[%s8681_s3 + $0x178] sm:$0xff]  ;;  %3844 = vmatpush.msra.mxu0 %v8938_v22 }
 0xf60   :  { %3666 = vmatpush.msrb.mxu1 %v3609_v18  ;;  %3688 = vmatpush.msra.mxu2 %v3604_v9 }
 0xf61   :  { %3845 = vmatpush.msra.mxu0 %v9015_v47  ;;  %3957 = vmatpush.msrb.mxu3 %v9021_v39 }
 0xf62   :  { %3667 = vmatpush.msrb.mxu1 %v3606_v8  ;;  %3689 = vmatpush.msra.mxu2 %v3601_v54 }
 0xf63   :  { %3846 = vmatpush.msra.mxu0 %v9021_v39  ;;  %3958 = vmatpush.msrb.mxu3 %v9032_v30 }
 0xf64   :  { %3668 = vmatpush.msrb.mxu1 %v3603_v56  ;;  %3926 = vmatpush.msrb.mxu2 %v8685_v34 }
 0xf65   :  { %3847 = vmatpush.msra.mxu0 %v9032_v30  ;;  %3959 = vmatpush.msrb.mxu3 %v9038_v51 }
 0xf66   :  { %3669 = vmatpush.msrb.mxu1 %v3600_v12  ;;  %3927 = vmatpush.msrb.mxu2 %v8692_v33 }
 0xf67   :  { %5674 = vmatmul.msk.f32.gmra.mxu1 %vm3307_vm13, %v8782_v36  ;;  %v8984_v36 = vld [vmem:[%s8681_s3 + $0xe8] sm:$0xff]  ;;  %3848 = vmatpush.msra.mxu0 %v9038_v51 }
 0xf68   :  { %3855 = vmatpush.msra.mxu1 %v8948_v25  ;;  %3928 = vmatpush.msrb.mxu2 %v8696_v49 }
 0xf69   :  { %3849 = vmatpush.msra.mxu0 %v9047_v24  ;;  %3960 = vmatpush.msrb.mxu3 %v9047_v24 }
 0xf6a   :  { %3856 = vmatpush.msra.mxu1 %v8956_v26  ;;  %3929 = vmatpush.msrb.mxu2 %v8700_v17 }
 0xf6b   :  { %3850 = vmatpush.msra.mxu0 %v9056_v6  ;;  %3961 = vmatpush.msrb.mxu3 %v9056_v6 }
 0xf6c   :  { %3857 = vmatpush.msra.mxu1 %v8963_v28  ;;  %3930 = vmatpush.msrb.mxu2 %v8704_v63 }
 0xf6d   :  { %4074 = vmatpush.msra.mxu3 %v8948_v25 }
 0xf6e   :  { %3858 = vmatpush.msra.mxu1 %v8970_v2  ;;  %3931 = vmatpush.msrb.mxu2 %v8708_v46 }
 0xf6f   :  { %4075 = vmatpush.msra.mxu3 %v8956_v26 }
 0xf70   :  { %3859 = vmatpush.msra.mxu1 %v8974_v20  ;;  %3932 = vmatpush.msrb.mxu2 %v8712_v52 }
 0xf71   :  { %4076 = vmatpush.msra.mxu3 %v8963_v28 }
 0xf72   :  { %3860 = vmatpush.msra.mxu1 %v8979_v7  ;;  %3933 = vmatpush.msrb.mxu2 %v8716_v43 }
 0xf73   :  { %4077 = vmatpush.msra.mxu3 %v8970_v2 }
 0xf74   :  { %3861 = vmatpush.msra.mxu1 %v8984_v36  ;;  %3934 = vmatpush.msrb.mxu2 %v8720_v29 }
 0xf75   :  { %4078 = vmatpush.msra.mxu3 %v8974_v20 }
 0xf76   :  { %3862 = vmatpush.msra.mxu1 %v8989_v5  ;;  %3935 = vmatpush.msrb.mxu2 %v8730_v53 }
 0xf77   :  { %4079 = vmatpush.msra.mxu3 %v8979_v7 }
 0xf78   :  { %3863 = vmatpush.msra.mxu1 %v8994_v23  ;;  %3936 = vmatpush.msrb.mxu2 %v8737_v48 }
 0xf79   :  { %4080 = vmatpush.msra.mxu3 %v8984_v36 }
 0xf7a   :  { %3864 = vmatpush.msra.mxu1 %v8999_v35  ;;  %3937 = vmatpush.msrb.mxu2 %v8743_v57 }
 0xf7b   :  { %4081 = vmatpush.msra.mxu3 %v8989_v5 }
 0xf7c   :  { %3938 = vmatpush.msrb.mxu2 %v8750_v10  ;;  %3865 = vmatpush.msra.mxu1 %v9018_v31 }
 0xf7d   :  { %4082 = vmatpush.msra.mxu3 %v8994_v23 }
 0xf7e   :  { %3939 = vmatpush.msrb.mxu2 %v10502_v21  ;;  %3866 = vmatpush.msra.mxu1 %v9026_v16 }
 0xf7f   :  { %4083 = vmatpush.msra.mxu3 %v8999_v35 }
 0xf80   :  { %3940 = vmatpush.msrb.mxu2 %v10503_v4  ;;  %3867 = vmatpush.msra.mxu1 %v9035_v0 }
 0xf81   :  { %4084 = vmatpush.msra.mxu3 %v9018_v31 }
 0xf82   :  { %3941 = vmatpush.msrb.mxu2 %v10504_v61  ;;  %3868 = vmatpush.msra.mxu1 %v9041_v19 }
 0xf83   :  { %4085 = vmatpush.msra.mxu3 %v9026_v16 }
 0xf84   :  { %3869 = vmatpush.msra.mxu1 %v9050_v1 }
 0xf85   :  { %4086 = vmatpush.msra.mxu3 %v9035_v0 }
 0xf86   :  { %3870 = vmatpush.msra.mxu1 %v9059_v58 }
 0xf87   :  { %4087 = vmatpush.msra.mxu3 %v9041_v19 }
 0xf89   :  { %4088 = vmatpush.msra.mxu3 %v9050_v1 }
 0xf8b   :  { %4089 = vmatpush.msra.mxu3 %v9059_v58 }
 0xfd4   :  { %v3398_v15 = vpop.f32.mrf.mxu1 }
 0xfd5   :  { %v3399_v62 = vadd.f32 %v5774_v38, %v3398_v15 }
 0xfd7   :  { %5679 = vmatmul.msk.f32.vlgmr.msrb.gmra.mxu0 %vm3307_vm13, %v3399_v62  ;;  %5680 = vmatmul.msk.f32.vlgmr.msrb.gmra.mxu1 %vm3307_vm13, %v3399_v62 }
 0xfd8   :  { %5681 = vmatmul.msk.f32.vlgmr.msra.gmra.mxu2 %vm3307_vm13, %v3399_v62  ;;  %3966 = vmatpush.msrb.mxu0 %v8948_v25 }
 0xfd9   :  { %4034 = vmatpush.msrb.mxu1 %v8685_v34  ;;  %4054 = vmatpush.msra.mxu2 %v8865_v44 }
 0xfda   :  { %3967 = vmatpush.msrb.mxu0 %v8956_v26 }
 0xfdb   :  { %4035 = vmatpush.msrb.mxu1 %v8692_v33  ;;  %4055 = vmatpush.msra.mxu2 %v8871_v55 }
 0xfdc   :  { %3968 = vmatpush.msrb.mxu0 %v8963_v28 }
 0xfdd   :  { %4036 = vmatpush.msrb.mxu1 %v8696_v49  ;;  %4056 = vmatpush.msra.mxu2 %v8876_v32 }
 0xfde   :  { %3969 = vmatpush.msrb.mxu0 %v8970_v2 }
 0xfdf   :  { %3851 = vmatmul.f32.vlgmr.msra.gmra.mxu0 %v10511_v11  ;;  %3871 = vmatmul.f32.vlgmr.msra.gmra.mxu1 %v10511_v11 }
 0xfe0   :  { %3970 = vmatpush.msrb.mxu0 %v8974_v20  ;;  %4037 = vmatpush.msrb.mxu1 %v8700_v17 }
 0xfe1   :  { %4057 = vmatpush.msra.mxu2 %v8886_v59 }
 0xfe2   :  { %3971 = vmatpush.msrb.mxu0 %v8979_v7  ;;  %4038 = vmatpush.msrb.mxu1 %v8704_v63 }
 0xfe3   :  { %4058 = vmatpush.msra.mxu2 %v8891_v14 }
 0xfe4   :  { %3972 = vmatpush.msrb.mxu0 %v8984_v36  ;;  %4039 = vmatpush.msrb.mxu1 %v8708_v46 }
 0xfe5   :  { %4059 = vmatpush.msra.mxu2 %v8899_v50 }
 0xfe6   :  { %3973 = vmatpush.msrb.mxu0 %v8989_v5  ;;  %4040 = vmatpush.msrb.mxu1 %v8712_v52 }
 0xfe7   :  { %4060 = vmatpush.msra.mxu2 %v8906_v13 }
 0xfe8   :  { %3974 = vmatpush.msrb.mxu0 %v8994_v23  ;;  %4041 = vmatpush.msrb.mxu1 %v8716_v43 }
 0xfe9   :  { %4061 = vmatpush.msra.mxu2 %v8914_v42 }
 0xfea   :  { %3975 = vmatpush.msrb.mxu0 %v8999_v35  ;;  %4042 = vmatpush.msrb.mxu1 %v8720_v29 }
 0xfeb   :  { %4062 = vmatpush.msra.mxu2 %v8924_v27 }
 0xfec   :  { %3976 = vmatpush.msrb.mxu0 %v9018_v31  ;;  %4043 = vmatpush.msrb.mxu1 %v8730_v53 }
 0xfed   :  { %4063 = vmatpush.msra.mxu2 %v8938_v22 }
 0xfee   :  { %3977 = vmatpush.msrb.mxu0 %v9026_v16  ;;  %4044 = vmatpush.msrb.mxu1 %v8737_v48 }
 0xfef   :  { %4064 = vmatpush.msra.mxu2 %v9015_v47 }
 0xff0   :  { %3978 = vmatpush.msrb.mxu0 %v9035_v0  ;;  %4045 = vmatpush.msrb.mxu1 %v8743_v57 }
 0xff1   :  { %4065 = vmatpush.msra.mxu2 %v9021_v39 }
 0xff2   :  { %3979 = vmatpush.msrb.mxu0 %v9041_v19  ;;  %4046 = vmatpush.msrb.mxu1 %v8750_v10 }
 0xff3   :  { %4066 = vmatpush.msra.mxu2 %v9032_v30 }
 0xff4   :  { %3980 = vmatpush.msrb.mxu0 %v9050_v1  ;;  %4047 = vmatpush.msrb.mxu1 %v10502_v21 }
 0xff5   :  { %4067 = vmatpush.msra.mxu2 %v9038_v51 }
 0xff6   :  { %3981 = vmatpush.msrb.mxu0 %v9059_v58  ;;  %4048 = vmatpush.msrb.mxu1 %v10503_v4 }
 0xff7   :  { %4068 = vmatpush.msra.mxu2 %v9047_v24 }
 0xff8   :  { %4142 = vmatpush.msra.mxu0 %v8685_v34  ;;  %4049 = vmatpush.msrb.mxu1 %v10504_v61  ;;  %v3472_v34 = vpop.f32.mrf.mxu2 }
 0xff9   :  { %4069 = vmatpush.msra.mxu2 %v9056_v6 }
 0xffa   :  { %4162 = vmatpush.msra.mxu1 %v8865_v44  ;;  %4143 = vmatpush.msra.mxu0 %v8692_v33  ;;  %v3495_v33 = vpop.f32.mrf.mxu3 }
 0xffc   :  { %4163 = vmatpush.msra.mxu1 %v8871_v55  ;;  %4144 = vmatpush.msra.mxu0 %v8696_v49 }
 0xffe   :  { %4164 = vmatpush.msra.mxu1 %v8876_v32  ;;  %4145 = vmatpush.msra.mxu0 %v8700_v17 }
0x1000   :  { %4165 = vmatpush.msra.mxu1 %v8886_v59  ;;  %4146 = vmatpush.msra.mxu0 %v8704_v63  ;;  %v3475_v49 = vpop.f32.mrf.mxu2  ;;  %v3547_v63 = vpop.f32.mrf.mxu1 }
0x1001   :  { %v3548_v40 = vadd.f32 %v3547_v63, %v3472_v34 }
0x1002   :  { %4166 = vmatpush.msra.mxu1 %v8891_v14  ;;  %4147 = vmatpush.msra.mxu0 %v8708_v46  ;;  %v3498_v17 = vpop.f32.mrf.mxu3  ;;  %v3518_v46 = vpop.f32.mrf.mxu0 }
0x1003   :  { %v3694_v38 = vperm.slane %v3548_v40, 0  ;;  %v3700_v15 = vperm.slane %v3548_v40, 1  ;;  %v3706_v34 = vperm.slane %v3548_v40, 2  ;;  %v3730_v9 = vperm.slane %v3548_v40, 6 }
0x1004   :  { %4167 = vmatpush.msra.mxu1 %v8899_v50  ;;  %4148 = vmatpush.msra.mxu0 %v8712_v52  ;;  %v3736_v45 = vperm.slane %v3548_v40, 7 }
0x1006   :  { %4168 = vmatpush.msra.mxu1 %v8906_v13  ;;  %4149 = vmatpush.msra.mxu0 %v8716_v43 }
0x1008   :  { %4169 = vmatpush.msra.mxu1 %v8914_v42  ;;  %4150 = vmatpush.msra.mxu0 %v8720_v29  ;;  %v3570_v52 = vpop.f32.mrf.mxu2 }
0x1009   :  { %v3571_v41 = vadd.f32 %v3570_v52, %v3495_v33  ;;  %v3724_v52 = vperm.slane %v3548_v40, 5 }
0x100a   :  { %4170 = vmatpush.msra.mxu1 %v8924_v27  ;;  %4151 = vmatpush.msra.mxu0 %v8730_v53  ;;  %v3593_v43 = vpop.f32.mrf.mxu3  ;;  %v3550_v53 = vpop.f32.mrf.mxu1 }
0x100b   :  { %v9178_v29 = vadd.f32 %v3593_v43, %v3518_v46  ;;  %v9186_v60 = vadd.f32 %v3550_v53, %v3475_v49  ;;  %v3701_v62 = vperm.slane %v3571_v41, 1  ;;  %v3707_v33 = vperm.slane %v3571_v41, 2 }
0x100c   :  { %4171 = vmatpush.msra.mxu1 %v8938_v22  ;;  %4152 = vmatpush.msra.mxu0 %v8737_v48  ;;  %v9180_v48 = vld [vmem:[%s5579_s6] sm:$0x7]  ;;  %v3712_v49 = vperm.slane %v3548_v40, 3  ;;  %v3719_v63 = vperm.slane %v3571_v41, 4  ;;  %v3718_v46 = vperm.slane %v3548_v40, 4  ;;  %v3731_v54 = vperm.slane %v3571_v41, 6 }
0x100d   :  { %v3625_v8 = vperm.slane %v9180_v48, 0  ;;  %v3737_v12 = vperm.slane %v3571_v41, 7  ;;  %v3742_v56 = vperm.slane %v9186_v60, 0 }
0x100e   :  { %4172 = vmatpush.msra.mxu1 %v9015_v47  ;;  %4153 = vmatpush.msra.mxu0 %v8743_v57  ;;  %v9182_v57 = vpop.f32.mrf.mxu0 }
0x100f   :  { %10512 = vst [vmem:[#allocation5_spill] sm:$0xff] %v9182_v57 }
0x1010   :  { %4173 = vmatpush.msra.mxu1 %v9021_v39  ;;  %4154 = vmatpush.msra.mxu0 %v8750_v10  ;;  %v3573_v10 = vpop.f32.mrf.mxu2 }
0x1011   :  { %v9189_v3 = vadd.f32 %v3573_v10, %v3498_v17  ;;  %v3713_v17 = vperm.slane %v3571_v41, 3  ;;  %v3725_v10 = vperm.slane %v3571_v41, 5 }
0x1012   :  { %4174 = vmatpush.msra.mxu1 %v9032_v30  ;;  %4155 = vmatpush.msra.mxu0 %v10502_v21  ;;  %v9184_v18 = vpop.f32.mrf.mxu3 }
0x1013   :  { %10513 = vst [vmem:[#allocation25_spill] sm:$0xff] %v9184_v18  ;;  %v3748_v18 = vperm.slane %v9186_v60, 1  ;;  %v3749_v57 = vperm.slane %v9189_v3, 1  ;;  %v3755_v58 = vperm.slane %v9189_v3, 2 }
0x1014   :  { %4175 = vmatpush.msra.mxu1 %v9038_v51  ;;  %4156 = vmatpush.msra.mxu0 %v10503_v4  ;;  %10514 = vst [vmem:[#allocation30_spill] sm:$0xff] %v9189_v3  ;;  %v3626_v4 = vperm.slane %v9180_v48, 1 }
0x1016   :  { %4176 = vmatpush.msra.mxu1 %v9047_v24  ;;  %4157 = vmatpush.msra.mxu0 %v10504_v61  ;;  %v3695_v61 = vperm.slane %v3571_v41, 0  ;;  %v3627_v24 = vperm.slane %v9180_v48, 2 }
0x1018   :  { %4177 = vmatpush.msra.mxu1 %v9056_v6  ;;  %v3754_v6 = vperm.slane %v9186_v60, 2 }
0x1054   :  { %v3651_v43 = vpop.f32.mrf.mxu0  ;;  %v3671_v53 = vpop.f32.mrf.mxu1 }
0x1055   :  { %v3652_v21 = vadd.f32 %v3651_v43, %v3625_v8  ;;  %v9199_v37 = vadd.f32 %v3671_v53, %v3626_v4  ;;  %v3832_v8 = vpop.f32.mrf.mxu3 }
0x1057   :  { %10515 = vst [vmem:[#allocation12_spill] sm:$0xff] %v9199_v37  ;;  %v3697_v1 = vadd.f32 %v3694_v38, %v3652_v21  ;;  %v9207_v51 = vadd.f32 %v3700_v15, %v3652_v21  ;;  %v9210_v40 = vadd.f32 %v3701_v62, %v9199_v37  ;;  %v9212_v41 = vadd.f32 %v3706_v34, %v3652_v21 }
0x1058   :  { %v9215_v4 = vadd.f32 %v3707_v33, %v9199_v37  ;;  %v9217_v43 = vadd.f32 %v3712_v49, %v3652_v21  ;;  %v9220_v53 = vadd.f32 %v3713_v17, %v9199_v37  ;;  %v9223_v48 = vadd.f32 %v3719_v63, %v9199_v37 }
0x1059   :  { %10516 = vst [vmem:[#allocation10_spill] sm:$0xff] %v9212_v41  ;;  %v3875_v19 = vadd.f32 %v3832_v8, %v3697_v1  ;;  %v9225_v38 = vadd.f32 %v3718_v46, %v3652_v21  ;;  %v9227_v15 = vadd.f32 %v3724_v52, %v3652_v21  ;;  %v9230_v62 = vadd.f32 %v3725_v10, %v9199_v37 }
0x105a   :  { %10517 = vst [vmem:[#allocation13_spill] sm:$0xff] %v9215_v4  ;;  %v9232_v34 = vadd.f32 %v3730_v9, %v3652_v21  ;;  %v9235_v33 = vadd.f32 %v3731_v54, %v9199_v37  ;;  %v9237_v49 = vadd.f32 %v3736_v45, %v3652_v21  ;;  %v3698_v1 = vadd.f32 %v3695_v61, %v9199_v37 }
0x105b   :  { %10518 = vst [vmem:[#allocation14_spill] sm:$0xff] %v9217_v43  ;;  %v3691_v17 = vpop.f32.mrf.mxu2  ;;  %v5682_v8 = vmul.f32 -1.442695, %v3875_v19  ;;  %v9241_v63 = vadd.f32 %v3737_v12, %v9199_v37  ;;  %v9243_v46 = vadd.f32 %v3742_v56, %v3652_v21  ;;  %v9250_v9 = vadd.f32 %v3749_v57, %v9199_v37 }
0x105c   :  { %10519 = vst [vmem:[#allocation11_spill] sm:$0xff] %v9220_v53  ;;  %v9245_v52 = vadd.f32 %v3691_v17, %v3627_v24  ;;  %v3852_v10 = vpop.f32.mrf.mxu0  ;;  %v9252_v54 = vadd.f32 %v3754_v6, %v3652_v21  ;;  %v9255_v61 = vadd.f32 %v3755_v58, %v9199_v37  ;;  %v3760_v19 = vperm.slane %v9186_v60, 3 }
0x105d   :  { %10520 = vst [vmem:[#allocation15_spill] sm:$0xff] %v9223_v48  ;;  %v3876_v45 = vadd.f32 %v3852_v10, %v3698_v1  ;;  %5958 = vpow2.f32 %v5682_v8  ;;  %v10534_v56 = vperm.slane %v9178_v29, 1  ;;  %v10537_v6 = vperm.slane %v9178_v29, 3 }
0x105e   :  { %10521 = vst [vmem:[#allocation7_spill] sm:$0xff] %v9225_v38  ;;  %v3761_v58 = vperm.slane %v9189_v3, 3  ;;  %v10539_v60 = vperm.slane %v9178_v29, 4  ;;  %v10541_v8 = vperm.slane %v9178_v29, 5 }
0x105f   :  { %10522 = vst [vmem:[#allocation27_spill] sm:$0xff] %v9227_v15  ;;  %v9261_v24 = vadd.f32 %v10534_v56, %v9245_v52  ;;  %v9271_v57 = vadd.f32 %v10537_v6, %v9245_v52  ;;  %v5683_v17 = vmul.f32 -1.442695, %v3876_v45  ;;  %v10543_v56 = vperm.slane %v9178_v29, 6 }
0x1060   :  { %10523 = vst [vmem:[#allocation24_spill] sm:$0xff] %v9230_v62  ;;  %v9247_v62 = vadd.f32 %v3748_v18, %v3652_v21  ;;  %v10535_v18 = vperm.slane %v9178_v29, 2  ;;  %v9277_v1 = vadd.f32 %v10539_v60, %v9245_v52  ;;  %v9282_v10 = vadd.f32 %v10541_v8, %v9245_v52 }
0x1061   :  { %10524 = vst [vmem:[#allocation21_spill] sm:$0xff] %v9232_v34  ;;  %v10545_v6 = vperm.slane %v9178_v29, 7  ;;  %5960 = vpow2.f32 %v5683_v17  ;;  %v9294_v45 = vadd.f32 %v3760_v19, %v3652_v21  ;;  %v9297_v60 = vadd.f32 %v3761_v58, %v9199_v37  ;;  %v9300_v19 = vld [vmem:[%s9085_s1] ss:$0 sm:$0xff]  ;;  %v3872_v58 = vpop.f32.mrf.mxu1 }
0x1062   :  { %10525 = vst [vmem:[#allocation26_spill] sm:$0xff] %v9235_v33  ;;  %v9266_v12 = vadd.f32 %v10535_v18, %v9245_v52  ;;  %v9287_v18 = vadd.f32 %v10543_v56, %v9245_v52 }
0x1063   :  { %10526 = vst [vmem:[#allocation33_spill] sm:$0xff] %v9237_v49 }
0x1064   :  { %10527 = vst [vmem:[#allocation19_spill] sm:$0xff] %v9241_v63 }
0x1065   :  { %10528 = vst [vmem:[#allocation28_spill] sm:$0xff] %v9243_v46 }
0x1066   :  { %10529 = vst [vmem:[#allocation32_spill] sm:$0xff] %v9245_v52 }
0x1067   :  { %10530 = vst [vmem:[#allocation29_spill] sm:$0xff] %v9247_v62 }
0x1068   :  { %10531 = vst [vmem:[#allocation16_spill] sm:$0xff] %v9250_v9 }
0x1069   :  { %10532 = vst [vmem:[#allocation18_spill] sm:$0xff] %v9252_v54  ;;  %v5959_v54 = vpop.eup %5958 }
0x106a   :  { %10533 = vst [vmem:[#allocation20_spill] sm:$0xff] %v9255_v61  ;;  %v9292_v61 = vadd.f32 %v10545_v6, %v9245_v52  ;;  %v3883_v8 = vadd.f32 1.0, %v5959_v54  ;;  %v5961_v9 = vpop.eup %5960  ;;  %v3696_v54 = vperm.slane %v9178_v29, 0 }
0x106b   :  { %10536 = vst [vmem:[#allocation17_spill] sm:$0xff] %v9266_v12  ;;  %v3884_v62 = vadd.f32 1.0, %v5961_v9 }
0x106c   :  { %10538 = vst [vmem:[#allocation23_spill] sm:$0xff] %v9271_v57  ;;  %5962 = vrcp.f32 %v3883_v8  ;;  %v3896_v49 = vand.u32 2147483648, %v3883_v8  ;;  %v3894_v21 = vand.u32 2147483647, %v3883_v8  ;;  %vm3890_vm2 = vweird.f32 %v3883_v8 }
0x106d   :  { %10540 = vst [vmem:[#allocation31_spill] sm:$0xff] %v9277_v1  ;;  %5964 = vrcp.f32 %v3884_v62  ;;  %v3911_v33 = vand.u32 2147483648, %v3884_v62  ;;  %v3699_v34 = vadd.f32 %v3696_v54, %v9245_v52  ;;  %vm3905_vm6 = vweird.f32 %v3884_v62  ;;  %v9385_v54 = vld [vmem:[%s8681_s3 + $0x48] sm:$0xff] }
0x106e   :  { %10542 = vst [vmem:[#allocation22_spill] sm:$0xff] %v9282_v10  ;;  %v3897_v9 = vor.u32 1.1754944e-38, %v3896_v49  ;;  %vm3895_vm4 = vcmp.eq.f32.partialorder %v3894_v21, 8.507059e+37 }
0x106f   :  { %10544 = vst [vmem:[#allocation34_spill] sm:$0xff] %v9287_v18 }
0x1070   :  { %10546 = vst [vmem:[#allocation35_spill] sm:$0xff] %v9292_v61 }
0x1071   :  { %10547 = vst [vmem:[#allocation36_spill] sm:$0xff] %v9294_v45 }
0x1072   :  { %10548 = vst [vmem:[#allocation37_spill] sm:$0xff] %v9297_v60  ;;  %v5963_v56 = vpop.eup %5962 }
0x1073   :  { %v3886_v46 = vmul.f32 %v5963_v56, %v3883_v8  ;;  %v5965_v63 = vpop.eup %5964  ;;  %vm3891_vm1 = vweird.f32 %v5963_v56  ;;  %v3912_v8 = vor.u32 1.1754944e-38, %v3911_v33  ;;  %v9349_v33 = vld [vmem:[%s8681_s3 + $0xd8] sm:$0xff] }
0x1074   :  { %v3901_v6 = vmul.f32 %v5965_v63, %v3884_v62  ;;  %vm3892_vm3 = vmor %vm3890_vm2, %vm3891_vm1  ;;  %vm3906_vm5 = vweird.f32 %v5965_v63 }
0x1075   :  { %v3887_v3 = vsub.f32 1.0, %v3886_v46  ;;  %v3918_v46 = vadd.f32 %v9300_v19, %v3872_v58  ;;  %vm3907_vm7 = vmor %vm3905_vm6, %vm3906_vm5  ;;  %v9373_v58 = vld [vmem:[%s8681_s3 + $0x78] sm:$0xff] }
0x1076   :  { %v3902_v17 = vsub.f32 1.0, %v3901_v6  ;;  %v3909_v6 = vand.u32 2147483647, %v3884_v62  ;;  %v9313_v62 = vld [vmem:[%s8681_s3 + $0x168] sm:$0xff] }
0x1077   :  { %v3888_v61 = vmul.f32 %v5963_v56, %v3887_v3 }
0x1078   :  { %v3903_v45 = vmul.f32 %v5965_v63, %v3902_v17  ;;  %vm3910_vm9 = vcmp.eq.f32.partialorder %v3909_v6, 8.507059e+37  ;;  %v9379_v17 = vld [vmem:[%s8681_s3 + $0x60] sm:$0xff]  ;;  %v10553_v6 = vld [vmem:[#allocation4_spill] sm:$0xff] }
0x1079   :  { %v3889_v60 = vadd.f32 %v5963_v56, %v3888_v61 }
0x107a   :  { %v3904_v3 = vadd.f32 %v5965_v63, %v3903_v45 }
0x107b   :  { %v3893_v37 = vsel %vm3892_vm3, %v5963_v56, %v3889_v60 }
0x107c   :  { %v3898_v18 = vsel %vm3895_vm4, %v3897_v9, %v3893_v37  ;;  %v3908_v29 = vsel %vm3907_vm7, %v5965_v63, %v3904_v3  ;;  %v9355_v63 = vld [vmem:[%s8681_s3 + $0xc0] sm:$0xff]  ;;  %v10550_v9 = vld [vmem:[#allocation9_spill] sm:$0xff]  ;;  %v10552_v3 = vld [vmem:[#allocation8_spill] sm:$0xff] }
0x107d   :  { %v3919_v10 = vmul.f32 %v3918_v46, %v3898_v18  ;;  %v3913_v49 = vsel %vm3910_vm9, %v3912_v8, %v3908_v29  ;;  %v9367_v18 = vld [vmem:[%s8681_s3 + $0x90] sm:$0xff]  ;;  %v10555_v29 = vld [vmem:[#allocation2_spill] sm:$0xff]  ;;  %v10556_v8 = vld [vmem:[#allocation3_spill] sm:$0xff] }
0x107e   :  { %v3922_v60 = vsub.f32 1.0, %v3913_v49  ;;  %v3924_v45 = vmul.f32 %v3913_v49, %v10511_v11  ;;  %v9319_v11 = vld [vmem:[%s8681_s3 + $0x150] sm:$0xff]  ;;  %v9403_v49 = vld [vmem:[%s8681_s3] sm:$0xff] }
0x107f   :  { %v3920_v61 = vadd.f32 %v3919_v10, %v3699_v34  ;;  %v9325_v34 = vld [vmem:[%s8681_s3 + $0x138] sm:$0xff]  ;;  %v9361_v10 = vld [vmem:[%s8681_s3 + $0xa8] sm:$0xff]  ;;  %v9391_v46 = vld [vmem:[%s8681_s3 + $0x30] sm:$0xff]  ;;  %10557 = vst [vmem:[#allocation4_spill] sm:$0xff] %v9403_v49 }
0x1080   :  { %10551 = vst [vmem:[#allocation9_spill] sm:$0xff] %v9391_v46 }
0x1081   :  { %5966 = vtanh.f32 %v3920_v61  ;;  %v9397_v61 = vld [vmem:[%s8681_s3 + $0x18] sm:$0xff] }
0x1082   :  { %10554 = vst [vmem:[#allocation8_spill] sm:$0xff] %v9397_v61 }
0x1087   :  { %v5967_v56 = vpop.eup %5966 }
0x1088   :  { %v3923_v37 = vmul.f32 %v5967_v56, %v3922_v60  ;;  %v10558_v60 = vld [vmem:[#allocation6_spill] sm:$0xff] }
0x108a   :  { %v9306_v21 = vadd.f32 %v3924_v45, %v3923_v37 }
0x108c   :  { %10549 = vst [vmem:[#allocation38_spill] sm:$0xff] %v9306_v21  ;;  %3942 = vmatmul.f32.vlgmr.msrb.gmra.mxu2 %v9306_v21  ;;  %3962 = vmatmul.f32.vlgmr.msrb.gmra.mxu3 %v9306_v21 }
0x108d   :  { %3982 = vmatmul.f32.vlgmr.msrb.gmra.mxu0 %v9306_v21  ;;  %4182 = vmatpush.msrb.mxu2 %v8948_v25 }
0x108e   :  { %4250 = vmatpush.msrb.mxu3 %v9313_v62  ;;  %4270 = vmatpush.msrb.mxu0 %v8865_v44  ;;  %v9331_v44 = vld [vmem:[%s8681_s3 + $0x120] sm:$0xff] }
0x108f   :  { %4183 = vmatpush.msrb.mxu2 %v8956_v26 }
0x1090   :  { %4251 = vmatpush.msrb.mxu3 %v9319_v11  ;;  %4271 = vmatpush.msrb.mxu0 %v8871_v55  ;;  %v9337_v55 = vld [vmem:[%s8681_s3 + $0x108] sm:$0xff] }
0x1091   :  { %4184 = vmatpush.msrb.mxu2 %v8963_v28 }
0x1092   :  { %4252 = vmatpush.msrb.mxu3 %v9325_v34  ;;  %4272 = vmatpush.msrb.mxu0 %v8876_v32  ;;  %v9343_v32 = vld [vmem:[%s8681_s3 + $0xf0] sm:$0xff] }
0x1093   :  { %4185 = vmatpush.msrb.mxu2 %v8970_v2 }
0x1094   :  { %4253 = vmatpush.msrb.mxu3 %v9331_v44  ;;  %4273 = vmatpush.msrb.mxu0 %v8886_v59 }
0x1095   :  { %4186 = vmatpush.msrb.mxu2 %v8974_v20 }
0x1096   :  { %4254 = vmatpush.msrb.mxu3 %v9337_v55  ;;  %4274 = vmatpush.msrb.mxu0 %v8891_v14 }
0x1097   :  { %4187 = vmatpush.msrb.mxu2 %v8979_v7 }
0x1098   :  { %4255 = vmatpush.msrb.mxu3 %v9343_v32  ;;  %4275 = vmatpush.msrb.mxu0 %v8899_v50 }
0x1099   :  { %4188 = vmatpush.msrb.mxu2 %v8984_v36 }
0x109a   :  { %4256 = vmatpush.msrb.mxu3 %v9349_v33  ;;  %4276 = vmatpush.msrb.mxu0 %v8906_v13 }
0x109b   :  { %4189 = vmatpush.msrb.mxu2 %v8989_v5 }
0x109c   :  { %4257 = vmatpush.msrb.mxu3 %v9355_v63  ;;  %4277 = vmatpush.msrb.mxu0 %v8914_v42 }
0x109d   :  { %4190 = vmatpush.msrb.mxu2 %v8994_v23 }
0x109e   :  { %4258 = vmatpush.msrb.mxu3 %v9361_v10  ;;  %4278 = vmatpush.msrb.mxu0 %v8924_v27 }
0x109f   :  { %4191 = vmatpush.msrb.mxu2 %v8999_v35 }
0x10a0   :  { %4259 = vmatpush.msrb.mxu3 %v9367_v18  ;;  %4279 = vmatpush.msrb.mxu0 %v8938_v22 }
0x10a1   :  { %4192 = vmatpush.msrb.mxu2 %v9018_v31 }
0x10a2   :  { %4260 = vmatpush.msrb.mxu3 %v9373_v58  ;;  %4280 = vmatpush.msrb.mxu0 %v9015_v47 }
0x10a3   :  { %4193 = vmatpush.msrb.mxu2 %v9026_v16 }
0x10a4   :  { %4261 = vmatpush.msrb.mxu3 %v9379_v17  ;;  %4281 = vmatpush.msrb.mxu0 %v9021_v39 }
0x10a5   :  { %4194 = vmatpush.msrb.mxu2 %v9035_v0 }
0x10a6   :  { %4262 = vmatpush.msrb.mxu3 %v9385_v54  ;;  %4282 = vmatpush.msrb.mxu0 %v9032_v30 }
0x10a7   :  { %4195 = vmatpush.msrb.mxu2 %v10550_v9 }
0x10a8   :  { %4263 = vmatpush.msrb.mxu3 %v9391_v46  ;;  %4283 = vmatpush.msrb.mxu0 %v10552_v3 }
0x10a9   :  { %4196 = vmatpush.msrb.mxu2 %v10553_v6 }
0x10aa   :  { %4264 = vmatpush.msrb.mxu3 %v9397_v61  ;;  %4284 = vmatpush.msrb.mxu0 %v10555_v29 }
0x10ab   :  { %4197 = vmatpush.msrb.mxu2 %v10556_v8 }
0x10ac   :  { %4265 = vmatpush.msrb.mxu3 %v9403_v49  ;;  %4285 = vmatpush.msrb.mxu0 %v10558_v60 }
0x110f   :  { %v3943_v56 = vpop.f32.mrf.mxu2  ;;  %v3963_v37 = vpop.f32.mrf.mxu3 }
0x1110   :  { %v3986_v45 = vadd.f32 %v3943_v56, %v9207_v51  ;;  %v3987_v52 = vadd.f32 %v3963_v37, %v9210_v40  ;;  %v3983_v56 = vpop.f32.mrf.mxu0 }
0x1112   :  { %v5684_v15 = vmul.f32 -1.442695, %v3986_v45  ;;  %v5685_v1 = vmul.f32 -1.442695, %v3987_v52 }
0x1114   :  { %5968 = vpow2.f32 %v5684_v15 }
0x1115   :  { %5970 = vpow2.f32 %v5685_v1 }
0x111a   :  { %v5969_v38 = vpop.eup %5968 }
0x111b   :  { %v5971_v48 = vpop.eup %5970  ;;  %v3994_v57 = vadd.f32 1.0, %v5969_v38 }
0x111c   :  { %v3995_v53 = vadd.f32 1.0, %v5971_v48  ;;  %v4026_v48 = vadd.f32 %v9300_v19, %v3983_v56 }
0x111d   :  { %5972 = vrcp.f32 %v3994_v57  ;;  %v4007_v49 = vand.u32 2147483648, %v3994_v57  ;;  %v4005_v40 = vand.u32 2147483647, %v3994_v57  ;;  %vm4001_vm12 = vweird.f32 %v3994_v57 }
0x111e   :  { %5974 = vrcp.f32 %v3995_v53  ;;  %vm4016_vm1 = vweird.f32 %v3995_v53 }
0x111f   :  { %v4008_v1 = vor.u32 1.1754944e-38, %v4007_v49  ;;  %vm4006_vm14 = vcmp.eq.f32.partialorder %v4005_v40, 8.507059e+37 }
0x1123   :  { %v5973_v43 = vpop.eup %5972 }
0x1124   :  { %v5975_v12 = vpop.eup %5974  ;;  %v3997_v4 = vmul.f32 %v5973_v43, %v3994_v57  ;;  %vm4002_vm11 = vweird.f32 %v5973_v43 }
0x1125   :  { %v4012_v41 = vmul.f32 %v5975_v12, %v3995_v53  ;;  %vm4003_vm13 = vmor %vm4001_vm12, %vm4002_vm11  ;;  %vm4017_vm15 = vweird.f32 %v5975_v12 }
0x1126   :  { %v3998_v60 = vsub.f32 1.0, %v3997_v4  ;;  %v4022_v4 = vand.u32 2147483648, %v3995_v53  ;;  %vm4018_vm2 = vmor %vm4016_vm1, %vm4017_vm15 }
0x1127   :  { %v4013_v8 = vsub.f32 1.0, %v4012_v41  ;;  %v4020_v41 = vand.u32 2147483647, %v3995_v53  ;;  %v9420_v53 = vld [vmem:[%s8681_s3 + $0x170] sm:$0xff] }
0x1128   :  { %v3999_v51 = vmul.f32 %v5973_v43, %v3998_v60  ;;  %v4023_v57 = vor.u32 1.1754944e-38, %v4022_v4 }
0x1129   :  { %v4014_v52 = vmul.f32 %v5975_v12, %v4013_v8  ;;  %vm4021_vm3 = vcmp.eq.f32.partialorder %v4020_v41, 8.507059e+37 }
0x112a   :  { %v4000_v15 = vadd.f32 %v5973_v43, %v3999_v51 }
0x112b   :  { %v4015_v45 = vadd.f32 %v5975_v12, %v4014_v52 }
0x112c   :  { %v4004_v38 = vsel %vm4003_vm13, %v5973_v43, %v4000_v15 }
0x112d   :  { %v4009_v37 = vsel %vm4006_vm14, %v4008_v1, %v4004_v38  ;;  %v4019_v8 = vsel %vm4018_vm2, %v5975_v12, %v4015_v45  ;;  %v9432_v12 = vld [vmem:[%s8681_s3 + $0x140] sm:$0xff] }
0x112e   :  { %v4027_v29 = vmul.f32 %v4026_v48, %v4009_v37  ;;  %v4024_v49 = vsel %vm4021_vm3, %v4023_v57, %v4019_v8  ;;  %v10566_v8 = vld [vmem:[#allocation17_spill] sm:$0xff] }
0x112f   :  { %v4030_v51 = vsub.f32 1.0, %v4024_v49  ;;  %v4032_v56 = vmul.f32 %v4024_v49, %v9306_v21 }
0x1130   :  { %v4028_v60 = vadd.f32 %v4027_v29, %v9261_v24  ;;  %v9426_v24 = vld [vmem:[%s8681_s3 + $0x158] sm:$0xff] }
0x1132   :  { %5976 = vtanh.f32 %v4028_v60 }
0x1138   :  { %v5977_v43 = vpop.eup %5976 }
0x1139   :  { %v4031_v40 = vmul.f32 %v5977_v43, %v4030_v51 }
0x113b   :  { %v9412_v52 = vadd.f32 %v4032_v56, %v4031_v40 }
0x113d   :  { %10559 = vst [vmem:[#allocation39_spill] sm:$0xff] %v9412_v52  ;;  %4050 = vmatmul.f32.vlgmr.msrb.gmra.mxu1 %v9412_v52  ;;  %4070 = vmatmul.f32.vlgmr.msra.gmra.mxu2 %v9412_v52 }
0x113e   :  { %4090 = vmatmul.f32.vlgmr.msra.gmra.mxu3 %v9412_v52  ;;  %4290 = vmatpush.msrb.mxu1 %v8948_v25 }
0x113f   :  { %4358 = vmatpush.msra.mxu2 %v9313_v62  ;;  %4378 = vmatpush.msra.mxu3 %v9420_v53 }
0x1140   :  { %4291 = vmatpush.msrb.mxu1 %v8956_v26 }
0x1141   :  { %4359 = vmatpush.msra.mxu2 %v9319_v11  ;;  %4379 = vmatpush.msra.mxu3 %v9426_v24 }
0x1142   :  { %4292 = vmatpush.msrb.mxu1 %v8963_v28  ;;  %v10565_v28 = vld [vmem:[#allocation13_spill] sm:$0xff] }
0x1143   :  { %4360 = vmatpush.msra.mxu2 %v9325_v34  ;;  %4380 = vmatpush.msra.mxu3 %v9432_v12 }
0x1144   :  { %4293 = vmatpush.msrb.mxu1 %v8970_v2 }
0x1145   :  { %4361 = vmatpush.msra.mxu2 %v9331_v44  ;;  %4381 = vmatpush.msra.mxu3 %v8886_v59  ;;  %v10560_v59 = vld [vmem:[#allocation2_spill] sm:$0xff] }
0x1146   :  { %4294 = vmatpush.msrb.mxu1 %v8974_v20 }
0x1147   :  { %4362 = vmatpush.msra.mxu2 %v9337_v55  ;;  %4382 = vmatpush.msra.mxu3 %v8891_v14  ;;  %v10561_v14 = vld [vmem:[#allocation3_spill] sm:$0xff] }
0x1148   :  { %4295 = vmatpush.msrb.mxu1 %v8979_v7 }
0x1149   :  { %4363 = vmatpush.msra.mxu2 %v9343_v32  ;;  %4383 = vmatpush.msra.mxu3 %v8899_v50  ;;  %v10562_v50 = vld [vmem:[#allocation4_spill] sm:$0xff] }
0x114a   :  { %4296 = vmatpush.msrb.mxu1 %v8984_v36 }
0x114b   :  { %4364 = vmatpush.msra.mxu2 %v9349_v33  ;;  %4384 = vmatpush.msra.mxu3 %v8906_v13  ;;  %v10563_v13 = vld [vmem:[#allocation6_spill] sm:$0xff] }
0x114c   :  { %4297 = vmatpush.msrb.mxu1 %v8989_v5 }
0x114d   :  { %4365 = vmatpush.msra.mxu2 %v9355_v63  ;;  %4385 = vmatpush.msra.mxu3 %v8914_v42 }
0x114e   :  { %4298 = vmatpush.msrb.mxu1 %v8994_v23 }
0x114f   :  { %4366 = vmatpush.msra.mxu2 %v9361_v10  ;;  %4386 = vmatpush.msra.mxu3 %v8924_v27  ;;  %v10564_v27 = vld [vmem:[#allocation10_spill] sm:$0xff] }
0x1150   :  { %4299 = vmatpush.msrb.mxu1 %v8999_v35 }
0x1151   :  { %4367 = vmatpush.msra.mxu2 %v9367_v18  ;;  %4387 = vmatpush.msra.mxu3 %v8938_v22 }
0x1152   :  { %4300 = vmatpush.msrb.mxu1 %v9018_v31 }
0x1153   :  { %4368 = vmatpush.msra.mxu2 %v9373_v58  ;;  %4388 = vmatpush.msra.mxu3 %v9015_v47 }
0x1154   :  { %4301 = vmatpush.msrb.mxu1 %v9026_v16 }
0x1155   :  { %4369 = vmatpush.msra.mxu2 %v9379_v17  ;;  %4389 = vmatpush.msra.mxu3 %v9021_v39 }
0x1156   :  { %4302 = vmatpush.msrb.mxu1 %v9035_v0 }
0x1157   :  { %4370 = vmatpush.msra.mxu2 %v9385_v54  ;;  %4390 = vmatpush.msra.mxu3 %v9032_v30 }
0x1158   :  { %4303 = vmatpush.msrb.mxu1 %v10550_v9 }
0x1159   :  { %4371 = vmatpush.msra.mxu2 %v9391_v46  ;;  %4391 = vmatpush.msra.mxu3 %v10552_v3 }
0x115a   :  { %4304 = vmatpush.msrb.mxu1 %v10553_v6 }
0x115b   :  { %4372 = vmatpush.msra.mxu2 %v9397_v61  ;;  %4392 = vmatpush.msra.mxu3 %v10560_v59 }
0x115c   :  { %4305 = vmatpush.msrb.mxu1 %v10561_v14 }
0x115d   :  { %4373 = vmatpush.msra.mxu2 %v10562_v50  ;;  %4393 = vmatpush.msra.mxu3 %v10563_v13 }
0x11ba   :  { %v4051_v42 = vpop.f32.mrf.mxu1 }
0x11bb   :  { %v4094_v22 = vadd.f32 %v4051_v42, %v10564_v27  ;;  %v9485_v42 = vld [vmem:[%s8681_s3 + $0x178] sm:$0xff]  ;;  %v9491_v27 = vld [vmem:[%s8681_s3 + $0x160] sm:$0xff] }
0x11bd   :  { %v5686_v25 = vmul.f32 -1.442695, %v4094_v22  ;;  %v9497_v22 = vld [vmem:[%s8681_s3 + $0x148] sm:$0xff] }
0x11bf   :  { %5978 = vpow2.f32 %v5686_v25  ;;  %v9503_v25 = vld [vmem:[%s8681_s3 + $0x130] sm:$0xff] }
0x11c0   :  { %v4071_v26 = vpop.f32.mrf.mxu2 }
0x11c1   :  { %v4095_v2 = vadd.f32 %v4071_v26, %v10565_v28  ;;  %v4091_v9 = vpop.f32.mrf.mxu3  ;;  %v9508_v26 = vld [vmem:[%s8681_s3 + $0x128] sm:$0xff]  ;;  %v9512_v28 = vld [vmem:[%s8681_s3 + $0x118] sm:$0xff] }
0x11c2   :  { %v4134_v48 = vadd.f32 %v9300_v19, %v4091_v9  ;;  %v9575_v9 = vld [vmem:[%s8681_s3 + $0x70] sm:$0xff] }
0x11c3   :  { %v5687_v20 = vmul.f32 -1.442695, %v4095_v2  ;;  %v9517_v2 = vld [vmem:[%s8681_s3 + $0x110] sm:$0xff] }
0x11c5   :  { %v5979_v7 = vpop.eup %5978  ;;  %5980 = vpow2.f32 %v5687_v20  ;;  %v9521_v20 = vld [vmem:[%s8681_s3 + $0x100] sm:$0xff] }
0x11c6   :  { %v4102_v36 = vadd.f32 1.0, %v5979_v7  ;;  %v9526_v7 = vld [vmem:[%s8681_s3 + $0xf8] sm:$0xff] }
0x11c8   :  { %5982 = vrcp.f32 %v4102_v36  ;;  %v4115_v39 = vand.u32 2147483648, %v4102_v36  ;;  %v4113_v30 = vand.u32 2147483647, %v4102_v36  ;;  %vm4109_vm5 = vweird.f32 %v4102_v36 }
0x11ca   :  { %v4116_v29 = vor.u32 1.1754944e-38, %v4115_v39  ;;  %vm4114_vm7 = vcmp.eq.f32.partialorder %v4113_v30, 8.507059e+37  ;;  %v9557_v39 = vld [vmem:[%s8681_s3 + $0xa0] sm:$0xff]  ;;  %v9566_v30 = vld [vmem:[%s8681_s3 + $0x88] sm:$0xff] }
0x11cb   :  { %v5981_v5 = vpop.eup %5980 }
0x11cc   :  { %v4103_v23 = vadd.f32 1.0, %v5981_v5  ;;  %v9535_v5 = vld [vmem:[%s8681_s3 + $0xe0] sm:$0xff] }
0x11ce   :  { %v5983_v35 = vpop.eup %5982  ;;  %5984 = vrcp.f32 %v4103_v23  ;;  %v4130_v45 = vand.u32 2147483648, %v4103_v23  ;;  %v4128_v41 = vand.u32 2147483647, %v4103_v23  ;;  %vm4124_vm11 = vweird.f32 %v4103_v23 }
0x11cf   :  { %v4105_v47 = vmul.f32 %v5983_v35, %v4102_v36  ;;  %vm4110_vm4 = vweird.f32 %v5983_v35  ;;  %v9530_v36 = vld [vmem:[%s8681_s3 + $0xe8] sm:$0xff] }
0x11d0   :  { %vm4111_vm6 = vmor %vm4109_vm5, %vm4110_vm4  ;;  %v4131_v49 = vor.u32 1.1754944e-38, %v4130_v45  ;;  %vm4129_vm13 = vcmp.eq.f32.partialorder %v4128_v41, 8.507059e+37  ;;  %v9616_v45 = vld [vmem:[%s8681_s3 + $0x8] sm:$0xff] }
0x11d1   :  { %v4106_v31 = vsub.f32 1.0, %v4105_v47  ;;  %v9548_v47 = vld [vmem:[%s8681_s3 + $0xb8] sm:$0xff]  ;;  %10572 = vst [vmem:[#allocation17_spill] sm:$0xff] %v9616_v45 }
0x11d3   :  { %v4107_v16 = vmul.f32 %v5983_v35, %v4106_v31  ;;  %v9553_v31 = vld [vmem:[%s8681_s3 + $0xb0] sm:$0xff] }
0x11d4   :  { %v5985_v0 = vpop.eup %5984 }
0x11d5   :  { %v4120_v3 = vmul.f32 %v5985_v0, %v4103_v23  ;;  %v4108_v6 = vadd.f32 %v5983_v35, %v4107_v16  ;;  %vm4125_vm9 = vweird.f32 %v5985_v0  ;;  %v9539_v23 = vld [vmem:[%s8681_s3 + $0xd0] sm:$0xff]  ;;  %v9562_v16 = vld [vmem:[%s8681_s3 + $0x98] sm:$0xff] }
0x11d6   :  { %vm4126_vm12 = vmor %vm4124_vm11, %vm4125_vm9 }
0x11d7   :  { %v4121_v15 = vsub.f32 1.0, %v4120_v3  ;;  %v4112_v1 = vsel %vm4111_vm6, %v5983_v35, %v4108_v6  ;;  %v9544_v35 = vld [vmem:[%s8681_s3 + $0xc8] sm:$0xff]  ;;  %v9584_v6 = vld [vmem:[%s8681_s3 + $0x58] sm:$0xff] }
0x11d8   :  { %v4117_v38 = vsel %vm4114_vm7, %v4116_v29, %v4112_v1  ;;  %v9580_v3 = vld [vmem:[%s8681_s3 + $0x68] sm:$0xff]  ;;  %v9589_v29 = vld [vmem:[%s8681_s3 + $0x50] sm:$0xff]  ;;  %v9598_v1 = vld [vmem:[%s8681_s3 + $0x38] sm:$0xff] }
0x11d9   :  { %v4122_v37 = vmul.f32 %v5985_v0, %v4121_v15  ;;  %v4135_v4 = vmul.f32 %v4134_v48, %v4117_v38  ;;  %v9593_v15 = vld [vmem:[%s8681_s3 + $0x40] sm:$0xff]  ;;  %10568 = vst [vmem:[#allocation3_spill] sm:$0xff] %v9598_v1  ;;  %v9602_v48 = vld [vmem:[%s8681_s3 + $0x28] sm:$0xff] }
0x11da   :  { %10569 = vst [vmem:[#allocation6_spill] sm:$0xff] %v9602_v48  ;;  %v9607_v38 = vld [vmem:[%s8681_s3 + $0x20] sm:$0xff] }
0x11db   :  { %v4123_v60 = vadd.f32 %v5985_v0, %v4122_v37  ;;  %v4136_v57 = vadd.f32 %v4135_v4, %v10566_v8  ;;  %10570 = vst [vmem:[#allocation10_spill] sm:$0xff] %v9607_v38  ;;  %v9611_v37 = vld [vmem:[%s8681_s3 + $0x10] sm:$0xff] }
0x11dc   :  { %10571 = vst [vmem:[#allocation13_spill] sm:$0xff] %v9611_v37 }
0x11dd   :  { %v4127_v51 = vsel %vm4126_vm12, %v5985_v0, %v4123_v60  ;;  %5986 = vtanh.f32 %v4136_v57  ;;  %v9571_v0 = vld [vmem:[%s8681_s3 + $0x80] sm:$0xff]  ;;  %v10574_v57 = vld [vmem:[#allocation11_spill] sm:$0xff] }
0x11de   :  { %v4132_v43 = vsel %vm4129_vm13, %v4131_v49, %v4127_v51  ;;  %v10573_v60 = vld [vmem:[#allocation14_spill] sm:$0xff] }
0x11df   :  { %v4138_v40 = vsub.f32 1.0, %v4132_v43  ;;  %v4140_v14 = vmul.f32 %v4132_v43, %v9412_v52 }
0x11e3   :  { %v5987_v56 = vpop.eup %5986 }
0x11e4   :  { %v4139_v59 = vmul.f32 %v5987_v56, %v4138_v40 }
0x11e6   :  { %v9479_v13 = vadd.f32 %v4140_v14, %v4139_v59 }
0x11e8   :  { %10567 = vst [vmem:[#allocation2_spill] sm:$0xff] %v9479_v13  ;;  %4158 = vmatmul.f32.vlgmr.msra.gmra.mxu0 %v9479_v13  ;;  %4178 = vmatmul.f32.vlgmr.msra.gmra.mxu1 %v9479_v13 }
0x11e9   :  { %4198 = vmatmul.f32.vlgmr.msrb.gmra.mxu2 %v9479_v13  ;;  %4398 = vmatpush.msra.mxu0 %v9485_v42 }
0x11ea   :  { %4466 = vmatpush.msra.mxu1 %v9313_v62  ;;  %4486 = vmatpush.msrb.mxu2 %v9420_v53 }
0x11eb   :  { %4399 = vmatpush.msra.mxu0 %v9491_v27 }
0x11ec   :  { %4467 = vmatpush.msra.mxu1 %v9319_v11  ;;  %4487 = vmatpush.msrb.mxu2 %v9426_v24 }
0x11ed   :  { %4400 = vmatpush.msra.mxu0 %v9497_v22 }
0x11ee   :  { %4468 = vmatpush.msra.mxu1 %v9325_v34  ;;  %4488 = vmatpush.msrb.mxu2 %v9432_v12 }
0x11ef   :  { %4401 = vmatpush.msra.mxu0 %v9503_v25 }
0x11f0   :  { %4469 = vmatpush.msra.mxu1 %v9331_v44  ;;  %4489 = vmatpush.msrb.mxu2 %v9508_v26 }
0x11f1   :  { %4402 = vmatpush.msra.mxu0 %v9512_v28 }
0x11f2   :  { %4470 = vmatpush.msra.mxu1 %v9337_v55  ;;  %4490 = vmatpush.msrb.mxu2 %v9517_v2 }
0x11f3   :  { %4403 = vmatpush.msra.mxu0 %v9521_v20 }
0x11f4   :  { %4471 = vmatpush.msra.mxu1 %v9343_v32  ;;  %4491 = vmatpush.msrb.mxu2 %v9526_v7 }
0x11f5   :  { %4404 = vmatpush.msra.mxu0 %v9530_v36 }
0x11f6   :  { %4472 = vmatpush.msra.mxu1 %v9349_v33  ;;  %4492 = vmatpush.msrb.mxu2 %v9535_v5 }
0x11f7   :  { %4405 = vmatpush.msra.mxu0 %v9539_v23 }
0x11f8   :  { %4473 = vmatpush.msra.mxu1 %v9355_v63  ;;  %4493 = vmatpush.msrb.mxu2 %v9544_v35 }
0x11f9   :  { %4406 = vmatpush.msra.mxu0 %v9548_v47 }
0x11fa   :  { %4474 = vmatpush.msra.mxu1 %v9361_v10  ;;  %4494 = vmatpush.msrb.mxu2 %v9553_v31 }
0x11fb   :  { %4407 = vmatpush.msra.mxu0 %v9557_v39 }
0x11fc   :  { %4475 = vmatpush.msra.mxu1 %v9367_v18  ;;  %4495 = vmatpush.msrb.mxu2 %v9562_v16 }
0x11fd   :  { %4408 = vmatpush.msra.mxu0 %v9566_v30 }
0x11fe   :  { %4476 = vmatpush.msra.mxu1 %v9373_v58  ;;  %4496 = vmatpush.msrb.mxu2 %v9571_v0 }
0x11ff   :  { %4409 = vmatpush.msra.mxu0 %v9575_v9 }
0x1200   :  { %4477 = vmatpush.msra.mxu1 %v9379_v17  ;;  %4497 = vmatpush.msrb.mxu2 %v9580_v3 }
0x1201   :  { %4410 = vmatpush.msra.mxu0 %v9584_v6 }
0x1202   :  { %4478 = vmatpush.msra.mxu1 %v9385_v54  ;;  %4498 = vmatpush.msrb.mxu2 %v9589_v29 }
0x1203   :  { %4411 = vmatpush.msra.mxu0 %v9593_v15 }
0x1204   :  { %4479 = vmatpush.msra.mxu1 %v9391_v46  ;;  %4499 = vmatpush.msrb.mxu2 %v9598_v1 }
0x1205   :  { %4412 = vmatpush.msra.mxu0 %v9602_v48 }
0x1206   :  { %4480 = vmatpush.msra.mxu1 %v9397_v61  ;;  %4500 = vmatpush.msrb.mxu2 %v9607_v38 }
0x1207   :  { %4413 = vmatpush.msra.mxu0 %v9611_v37 }
0x1208   :  { %4481 = vmatpush.msra.mxu1 %v10562_v50  ;;  %4501 = vmatpush.msrb.mxu2 %v9616_v45 }
0x1265   :  { %v4159_v4 = vpop.f32.mrf.mxu0  ;;  %v4179_v41 = vpop.f32.mrf.mxu1 }
0x1266   :  { %v4202_v8 = vadd.f32 %v4159_v4, %v10573_v60  ;;  %v4203_v49 = vadd.f32 %v4179_v41, %v10574_v57 }
0x1268   :  { %v5688_v51 = vmul.f32 -1.442695, %v4202_v8  ;;  %v5689_v43 = vmul.f32 -1.442695, %v4203_v49 }
0x126a   :  { %5988 = vpow2.f32 %v5688_v51 }
0x126b   :  { %5990 = vpow2.f32 %v5689_v43 }
0x126c   :  { %v4199_v8 = vpop.f32.mrf.mxu2 }
0x126d   :  { %v4242_v43 = vadd.f32 %v9300_v19, %v4199_v8  ;;  %v10582_v8 = vld [vmem:[#allocation13_spill] sm:$0xff] }
0x1270   :  { %v5989_v40 = vpop.eup %5988 }
0x1271   :  { %v5991_v56 = vpop.eup %5990  ;;  %v4210_v59 = vadd.f32 1.0, %v5989_v40 }
0x1272   :  { %v4211_v14 = vadd.f32 1.0, %v5991_v56 }
0x1273   :  { %5992 = vrcp.f32 %v4210_v59  ;;  %v4223_v61 = vand.u32 2147483648, %v4210_v59  ;;  %v4221_v41 = vand.u32 2147483647, %v4210_v59  ;;  %vm4217_vm15 = vweird.f32 %v4210_v59 }
0x1274   :  { %5994 = vrcp.f32 %v4211_v14  ;;  %v4238_v48 = vand.u32 2147483648, %v4211_v14  ;;  %vm4232_vm4 = vweird.f32 %v4211_v14 }
0x1275   :  { %v4224_v49 = vor.u32 1.1754944e-38, %v4223_v61  ;;  %vm4222_vm2 = vcmp.eq.f32.partialorder %v4221_v41, 8.507059e+37 }
0x1276   :  { %v4239_v46 = vor.u32 1.1754944e-38, %v4238_v48  ;;  %v10580_v48 = vld [vmem:[#allocation8_spill] sm:$0xff] }
0x1279   :  { %v5993_v21 = vpop.eup %5992 }
0x127a   :  { %v5995_v52 = vpop.eup %5994  ;;  %v4213_v50 = vmul.f32 %v5993_v21, %v4210_v59  ;;  %vm4218_vm14 = vweird.f32 %v5993_v21 }
0x127b   :  { %v4228_v45 = vmul.f32 %v5995_v52, %v4211_v14  ;;  %vm4219_vm1 = vmor %vm4217_vm15, %vm4218_vm14  ;;  %vm4233_vm3 = vweird.f32 %v5995_v52 }
0x127c   :  { %v4214_v37 = vsub.f32 1.0, %v4213_v50  ;;  %vm4234_vm5 = vmor %vm4232_vm4, %vm4233_vm3 }
0x127d   :  { %v4229_v38 = vsub.f32 1.0, %v4228_v45  ;;  %v4236_v45 = vand.u32 2147483647, %v4211_v14  ;;  %v10581_v14 = vld [vmem:[#allocation10_spill] sm:$0xff] }
0x127e   :  { %v4215_v4 = vmul.f32 %v5993_v21, %v4214_v37  ;;  %v10575_v37 = vld [vmem:[#allocation23_spill] sm:$0xff] }
0x127f   :  { %v4230_v60 = vmul.f32 %v5995_v52, %v4229_v38  ;;  %vm4237_vm6 = vcmp.eq.f32.partialorder %v4236_v45, 8.507059e+37  ;;  %v10586_v45 = vld [vmem:[#allocation7_spill] sm:$0xff] }
0x1280   :  { %v4216_v57 = vadd.f32 %v5993_v21, %v4215_v4 }
0x1281   :  { %v4231_v40 = vadd.f32 %v5995_v52, %v4230_v60 }
0x1282   :  { %v4220_v51 = vsel %vm4219_vm1, %v5993_v21, %v4216_v57  ;;  %v10583_v57 = vld [vmem:[#allocation4_spill] sm:$0xff] }
0x1283   :  { %v4225_v56 = vsel %vm4222_vm2, %v4224_v49, %v4220_v51  ;;  %v4235_v38 = vsel %vm4234_vm5, %v5995_v52, %v4231_v40  ;;  %v10578_v52 = vld [vmem:[#allocation3_spill] sm:$0xff]  ;;  %v10584_v49 = vld [vmem:[#allocation17_spill] sm:$0xff] }
0x1284   :  { %v4243_v50 = vmul.f32 %v4242_v43, %v4225_v56  ;;  %v4240_v59 = vsel %vm4237_vm6, %v4239_v46, %v4235_v38  ;;  %v10577_v46 = vld [vmem:[#allocation9_spill] sm:$0xff]  ;;  %v10585_v43 = vld [vmem:[#allocation15_spill] sm:$0xff] }
0x1285   :  { %v4246_v61 = vsub.f32 1.0, %v4240_v59  ;;  %v4248_v41 = vmul.f32 %v4240_v59, %v9479_v13 }
0x1286   :  { %v4244_v1 = vadd.f32 %v4243_v50, %v10575_v37 }
0x1288   :  { %5996 = vtanh.f32 %v4244_v1  ;;  %v10579_v1 = vld [vmem:[#allocation6_spill] sm:$0xff] }
0x128e   :  { %v5997_v21 = vpop.eup %5996 }
0x128f   :  { %v4247_v4 = vmul.f32 %v5997_v21, %v4246_v61 }
0x1291   :  { %v9624_v60 = vadd.f32 %v4248_v41, %v4247_v4 }
0x1293   :  { %10576 = vst [vmem:[#allocation14_spill] sm:$0xff] %v9624_v60  ;;  %4266 = vmatmul.f32.vlgmr.msrb.gmra.mxu3 %v9624_v60  ;;  %4286 = vmatmul.f32.vlgmr.msrb.gmra.mxu0 %v9624_v60 }
0x1294   :  { %4306 = vmatmul.f32.vlgmr.msrb.gmra.mxu1 %v9624_v60  ;;  %4506 = vmatpush.msrb.mxu3 %v9485_v42 }
0x1295   :  { %4574 = vmatpush.msrb.mxu0 %v9313_v62  ;;  %4594 = vmatpush.msrb.mxu1 %v9420_v53 }
0x1296   :  { %4507 = vmatpush.msrb.mxu3 %v9491_v27 }
0x1297   :  { %4575 = vmatpush.msrb.mxu0 %v9319_v11  ;;  %4595 = vmatpush.msrb.mxu1 %v9426_v24 }
0x1298   :  { %4508 = vmatpush.msrb.mxu3 %v9497_v22 }
0x1299   :  { %4576 = vmatpush.msrb.mxu0 %v9325_v34  ;;  %4596 = vmatpush.msrb.mxu1 %v9432_v12 }
0x129a   :  { %4509 = vmatpush.msrb.mxu3 %v9503_v25 }
0x129b   :  { %4577 = vmatpush.msrb.mxu0 %v9331_v44  ;;  %4597 = vmatpush.msrb.mxu1 %v9508_v26 }
0x129c   :  { %4510 = vmatpush.msrb.mxu3 %v9512_v28 }
0x129d   :  { %4578 = vmatpush.msrb.mxu0 %v9337_v55  ;;  %4598 = vmatpush.msrb.mxu1 %v9517_v2 }
0x129e   :  { %4511 = vmatpush.msrb.mxu3 %v9521_v20 }
0x129f   :  { %4579 = vmatpush.msrb.mxu0 %v9343_v32  ;;  %4599 = vmatpush.msrb.mxu1 %v9526_v7 }
0x12a0   :  { %4512 = vmatpush.msrb.mxu3 %v9530_v36 }
0x12a1   :  { %4580 = vmatpush.msrb.mxu0 %v9349_v33  ;;  %4600 = vmatpush.msrb.mxu1 %v9535_v5 }
0x12a2   :  { %4513 = vmatpush.msrb.mxu3 %v9539_v23 }
0x12a3   :  { %4581 = vmatpush.msrb.mxu0 %v9355_v63  ;;  %4601 = vmatpush.msrb.mxu1 %v9544_v35 }
0x12a4   :  { %4514 = vmatpush.msrb.mxu3 %v9548_v47 }
0x12a5   :  { %4582 = vmatpush.msrb.mxu0 %v9361_v10  ;;  %4602 = vmatpush.msrb.mxu1 %v9553_v31 }
0x12a6   :  { %4515 = vmatpush.msrb.mxu3 %v9557_v39 }
0x12a7   :  { %4583 = vmatpush.msrb.mxu0 %v9367_v18  ;;  %4603 = vmatpush.msrb.mxu1 %v9562_v16 }
0x12a8   :  { %4516 = vmatpush.msrb.mxu3 %v9566_v30 }
0x12a9   :  { %4584 = vmatpush.msrb.mxu0 %v9373_v58  ;;  %4604 = vmatpush.msrb.mxu1 %v9571_v0 }
0x12aa   :  { %4517 = vmatpush.msrb.mxu3 %v9575_v9 }
0x12ab   :  { %4585 = vmatpush.msrb.mxu0 %v9379_v17  ;;  %4605 = vmatpush.msrb.mxu1 %v9580_v3 }
0x12ac   :  { %4518 = vmatpush.msrb.mxu3 %v9584_v6 }
0x12ad   :  { %4586 = vmatpush.msrb.mxu0 %v9385_v54  ;;  %4606 = vmatpush.msrb.mxu1 %v9589_v29 }
0x12ae   :  { %4519 = vmatpush.msrb.mxu3 %v9593_v15 }
0x12af   :  { %4587 = vmatpush.msrb.mxu0 %v10577_v46  ;;  %4607 = vmatpush.msrb.mxu1 %v10578_v52 }
0x12b0   :  { %4520 = vmatpush.msrb.mxu3 %v10579_v1 }
0x12b1   :  { %4588 = vmatpush.msrb.mxu0 %v10580_v48  ;;  %4608 = vmatpush.msrb.mxu1 %v10581_v14 }
0x12b2   :  { %4521 = vmatpush.msrb.mxu3 %v10582_v8 }
0x12b3   :  { %4589 = vmatpush.msrb.mxu0 %v10583_v57  ;;  %4609 = vmatpush.msrb.mxu1 %v10584_v49 }
0x1310   :  { %v4287_v51 = vpop.f32.mrf.mxu0 }
0x1311   :  { %v4311_v40 = vadd.f32 %v4287_v51, %v10585_v43 }
0x1313   :  { %v5691_v56 = vmul.f32 -1.442695, %v4311_v40 }
0x1315   :  { %5998 = vpow2.f32 %v5691_v56 }
0x1316   :  { %v4267_v50 = vpop.f32.mrf.mxu3 }
0x1317   :  { %v4310_v37 = vadd.f32 %v4267_v50, %v10586_v45  ;;  %v4307_v50 = vpop.f32.mrf.mxu1 }
0x1319   :  { %v5690_v38 = vmul.f32 -1.442695, %v4310_v37 }
0x131b   :  { %v5999_v59 = vpop.eup %5998  ;;  %6000 = vpow2.f32 %v5690_v38  ;;  %v4350_v38 = vadd.f32 %v9300_v19, %v4307_v50 }
0x131c   :  { %v4319_v61 = vadd.f32 1.0, %v5999_v59 }
0x131e   :  { %6002 = vrcp.f32 %v4319_v61  ;;  %v4346_v1 = vand.u32 2147483648, %v4319_v61  ;;  %vm4340_vm14 = vweird.f32 %v4319_v61 }
0x1320   :  { %v4347_v46 = vor.u32 1.1754944e-38, %v4346_v1 }
0x1321   :  { %v6001_v21 = vpop.eup %6000 }
0x1322   :  { %v4318_v4 = vadd.f32 1.0, %v6001_v21 }
0x1324   :  { %6004 = vrcp.f32 %v4318_v4  ;;  %v6003_v41 = vpop.eup %6002  ;;  %v4331_v51 = vand.u32 2147483648, %v4318_v4  ;;  %v4329_v40 = vand.u32 2147483647, %v4318_v4  ;;  %vm4325_vm9 = vweird.f32 %v4318_v4 }
0x1325   :  { %v4336_v13 = vmul.f32 %v6003_v41, %v4319_v61  ;;  %vm4341_vm13 = vweird.f32 %v6003_v41 }
0x1326   :  { %v4332_v37 = vor.u32 1.1754944e-38, %v4331_v51  ;;  %vm4330_vm12 = vcmp.eq.f32.partialorder %v4329_v40, 8.507059e+37  ;;  %vm4342_vm15 = vmor %vm4340_vm14, %vm4341_vm13 }
0x1327   :  { %v4337_v8 = vsub.f32 1.0, %v4336_v13 }
0x1329   :  { %v4338_v56 = vmul.f32 %v6003_v41, %v4337_v8 }
0x132a   :  { %v6005_v57 = vpop.eup %6004 }
0x132b   :  { %v4321_v49 = vmul.f32 %v6005_v57, %v4318_v4  ;;  %vm4326_vm7 = vweird.f32 %v6005_v57  ;;  %v4339_v21 = vadd.f32 %v6003_v41, %v4338_v56 }
0x132c   :  { %vm4327_vm11 = vmor %vm4325_vm9, %vm4326_vm7 }
0x132d   :  { %v4322_v14 = vsub.f32 1.0, %v4321_v49  ;;  %v4344_v49 = vand.u32 2147483647, %v4319_v61  ;;  %v4343_v8 = vsel %vm4342_vm15, %v6003_v41, %v4339_v21 }
0x132f   :  { %v4323_v43 = vmul.f32 %v6005_v57, %v4322_v14  ;;  %v10587_v14 = vld [vmem:[#allocation31_spill] sm:$0xff]  ;;  %vm4345_vm1 = vcmp.eq.f32.partialorder %v4344_v49, 8.507059e+37 }
0x1330   :  { %v4348_v4 = vsel %vm4345_vm1, %v4347_v46, %v4343_v8 }
0x1331   :  { %v4324_v45 = vadd.f32 %v6005_v57, %v4323_v43  ;;  %v4354_v51 = vsub.f32 1.0, %v4348_v4 }
0x1333   :  { %v4328_v59 = vsel %vm4327_vm11, %v6005_v57, %v4324_v45  ;;  %v4356_v57 = vmul.f32 %v4348_v4, %v9624_v60 }
0x1334   :  { %v4333_v48 = vsel %vm4330_vm12, %v4332_v37, %v4328_v59 }
0x1335   :  { %v4351_v13 = vmul.f32 %v4350_v38, %v4333_v48 }
0x1337   :  { %v4352_v52 = vadd.f32 %v4351_v13, %v10587_v14 }
0x1339   :  { %6006 = vtanh.f32 %v4352_v52 }
0x133f   :  { %v6007_v43 = vpop.eup %6006 }
0x1340   :  { %v4355_v19 = vmul.f32 %v6007_v43, %v4354_v51 }
0x1342   :  { %v9682_v40 = vadd.f32 %v4356_v57, %v4355_v19  ;;  %v9738_v19 = vld [vmem:[%s9085_s1] ss:$0 sm:$0xff] }
0x1344   :  { %10588 = vst [vmem:[#allocation11_spill] sm:$0xff] %v9682_v40  ;;  %4374 = vmatmul.f32.vlgmr.msra.gmra.mxu2 %v9682_v40  ;;  %4394 = vmatmul.f32.vlgmr.msra.gmra.mxu3 %v9682_v40 }
0x1345   :  { %4414 = vmatmul.f32.vlgmr.msra.gmra.mxu0 %v9682_v40  ;;  %4614 = vmatpush.msra.mxu2 %v9485_v42 }
0x1346   :  { %4682 = vmatpush.msra.mxu3 %v9313_v62  ;;  %4702 = vmatpush.msra.mxu0 %v9420_v53  ;;  %v10589_v62 = vld [vmem:[#allocation9_spill] sm:$0xff] }
0x1347   :  { %4615 = vmatpush.msra.mxu2 %v9491_v27 }
0x1348   :  { %4683 = vmatpush.msra.mxu3 %v9319_v11  ;;  %4703 = vmatpush.msra.mxu0 %v9426_v24  ;;  %v10590_v11 = vld [vmem:[#allocation3_spill] sm:$0xff] }
0x1349   :  { %4616 = vmatpush.msra.mxu2 %v9497_v22 }
0x134a   :  { %4684 = vmatpush.msra.mxu3 %v9325_v34  ;;  %4704 = vmatpush.msra.mxu0 %v9432_v12  ;;  %v10591_v34 = vld [vmem:[#allocation6_spill] sm:$0xff] }
0x134b   :  { %4617 = vmatpush.msra.mxu2 %v9503_v25 }
0x134c   :  { %4685 = vmatpush.msra.mxu3 %v9331_v44  ;;  %4705 = vmatpush.msra.mxu0 %v9508_v26  ;;  %v10592_v44 = vld [vmem:[#allocation8_spill] sm:$0xff] }
0x134d   :  { %4618 = vmatpush.msra.mxu2 %v9512_v28 }
0x134e   :  { %4686 = vmatpush.msra.mxu3 %v9337_v55  ;;  %4706 = vmatpush.msra.mxu0 %v9517_v2  ;;  %v10593_v55 = vld [vmem:[#allocation10_spill] sm:$0xff] }
0x134f   :  { %4619 = vmatpush.msra.mxu2 %v9521_v20 }
0x1350   :  { %4687 = vmatpush.msra.mxu3 %v9343_v32  ;;  %4707 = vmatpush.msra.mxu0 %v9526_v7  ;;  %v10594_v32 = vld [vmem:[#allocation13_spill] sm:$0xff] }
0x1351   :  { %4620 = vmatpush.msra.mxu2 %v9530_v36 }
0x1352   :  { %4688 = vmatpush.msra.mxu3 %v9349_v33  ;;  %4708 = vmatpush.msra.mxu0 %v9535_v5  ;;  %v10595_v33 = vld [vmem:[#allocation4_spill] sm:$0xff] }
0x1353   :  { %4621 = vmatpush.msra.mxu2 %v9539_v23 }
0x1354   :  { %4689 = vmatpush.msra.mxu3 %v9355_v63  ;;  %4709 = vmatpush.msra.mxu0 %v9544_v35  ;;  %v10596_v63 = vld [vmem:[#allocation17_spill] sm:$0xff] }
0x1355   :  { %4622 = vmatpush.msra.mxu2 %v9548_v47 }
0x1356   :  { %4690 = vmatpush.msra.mxu3 %v9361_v10  ;;  %4710 = vmatpush.msra.mxu0 %v9553_v31 }
0x1357   :  { %4623 = vmatpush.msra.mxu2 %v9557_v39 }
0x1358   :  { %4691 = vmatpush.msra.mxu3 %v9367_v18  ;;  %4711 = vmatpush.msra.mxu0 %v9562_v16 }
0x1359   :  { %4624 = vmatpush.msra.mxu2 %v9566_v30 }
0x135a   :  { %4692 = vmatpush.msra.mxu3 %v9373_v58  ;;  %4712 = vmatpush.msra.mxu0 %v9571_v0  ;;  %v10597_v58 = vld [vmem:[#allocation27_spill] sm:$0xff] }
0x135b   :  { %4625 = vmatpush.msra.mxu2 %v9575_v9 }
0x135c   :  { %4693 = vmatpush.msra.mxu3 %v9379_v17  ;;  %4713 = vmatpush.msra.mxu0 %v9580_v3 }
0x135d   :  { %4626 = vmatpush.msra.mxu2 %v9584_v6 }
0x135e   :  { %4694 = vmatpush.msra.mxu3 %v9385_v54  ;;  %4714 = vmatpush.msra.mxu0 %v9589_v29  ;;  %v10598_v54 = vld [vmem:[#allocation24_spill] sm:$0xff] }
0x135f   :  { %4627 = vmatpush.msra.mxu2 %v9593_v15 }
0x1360   :  { %4695 = vmatpush.msra.mxu3 %v10589_v62  ;;  %4715 = vmatpush.msra.mxu0 %v10590_v11 }
0x1361   :  { %4628 = vmatpush.msra.mxu2 %v10591_v34 }
0x1362   :  { %4696 = vmatpush.msra.mxu3 %v10592_v44  ;;  %4716 = vmatpush.msra.mxu0 %v10593_v55 }
0x1363   :  { %4629 = vmatpush.msra.mxu2 %v10594_v32 }
0x1364   :  { %4697 = vmatpush.msra.mxu3 %v10595_v33  ;;  %4717 = vmatpush.msra.mxu0 %v10596_v63 }
0x13c2   :  { %v4415_v8 = vpop.f32.mrf.mxu0 }
0x13c3   :  { %v4458_v57 = vadd.f32 %v9738_v19, %v4415_v8  ;;  %v9816_v8 = vld [vmem:[%s8681_s3 + $0x60] sm:$0xff] }
0x13c7   :  { %v4375_v10 = vpop.f32.mrf.mxu2  ;;  %v4395_v18 = vpop.f32.mrf.mxu3 }
0x13c8   :  { %v4418_v17 = vadd.f32 %v4375_v10, %v10597_v58  ;;  %v4419_v46 = vadd.f32 %v4395_v18, %v10598_v54 }
0x13ca   :  { %v5692_v52 = vmul.f32 -1.442695, %v4418_v17  ;;  %v5693_v1 = vmul.f32 -1.442695, %v4419_v46  ;;  %v10599_v17 = vld [vmem:[#allocation22_spill] sm:$0xff] }
0x13cc   :  { %6008 = vpow2.f32 %v5692_v52 }
0x13cd   :  { %6010 = vpow2.f32 %v5693_v1 }
0x13d2   :  { %v6009_v48 = vpop.eup %6008 }
0x13d3   :  { %v6011_v61 = vpop.eup %6010  ;;  %v4426_v41 = vadd.f32 1.0, %v6009_v48 }
0x13d4   :  { %v4427_v56 = vadd.f32 1.0, %v6011_v61 }
0x13d5   :  { %6012 = vrcp.f32 %v4426_v41  ;;  %v4439_v21 = vand.u32 2147483648, %v4426_v41  ;;  %v4437_v14 = vand.u32 2147483647, %v4426_v41  ;;  %vm4433_vm3 = vweird.f32 %v4426_v41 }
0x13d6   :  { %6014 = vrcp.f32 %v4427_v56  ;;  %v4454_v18 = vand.u32 2147483648, %v4427_v56  ;;  %vm4448_vm7 = vweird.f32 %v4427_v56  ;;  %v4452_v58 = vand.u32 2147483647, %v4427_v56 }
0x13d7   :  { %v4440_v43 = vor.u32 1.1754944e-38, %v4439_v21  ;;  %vm4438_vm5 = vcmp.eq.f32.partialorder %v4437_v14, 8.507059e+37  ;;  %v9792_v21 = vld [vmem:[%s8681_s3 + $0xc0] sm:$0xff]  ;;  %v9810_v14 = vld [vmem:[%s8681_s3 + $0x78] sm:$0xff] }
0x13d8   :  { %v4455_v52 = vor.u32 1.1754944e-38, %v4454_v18  ;;  %vm4453_vm11 = vcmp.eq.f32.partialorder %v4452_v58, 8.507059e+37  ;;  %v10603_v58 = vld [vmem:[#allocation26_spill] sm:$0xff] }
0x13db   :  { %v6013_v50 = vpop.eup %6012 }
0x13dc   :  { %v6015_v45 = vpop.eup %6014  ;;  %v4429_v37 = vmul.f32 %v6013_v50, %v4426_v41  ;;  %vm4434_vm2 = vweird.f32 %v6013_v50 }
0x13dd   :  { %v4444_v38 = vmul.f32 %v6015_v45, %v4427_v56  ;;  %vm4435_vm4 = vmor %vm4433_vm3, %vm4434_vm2  ;;  %vm4449_vm6 = vweird.f32 %v6015_v45  ;;  %v9750_v56 = vld [vmem:[%s8681_s3 + $0x168] sm:$0xff] }
0x13de   :  { %v4430_v59 = vsub.f32 1.0, %v4429_v37  ;;  %vm4450_vm9 = vmor %vm4448_vm7, %vm4449_vm6 }
0x13df   :  { %v4445_v13 = vsub.f32 1.0, %v4444_v38  ;;  %v9762_v38 = vld [vmem:[%s8681_s3 + $0x138] sm:$0xff] }
0x13e0   :  { %v4431_v49 = vmul.f32 %v6013_v50, %v4430_v59  ;;  %v9786_v59 = vld [vmem:[%s8681_s3 + $0xd8] sm:$0xff] }
0x13e1   :  { %v4446_v4 = vmul.f32 %v6015_v45, %v4445_v13  ;;  %v9798_v13 = vld [vmem:[%s8681_s3 + $0xa8] sm:$0xff] }
0x13e2   :  { %v4432_v51 = vadd.f32 %v6013_v50, %v4431_v49  ;;  %v9804_v49 = vld [vmem:[%s8681_s3 + $0x90] sm:$0xff] }
0x13e3   :  { %v4447_v33 = vadd.f32 %v6015_v45, %v4446_v4  ;;  %v9822_v4 = vld [vmem:[%s8681_s3 + $0x48] sm:$0xff] }
0x13e4   :  { %v4436_v62 = vsel %vm4435_vm4, %v6013_v50, %v4432_v51  ;;  %v9828_v51 = vld [vmem:[%s8681_s3 + $0x30] sm:$0xff] }
0x13e5   :  { %v4441_v44 = vsel %vm4438_vm5, %v4440_v43, %v4436_v62  ;;  %v4451_v46 = vsel %vm4450_vm9, %v6015_v45, %v4447_v33  ;;  %v9756_v45 = vld [vmem:[%s8681_s3 + $0x150] sm:$0xff]  ;;  %v9834_v43 = vld [vmem:[%s8681_s3 + $0x18] sm:$0xff] }
0x13e6   :  { %v4459_v10 = vmul.f32 %v4458_v57, %v4441_v44  ;;  %v4456_v1 = vsel %vm4453_vm11, %v4455_v52, %v4451_v46  ;;  %10600 = vst [vmem:[#allocation23_spill] sm:$0xff] %v9834_v43  ;;  %v9840_v57 = vld [vmem:[%s8681_s3] sm:$0xff]  ;;  %v10602_v44 = vld [vmem:[#allocation21_spill] sm:$0xff] }
0x13e7   :  { %v4462_v48 = vsub.f32 1.0, %v4456_v1  ;;  %v4464_v50 = vmul.f32 %v4456_v1, %v9682_v40  ;;  %10601 = vst [vmem:[#allocation15_spill] sm:$0xff] %v9840_v57 }
0x13e8   :  { %v4460_v54 = vadd.f32 %v4459_v10, %v10599_v17 }
0x13ea   :  { %6016 = vtanh.f32 %v4460_v54 }
0x13f0   :  { %v6017_v61 = vpop.eup %6016 }
0x13f1   :  { %v4463_v41 = vmul.f32 %v6017_v61, %v4462_v48 }
0x13f3   :  { %v9743_v37 = vadd.f32 %v4464_v50, %v4463_v41 }
0x13f5   :  { %4482 = vmatmul.f32.vlgmr.msra.gmra.mxu1 %v9743_v37  ;;  %4502 = vmatmul.f32.vlgmr.msrb.gmra.mxu2 %v9743_v37 }
0x13f6   :  { %4522 = vmatmul.f32.vlgmr.msrb.gmra.mxu3 %v9743_v37  ;;  %4722 = vmatpush.msra.mxu1 %v9485_v42 }
0x13f7   :  { %4790 = vmatpush.msrb.mxu2 %v9750_v56  ;;  %4810 = vmatpush.msrb.mxu3 %v9420_v53  ;;  %v9768_v53 = vld [vmem:[%s8681_s3 + $0x120] sm:$0xff] }
0x13f8   :  { %4723 = vmatpush.msra.mxu1 %v9491_v27 }
0x13f9   :  { %4791 = vmatpush.msrb.mxu2 %v9756_v45  ;;  %4811 = vmatpush.msrb.mxu3 %v9426_v24  ;;  %v9774_v24 = vld [vmem:[%s8681_s3 + $0x108] sm:$0xff] }
0x13fa   :  { %4724 = vmatpush.msra.mxu1 %v9497_v22 }
0x13fb   :  { %4792 = vmatpush.msrb.mxu2 %v9762_v38  ;;  %4812 = vmatpush.msrb.mxu3 %v9432_v12  ;;  %v9780_v12 = vld [vmem:[%s8681_s3 + $0xf0] sm:$0xff] }
0x13fc   :  { %4725 = vmatpush.msra.mxu1 %v9503_v25 }
0x13fd   :  { %4793 = vmatpush.msrb.mxu2 %v9768_v53  ;;  %4813 = vmatpush.msrb.mxu3 %v9508_v26 }
0x13fe   :  { %4726 = vmatpush.msra.mxu1 %v9512_v28 }
0x13ff   :  { %4794 = vmatpush.msrb.mxu2 %v9774_v24  ;;  %4814 = vmatpush.msrb.mxu3 %v9517_v2 }
0x1400   :  { %4727 = vmatpush.msra.mxu1 %v9521_v20 }
0x1401   :  { %4795 = vmatpush.msrb.mxu2 %v9780_v12  ;;  %4815 = vmatpush.msrb.mxu3 %v9526_v7 }
0x1402   :  { %4728 = vmatpush.msra.mxu1 %v9530_v36 }
0x1403   :  { %4796 = vmatpush.msrb.mxu2 %v9786_v59  ;;  %4816 = vmatpush.msrb.mxu3 %v9535_v5 }
0x1404   :  { %4729 = vmatpush.msra.mxu1 %v9539_v23 }
0x1405   :  { %4797 = vmatpush.msrb.mxu2 %v9792_v21  ;;  %4817 = vmatpush.msrb.mxu3 %v9544_v35 }
0x1406   :  { %4730 = vmatpush.msra.mxu1 %v9548_v47 }
0x1407   :  { %4798 = vmatpush.msrb.mxu2 %v9798_v13  ;;  %4818 = vmatpush.msrb.mxu3 %v9553_v31 }
0x1408   :  { %4731 = vmatpush.msra.mxu1 %v9557_v39 }
0x1409   :  { %4799 = vmatpush.msrb.mxu2 %v9804_v49  ;;  %4819 = vmatpush.msrb.mxu3 %v9562_v16 }
0x140a   :  { %4732 = vmatpush.msra.mxu1 %v9566_v30 }
0x140b   :  { %4800 = vmatpush.msrb.mxu2 %v9810_v14  ;;  %4820 = vmatpush.msrb.mxu3 %v9571_v0 }
0x140c   :  { %4733 = vmatpush.msra.mxu1 %v9575_v9 }
0x140d   :  { %4801 = vmatpush.msrb.mxu2 %v9816_v8  ;;  %4821 = vmatpush.msrb.mxu3 %v9580_v3 }
0x140e   :  { %4734 = vmatpush.msra.mxu1 %v9584_v6 }
0x140f   :  { %4802 = vmatpush.msrb.mxu2 %v9822_v4  ;;  %4822 = vmatpush.msrb.mxu3 %v9589_v29 }
0x1410   :  { %4735 = vmatpush.msra.mxu1 %v9593_v15 }
0x1411   :  { %4803 = vmatpush.msrb.mxu2 %v9828_v51  ;;  %4823 = vmatpush.msrb.mxu3 %v10590_v11 }
0x1412   :  { %4736 = vmatpush.msra.mxu1 %v10591_v34 }
0x1413   :  { %4804 = vmatpush.msrb.mxu2 %v9834_v43  ;;  %4824 = vmatpush.msrb.mxu3 %v10593_v55  ;;  %v10604_v55 = vld [vmem:[#allocation34_spill] sm:$0xff] }
0x1414   :  { %4737 = vmatpush.msra.mxu1 %v10594_v32 }
0x1415   :  { %4805 = vmatpush.msrb.mxu2 %v9840_v57  ;;  %4825 = vmatpush.msrb.mxu3 %v10596_v63 }
0x1472   :  { %v4483_v62 = vpop.f32.mrf.mxu1 }
0x1473   :  { %v4526_v33 = vadd.f32 %v4483_v62, %v10602_v44 }
0x1475   :  { %v5694_v10 = vmul.f32 -1.442695, %v4526_v33 }
0x1477   :  { %6018 = vpow2.f32 %v5694_v10 }
0x1478   :  { %v4503_v18 = vpop.f32.mrf.mxu2 }
0x1479   :  { %v4527_v17 = vadd.f32 %v4503_v18, %v10603_v58  ;;  %v4523_v33 = vpop.f32.mrf.mxu3 }
0x147b   :  { %v5695_v54 = vmul.f32 -1.442695, %v4527_v17 }
0x147d   :  { %v6019_v46 = vpop.eup %6018  ;;  %6020 = vpow2.f32 %v5695_v54  ;;  %v4566_v54 = vadd.f32 %v9738_v19, %v4523_v33 }
0x147e   :  { %v4534_v52 = vadd.f32 1.0, %v6019_v46 }
0x1480   :  { %6022 = vrcp.f32 %v4534_v52  ;;  %v4547_v40 = vand.u32 2147483648, %v4534_v52  ;;  %v4545_v62 = vand.u32 2147483647, %v4534_v52  ;;  %vm4541_vm13 = vweird.f32 %v4534_v52 }
0x1482   :  { %v4548_v18 = vor.u32 1.1754944e-38, %v4547_v40  ;;  %vm4546_vm15 = vcmp.eq.f32.partialorder %v4545_v62, 8.507059e+37 }
0x1483   :  { %v6021_v1 = vpop.eup %6020 }
0x1484   :  { %v4535_v48 = vadd.f32 1.0, %v6021_v1 }
0x1486   :  { %v6023_v61 = vpop.eup %6022  ;;  %6024 = vrcp.f32 %v4535_v48  ;;  %vm4556_vm2 = vweird.f32 %v4535_v48 }
0x1487   :  { %v4537_v41 = vmul.f32 %v6023_v61, %v4534_v52  ;;  %vm4542_vm12 = vweird.f32 %v6023_v61 }
0x1488   :  { %vm4543_vm14 = vmor %vm4541_vm13, %vm4542_vm12 }
0x1489   :  { %v4538_v50 = vsub.f32 1.0, %v4537_v41  ;;  %v4562_v41 = vand.u32 2147483648, %v4535_v48 }
0x148b   :  { %v4539_v60 = vmul.f32 %v6023_v61, %v4538_v50  ;;  %v4560_v50 = vand.u32 2147483647, %v4535_v48 }
0x148c   :  { %v6025_v44 = vpop.eup %6024 }
0x148d   :  { %v4552_v10 = vmul.f32 %v6025_v44, %v4535_v48  ;;  %v4540_v63 = vadd.f32 %v6023_v61, %v4539_v60  ;;  %vm4557_vm1 = vweird.f32 %v6025_v44  ;;  %v4563_v60 = vor.u32 1.1754944e-38, %v4562_v41 }
0x148e   :  { %vm4558_vm3 = vmor %vm4556_vm2, %vm4557_vm1  ;;  %vm4561_vm4 = vcmp.eq.f32.partialorder %v4560_v50, 8.507059e+37 }
0x148f   :  { %v4553_v58 = vsub.f32 1.0, %v4552_v10  ;;  %v4544_v17 = vsel %vm4543_vm14, %v6023_v61, %v4540_v63 }
0x1490   :  { %v4549_v46 = vsel %vm4546_vm15, %v4548_v18, %v4544_v17 }
0x1491   :  { %v4554_v1 = vmul.f32 %v6025_v44, %v4553_v58  ;;  %v4567_v57 = vmul.f32 %v4566_v54, %v4549_v46 }
0x1493   :  { %v4555_v32 = vadd.f32 %v6025_v44, %v4554_v1  ;;  %v4568_v43 = vadd.f32 %v4567_v57, %v10604_v55  ;;  %v9857_v55 = vld [vmem:[%s8681_s3 + $0x170] sm:$0xff] }
0x1495   :  { %v4559_v52 = vsel %vm4558_vm3, %v6025_v44, %v4555_v32  ;;  %6026 = vtanh.f32 %v4568_v43  ;;  %v9863_v32 = vld [vmem:[%s8681_s3 + $0x158] sm:$0xff]  ;;  %v9869_v43 = vld [vmem:[%s8681_s3 + $0x140] sm:$0xff] }
0x1496   :  { %v4564_v40 = vsel %vm4561_vm4, %v4563_v60, %v4559_v52  ;;  %v10612_v60 = vld [vmem:[#allocation35_spill] sm:$0xff] }
0x1497   :  { %v4570_v63 = vsub.f32 1.0, %v4564_v40  ;;  %v4572_v33 = vmul.f32 %v4564_v40, %v9743_v37 }
0x149b   :  { %v6027_v61 = vpop.eup %6026 }
0x149c   :  { %v4571_v62 = vmul.f32 %v6027_v61, %v4570_v63 }
0x149e   :  { %v9849_v10 = vadd.f32 %v4572_v33, %v4571_v62 }
0x14a0   :  { %4590 = vmatmul.f32.vlgmr.msrb.gmra.mxu0 %v9849_v10  ;;  %4610 = vmatmul.f32.vlgmr.msrb.gmra.mxu1 %v9849_v10 }
0x14a1   :  { %4630 = vmatmul.f32.vlgmr.msra.gmra.mxu2 %v9849_v10  ;;  %4830 = vmatpush.msrb.mxu0 %v9485_v42  ;;  %v10605_v42 = vld [vmem:[#allocation23_spill] sm:$0xff] }
0x14a2   :  { %4898 = vmatpush.msrb.mxu1 %v9750_v56  ;;  %4918 = vmatpush.msra.mxu2 %v9857_v55 }
0x14a3   :  { %4831 = vmatpush.msrb.mxu0 %v9491_v27  ;;  %v10606_v27 = vld [vmem:[#allocation10_spill] sm:$0xff] }
0x14a4   :  { %4899 = vmatpush.msrb.mxu1 %v9756_v45  ;;  %4919 = vmatpush.msra.mxu2 %v9863_v32 }
0x14a5   :  { %4832 = vmatpush.msrb.mxu0 %v9497_v22  ;;  %v10607_v22 = vld [vmem:[#allocation13_spill] sm:$0xff] }
0x14a6   :  { %4900 = vmatpush.msrb.mxu1 %v9762_v38  ;;  %4920 = vmatpush.msra.mxu2 %v9869_v43 }
0x14a7   :  { %4833 = vmatpush.msrb.mxu0 %v9503_v25  ;;  %v10608_v25 = vld [vmem:[#allocation15_spill] sm:$0xff] }
0x14a8   :  { %4901 = vmatpush.msrb.mxu1 %v9768_v53  ;;  %4921 = vmatpush.msra.mxu2 %v9508_v26  ;;  %v10609_v26 = vld [vmem:[#allocation17_spill] sm:$0xff] }
0x14a9   :  { %4834 = vmatpush.msrb.mxu0 %v9512_v28 }
0x14aa   :  { %4902 = vmatpush.msrb.mxu1 %v9774_v24  ;;  %4922 = vmatpush.msra.mxu2 %v9517_v2 }
0x14ab   :  { %4835 = vmatpush.msrb.mxu0 %v9521_v20  ;;  %v10610_v20 = vld [vmem:[#allocation33_spill] sm:$0xff] }
0x14ac   :  { %4903 = vmatpush.msrb.mxu1 %v9780_v12  ;;  %4923 = vmatpush.msra.mxu2 %v9526_v7 }
0x14ad   :  { %4836 = vmatpush.msrb.mxu0 %v9530_v36  ;;  %v10611_v36 = vld [vmem:[#allocation19_spill] sm:$0xff] }
0x14ae   :  { %4904 = vmatpush.msrb.mxu1 %v9786_v59  ;;  %4924 = vmatpush.msra.mxu2 %v9535_v5 }
0x14af   :  { %4837 = vmatpush.msrb.mxu0 %v9539_v23 }
0x14b0   :  { %4905 = vmatpush.msrb.mxu1 %v9792_v21  ;;  %4925 = vmatpush.msra.mxu2 %v9544_v35 }
0x14b1   :  { %4838 = vmatpush.msrb.mxu0 %v9548_v47 }
0x14b2   :  { %4906 = vmatpush.msrb.mxu1 %v9798_v13  ;;  %4926 = vmatpush.msra.mxu2 %v9553_v31 }
0x14b3   :  { %4839 = vmatpush.msrb.mxu0 %v9557_v39 }
0x14b4   :  { %4907 = vmatpush.msrb.mxu1 %v9804_v49  ;;  %4927 = vmatpush.msra.mxu2 %v9562_v16 }
0x14b5   :  { %4840 = vmatpush.msrb.mxu0 %v9566_v30 }
0x14b6   :  { %4908 = vmatpush.msrb.mxu1 %v9810_v14  ;;  %4928 = vmatpush.msra.mxu2 %v9571_v0 }
0x14b7   :  { %4841 = vmatpush.msrb.mxu0 %v9575_v9 }
0x14b8   :  { %4909 = vmatpush.msrb.mxu1 %v9816_v8  ;;  %4929 = vmatpush.msra.mxu2 %v9580_v3 }
0x14b9   :  { %4842 = vmatpush.msrb.mxu0 %v9584_v6 }
0x14ba   :  { %4910 = vmatpush.msrb.mxu1 %v9822_v4  ;;  %4930 = vmatpush.msra.mxu2 %v9589_v29 }
0x14bb   :  { %4843 = vmatpush.msrb.mxu0 %v9593_v15 }
0x14bc   :  { %4911 = vmatpush.msrb.mxu1 %v9828_v51  ;;  %4931 = vmatpush.msra.mxu2 %v10590_v11 }
0x14bd   :  { %4844 = vmatpush.msrb.mxu0 %v10591_v34 }
0x14be   :  { %4912 = vmatpush.msrb.mxu1 %v10605_v42  ;;  %4932 = vmatpush.msra.mxu2 %v10606_v27 }
0x14bf   :  { %4845 = vmatpush.msrb.mxu0 %v10607_v22 }
0x14c0   :  { %4913 = vmatpush.msrb.mxu1 %v10608_v25  ;;  %4933 = vmatpush.msra.mxu2 %v10609_v26 }
0x151d   :  { %v4591_v28 = vpop.f32.mrf.mxu0  ;;  %v4611_v2 = vpop.f32.mrf.mxu1 }
0x151e   :  { %v4634_v7 = vadd.f32 %v4591_v28, %v10610_v20  ;;  %v4635_v5 = vadd.f32 %v4611_v2, %v10611_v36  ;;  %v9922_v28 = vld [vmem:[%s8681_s3 + $0x178] sm:$0xff]  ;;  %v9928_v2 = vld [vmem:[%s8681_s3 + $0x160] sm:$0xff]  ;;  %v9934_v20 = vld [vmem:[%s8681_s3 + $0x148] sm:$0xff] }
0x151f   :  { %v9970_v36 = vld [vmem:[%s8681_s3 + $0xb8] sm:$0xff] }
0x1520   :  { %v5696_v23 = vmul.f32 -1.442695, %v4634_v7  ;;  %v5697_v35 = vmul.f32 -1.442695, %v4635_v5  ;;  %v9964_v7 = vld [vmem:[%s8681_s3 + $0xd0] sm:$0xff]  ;;  %v9976_v5 = vld [vmem:[%s8681_s3 + $0xa0] sm:$0xff] }
0x1522   :  { %6028 = vpow2.f32 %v5696_v23  ;;  %v9982_v23 = vld [vmem:[%s8681_s3 + $0x88] sm:$0xff] }
0x1523   :  { %6030 = vpow2.f32 %v5697_v35  ;;  %v9988_v35 = vld [vmem:[%s8681_s3 + $0x70] sm:$0xff] }
0x1524   :  { %v4631_v48 = vpop.f32.mrf.mxu2 }
0x1525   :  { %v4674_v17 = vadd.f32 %v9738_v19, %v4631_v48 }
0x1528   :  { %v6029_v47 = vpop.eup %6028 }
0x1529   :  { %v6031_v31 = vpop.eup %6030  ;;  %v4642_v39 = vadd.f32 1.0, %v6029_v47  ;;  %v9994_v47 = vld [vmem:[%s8681_s3 + $0x58] sm:$0xff] }
0x152a   :  { %v4643_v16 = vadd.f32 1.0, %v6031_v31  ;;  %v10000_v31 = vld [vmem:[%s8681_s3 + $0x40] sm:$0xff] }
0x152b   :  { %6032 = vrcp.f32 %v4642_v39  ;;  %v4655_v15 = vand.u32 2147483648, %v4642_v39  ;;  %v4653_v34 = vand.u32 2147483647, %v4642_v39  ;;  %vm4649_vm6 = vweird.f32 %v4642_v39 }
0x152c   :  { %6034 = vrcp.f32 %v4643_v16  ;;  %v4670_v1 = vand.u32 2147483648, %v4643_v16  ;;  %vm4664_vm12 = vweird.f32 %v4643_v16  ;;  %v4668_v50 = vand.u32 2147483647, %v4643_v16 }
0x152d   :  { %v4656_v18 = vor.u32 1.1754944e-38, %v4655_v15  ;;  %vm4654_vm9 = vcmp.eq.f32.partialorder %v4653_v34, 8.507059e+37 }
0x152e   :  { %v4671_v63 = vor.u32 1.1754944e-38, %v4670_v1  ;;  %vm4669_vm14 = vcmp.eq.f32.partialorder %v4668_v50, 8.507059e+37 }
0x1531   :  { %v6033_v30 = vpop.eup %6032 }
0x1532   :  { %v6035_v0 = vpop.eup %6034  ;;  %v4645_v9 = vmul.f32 %v6033_v30, %v4642_v39  ;;  %vm4650_vm5 = vweird.f32 %v6033_v30  ;;  %v10006_v39 = vld [vmem:[%s8681_s3 + $0x28] sm:$0xff] }
0x1533   :  { %v4660_v3 = vmul.f32 %v6035_v0, %v4643_v16  ;;  %vm4651_vm7 = vmor %vm4649_vm6, %vm4650_vm5  ;;  %vm4665_vm11 = vweird.f32 %v6035_v0  ;;  %v6306_v16 = vld [vmem:[%s8681_s3 + $0x20] sm:$0xff] }
0x1534   :  { %v4646_v6 = vsub.f32 1.0, %v4645_v9  ;;  %vm4666_vm13 = vmor %vm4664_vm12, %vm4665_vm11  ;;  %v10614_v9 = vld [vmem:[#allocation12_spill] sm:$0xff] }
0x1535   :  { %v4661_v29 = vsub.f32 1.0, %v4660_v3 }
0x1536   :  { %v4647_v11 = vmul.f32 %v6033_v30, %v4646_v6 }
0x1537   :  { %v4662_v57 = vmul.f32 %v6035_v0, %v4661_v29 }
0x1538   :  { %v4648_v44 = vadd.f32 %v6033_v30, %v4647_v11 }
0x1539   :  { %v4663_v54 = vadd.f32 %v6035_v0, %v4662_v57 }
0x153a   :  { %v4652_v58 = vsel %vm4651_vm7, %v6033_v30, %v4648_v44  ;;  %v6308_v30 = vld [vmem:[%s8681_s3 + $0x8] sm:$0xff] }
0x153b   :  { %v4657_v46 = vsel %vm4654_vm9, %v4656_v18, %v4652_v58  ;;  %v4667_v40 = vsel %vm4666_vm13, %v6035_v0, %v4663_v54  ;;  %v10613_v0 = vld [vmem:[#allocation30_spill] sm:$0xff] }
0x153c   :  { %v4675_v41 = vmul.f32 %v4674_v17, %v4657_v46  ;;  %v4672_v61 = vsel %vm4669_vm14, %v4671_v63, %v4667_v40 }
0x153d   :  { %v4678_v62 = vsub.f32 1.0, %v4672_v61  ;;  %v4680_v22 = vmul.f32 %v4672_v61, %v9849_v10 }
0x153e   :  { %v4676_v52 = vadd.f32 %v4675_v41, %v10612_v60  ;;  %v10616_v60 = vld [vmem:[#allocation5_spill] sm:$0xff] }
0x1540   :  { %6036 = vtanh.f32 %v4676_v52  ;;  %v10617_v52 = vld [vmem:[#allocation25_spill] sm:$0xff] }
0x1541   :  { %v10022_v40 = vadd.f32 %v10617_v52, %v10616_v60 }
0x1546   :  { %v6037_v33 = vpop.eup %6036 }
0x1547   :  { %v4679_v27 = vmul.f32 %v6037_v33, %v4678_v62 }
0x1549   :  { %v9916_v26 = vadd.f32 %v4680_v22, %v4679_v27 }
0x154b   :  { %4698 = vmatmul.f32.vlgmr.msra.gmra.mxu3 %v9916_v26  ;;  %4718 = vmatmul.f32.vlgmr.msra.gmra.mxu0 %v9916_v26 }
0x154c   :  { %4738 = vmatmul.f32.vlgmr.msra.gmra.mxu1 %v9916_v26  ;;  %4938 = vmatpush.msra.mxu3 %v9922_v28 }
0x154d   :  { %5006 = vmatpush.msra.mxu0 %v9750_v56  ;;  %5026 = vmatpush.msra.mxu1 %v9857_v55  ;;  %v9940_v56 = vld [vmem:[%s8681_s3 + $0x130] sm:$0xff]  ;;  %v9946_v55 = vld [vmem:[%s8681_s3 + $0x118] sm:$0xff] }
0x154e   :  { %4939 = vmatpush.msra.mxu3 %v9928_v2 }
0x154f   :  { %5007 = vmatpush.msra.mxu0 %v9756_v45  ;;  %5027 = vmatpush.msra.mxu1 %v9863_v32  ;;  %v6284_v45 = vld [vmem:[%s8681_s3 + $0x128] sm:$0xff]  ;;  %v9952_v32 = vld [vmem:[%s8681_s3 + $0x100] sm:$0xff] }
0x1550   :  { %4940 = vmatpush.msra.mxu3 %v9934_v20 }
0x1551   :  { %5008 = vmatpush.msra.mxu0 %v9762_v38  ;;  %5028 = vmatpush.msra.mxu1 %v9869_v43  ;;  %v6286_v38 = vld [vmem:[%s8681_s3 + $0x110] sm:$0xff]  ;;  %v9958_v43 = vld [vmem:[%s8681_s3 + $0xe8] sm:$0xff] }
0x1552   :  { %4941 = vmatpush.msra.mxu3 %v9940_v56 }
0x1553   :  { %5009 = vmatpush.msra.mxu0 %v9768_v53  ;;  %5029 = vmatpush.msra.mxu1 %v6284_v45  ;;  %v6288_v53 = vld [vmem:[%s8681_s3 + $0xf8] sm:$0xff]  ;;  %v3744_v45 = vperm.slane %v10022_v40, 0 }
0x1554   :  { %4942 = vmatpush.msra.mxu3 %v9946_v55 }
0x1555   :  { %5010 = vmatpush.msra.mxu0 %v9774_v24  ;;  %5030 = vmatpush.msra.mxu1 %v6286_v38  ;;  %v6290_v24 = vld [vmem:[%s8681_s3 + $0xe0] sm:$0xff] }
0x1556   :  { %4943 = vmatpush.msra.mxu3 %v9952_v32 }
0x1557   :  { %5011 = vmatpush.msra.mxu0 %v9780_v12  ;;  %5031 = vmatpush.msra.mxu1 %v6288_v53  ;;  %v6292_v12 = vld [vmem:[%s8681_s3 + $0xc8] sm:$0xff] }
0x1558   :  { %4944 = vmatpush.msra.mxu3 %v9958_v43 }
0x1559   :  { %5012 = vmatpush.msra.mxu0 %v9786_v59  ;;  %5032 = vmatpush.msra.mxu1 %v6290_v24  ;;  %v6294_v59 = vld [vmem:[%s8681_s3 + $0xb0] sm:$0xff] }
0x155a   :  { %4945 = vmatpush.msra.mxu3 %v9964_v7 }
0x155b   :  { %5013 = vmatpush.msra.mxu0 %v9792_v21  ;;  %5033 = vmatpush.msra.mxu1 %v6292_v12  ;;  %v6296_v21 = vld [vmem:[%s8681_s3 + $0x98] sm:$0xff] }
0x155c   :  { %4946 = vmatpush.msra.mxu3 %v9970_v36 }
0x155d   :  { %5014 = vmatpush.msra.mxu0 %v9798_v13  ;;  %5034 = vmatpush.msra.mxu1 %v6294_v59  ;;  %v6298_v13 = vld [vmem:[%s8681_s3 + $0x80] sm:$0xff] }
0x155e   :  { %4947 = vmatpush.msra.mxu3 %v9976_v5 }
0x155f   :  { %5015 = vmatpush.msra.mxu0 %v9804_v49  ;;  %5035 = vmatpush.msra.mxu1 %v6296_v21  ;;  %v6300_v49 = vld [vmem:[%s8681_s3 + $0x68] sm:$0xff]  ;;  %v10618_v21 = vld [vmem:[#allocation32_spill] sm:$0xff] }
0x1560   :  { %4948 = vmatpush.msra.mxu3 %v9982_v23 }
0x1561   :  { %5016 = vmatpush.msra.mxu0 %v9810_v14  ;;  %5036 = vmatpush.msra.mxu1 %v6298_v13  ;;  %v6302_v14 = vld [vmem:[%s8681_s3 + $0x50] sm:$0xff]  ;;  %v3747_v13 = vadd.f32 %v3744_v45, %v10618_v21 }
0x1562   :  { %4949 = vmatpush.msra.mxu3 %v9988_v35 }
0x1563   :  { %5017 = vmatpush.msra.mxu0 %v9816_v8  ;;  %5037 = vmatpush.msra.mxu1 %v6300_v49  ;;  %v6304_v8 = vld [vmem:[%s8681_s3 + $0x38] sm:$0xff] }
0x1564   :  { %4950 = vmatpush.msra.mxu3 %v9994_v47 }
0x1565   :  { %5018 = vmatpush.msra.mxu0 %v9822_v4  ;;  %5038 = vmatpush.msra.mxu1 %v6302_v14  ;;  %v10012_v4 = vld [vmem:[%s8681_s3 + $0x10] sm:$0xff]  ;;  %s6342_s3 = smov 31  }
0x1566   :  { %4951 = vmatpush.msra.mxu3 %v10000_v31  ;;  %s10063_s9 = sld [smem:[%s10240_s0 + %s6342_s3]]  }
0x1567   :  { %5019 = vmatpush.msra.mxu0 %v9828_v51  ;;  %5039 = vmatpush.msra.mxu1 %v6304_v8  ;;  %v3743_v51 = vperm.slane %v10613_v0, 0 }
0x1568   :  { %4952 = vmatpush.msra.mxu3 %v10006_v39 }
0x1569   :  { %5020 = vmatpush.msra.mxu0 %v10605_v42  ;;  %5040 = vmatpush.msra.mxu1 %v6306_v16  ;;  %v3746_v3 = vadd.f32 %v3743_v51, %v10614_v9  ;;  %v10615_v42 = vld [vmem:[#allocation28_spill] sm:$0xff] }
0x156a   :  { %4953 = vmatpush.msra.mxu3 %v10012_v4 }
0x156b   :  { %5021 = vmatpush.msra.mxu0 %v10608_v25  ;;  %5041 = vmatpush.msra.mxu1 %v6308_v30 }
0x15c8   :  { %v4719_v6 = vpop.f32.mrf.mxu0 }
0x15c9   :  { %v4743_v29 = vadd.f32 %v4719_v6, %v3746_v3  ;;  %v4739_v33 = vpop.f32.mrf.mxu1 }
0x15ca   :  { %v4782_v38 = vadd.f32 %v9738_v19, %v4739_v33 }
0x15cb   :  { %v5699_v15 = vmul.f32 -1.442695, %v4743_v29 }
0x15cd   :  { %6038 = vpow2.f32 %v5699_v15 }
0x15ce   :  { %v4699_v11 = vpop.f32.mrf.mxu3 }
0x15cf   :  { %v4742_v34 = vadd.f32 %v4699_v11, %v10615_v42 }
0x15d1   :  { %v5698_v57 = vmul.f32 -1.442695, %v4742_v34 }
0x15d3   :  { %v6039_v48 = vpop.eup %6038  ;;  %6040 = vpow2.f32 %v5698_v57 }
0x15d4   :  { %v4751_v44 = vadd.f32 1.0, %v6039_v48 }
0x15d6   :  { %6042 = vrcp.f32 %v4751_v44  ;;  %v4778_v59 = vand.u32 2147483648, %v4751_v44  ;;  %vm4772_vm5 = vweird.f32 %v4751_v44  ;;  %v4776_v14 = vand.u32 2147483647, %v4751_v44 }
0x15d8   :  { %v4779_v30 = vor.u32 1.1754944e-38, %v4778_v59  ;;  %vm4777_vm7 = vcmp.eq.f32.partialorder %v4776_v14, 8.507059e+37 }
0x15d9   :  { %v6041_v18 = vpop.eup %6040 }
0x15da   :  { %v4750_v25 = vadd.f32 1.0, %v6041_v18 }
0x15dc   :  { %6044 = vrcp.f32 %v4750_v25  ;;  %v6043_v58 = vpop.eup %6042  ;;  %v4763_v50 = vand.u32 2147483648, %v4750_v25  ;;  %v4761_v61 = vand.u32 2147483647, %v4750_v25  ;;  %vm4757_vm1 = vweird.f32 %v4750_v25 }
0x15dd   :  { %v4768_v17 = vmul.f32 %v6043_v58, %v4751_v44  ;;  %vm4773_vm4 = vweird.f32 %v6043_v58 }
0x15de   :  { %v4764_v22 = vor.u32 1.1754944e-38, %v4763_v50  ;;  %vm4762_vm3 = vcmp.eq.f32.partialorder %v4761_v61, 8.507059e+37  ;;  %vm4774_vm6 = vmor %vm4772_vm5, %vm4773_vm4 }
0x15df   :  { %v4769_v1 = vsub.f32 1.0, %v4768_v17 }
0x15e1   :  { %v4770_v62 = vmul.f32 %v6043_v58, %v4769_v1 }
0x15e2   :  { %v6045_v54 = vpop.eup %6044 }
0x15e3   :  { %v4753_v46 = vmul.f32 %v6045_v54, %v4750_v25  ;;  %vm4758_vm15 = vweird.f32 %v6045_v54  ;;  %v4771_v24 = vadd.f32 %v6043_v58, %v4770_v62 }
0x15e4   :  { %vm4759_vm2 = vmor %vm4757_vm1, %vm4758_vm15 }
0x15e5   :  { %v4754_v41 = vsub.f32 1.0, %v4753_v46  ;;  %v4775_v16 = vsel %vm4774_vm6, %v6043_v58, %v4771_v24  ;;  %v3750_v58 = vperm.slane %v10022_v40, 1  ;;  %v5177_v24 = vld [vmem:[%s10063_s9 + $0x78] sm:$0xff] }
0x15e6   :  { %v4780_v0 = vsel %vm4777_vm7, %v4779_v30, %v4775_v16  ;;  %v5173_v30 = vld [vmem:[%s10063_s9 + $0x58] sm:$0xff] }
0x15e7   :  { %v4755_v63 = vmul.f32 %v6045_v54, %v4754_v41  ;;  %v4786_v51 = vsub.f32 1.0, %v4780_v0  ;;  %v4788_v6 = vmul.f32 %v4780_v0, %v9916_v26  ;;  %v3753_v41 = vadd.f32 %v3750_v58, %v10618_v21 }
0x15e9   :  { %v4756_v27 = vadd.f32 %v6045_v54, %v4755_v63 }
0x15eb   :  { %v4760_v53 = vsel %vm4759_vm2, %v6045_v54, %v4756_v27 }
0x15ec   :  { %v4765_v12 = vsel %vm4762_vm3, %v4764_v22, %v4760_v53 }
0x15ed   :  { %v4783_v49 = vmul.f32 %v4782_v38, %v4765_v12  ;;  %v5176_v12 = vld [vmem:[%s10063_s9 + $0x70] sm:$0xff] }
0x15ef   :  { %v4784_v8 = vadd.f32 %v4783_v49, %v3747_v13  ;;  %v5175_v13 = vld [vmem:[%s10063_s9 + $0x68] sm:$0xff]  ;;  %v10621_v49 = vld [vmem:[#allocation18_spill] sm:$0xff] }
0x15f1   :  { %6046 = vtanh.f32 %v4784_v8  ;;  %v5174_v8 = vld [vmem:[%s10063_s9 + $0x60] sm:$0xff] }
0x15f7   :  { %v6047_v9 = vpop.eup %6046 }
0x15f8   :  { %v4787_v3 = vmul.f32 %v6047_v9, %v4786_v51  ;;  %v5172_v51 = vld [vmem:[%s10063_s9 + $0x50] sm:$0xff] }
0x15f9   :  { %v10622_v9 = vld [vmem:[#allocation20_spill] sm:$0xff] }
0x15fa   :  { %v10028_v29 = vadd.f32 %v4788_v6, %v4787_v3  ;;  %v5171_v6 = vld [vmem:[%s10063_s9 + $0x48] sm:$0xff] }
0x15fc   :  { %4806 = vmatmul.f32.vlgmr.msrb.gmra.mxu2 %v10028_v29  ;;  %4826 = vmatmul.f32.vlgmr.msrb.gmra.mxu3 %v10028_v29 }
0x15fd   :  { %4846 = vmatmul.f32.vlgmr.msrb.gmra.mxu0 %v10028_v29  ;;  %5046 = vmatpush.msrb.mxu2 %v9922_v28 }
0x15fe   :  { %5229 = vmatpush.msrb.mxu0 %v5177_v24 }
0x15ff   :  { %5047 = vmatpush.msrb.mxu2 %v9928_v2 }
0x1600   :  { %5230 = vmatpush.msrb.mxu0 %v5176_v12 }
0x1601   :  { %5048 = vmatpush.msrb.mxu2 %v9934_v20  ;;  %v10619_v20 = vld [vmem:[#allocation29_spill] sm:$0xff] }
0x1602   :  { %5231 = vmatpush.msrb.mxu0 %v5175_v13 }
0x1603   :  { %5049 = vmatpush.msrb.mxu2 %v9940_v56 }
0x1604   :  { %5232 = vmatpush.msrb.mxu0 %v5174_v8  ;;  %v10625_v8 = vld [vmem:[#allocation14_spill] sm:$0xff] }
0x1605   :  { %5050 = vmatpush.msrb.mxu2 %v9946_v55  ;;  %v10620_v55 = vld [vmem:[#allocation16_spill] sm:$0xff] }
0x1606   :  { %5233 = vmatpush.msrb.mxu0 %v5173_v30  ;;  %v10626_v30 = vld [vmem:[#allocation2_spill] sm:$0xff] }
0x1607   :  { %5051 = vmatpush.msrb.mxu2 %v9952_v32 }
0x1608   :  { %5234 = vmatpush.msrb.mxu0 %v5172_v51  ;;  %v5121_v51 = vrot.slane %v9743_v37, 4 }
0x1609   :  { %5052 = vmatpush.msrb.mxu2 %v9958_v43 }
0x160a   :  { %5235 = vmatpush.msrb.mxu0 %v5171_v6  ;;  %v5124_v6 = vrot.slane %v9916_v26, 4 }
0x160b   :  { %5053 = vmatpush.msrb.mxu2 %v9964_v7 }
0x160d   :  { %5054 = vmatpush.msrb.mxu2 %v9970_v36 }
0x160f   :  { %5055 = vmatpush.msrb.mxu2 %v9976_v5 }
0x1611   :  { %5056 = vmatpush.msrb.mxu2 %v9982_v23 }
0x1613   :  { %5057 = vmatpush.msrb.mxu2 %v9988_v35 }
0x1615   :  { %5058 = vmatpush.msrb.mxu2 %v9994_v47 }
0x1617   :  { %5059 = vmatpush.msrb.mxu2 %v10000_v31 }
0x1619   :  { %5060 = vmatpush.msrb.mxu2 %v10006_v39 }
0x161b   :  { %5061 = vmatpush.msrb.mxu2 %v10012_v4 }
0x167a   :  { %v4847_v48 = vpop.f32.mrf.mxu0 }
0x167b   :  { %v4890_v17 = vadd.f32 %v9738_v19, %v4847_v48 }
0x167f   :  { %v4807_v28 = vpop.f32.mrf.mxu2  ;;  %v4827_v2 = vpop.f32.mrf.mxu3 }
0x1680   :  { %v4850_v56 = vadd.f32 %v4807_v28, %v10619_v20  ;;  %v4851_v32 = vadd.f32 %v4827_v2, %v10620_v55  ;;  %v5170_v2 = vld [vmem:[%s10063_s9 + $0x40] sm:$0xff]  ;;  %v5169_v55 = vld [vmem:[%s10063_s9 + $0x38] sm:$0xff] }
0x1681   :  { %5236 = vmatpush.msrb.mxu0 %v5170_v2 }
0x1682   :  { %v5700_v43 = vmul.f32 -1.442695, %v4850_v56  ;;  %v5701_v7 = vmul.f32 -1.442695, %v4851_v32  ;;  %v5168_v32 = vld [vmem:[%s10063_s9 + $0x30] sm:$0xff] }
0x1683   :  { %5237 = vmatpush.msrb.mxu0 %v5169_v55  ;;  %v5192_v55 = vld [vmem:[%s10110_s13 + $0x70] sm:$0xff] }
0x1684   :  { %6048 = vpow2.f32 %v5700_v43  ;;  %v5167_v43 = vld [vmem:[%s10063_s9 + $0x28] sm:$0xff] }
0x1685   :  { %6050 = vpow2.f32 %v5701_v7  ;;  %5238 = vmatpush.msrb.mxu0 %v5168_v32  ;;  %v5166_v7 = vld [vmem:[%s10063_s9 + $0x20] sm:$0xff]  ;;  %v5191_v32 = vld [vmem:[%s10110_s13 + $0x68] sm:$0xff] }
0x1687   :  { %5239 = vmatpush.msrb.mxu0 %v5167_v43  ;;  %v5190_v43 = vld [vmem:[%s10110_s13 + $0x60] sm:$0xff] }
0x1689   :  { %5240 = vmatpush.msrb.mxu0 %v5166_v7 }
0x168a   :  { %v6049_v36 = vpop.eup %6048 }
0x168b   :  { %v6051_v5 = vpop.eup %6050  ;;  %v4858_v23 = vadd.f32 1.0, %v6049_v36 }
0x168c   :  { %v4859_v35 = vadd.f32 1.0, %v6051_v5 }
0x168d   :  { %6052 = vrcp.f32 %v4858_v23  ;;  %v4871_v11 = vand.u32 2147483648, %v4858_v23  ;;  %v4869_v57 = vand.u32 2147483647, %v4858_v23  ;;  %vm4865_vm11 = vweird.f32 %v4858_v23 }
0x168e   :  { %6054 = vrcp.f32 %v4859_v35  ;;  %v4886_v60 = vand.u32 2147483648, %v4859_v35  ;;  %vm4880_vm15 = vweird.f32 %v4859_v35  ;;  %v4884_v52 = vand.u32 2147483647, %v4859_v35 }
0x168f   :  { %v4872_v25 = vor.u32 1.1754944e-38, %v4871_v11  ;;  %vm4870_vm13 = vcmp.eq.f32.partialorder %v4869_v57, 8.507059e+37  ;;  %v5162_v11 = vld [vmem:[%s10063_s9] sm:$0xff] }
0x1690   :  { %v4887_v62 = vor.u32 1.1754944e-38, %v4886_v60  ;;  %vm4885_vm2 = vcmp.eq.f32.partialorder %v4884_v52, 8.507059e+37 }
0x1693   :  { %v6053_v47 = vpop.eup %6052 }
0x1694   :  { %v6055_v31 = vpop.eup %6054  ;;  %v4861_v39 = vmul.f32 %v6053_v47, %v4858_v23  ;;  %vm4866_vm9 = vweird.f32 %v6053_v47  ;;  %v5165_v23 = vld [vmem:[%s10063_s9 + $0x18] sm:$0xff] }
0x1695   :  { %v4876_v4 = vmul.f32 %v6055_v31, %v4859_v35  ;;  %vm4867_vm12 = vmor %vm4865_vm11, %vm4866_vm9  ;;  %vm4881_vm14 = vweird.f32 %v6055_v31  ;;  %5241 = vmatpush.msrb.mxu0 %v5165_v23 }
0x1696   :  { %v4862_v15 = vsub.f32 1.0, %v4861_v39  ;;  %vm4882_vm1 = vmor %vm4880_vm15, %vm4881_vm14  ;;  %v5163_v39 = vld [vmem:[%s10063_s9 + $0x8] sm:$0xff] }
0x1697   :  { %v4877_v42 = vsub.f32 1.0, %v4876_v4 }
0x1698   :  { %v4863_v34 = vmul.f32 %v6053_v47, %v4862_v15 }
0x1699   :  { %v4878_v44 = vmul.f32 %v6055_v31, %v4877_v42 }
0x169a   :  { %v4864_v18 = vadd.f32 %v6053_v47, %v4863_v34 }
0x169b   :  { %v4879_v1 = vadd.f32 %v6055_v31, %v4878_v44 }
0x169c   :  { %v4868_v54 = vsel %vm4867_vm12, %v6053_v47, %v4864_v18  ;;  %v5164_v47 = vld [vmem:[%s10063_s9 + $0x10] sm:$0xff] }
0x169d   :  { %v4873_v46 = vsel %vm4870_vm13, %v4872_v25, %v4868_v54  ;;  %v4883_v61 = vsel %vm4882_vm1, %v6055_v31, %v4879_v1  ;;  %5242 = vmatpush.msrb.mxu0 %v5164_v47  ;;  %v3756_v25 = vperm.slane %v10022_v40, 2 }
0x169e   :  { %v4891_v50 = vmul.f32 %v4890_v17, %v4873_v46  ;;  %v4888_v33 = vsel %vm4885_vm2, %v4887_v62, %v4883_v61 }
0x169f   :  { %v4894_v27 = vsub.f32 1.0, %v4888_v33  ;;  %v4896_v38 = vmul.f32 %v4888_v33, %v10028_v29  ;;  %5243 = vmatpush.msrb.mxu0 %v5163_v39  ;;  %v3759_v1 = vadd.f32 %v3756_v25, %v10618_v21 }
0x16a0   :  { %v4892_v63 = vadd.f32 %v4891_v50, %v3753_v41 }
0x16a1   :  { %5244 = vmatpush.msrb.mxu0 %v5162_v11  ;;  %v5187_v11 = vld [vmem:[%s10110_s13 + $0x48] sm:$0xff] }
0x16a2   :  { %6056 = vtanh.f32 %v4892_v63 }
0x16a8   :  { %v6057_v22 = vpop.eup %6056 }
0x16a9   :  { %v4895_v45 = vmul.f32 %v6057_v22, %v4894_v27 }
0x16ab   :  { %v10055_v53 = vadd.f32 %v4896_v38, %v4895_v45 }
0x16ad   :  { %4914 = vmatmul.f32.vlgmr.msrb.gmra.mxu1 %v10055_v53  ;;  %4934 = vmatmul.f32.vlgmr.msra.gmra.mxu2 %v10055_v53  ;;  %v5127_v2 = vrot.slane %v10055_v53, 4 }
0x16ae   :  { %4954 = vmatmul.f32.vlgmr.msra.gmra.mxu3 %v10055_v53 }
0x172a   :  { %v4915_v59 = vpop.f32.mrf.mxu1 }
0x172b   :  { %v4958_v14 = vadd.f32 %v4915_v59, %v10621_v49  ;;  %v10623_v59 = vld [vmem:[#allocation39_spill] sm:$0xff]  ;;  %v10624_v49 = vld [vmem:[#allocation38_spill] sm:$0xff] }
0x172c   :  { %v5115_v13 = vrot.slane %v10623_v59, 4 }
0x172d   :  { %v5702_v16 = vmul.f32 -1.442695, %v4958_v14 }
0x172e   :  { %v5132_v14 = vsel %vm1391_vm10, %v10624_v49, %v5115_v13  ;;  %v3762_v13 = vperm.slane %v10022_v40, 3 }
0x172f   :  { %6058 = vpow2.f32 %v5702_v16  ;;  %v5118_v16 = vrot.slane %v10625_v8, 4 }
0x1730   :  { %v4935_v0 = vpop.f32.mrf.mxu2 }
0x1731   :  { %v4959_v3 = vadd.f32 %v4935_v0, %v10622_v9  ;;  %v4955_v48 = vpop.f32.mrf.mxu3  ;;  %v5133_v0 = vsel %vm1391_vm10, %v10626_v30, %v5118_v16  ;;  %v10627_v9 = vld [vmem:[#allocation11_spill] sm:$0xff]  ;;  %v6309_v16 = vld [vmem:[%s9085_s1] ss:$0 sm:$0xff] }
0x1732   :  { %v4998_v46 = vadd.f32 %v9738_v19, %v4955_v48 }
0x1733   :  { %v5703_v28 = vmul.f32 -1.442695, %v4959_v3  ;;  %v5134_v3 = vsel %vm1391_vm10, %v10627_v9, %v5121_v51 }
0x1735   :  { %v6059_v20 = vpop.eup %6058  ;;  %6060 = vpow2.f32 %v5703_v28  ;;  %v5135_v28 = vsel %vm1391_vm10, %v9849_v10, %v5124_v6 }
0x1736   :  { %v4966_v56 = vadd.f32 1.0, %v6059_v20  ;;  %v5136_v20 = vsel %vm1391_vm10, %v10028_v29, %v5127_v2 }
0x1738   :  { %6062 = vrcp.f32 %v4966_v56  ;;  %v4979_v15 = vand.u32 2147483648, %v4966_v56  ;;  %v4977_v34 = vand.u32 2147483647, %v4966_v56  ;;  %vm4973_vm4 = vweird.f32 %v4966_v56 }
0x173a   :  { %v4980_v58 = vor.u32 1.1754944e-38, %v4979_v15  ;;  %vm4978_vm6 = vcmp.eq.f32.partialorder %v4977_v34, 8.507059e+37  ;;  %v5188_v15 = vld [vmem:[%s10110_s13 + $0x50] sm:$0xff]  ;;  %v5185_v34 = vld [vmem:[%s10110_s13 + $0x38] sm:$0xff] }
0x173b   :  { %v6061_v36 = vpop.eup %6060 }
0x173c   :  { %v4967_v5 = vadd.f32 1.0, %v6061_v36 }
0x173e   :  { %v6063_v35 = vpop.eup %6062  ;;  %6064 = vrcp.f32 %v4967_v5  ;;  %v4994_v60 = vand.u32 2147483648, %v4967_v5  ;;  %v4992_v63 = vand.u32 2147483647, %v4967_v5  ;;  %vm4988_vm9 = vweird.f32 %v4967_v5 }
0x173f   :  { %v4969_v31 = vmul.f32 %v6063_v35, %v4966_v56  ;;  %vm4974_vm3 = vweird.f32 %v6063_v35  ;;  %v5193_v56 = vld [vmem:[%s10110_s13 + $0x78] sm:$0xff] }
0x1740   :  { %vm4975_vm5 = vmor %vm4973_vm4, %vm4974_vm3  ;;  %v4995_v33 = vor.u32 1.1754944e-38, %v4994_v60  ;;  %vm4993_vm12 = vcmp.eq.f32.partialorder %v4992_v63, 8.507059e+37  ;;  %5194 = vmatpush.msrb.mxu3 %v5193_v56 }
0x1741   :  { %v4970_v4 = vsub.f32 1.0, %v4969_v31  ;;  %v5189_v31 = vld [vmem:[%s10110_s13 + $0x58] sm:$0xff] }
0x1742   :  { %5195 = vmatpush.msrb.mxu3 %v5192_v55 }
0x1743   :  { %v4971_v42 = vmul.f32 %v6063_v35, %v4970_v4 }
0x1744   :  { %v6065_v57 = vpop.eup %6064  ;;  %5196 = vmatpush.msrb.mxu3 %v5191_v32 }
0x1745   :  { %v4984_v44 = vmul.f32 %v6065_v57, %v4967_v5  ;;  %v4972_v18 = vadd.f32 %v6063_v35, %v4971_v42  ;;  %vm4989_vm7 = vweird.f32 %v6065_v57  ;;  %v10628_v5 = vld [vmem:[#allocation36_spill] sm:$0xff]  ;;  %v5186_v42 = vld [vmem:[%s10110_s13 + $0x40] sm:$0xff] }
0x1746   :  { %vm4990_vm11 = vmor %vm4988_vm9, %vm4989_vm7  ;;  %5197 = vmatpush.msrb.mxu3 %v5190_v43 }
0x1747   :  { %v4985_v17 = vsub.f32 1.0, %v4984_v44  ;;  %v4976_v54 = vsel %vm4975_vm5, %v6063_v35, %v4972_v18  ;;  %v10629_v35 = vld [vmem:[#allocation37_spill] sm:$0xff]  ;;  %v5183_v44 = vld [vmem:[%s10110_s13 + $0x28] sm:$0xff] }
0x1748   :  { %v4981_v41 = vsel %vm4978_vm6, %v4980_v58, %v4976_v54  ;;  %5198 = vmatpush.msrb.mxu3 %v5189_v31  ;;  %v5181_v54 = vld [vmem:[%s10110_s13 + $0x18] sm:$0xff] }
0x1749   :  { %v4986_v50 = vmul.f32 %v6065_v57, %v4985_v17  ;;  %v4999_v52 = vmul.f32 %v4998_v46, %v4981_v41  ;;  %v5182_v17 = vld [vmem:[%s10110_s13 + $0x20] sm:$0xff]  ;;  %v5180_v46 = vld [vmem:[%s10110_s13 + $0x10] sm:$0xff] }
0x174a   :  { %5199 = vmatpush.msrb.mxu3 %v5188_v15  ;;  %v5145_v15 = vrot.slane %v9849_v10, 4 }
0x174b   :  { %v4987_v61 = vadd.f32 %v6065_v57, %v4986_v50  ;;  %v5000_v62 = vadd.f32 %v4999_v52, %v3759_v1  ;;  %v5179_v1 = vld [vmem:[%s10110_s13 + $0x8] sm:$0xff]  ;;  %v5178_v52 = vld [vmem:[%s10110_s13] sm:$0xff] }
0x174c   :  { %5200 = vmatpush.msrb.mxu3 %v5187_v11  ;;  %v5158_v11 = vsel %vm1391_vm10, %v9916_v26, %v5145_v15  ;;  %v5282_v26 = vld [vmem:[%s5585_s26 + $0x10] sm:$0xff]  ;;  %v10189_v15 = vld [vmem:[%s10176_s29] ss:$0 sm:$0xff] }
0x174d   :  { %v4991_v27 = vsel %vm4990_vm11, %v6065_v57, %v4987_v61  ;;  %6066 = vtanh.f32 %v5000_v62  ;;  %v5184_v57 = vld [vmem:[%s10110_s13 + $0x30] sm:$0xff] }
0x174e   :  { %v4996_v22 = vsel %vm4993_vm12, %v4995_v33, %v4991_v27  ;;  %5201 = vmatpush.msrb.mxu3 %v5186_v42  ;;  %v5148_v42 = vrot.slane %v10627_v9, 4 }
0x174f   :  { %v5002_v45 = vsub.f32 1.0, %v4996_v22  ;;  %v5004_v24 = vmul.f32 %v4996_v22, %v10055_v53 }
0x1750   :  { %5202 = vmatpush.msrb.mxu3 %v5185_v34  ;;  %v5159_v34 = vsel %vm1391_vm10, %v9743_v37, %v5148_v42  ;;  %v5283_v37 = vld [vmem:[%s5585_s26 + $0x18] sm:$0xff] }
0x1751   :  { %5318 = vmatpush.msrb.mxu1 %v5283_v37 }
0x1752   :  { %5203 = vmatpush.msrb.mxu3 %v5184_v57 }
0x1753   :  { %v6067_v38 = vpop.eup %6066  ;;  %5319 = vmatpush.msrb.mxu1 %v5282_v26 }
0x1754   :  { %v5003_v19 = vmul.f32 %v6067_v38, %v5002_v45  ;;  %5204 = vmatpush.msrb.mxu3 %v5183_v44 }
0x1756   :  { %v10087_v12 = vadd.f32 %v5004_v24, %v5003_v19  ;;  %5205 = vmatpush.msrb.mxu3 %v5182_v17 }
0x1758   :  { %5022 = vmatmul.f32.vlgmr.msra.gmra.mxu0 %v10087_v12  ;;  %5042 = vmatmul.f32.vlgmr.msra.gmra.mxu1 %v10087_v12 }
0x1759   :  { %5062 = vmatmul.f32.vlgmr.msrb.gmra.mxu2 %v10087_v12  ;;  %5206 = vmatpush.msrb.mxu3 %v5181_v54 }
0x175b   :  { %5207 = vmatpush.msrb.mxu3 %v5180_v46 }
0x175d   :  { %5208 = vmatpush.msrb.mxu3 %v5179_v1 }
0x175f   :  { %5209 = vmatpush.msrb.mxu3 %v5178_v52 }
0x1760   :  { %5245 = vmatmul.f32.vlgmr.msrb.gmra.mxu0 %v5132_v14 }
0x1768   :  { %5248 = vmatmul.f32.gmra.mxu0 %v5133_v0 }
0x1770   :  { %5251 = vmatmul.f32.gmra.mxu0 %v5134_v3 }
0x1778   :  { %5254 = vmatmul.f32.gmra.mxu0 %v5135_v28  ;;  %v3765_v28 = vadd.f32 %v3762_v13, %v10618_v21 }
0x1780   :  { %5257 = vmatmul.f32.gmra.mxu0 %v5136_v20 }
0x17d5   :  { %v5023_v7 = vpop.f32.mrf.mxu0  ;;  %v5043_v36 = vpop.f32.mrf.mxu1 }
0x17d6   :  { %v5066_v23 = vadd.f32 %v5023_v7, %v10628_v5  ;;  %v5067_v47 = vadd.f32 %v5043_v36, %v10629_v35  ;;  %v5139_v35 = vrot.slane %v10087_v12, 4 }
0x17d8   :  { %v5704_v39 = vmul.f32 -1.442695, %v5066_v23  ;;  %v5705_v4 = vmul.f32 -1.442695, %v5067_v47 }
0x17da   :  { %6068 = vpow2.f32 %v5704_v39  ;;  %v5142_v39 = vrot.slane %v10028_v29, 4 }
0x17db   :  { %6070 = vpow2.f32 %v5705_v4 }
0x17dc   :  { %v5063_v38 = vpop.f32.mrf.mxu2  ;;  %v5157_v4 = vsel %vm1391_vm10, %v10055_v53, %v5142_v39  ;;  %v5154_v53 = vrot.slane %v10624_v49, 4  ;;  %v5281_v49 = vld [vmem:[%s5585_s26 + $0x8] sm:$0xff] }
0x17dd   :  { %v5106_v0 = vadd.f32 %v6309_v16, %v5063_v38  ;;  %5320 = vmatpush.msrb.mxu1 %v5281_v49 }
0x17de   :  { %v5161_v10 = vsel %vm1391_vm10, %v10623_v59, %v5154_v53  ;;  %v5246_v59 = vpop.f32.mrf.mxu0 }
0x17e0   :  { %v6069_v48 = vpop.eup %6068 }
0x17e1   :  { %v6071_v18 = vpop.eup %6070  ;;  %v5074_v25 = vadd.f32 1.0, %v6069_v48 }
0x17e2   :  { %v5075_v58 = vadd.f32 1.0, %v6071_v18 }
0x17e3   :  { %6072 = vrcp.f32 %v5074_v25  ;;  %v5087_v33 = vand.u32 2147483648, %v5074_v25  ;;  %v5085_v22 = vand.u32 2147483647, %v5074_v25  ;;  %vm5081_vm14 = vweird.f32 %v5074_v25 }
0x17e4   :  { %6074 = vrcp.f32 %v5075_v58  ;;  %v5102_v6 = vand.u32 2147483648, %v5075_v58  ;;  %vm5096_vm3 = vweird.f32 %v5075_v58  ;;  %v5100_v20 = vand.u32 2147483647, %v5075_v58 }
0x17e5   :  { %v5088_v24 = vor.u32 1.1754944e-38, %v5087_v33  ;;  %vm5086_vm1 = vcmp.eq.f32.partialorder %v5085_v22, 8.507059e+37 }
0x17e6   :  { %v5103_v32 = vor.u32 1.1754944e-38, %v5102_v6  ;;  %vm5101_vm5 = vcmp.eq.f32.partialorder %v5100_v20, 8.507059e+37  ;;  %v5249_v48 = vpop.f32.mrf.mxu0  ;;  %v5777_v6 = vld [vmem:[%s10161_s21] ss:$0 sm:$0xff] }
0x17e9   :  { %v6073_v41 = vpop.eup %6072 }
0x17ea   :  { %v6075_v50 = vpop.eup %6074  ;;  %v5077_v60 = vmul.f32 %v6073_v41, %v5074_v25  ;;  %vm5082_vm13 = vweird.f32 %v6073_v41 }
0x17eb   :  { %v5092_v63 = vmul.f32 %v6075_v50, %v5075_v58  ;;  %vm5083_vm15 = vmor %vm5081_vm14, %vm5082_vm13  ;;  %vm5097_vm2 = vweird.f32 %v6075_v50 }
0x17ec   :  { %v5078_v61 = vsub.f32 1.0, %v5077_v60  ;;  %vm5098_vm4 = vmor %vm5096_vm3, %vm5097_vm2 }
0x17ed   :  { %v5093_v62 = vsub.f32 1.0, %v5092_v63 }
0x17ee   :  { %v5079_v27 = vmul.f32 %v6073_v41, %v5078_v61  ;;  %v5252_v54 = vpop.f32.mrf.mxu0 }
0x17ef   :  { %v5094_v45 = vmul.f32 %v6075_v50, %v5093_v62 }
0x17f0   :  { %v5080_v19 = vadd.f32 %v6073_v41, %v5079_v27 }
0x17f1   :  { %v5095_v51 = vadd.f32 %v6075_v50, %v5094_v45 }
0x17f2   :  { %v5084_v14 = vsel %vm5083_vm15, %v6073_v41, %v5080_v19 }
0x17f3   :  { %v5089_v3 = vsel %vm5086_vm1, %v5088_v24, %v5084_v14  ;;  %v5099_v55 = vsel %vm5098_vm4, %v6075_v50, %v5095_v51  ;;  %v5348_v51 = vld [vmem:[%s5587_s4 + $0x8] sm:$0xff] }
0x17f4   :  { %v5107_v2 = vmul.f32 %v5106_v0, %v5089_v3  ;;  %v5104_v40 = vsel %vm5101_vm5, %v5103_v32, %v5099_v55  ;;  %v5347_v3 = vld [vmem:[%s5587_s4] sm:$0xff]  ;;  %5386 = vmatpush.msra.mxu2 %v5348_v51 }
0x17f5   :  { %v5110_v43 = vsub.f32 1.0, %v5104_v40  ;;  %v5112_v5 = vmul.f32 %v5104_v40, %v10087_v12 }
0x17f6   :  { %v5108_v56 = vadd.f32 %v5107_v2, %v3765_v28  ;;  %v5255_v60 = vpop.f32.mrf.mxu0  ;;  %5387 = vmatpush.msra.mxu2 %v5347_v3 }
0x17f8   :  { %6076 = vtanh.f32 %v5108_v56 }
0x17fe   :  { %v6077_v7 = vpop.eup %6076  ;;  %v5258_v33 = vpop.f32.mrf.mxu0 }
0x17ff   :  { %v5111_v36 = vmul.f32 %v6077_v7, %v5110_v43 }
0x1801   :  { %v5113_v23 = vadd.f32 %v5112_v5, %v5111_v36 }
0x1803   :  { %v5156_v21 = vsel %vm1391_vm10, %v5113_v23, %v5139_v35  ;;  %v5130_v47 = vrot.slane %v5113_v23, 4 }
0x1804   :  { %5210 = vmatmul.f32.vlgmr.msrb.gmra.mxu3 %v5156_v21 }
0x1805   :  { %v5137_v31 = vsel %vm1391_vm10, %v10087_v12, %v5130_v47  ;;  %v5151_v12 = vrot.slane %v10626_v30, 4  ;;  %v5776_v30 = vld [vmem:[%s10139_s17] ss:$0 sm:$0xff] }
0x1806   :  { %5260 = vmatmul.f32.gmra.mxu0 %v5137_v31 }
0x1807   :  { %v5160_v29 = vsel %vm1391_vm10, %v10625_v8, %v5151_v12  ;;  %v5280_v8 = vld [vmem:[%s5585_s26] sm:$0xff]  ;;  %vm5353_vm10 = vcmask 130048  }
0x1808   :  { %5321 = vmatpush.msrb.mxu1 %v5280_v8 }
0x180c   :  { %5213 = vmatmul.f32.gmra.mxu3 %v5157_v4 }
0x1814   :  { %5216 = vmatmul.f32.gmra.mxu3 %v5158_v11 }
0x181c   :  { %5219 = vmatmul.f32.gmra.mxu3 %v5159_v34 }
0x1824   :  { %5222 = vmatmul.f32.gmra.mxu3 %v5160_v29 }
0x182c   :  { %5225 = vmatmul.f32.gmra.mxu3 %v5161_v10 }
0x1883   :  { %v5261_v19 = vpop.f32.mrf.mxu0 }
0x1887   :  { %v5211_v9 = vpop.f32.mrf.mxu3 }
0x1888   :  { %v5247_v57 = vadd.f32 %v5246_v59, %v5211_v9  ;;  %v5407_v9 = vld [vmem:[%s10196_s7] sm:$0x1] }
0x188a   :  { %v5268_v44 = vadd.f32 %v5776_v30, %v5247_v57  ;;  %v5408_v57 = vld [vmem:[%s5590_s11] sm:$0x1] }
0x188c   :  { %6078 = vtanh.f32 %v5268_v44 }
0x188f   :  { %v5214_v18 = vpop.f32.mrf.mxu3 }
0x1890   :  { %v5250_v25 = vadd.f32 %v5249_v48, %v5214_v18  ;;  %v5409_v18 = vsub.f32 %v5408_v57, %v5407_v9 }
0x1892   :  { %v6079_v58 = vpop.eup %6078  ;;  %v5269_v17 = vadd.f32 %v5776_v30, %v5250_v25 }
0x1893   :  { %5706 = vmatmul.msk.f32.vlgmr.msrb.gmra.mxu1 %vm3075_vm8, %v6079_v58 }
0x1894   :  { %6080 = vtanh.f32 %v5269_v17 }
0x1897   :  { %v5217_v46 = vpop.f32.mrf.mxu3 }
0x1898   :  { %v5253_v1 = vadd.f32 %v5252_v54, %v5217_v46 }
0x189a   :  { %v6081_v41 = vpop.eup %6080  ;;  %v5270_v50 = vadd.f32 %v5776_v30, %v5253_v1 }
0x189b   :  { %5707 = vmatmul.msk.f32.gmra.mxu1 %vm3075_vm8, %v6081_v41 }
0x189c   :  { %6082 = vtanh.f32 %v5270_v50 }
0x189f   :  { %v5220_v52 = vpop.f32.mrf.mxu3 }
0x18a0   :  { %v5256_v63 = vadd.f32 %v5255_v60, %v5220_v52  ;;  %v10209_v60 = vperm.slane %v5409_v18, 0 }
0x18a2   :  { %v6083_v61 = vpop.eup %6082  ;;  %v5271_v62 = vadd.f32 %v5776_v30, %v5256_v63 }
0x18a3   :  { %5708 = vmatmul.msk.f32.gmra.mxu1 %vm3075_vm8, %v6083_v61 }
0x18a4   :  { %6084 = vtanh.f32 %v5271_v62 }
0x18a7   :  { %v5223_v27 = vpop.f32.mrf.mxu3 }
0x18a8   :  { %v5259_v22 = vadd.f32 %v5258_v33, %v5223_v27  ;;  %v10212_v27 = vld [vmem:[%s10196_s7] ss:$0 sm:$0xff] }
0x18aa   :  { %v6085_v45 = vpop.eup %6084  ;;  %v5272_v38 = vadd.f32 %v5776_v30, %v5259_v22 }
0x18ab   :  { %5709 = vmatmul.msk.f32.gmra.mxu1 %vm3075_vm8, %v6085_v45 }
0x18ac   :  { %6086 = vtanh.f32 %v5272_v38 }
0x18af   :  { %v5226_v24 = vpop.f32.mrf.mxu3 }
0x18b0   :  { %v5262_v13 = vadd.f32 %v5261_v19, %v5226_v24 }
0x18b2   :  { %v6087_v14 = vpop.eup %6086  ;;  %v5273_v16 = vadd.f32 %v5776_v30, %v5262_v13 }
0x18b3   :  { %5710 = vmatmul.msk.f32.gmra.mxu1 %vm3075_vm8, %v6087_v14 }
0x18b4   :  { %6088 = vtanh.f32 %v5273_v16 }
0x18ba   :  { %v6089_v0 = vpop.eup %6088 }
0x18bb   :  { %5711 = vmatmul.msk.f32.gmra.mxu1 %vm3075_vm8, %v6089_v0 }
0x1910   :  { %v5323_v28 = vpop.f32.mrf.mxu1 }
0x1911   :  { %v5324_v2 = vadd.f32 %v5777_v6, %v5323_v28 }
0x1913   :  { %v5341_v20 = vmax.f32 %v5324_v2, 0.0 }
0x1915   :  { %5712 = vmatmul.msk.f32.vlgmr.msra.gmra.mxu2 %vm5353_vm10, %v5341_v20 }
0x1918   :  { %v5326_v56 = vpop.f32.mrf.mxu1 }
0x1919   :  { %v5327_v55 = vadd.f32 %v5777_v6, %v5326_v56 }
0x191b   :  { %v5342_v32 = vmax.f32 %v5327_v55, 0.0 }
0x191d   :  { %5713 = vmatmul.msk.f32.gmra.mxu2 %vm5353_vm10, %v5342_v32 }
0x1920   :  { %v5329_v40 = vpop.f32.mrf.mxu1 }
0x1921   :  { %v5330_v43 = vadd.f32 %v5777_v6, %v5329_v40 }
0x1923   :  { %v5343_v7 = vmax.f32 %v5330_v43, 0.0 }
0x1925   :  { %5714 = vmatmul.msk.f32.gmra.mxu2 %vm5353_vm10, %v5343_v7 }
0x1928   :  { %v5332_v36 = vpop.f32.mrf.mxu1 }
0x1929   :  { %v5333_v5 = vadd.f32 %v5777_v6, %v5332_v36 }
0x192b   :  { %v5344_v23 = vmax.f32 %v5333_v5, 0.0 }
0x192d   :  { %5715 = vmatmul.msk.f32.gmra.mxu2 %vm5353_vm10, %v5344_v23 }
0x1930   :  { %v5335_v35 = vpop.f32.mrf.mxu1 }
0x1931   :  { %v5336_v21 = vadd.f32 %v5777_v6, %v5335_v35 }
0x1933   :  { %v5345_v47 = vmax.f32 %v5336_v21, 0.0 }
0x1935   :  { %5716 = vmatmul.msk.f32.gmra.mxu2 %vm5353_vm10, %v5345_v47 }
0x1938   :  { %v5338_v31 = vpop.f32.mrf.mxu1 }
0x1939   :  { %v5339_v39 = vadd.f32 %v5777_v6, %v5338_v31 }
0x193b   :  { %v5346_v4 = vmax.f32 %v5339_v39, 0.0 }
0x193d   :  { %5717 = vmatmul.msk.f32.gmra.mxu2 %vm5353_vm10, %v5346_v4 }
0x1998   :  { %v5389_v11 = vpop.f32.mrf.mxu2 }
0x1999   :  { %v5390_v42 = vadd.f32 %v10189_v15, %v5389_v11 }
0x199b   :  { %v5718_v34 = vmul.f32 -1.442695, %v5390_v42 }
0x199d   :  { %6090 = vpow2.f32 %v5718_v34 }
0x19a0   :  { %v5392_v12 = vpop.f32.mrf.mxu2 }
0x19a1   :  { %v5393_v29 = vadd.f32 %v10189_v15, %v5392_v12 }
0x19a3   :  { %v6091_v53 = vpop.eup %6090  ;;  %v5719_v10 = vmul.f32 -1.442695, %v5393_v29 }
0x19a4   :  { %v5428_v37 = vadd.f32 1.0, %v6091_v53 }
0x19a5   :  { %6092 = vpow2.f32 %v5719_v10 }
0x19a6   :  { %6094 = vrcp.f32 %v5428_v37  ;;  %v5445_v58 = vand.u32 2147483648, %v5428_v37  ;;  %v5443_v46 = vand.u32 2147483647, %v5428_v37  ;;  %vm5439_vm6 = vweird.f32 %v5428_v37 }
0x19a8   :  { %v5395_v26 = vpop.f32.mrf.mxu2  ;;  %v5446_v61 = vor.u32 1.1754944e-38, %v5445_v58  ;;  %vm5444_vm9 = vcmp.eq.f32.partialorder %v5443_v46, 8.507059e+37 }
0x19a9   :  { %v5396_v49 = vadd.f32 %v10189_v15, %v5395_v26 }
0x19ab   :  { %v6093_v8 = vpop.eup %6092  ;;  %v5720_v59 = vmul.f32 -1.442695, %v5396_v49 }
0x19ac   :  { %v6095_v30 = vpop.eup %6094  ;;  %v5429_v48 = vadd.f32 1.0, %v6093_v8 }
0x19ad   :  { %v5435_v44 = vmul.f32 %v6095_v30, %v5428_v37  ;;  %6096 = vpow2.f32 %v5720_v59  ;;  %vm5440_vm8 = vweird.f32 %v6095_v30 }
0x19ae   :  { %6098 = vrcp.f32 %v5429_v48  ;;  %vm5441_vm7 = vmor %vm5439_vm6, %vm5440_vm8  ;;  %v5458_v24 = vand.u32 2147483647, %v5429_v48  ;;  %v5460_v13 = vand.u32 2147483648, %v5429_v48  ;;  %vm5454_vm12 = vweird.f32 %v5429_v48 }
0x19af   :  { %v5436_v25 = vsub.f32 1.0, %v5435_v44 }
0x19b0   :  { %v5398_v17 = vpop.f32.mrf.mxu2  ;;  %v5461_v20 = vor.u32 1.1754944e-38, %v5460_v13  ;;  %vm5459_vm14 = vcmp.eq.f32.partialorder %v5458_v24, 8.507059e+37 }
0x19b1   :  { %v5437_v54 = vmul.f32 %v6095_v30, %v5436_v25  ;;  %v5399_v1 = vadd.f32 %v10189_v15, %v5398_v17 }
0x19b3   :  { %v6097_v41 = vpop.eup %6096  ;;  %v5438_v50 = vadd.f32 %v6095_v30, %v5437_v54  ;;  %v5721_v52 = vmul.f32 -1.442695, %v5399_v1 }
0x19b4   :  { %v6099_v63 = vpop.eup %6098  ;;  %v5430_v62 = vadd.f32 1.0, %v6097_v41 }
0x19b5   :  { %v5442_v33 = vsel %vm5441_vm7, %v6095_v30, %v5438_v50  ;;  %v5450_v22 = vmul.f32 %v6099_v63, %v5429_v48  ;;  %6100 = vpow2.f32 %v5721_v52  ;;  %vm5455_vm11 = vweird.f32 %v6099_v63 }
0x19b6   :  { %v5447_v45 = vsel %vm5444_vm9, %v5446_v61, %v5442_v33  ;;  %6102 = vrcp.f32 %v5430_v62  ;;  %vm5456_vm13 = vmor %vm5454_vm12, %vm5455_vm11  ;;  %v5473_v36 = vand.u32 2147483647, %v5430_v62  ;;  %v5475_v5 = vand.u32 2147483648, %v5430_v62 }
0x19b7   :  { %v5527_v38 = vmul.f32 %v10209_v60, %v5447_v45  ;;  %v5451_v19 = vsub.f32 1.0, %v5450_v22  ;;  %vm5469_vm1 = vweird.f32 %v5430_v62 }
0x19b8   :  { %v5401_v14 = vpop.f32.mrf.mxu2  ;;  %v5476_v42 = vor.u32 1.1754944e-38, %v5475_v5  ;;  %vm5474_vm3 = vcmp.eq.f32.partialorder %v5473_v36, 8.507059e+37 }
0x19b9   :  { %v5536_v16 = vadd.f32 %v10212_v27, %v5527_v38  ;;  %v5452_v0 = vmul.f32 %v6099_v63, %v5451_v19  ;;  %v5402_v51 = vadd.f32 %v10189_v15, %v5401_v14 }
0x19bb   :  { %v6101_v3 = vpop.eup %6100  ;;  %5542 = vst.msk [vmem:[%s10207_s15] sm:$0xff] %vm3205_vm0, %v5536_v16  ;;  %v5453_v6 = vadd.f32 %v6099_v63, %v5452_v0  ;;  %v5722_v28 = vmul.f32 -1.442695, %v5402_v51 }
0x19bc   :  { %v6103_v2 = vpop.eup %6102  ;;  %v5431_v56 = vadd.f32 1.0, %v6101_v3 }
0x19bd   :  { %v5457_v55 = vsel %vm5456_vm13, %v6099_v63, %v5453_v6  ;;  %v5465_v32 = vmul.f32 %v6103_v2, %v5430_v62  ;;  %6104 = vpow2.f32 %v5722_v28  ;;  %vm5470_vm15 = vweird.f32 %v6103_v2 }
0x19be   :  { %v5462_v40 = vsel %vm5459_vm14, %v5461_v20, %v5457_v55  ;;  %6106 = vrcp.f32 %v5431_v56  ;;  %vm5471_vm2 = vmor %vm5469_vm1, %vm5470_vm15  ;;  %v5490_v37 = vand.u32 2147483648, %v5431_v56  ;;  %v5488_v8 = vand.u32 2147483647, %v5431_v56 }
0x19bf   :  { %v5528_v43 = vmul.f32 %v10209_v60, %v5462_v40  ;;  %v5466_v7 = vsub.f32 1.0, %v5465_v32  ;;  %vm5484_vm5 = vweird.f32 %v5431_v56 }
0x19c0   :  { %v5404_v23 = vpop.f32.mrf.mxu2  ;;  %v5491_v57 = vor.u32 1.1754944e-38, %v5490_v37  ;;  %vm5489_vm8 = vcmp.eq.f32.partialorder %v5488_v8, 8.507059e+37 }
0x19c1   :  { %v5537_v35 = vadd.f32 %v10212_v27, %v5528_v43  ;;  %v5467_v21 = vmul.f32 %v6103_v2, %v5466_v7  ;;  %v5405_v47 = vadd.f32 %v10189_v15, %v5404_v23 }
0x19c3   :  { %v6105_v31 = vpop.eup %6104  ;;  %5543 = vst.msk [vmem:[%s10207_s15 + $0x8] sm:$0xff] %vm3205_vm0, %v5537_v35  ;;  %v5468_v39 = vadd.f32 %v6103_v2, %v5467_v21  ;;  %v5723_v4 = vmul.f32 -1.442695, %v5405_v47 }
0x19c4   :  { %v6107_v11 = vpop.eup %6106  ;;  %v5432_v34 = vadd.f32 1.0, %v6105_v31 }
0x19c5   :  { %v5472_v12 = vsel %vm5471_vm2, %v6103_v2, %v5468_v39  ;;  %v5480_v29 = vmul.f32 %v6107_v11, %v5431_v56  ;;  %6108 = vpow2.f32 %v5723_v4  ;;  %vm5485_vm4 = vweird.f32 %v6107_v11 }
0x19c6   :  { %v5477_v53 = vsel %vm5474_vm3, %v5476_v42, %v5472_v12  ;;  %6110 = vrcp.f32 %v5432_v34  ;;  %vm5486_vm10 = vmor %vm5484_vm5, %vm5485_vm4  ;;  %v5505_v54 = vand.u32 2147483648, %v5432_v34  ;;  %v5503_v41 = vand.u32 2147483647, %v5432_v34 }
0x19c7   :  { %v5529_v10 = vmul.f32 %v10209_v60, %v5477_v53  ;;  %v5481_v15 = vsub.f32 1.0, %v5480_v29  ;;  %vm5499_vm7 = vweird.f32 %v5432_v34 }
0x19c8   :  { %v5506_v63 = vor.u32 1.1754944e-38, %v5505_v54  ;;  %vm5504_vm11 = vcmp.eq.f32.partialorder %v5503_v41, 8.507059e+37 }
0x19c9   :  { %v5538_v26 = vadd.f32 %v10212_v27, %v5529_v10  ;;  %v5482_v49 = vmul.f32 %v6107_v11, %v5481_v15 }
0x19cb   :  { %v6109_v59 = vpop.eup %6108  ;;  %5544 = vst.msk [vmem:[%s10207_s15 + $0x10] sm:$0xff] %vm3205_vm0, %v5538_v26  ;;  %v5483_v30 = vadd.f32 %v6107_v11, %v5482_v49 }
0x19cc   :  { %v6111_v9 = vpop.eup %6110  ;;  %v5433_v48 = vadd.f32 1.0, %v6109_v59 }
0x19cd   :  { %v5487_v44 = vsel %vm5486_vm10, %v6107_v11, %v5483_v30  ;;  %v5495_v18 = vmul.f32 %v6111_v9, %v5432_v34  ;;  %vm5500_vm6 = vweird.f32 %v6111_v9 }
0x19ce   :  { %v5492_v25 = vsel %vm5489_vm8, %v5491_v57, %v5487_v44  ;;  %6112 = vrcp.f32 %v5433_v48  ;;  %vm5501_vm9 = vmor %vm5499_vm7, %vm5500_vm6  ;;  %v5520_v38 = vand.u32 2147483648, %v5433_v48  ;;  %v5518_v13 = vand.u32 2147483647, %v5433_v48 }
0x19cf   :  { %v5530_v58 = vmul.f32 %v10209_v60, %v5492_v25  ;;  %v5496_v17 = vsub.f32 1.0, %v5495_v18  ;;  %vm5514_vm13 = vweird.f32 %v5433_v48 }
0x19d0   :  { %v5521_v16 = vor.u32 1.1754944e-38, %v5520_v38  ;;  %vm5519_vm15 = vcmp.eq.f32.partialorder %v5518_v13, 8.507059e+37 }
0x19d1   :  { %v5539_v46 = vadd.f32 %v10212_v27, %v5530_v58  ;;  %v5497_v1 = vmul.f32 %v6111_v9, %v5496_v17 }
0x19d3   :  { %5545 = vst.msk [vmem:[%s10207_s15 + $0x18] sm:$0xff] %vm3205_vm0, %v5539_v46  ;;  %v5498_v50 = vadd.f32 %v6111_v9, %v5497_v1 }
0x19d4   :  { %v6113_v52 = vpop.eup %6112 }
0x19d5   :  { %v5502_v61 = vsel %vm5501_vm9, %v6111_v9, %v5498_v50  ;;  %v5510_v62 = vmul.f32 %v6113_v52, %v5433_v48  ;;  %vm5515_vm12 = vweird.f32 %v6113_v52 }
0x19d6   :  { %v5507_v33 = vsel %vm5504_vm11, %v5506_v63, %v5502_v61  ;;  %vm5516_vm14 = vmor %vm5514_vm13, %vm5515_vm12 }
0x19d7   :  { %v5531_v22 = vmul.f32 %v10209_v60, %v5507_v33  ;;  %v5511_v45 = vsub.f32 1.0, %v5510_v62 }
0x19d9   :  { %v5540_v19 = vadd.f32 %v10212_v27, %v5531_v22  ;;  %v5512_v24 = vmul.f32 %v6113_v52, %v5511_v45 }
0x19db   :  { %5546 = vst.msk [vmem:[%s10207_s15 + $0x20] sm:$0xff] %vm3205_vm0, %v5540_v19  ;;  %v5513_v14 = vadd.f32 %v6113_v52, %v5512_v24 }
0x19dd   :  { %v5517_v0 = vsel %vm5516_vm14, %v6113_v52, %v5513_v14 }
0x19de   :  { %v5522_v51 = vsel %vm5519_vm15, %v5521_v16, %v5517_v0 }
0x19df   :  { %v5532_v3 = vmul.f32 %v10209_v60, %v5522_v51 }
0x19e1   :  { %v5541_v6 = vadd.f32 %v10212_v27, %v5532_v3 }
0x19e3   :  { %5547 = vst.msk [vmem:[%s10207_s15 + $0x28] sm:$0xff] %vm3205_vm0, %v5541_v6 }

</bundles_post_ra>
